<compile_context>
chip_gen: v6e
topology: v6e:2x2x1
jax: 0.10.0
libtpu: 0.0.40
codegen_flags: <defaults>
</compile_context>

<pallas_src>
import functools

import jax
import jax.numpy as jnp
import numpy as np
from jax.experimental import pallas as pl
from jax.experimental.pallas import tpu as pltpu

_NEG = float("-inf")  # maxpool padding value (matches MaxPool2d exactly)


# ----------------------------------------------------------------------------
# Fused SPPF kernel (one batch element per grid step)
# ----------------------------------------------------------------------------
def _sppf_kernel(x_ref, w1_ref, b1_ref, w2_ref, b2_ref, o_ref,
                 xpad, ppad, cpad, *, H, W, C, Cout):
    # x_ref : (1, H, W, C)          input activation (NHWC)
    # w1_ref: (9*C, C),  b1_ref: (1, C)        conv1, rows = (kh*3+kw)*C + cin
    # w2_ref: (9*4C, Cout), b2_ref: (1, Cout)  conv2, rows = (kh*3+kw)*4C + cin
    # o_ref : (1, Cout, H*W)        lane-dense output (H*W on lanes)
    # xpad  : VMEM (H+2, W+2, C)    conv1 halo (zero border)
    # ppad  : VMEM (H+4, W+4, C)    pooling halo (-inf border)
    # cpad  : VMEM (H+2, W+2, 4*C)  concat + conv2 halo (zero border)
    f32 = jnp.float32
    C4 = 4 * C

    # ---- halo borders: write ONLY the border strips (interiors are always
    #      overwritten below).  Border strips persist across the 3 pools.
    xpad[pl.ds(0, 1), :, :] = jnp.zeros((1, W + 2, C), f32)
    xpad[pl.ds(H + 1, 1), :, :] = jnp.zeros((1, W + 2, C), f32)
    xpad[pl.ds(1, H), pl.ds(0, 1), :] = jnp.zeros((H, 1, C), f32)
    xpad[pl.ds(1, H), pl.ds(W + 1, 1), :] = jnp.zeros((H, 1, C), f32)

    ppad[pl.ds(0, 2), :, :] = jnp.full((2, W + 4, C), _NEG, f32)
    ppad[pl.ds(H + 2, 2), :, :] = jnp.full((2, W + 4, C), _NEG, f32)
    ppad[pl.ds(2, H), pl.ds(0, 2), :] = jnp.full((H, 2, C), _NEG, f32)
    ppad[pl.ds(2, H), pl.ds(W + 2, 2), :] = jnp.full((H, 2, C), _NEG, f32)

    cpad[pl.ds(0, 1), :, :] = jnp.zeros((1, W + 2, C4), f32)
    cpad[pl.ds(H + 1, 1), :, :] = jnp.zeros((1, W + 2, C4), f32)
    cpad[pl.ds(1, H), pl.ds(0, 1), :] = jnp.zeros((H, 1, C4), f32)
    cpad[pl.ds(1, H), pl.ds(W + 1, 1), :] = jnp.zeros((H, 1, C4), f32)

    # ---------------- conv1: 3x3, stride 1, pad 1, + bias -------------------
    # Nine accumulating matmuls on shifted windows (no materialized im2col).
    xpad[pl.ds(1, H), pl.ds(1, W), :] = x_ref[0]
    acc1 = None
    for dy in range(3):
        for dx in range(3):
            tap = xpad[pl.ds(dy, H), pl.ds(dx, W), :].reshape(H * W, C)
            wk = w1_ref[pl.ds((dy * 3 + dx) * C, C), :]
            d = jnp.dot(tap, wk, preferred_element_type=f32)
            acc1 = d if acc1 is None else acc1 + d
    y1 = (acc1 + b1_ref[...]).reshape(H, W, C)          # (H, W, C), f32

    # ---------------- three chained 5x5/1/2 max pools (separable) -----------
    # Only the interior of ppad is rewritten per pool; the -inf border strips
    # written above persist across the three pools.
    # TODO(synk): replace the interior store + padded reload with in-vreg
    #   shifts + broadcasted_iota border masks once the store slot shows up as
    #   the binding unit (matters most on v5e's single vst slot per bundle).
    def pool5(y):
        ppad[pl.ds(2, H), pl.ds(2, W), :] = y            # border stays -inf
        pp = ppad[...]                                   # (H+4, W+4, C)
        hm = pp[:, 0:W, :]
        for dx in range(1, 5):                           # horizontal 5-tap max
            hm = jnp.maximum(hm, pp[:, dx:dx + W, :])
        out = hm[0:H, :, :]
        for dy in range(1, 5):                           # vertical 5-tap max
            out = jnp.maximum(out, hm[dy:dy + H, :, :])
        return out                                       # (H, W, C)

    # ---------------- concat fused into the conv2 halo ----------------------
    # Each branch is written straight into its channel slice of cpad as it is
    # produced (no jnp.concatenate, branch values dropped right after use).
    cpad[pl.ds(1, H), pl.ds(1, W), pl.ds(0 * C, C)] = y1
    p1 = pool5(y1)
    cpad[pl.ds(1, H), pl.ds(1, W), pl.ds(1 * C, C)] = p1
    p2 = pool5(p1)
    cpad[pl.ds(1, H), pl.ds(1, W), pl.ds(2 * C, C)] = p2
    p3 = pool5(p2)
    cpad[pl.ds(1, H), pl.ds(1, W), pl.ds(3 * C, C)] = p3

    # ---------------- conv2: 3x3, stride 1, pad 1, + bias -------------------
    acc2 = None
    for dy in range(3):
        for dx in range(3):
            tap = cpad[pl.ds(dy, H), pl.ds(dx, W), :].reshape(H * W, C4)
            wk = w2_ref[pl.ds((dy * 3 + dx) * C4, C4), :]
            d = jnp.dot(tap, wk, preferred_element_type=f32)
            acc2 = d if acc2 is None else acc2 + d
    y2 = acc2 + b2_ref[...]                              # (H*W, Cout), f32

    # Lane-dense store: (Cout, H*W) puts H*W (=256 here) on lanes -> unmasked
    # vst, and removes the post-kernel NCHW transpose (wrapper only reshapes).
    o_ref[0] = jnp.transpose(y2).astype(o_ref.dtype)


# ----------------------------------------------------------------------------
# Wrapper: NCHW in / NCHW out (PyTorch convention), one fused pallas_call
# ----------------------------------------------------------------------------
def sppf_forward(x_nchw, params):
    w1, b1, w2, b2 = params
    N, C, H, W = x_nchw.shape
    Cout = w2.shape[0]

    # NCHW -> NHWC for the channels-last kernel layout (see TODO at top).
    x_nhwc = jnp.transpose(x_nchw, (0, 2, 3, 1))

    # OIHW -> (kh, kw, I, O) -> (9*I, O): row (kh*3+kw)*I + i matches the
    # per-tap weight slices taken inside the kernel.  Hoisted: once per call.
    w1m = jnp.transpose(w1, (2, 3, 1, 0)).reshape(9 * C, C)
    w2m = jnp.transpose(w2, (2, 3, 1, 0)).reshape(9 * 4 * C, Cout)
    b1m = b1.reshape(1, C)
    b2m = b2.reshape(1, Cout)

    kern = functools.partial(_sppf_kernel, H=H, W=W, C=C, Cout=Cout)

    flops = 2 * N * H * W * 9 * (C * C + 4 * C * Cout)
    bytes_accessed = 4 * (N * H * W * C + 9 * C * C + C
                          + 9 * 4 * C * Cout + Cout + N * H * W * Cout)

    out_flat = pl.pallas_call(
        kern,
        out_shape=jax.ShapeDtypeStruct((N, Cout, H * W), x_nchw.dtype),
        grid=(N,),
        in_specs=[
            pl.BlockSpec((1, H, W, C), lambda n: (n, 0, 0, 0)),
            pl.BlockSpec((9 * C, C), lambda n: (0, 0)),
            pl.BlockSpec((1, C), lambda n: (0, 0)),
            pl.BlockSpec((9 * 4 * C, Cout), lambda n: (0, 0)),
            pl.BlockSpec((1, Cout), lambda n: (0, 0)),
        ],
        out_specs=pl.BlockSpec((1, Cout, H * W), lambda n: (n, 0, 0)),
        scratch_shapes=[
            pltpu.VMEM((H + 2, W + 2, C), jnp.float32),      # conv1 halo
            pltpu.VMEM((H + 4, W + 4, C), jnp.float32),      # pool halo
            pltpu.VMEM((H + 2, W + 2, 4 * C), jnp.float32),  # concat+conv2 halo
        ],
        compiler_params=pltpu.CompilerParams(
            dimension_semantics=("parallel",),
            # Explicit scoped-VMEM limit (default is 32 MiB, not physical);
            # safe on v5e/v6e (128 MiB) and v7x (64 MiB).  Re-derive together
            # with the row-tile size when H-tiling lands (see TODO at top).
            vmem_limit_bytes=48 * 1024 * 1024,
        ),
        cost_estimate=pl.CostEstimate(
            flops=flops, transcendentals=0, bytes_accessed=bytes_accessed),
    )(x_nhwc, w1m, b1m, w2m, b2m)

    # Lane-dense kernel output (N, Cout, H*W): NCHW is just a free reshape.
    return out_flat.reshape(N, Cout, H, W)


# ----------------------------------------------------------------------------
# Parameter init (deterministic, PyTorch-Conv2d-like ranges)
# ----------------------------------------------------------------------------
def init_params(key, c_in, c_out):
    def conv_w(k, shape):
        fan_in = shape[1] * shape[2] * shape[3]
        bound = float(1.0 / np.sqrt(fan_in))
        return jax.random.uniform(k, shape, jnp.float32, -bound, bound)

    ks = [jax.random.fold_in(key, i) for i in range(1, 5)]
    w1 = conv_w(ks[0], (c_in, c_in, 3, 3))
    b1 = jax.random.uniform(ks[1], (c_in,), jnp.float32, -0.1, 0.1)
    w2 = conv_w(ks[2], (c_out, 4 * c_in, 3, 3))
    b2 = jax.random.uniform(ks[3], (c_out,), jnp.float32, -0.1, 0.1)
    return (w1, b1, w2, b2)


# ----------------------------------------------------------------------------
# Pure-JAX reference for verification
# ----------------------------------------------------------------------------
def _ref_sppf(x_nchw, params):
    w1, b1, w2, b2 = params
    x = jnp.transpose(x_nchw, (0, 2, 3, 1))

    def conv(z, w, b):
        wh = jnp.transpose(w, (2, 3, 1, 0))
        y = jax.lax.conv_general_dilated(
            z, wh, window_strides=(1, 1), padding="SAME",
            dimension_numbers=("NHWC", "HWIO", "NHWC"))
        return y + b.reshape(1, 1, 1, -1)

    def pool(z):
        return jax.lax.reduce_window(
            z, -jnp.inf, jax.lax.max, (1, 5, 5, 1), (1, 1, 1, 1),
            ((0, 0), (2, 2), (2, 2), (0, 0)))

    y1 = conv(x, w1, b1)
    p1 = pool(y1)
    p2 = pool(p1)
    p3 = pool(p2)
    y2 = conv(jnp.concatenate([y1, p1, p2, p3], axis=-1), w2, b2)
    return jnp.transpose(y2, (0, 3, 1, 2))


if __name__ == "__main__":
    # Small shapes consistent with the module: NCHW input (2, 4, 16, 16),
    # c_in = 4, c_out = 4.
    N, C_IN, C_OUT, H, W = 2, 4, 4, 16, 16

    key = jax.random.PRNGKey(0)
    x = jax.random.normal(jax.random.fold_in(key, 0), (N, C_IN, H, W),
                          dtype=jnp.float32)
    params = init_params(key, C_IN, C_OUT)

    fwd = jax.jit(sppf_forward)
    out = jax.block_until_ready(fwd(x, params))
    assert out.shape == (N, C_OUT, H, W)

    ref = jax.block_until_ready(_ref_sppf(x, params))
    np.testing.assert_allclose(np.asarray(out), np.asarray(ref),
                               rtol=1e-4, atol=1e-4)

    print("KERNEL_OK")
</pallas_src>

<mosaic_0001>
module attributes {stable_mosaic.version = 11 : i64} {
  func.func @_sppf_kernel(%arg0: i32, %arg1: memref<1x16x16x4xf32, #tpu.memory_space<vmem>>, %arg2: memref<36x4xf32, #tpu.memory_space<vmem>>, %arg3: memref<1x4xf32, #tpu.memory_space<vmem>>, %arg4: memref<144x4xf32, #tpu.memory_space<vmem>>, %arg5: memref<1x4xf32, #tpu.memory_space<vmem>>, %arg6: memref<1x4x256xf32, #tpu.memory_space<vmem>>, %arg7: memref<18x18x4xf32, #tpu.memory_space<vmem>>, %arg8: memref<20x20x4xf32, #tpu.memory_space<vmem>>, %arg9: memref<18x18x16xf32, #tpu.memory_space<vmem>>) attributes {dimension_semantics = [#tpu.dimension_semantics<parallel>], iteration_bounds = array<i64: 2>, scalar_prefetch = 0 : i64, scratch_operands = 3 : i64, tpu.core_type = #tpu.core_type<tc>, window_params = [{transform_indices = @transform_0, window_bounds = array<i64: 1, 16, 16, 4>}, {pipeline_mode = #tpu.pipeline_mode<synchronous>, transform_indices = @transform_1, window_bounds = array<i64: 36, 4>}, {pipeline_mode = #tpu.pipeline_mode<synchronous>, transform_indices = @transform_2, window_bounds = array<i64: 1, 4>}, {pipeline_mode = #tpu.pipeline_mode<synchronous>, transform_indices = @transform_3, window_bounds = array<i64: 144, 4>}, {pipeline_mode = #tpu.pipeline_mode<synchronous>, transform_indices = @transform_4, window_bounds = array<i64: 1, 4>}, {transform_indices = @transform_5, window_bounds = array<i64: 1, 4, 256>}]} {
    %cst = arith.constant 0.000000e+00 : f32
    %0 = vector.broadcast %cst : f32 to vector<1x18x4xf32>
    %c0 = arith.constant 0 : index
    %c0_0 = arith.constant 0 : index
    %c0_1 = arith.constant 0 : index
    %1 = vector.load %arg7[%c0, %c0_0, %c0_1] : memref<18x18x4xf32, #tpu.memory_space<vmem>>, vector<1x18x4xf32>
    tpu.vector_store %arg7[%c0, %c0_0, %c0_1], %0 {strides = array<i32>} : memref<18x18x4xf32, #tpu.memory_space<vmem>>, vector<1x18x4xf32>,
    %cst_2 = arith.constant 0.000000e+00 : f32
    %2 = vector.broadcast %cst_2 : f32 to vector<1x18x4xf32>
    %c17 = arith.constant 17 : index
    %c0_3 = arith.constant 0 : index
    %c0_4 = arith.constant 0 : index
    %3 = vector.load %arg7[%c17, %c0_3, %c0_4] : memref<18x18x4xf32, #tpu.memory_space<vmem>>, vector<1x18x4xf32>
    tpu.vector_store %arg7[%c17, %c0_3, %c0_4], %2 {strides = array<i32>} : memref<18x18x4xf32, #tpu.memory_space<vmem>>, vector<1x18x4xf32>,
    %cst_5 = arith.constant 0.000000e+00 : f32
    %4 = vector.broadcast %cst_5 : f32 to vector<16x1x4xf32>
    %c1 = arith.constant 1 : index
    %c0_6 = arith.constant 0 : index
    %c0_7 = arith.constant 0 : index
    %5 = vector.load %arg7[%c1, %c0_6, %c0_7] : memref<18x18x4xf32, #tpu.memory_space<vmem>>, vector<16x1x4xf32>
    tpu.vector_store %arg7[%c1, %c0_6, %c0_7], %4 {strides = array<i32>} : memref<18x18x4xf32, #tpu.memory_space<vmem>>, vector<16x1x4xf32>,
    %cst_8 = arith.constant 0.000000e+00 : f32
    %6 = vector.broadcast %cst_8 : f32 to vector<16x1x4xf32>
    %c1_9 = arith.constant 1 : index
    %c17_10 = arith.constant 17 : index
    %c0_11 = arith.constant 0 : index
    %7 = vector.load %arg7[%c1_9, %c17_10, %c0_11] : memref<18x18x4xf32, #tpu.memory_space<vmem>>, vector<16x1x4xf32>
    tpu.vector_store %arg7[%c1_9, %c17_10, %c0_11], %6 {strides = array<i32>} : memref<18x18x4xf32, #tpu.memory_space<vmem>>, vector<16x1x4xf32>,
    %cst_12 = arith.constant 0xFF800000 : f32
    %8 = vector.broadcast %cst_12 : f32 to vector<2x20x4xf32>
    %c0_13 = arith.constant 0 : index
    %c0_14 = arith.constant 0 : index
    %c0_15 = arith.constant 0 : index
    %9 = vector.load %arg8[%c0_13, %c0_14, %c0_15] : memref<20x20x4xf32, #tpu.memory_space<vmem>>, vector<2x20x4xf32>
    tpu.vector_store %arg8[%c0_13, %c0_14, %c0_15], %8 {strides = array<i32>} : memref<20x20x4xf32, #tpu.memory_space<vmem>>, vector<2x20x4xf32>,
    %cst_16 = arith.constant 0xFF800000 : f32
    %10 = vector.broadcast %cst_16 : f32 to vector<2x20x4xf32>
    %c18 = arith.constant 18 : index
    %c0_17 = arith.constant 0 : index
    %c0_18 = arith.constant 0 : index
    %11 = vector.load %arg8[%c18, %c0_17, %c0_18] : memref<20x20x4xf32, #tpu.memory_space<vmem>>, vector<2x20x4xf32>
    tpu.vector_store %arg8[%c18, %c0_17, %c0_18], %10 {strides = array<i32>} : memref<20x20x4xf32, #tpu.memory_space<vmem>>, vector<2x20x4xf32>,
    %cst_19 = arith.constant 0xFF800000 : f32
    %12 = vector.broadcast %cst_19 : f32 to vector<16x2x4xf32>
    %c2 = arith.constant 2 : index
    %c0_20 = arith.constant 0 : index
    %c0_21 = arith.constant 0 : index
    %13 = vector.load %arg8[%c2, %c0_20, %c0_21] : memref<20x20x4xf32, #tpu.memory_space<vmem>>, vector<16x2x4xf32>
    tpu.vector_store %arg8[%c2, %c0_20, %c0_21], %12 {strides = array<i32>} : memref<20x20x4xf32, #tpu.memory_space<vmem>>, vector<16x2x4xf32>,
    %cst_22 = arith.constant 0xFF800000 : f32
    %14 = vector.broadcast %cst_22 : f32 to vector<16x2x4xf32>
    %c2_23 = arith.constant 2 : index
    %c18_24 = arith.constant 18 : index
    %c0_25 = arith.constant 0 : index
    %15 = vector.load %arg8[%c2_23, %c18_24, %c0_25] : memref<20x20x4xf32, #tpu.memory_space<vmem>>, vector<16x2x4xf32>
    tpu.vector_store %arg8[%c2_23, %c18_24, %c0_25], %14 {strides = array<i32>} : memref<20x20x4xf32, #tpu.memory_space<vmem>>, vector<16x2x4xf32>,
    %cst_26 = arith.constant 0.000000e+00 : f32
    %16 = vector.broadcast %cst_26 : f32 to vector<1x18x16xf32>
    %c0_27 = arith.constant 0 : index
    %c0_28 = arith.constant 0 : index
    %c0_29 = arith.constant 0 : index
    %17 = vector.load %arg9[%c0_27, %c0_28, %c0_29] : memref<18x18x16xf32, #tpu.memory_space<vmem>>, vector<1x18x16xf32>
    tpu.vector_store %arg9[%c0_27, %c0_28, %c0_29], %16 {strides = array<i32>} : memref<18x18x16xf32, #tpu.memory_space<vmem>>, vector<1x18x16xf32>,
    %cst_30 = arith.constant 0.000000e+00 : f32
    %18 = vector.broadcast %cst_30 : f32 to vector<1x18x16xf32>
    %c17_31 = arith.constant 17 : index
    %c0_32 = arith.constant 0 : index
    %c0_33 = arith.constant 0 : index
    %19 = vector.load %arg9[%c17_31, %c0_32, %c0_33] : memref<18x18x16xf32, #tpu.memory_space<vmem>>, vector<1x18x16xf32>
    tpu.vector_store %arg9[%c17_31, %c0_32, %c0_33], %18 {strides = array<i32>} : memref<18x18x16xf32, #tpu.memory_space<vmem>>, vector<1x18x16xf32>,
    %cst_34 = arith.constant 0.000000e+00 : f32
    %20 = vector.broadcast %cst_34 : f32 to vector<16x1x16xf32>
    %c1_35 = arith.constant 1 : index
    %c0_36 = arith.constant 0 : index
    %c0_37 = arith.constant 0 : index
    %21 = vector.load %arg9[%c1_35, %c0_36, %c0_37] : memref<18x18x16xf32, #tpu.memory_space<vmem>>, vector<16x1x16xf32>
    tpu.vector_store %arg9[%c1_35, %c0_36, %c0_37], %20 {strides = array<i32>} : memref<18x18x16xf32, #tpu.memory_space<vmem>>, vector<16x1x16xf32>,
    %cst_38 = arith.constant 0.000000e+00 : f32
    %22 = vector.broadcast %cst_38 : f32 to vector<16x1x16xf32>
    %c1_39 = arith.constant 1 : index
    %c17_40 = arith.constant 17 : index
    %c0_41 = arith.constant 0 : index
    %23 = vector.load %arg9[%c1_39, %c17_40, %c0_41] : memref<18x18x16xf32, #tpu.memory_space<vmem>>, vector<16x1x16xf32>
    tpu.vector_store %arg9[%c1_39, %c17_40, %c0_41], %22 {strides = array<i32>} : memref<18x18x16xf32, #tpu.memory_space<vmem>>, vector<16x1x16xf32>,
    %c0_42 = arith.constant 0 : index
    %c0_43 = arith.constant 0 : index
    %c0_44 = arith.constant 0 : index
    %c0_45 = arith.constant 0 : index
    %24 = vector.load %arg1[%c0_42, %c0_43, %c0_44, %c0_45] : memref<1x16x16x4xf32, #tpu.memory_space<vmem>>, vector<1x16x16x4xf32>
    %25 = vector.shape_cast %24 : vector<1x16x16x4xf32> to vector<16x16x4xf32>
    %c1_46 = arith.constant 1 : index
    %c1_47 = arith.constant 1 : index
    %c0_48 = arith.constant 0 : index
    %26 = vector.load %arg7[%c1_46, %c1_47, %c0_48] : memref<18x18x4xf32, #tpu.memory_space<vmem>>, vector<16x16x4xf32>
    tpu.vector_store %arg7[%c1_46, %c1_47, %c0_48], %25 {strides = array<i32>} : memref<18x18x4xf32, #tpu.memory_space<vmem>>, vector<16x16x4xf32>,
    %c0_49 = arith.constant 0 : index
    %c0_50 = arith.constant 0 : index
    %c0_51 = arith.constant 0 : index
    %27 = vector.load %arg7[%c0_49, %c0_50, %c0_51] : memref<18x18x4xf32, #tpu.memory_space<vmem>>, vector<16x16x4xf32>
    %28 = vector.shape_cast %27 : vector<16x16x4xf32> to vector<256x4xf32>
    %c0_52 = arith.constant 0 : index
    %c0_53 = arith.constant 0 : index
    %29 = vector.load %arg2[%c0_52, %c0_53] : memref<36x4xf32, #tpu.memory_space<vmem>>, vector<4x4xf32>
    %cst_54 = arith.constant dense<0.000000e+00> : vector<256x4xf32>
    %30 = tpu.matmul %28, %29, %cst_54 {dimension_numbers = #tpu.dot_dimension_numbers<[1], [0], [0], [1], [0, 0, 1, 1], [], []>} : vector<256x4xf32>, vector<4x4xf32>, vector<256x4xf32> -> vector<256x4xf32>
    %c0_55 = arith.constant 0 : index
    %c1_56 = arith.constant 1 : index
    %c0_57 = arith.constant 0 : index
    %31 = vector.load %arg7[%c0_55, %c1_56, %c0_57] : memref<18x18x4xf32, #tpu.memory_space<vmem>>, vector<16x16x4xf32>
    %32 = vector.shape_cast %31 : vector<16x16x4xf32> to vector<256x4xf32>
    %c4 = arith.constant 4 : index
    %c0_58 = arith.constant 0 : index
    %33 = vector.load %arg2[%c4, %c0_58] : memref<36x4xf32, #tpu.memory_space<vmem>>, vector<4x4xf32>
    %cst_59 = arith.constant dense<0.000000e+00> : vector<256x4xf32>
    %34 = tpu.matmul %32, %33, %cst_59 {dimension_numbers = #tpu.dot_dimension_numbers<[1], [0], [0], [1], [0, 0, 1, 1], [], []>} : vector<256x4xf32>, vector<4x4xf32>, vector<256x4xf32> -> vector<256x4xf32>
    %35 = arith.addf %30, %34 : vector<256x4xf32>
    %c0_60 = arith.constant 0 : index
    %c2_61 = arith.constant 2 : index
    %c0_62 = arith.constant 0 : index
    %36 = vector.load %arg7[%c0_60, %c2_61, %c0_62] : memref<18x18x4xf32, #tpu.memory_space<vmem>>, vector<16x16x4xf32>
    %37 = vector.shape_cast %36 : vector<16x16x4xf32> to vector<256x4xf32>
    %c8 = arith.constant 8 : index
    %c0_63 = arith.constant 0 : index
    %38 = vector.load %arg2[%c8, %c0_63] : memref<36x4xf32, #tpu.memory_space<vmem>>, vector<4x4xf32>
    %cst_64 = arith.constant dense<0.000000e+00> : vector<256x4xf32>
    %39 = tpu.matmul %37, %38, %cst_64 {dimension_numbers = #tpu.dot_dimension_numbers<[1], [0], [0], [1], [0, 0, 1, 1], [], []>} : vector<256x4xf32>, vector<4x4xf32>, vector<256x4xf32> -> vector<256x4xf32>
    %40 = arith.addf %35, %39 : vector<256x4xf32>
    %c1_65 = arith.constant 1 : index
    %c0_66 = arith.constant 0 : index
    %c0_67 = arith.constant 0 : index
    %41 = vector.load %arg7[%c1_65, %c0_66, %c0_67] : memref<18x18x4xf32, #tpu.memory_space<vmem>>, vector<16x16x4xf32>
    %42 = vector.shape_cast %41 : vector<16x16x4xf32> to vector<256x4xf32>
    %c12 = arith.constant 12 : index
    %c0_68 = arith.constant 0 : index
    %43 = vector.load %arg2[%c12, %c0_68] : memref<36x4xf32, #tpu.memory_space<vmem>>, vector<4x4xf32>
    %cst_69 = arith.constant dense<0.000000e+00> : vector<256x4xf32>
    %44 = tpu.matmul %42, %43, %cst_69 {dimension_numbers = #tpu.dot_dimension_numbers<[1], [0], [0], [1], [0, 0, 1, 1], [], []>} : vector<256x4xf32>, vector<4x4xf32>, vector<256x4xf32> -> vector<256x4xf32>
    %45 = arith.addf %40, %44 : vector<256x4xf32>
    %c1_70 = arith.constant 1 : index
    %c1_71 = arith.constant 1 : index
    %c0_72 = arith.constant 0 : index
    %46 = vector.load %arg7[%c1_70, %c1_71, %c0_72] : memref<18x18x4xf32, #tpu.memory_space<vmem>>, vector<16x16x4xf32>
    %47 = vector.shape_cast %46 : vector<16x16x4xf32> to vector<256x4xf32>
    %c16 = arith.constant 16 : index
    %c0_73 = arith.constant 0 : index
    %48 = vector.load %arg2[%c16, %c0_73] : memref<36x4xf32, #tpu.memory_space<vmem>>, vector<4x4xf32>
    %cst_74 = arith.constant dense<0.000000e+00> : vector<256x4xf32>
    %49 = tpu.matmul %47, %48, %cst_74 {dimension_numbers = #tpu.dot_dimension_numbers<[1], [0], [0], [1], [0, 0, 1, 1], [], []>} : vector<256x4xf32>, vector<4x4xf32>, vector<256x4xf32> -> vector<256x4xf32>
    %50 = arith.addf %45, %49 : vector<256x4xf32>
    %c1_75 = arith.constant 1 : index
    %c2_76 = arith.constant 2 : index
    %c0_77 = arith.constant 0 : index
    %51 = vector.load %arg7[%c1_75, %c2_76, %c0_77] : memref<18x18x4xf32, #tpu.memory_space<vmem>>, vector<16x16x4xf32>
    %52 = vector.shape_cast %51 : vector<16x16x4xf32> to vector<256x4xf32>
    %c20 = arith.constant 20 : index
    %c0_78 = arith.constant 0 : index
    %53 = vector.load %arg2[%c20, %c0_78] : memref<36x4xf32, #tpu.memory_space<vmem>>, vector<4x4xf32>
    %cst_79 = arith.constant dense<0.000000e+00> : vector<256x4xf32>
    %54 = tpu.matmul %52, %53, %cst_79 {dimension_numbers = #tpu.dot_dimension_numbers<[1], [0], [0], [1], [0, 0, 1, 1], [], []>} : vector<256x4xf32>, vector<4x4xf32>, vector<256x4xf32> -> vector<256x4xf32>
    %55 = arith.addf %50, %54 : vector<256x4xf32>
    %c2_80 = arith.constant 2 : index
    %c0_81 = arith.constant 0 : index
    %c0_82 = arith.constant 0 : index
    %56 = vector.load %arg7[%c2_80, %c0_81, %c0_82] : memref<18x18x4xf32, #tpu.memory_space<vmem>>, vector<16x16x4xf32>
    %57 = vector.shape_cast %56 : vector<16x16x4xf32> to vector<256x4xf32>
    %c24 = arith.constant 24 : index
    %c0_83 = arith.constant 0 : index
    %58 = vector.load %arg2[%c24, %c0_83] : memref<36x4xf32, #tpu.memory_space<vmem>>, vector<4x4xf32>
    %cst_84 = arith.constant dense<0.000000e+00> : vector<256x4xf32>
    %59 = tpu.matmul %57, %58, %cst_84 {dimension_numbers = #tpu.dot_dimension_numbers<[1], [0], [0], [1], [0, 0, 1, 1], [], []>} : vector<256x4xf32>, vector<4x4xf32>, vector<256x4xf32> -> vector<256x4xf32>
    %60 = arith.addf %55, %59 : vector<256x4xf32>
    %c2_85 = arith.constant 2 : index
    %c1_86 = arith.constant 1 : index
    %c0_87 = arith.constant 0 : index
    %61 = vector.load %arg7[%c2_85, %c1_86, %c0_87] : memref<18x18x4xf32, #tpu.memory_space<vmem>>, vector<16x16x4xf32>
    %62 = vector.shape_cast %61 : vector<16x16x4xf32> to vector<256x4xf32>
    %c28 = arith.constant 28 : index
    %c0_88 = arith.constant 0 : index
    %63 = vector.load %arg2[%c28, %c0_88] : memref<36x4xf32, #tpu.memory_space<vmem>>, vector<4x4xf32>
    %cst_89 = arith.constant dense<0.000000e+00> : vector<256x4xf32>
    %64 = tpu.matmul %62, %63, %cst_89 {dimension_numbers = #tpu.dot_dimension_numbers<[1], [0], [0], [1], [0, 0, 1, 1], [], []>} : vector<256x4xf32>, vector<4x4xf32>, vector<256x4xf32> -> vector<256x4xf32>
    %65 = arith.addf %60, %64 : vector<256x4xf32>
    %c2_90 = arith.constant 2 : index
    %c2_91 = arith.constant 2 : index
    %c0_92 = arith.constant 0 : index
    %66 = vector.load %arg7[%c2_90, %c2_91, %c0_92] : memref<18x18x4xf32, #tpu.memory_space<vmem>>, vector<16x16x4xf32>
    %67 = vector.shape_cast %66 : vector<16x16x4xf32> to vector<256x4xf32>
    %c32 = arith.constant 32 : index
    %c0_93 = arith.constant 0 : index
    %68 = vector.load %arg2[%c32, %c0_93] : memref<36x4xf32, #tpu.memory_space<vmem>>, vector<4x4xf32>
    %cst_94 = arith.constant dense<0.000000e+00> : vector<256x4xf32>
    %69 = tpu.matmul %67, %68, %cst_94 {dimension_numbers = #tpu.dot_dimension_numbers<[1], [0], [0], [1], [0, 0, 1, 1], [], []>} : vector<256x4xf32>, vector<4x4xf32>, vector<256x4xf32> -> vector<256x4xf32>
    %70 = arith.addf %65, %69 : vector<256x4xf32>
    %c0_95 = arith.constant 0 : index
    %c0_96 = arith.constant 0 : index
    %71 = vector.load %arg3[%c0_95, %c0_96] : memref<1x4xf32, #tpu.memory_space<vmem>>, vector<1x4xf32>
    %72 = vector.broadcast %71 : vector<1x4xf32> to vector<256x4xf32>
    %73 = arith.addf %70, %72 : vector<256x4xf32>
    %74 = vector.shape_cast %73 : vector<256x4xf32> to vector<16x16x4xf32>
    %c1_97 = arith.constant 1 : index
    %c1_98 = arith.constant 1 : index
    %c0_99 = arith.constant 0 : index
    %75 = vector.load %arg9[%c1_97, %c1_98, %c0_99] : memref<18x18x16xf32, #tpu.memory_space<vmem>>, vector<16x16x4xf32>
    tpu.vector_store %arg9[%c1_97, %c1_98, %c0_99], %74 {strides = array<i32>} : memref<18x18x16xf32, #tpu.memory_space<vmem>>, vector<16x16x4xf32>,
    %c2_100 = arith.constant 2 : index
    %c2_101 = arith.constant 2 : index
    %c0_102 = arith.constant 0 : index
    %76 = vector.load %arg8[%c2_100, %c2_101, %c0_102] : memref<20x20x4xf32, #tpu.memory_space<vmem>>, vector<16x16x4xf32>
    tpu.vector_store %arg8[%c2_100, %c2_101, %c0_102], %74 {strides = array<i32>} : memref<20x20x4xf32, #tpu.memory_space<vmem>>, vector<16x16x4xf32>,
    %c0_103 = arith.constant 0 : index
    %c0_104 = arith.constant 0 : index
    %c0_105 = arith.constant 0 : index
    %77 = vector.load %arg8[%c0_103, %c0_104, %c0_105] : memref<20x20x4xf32, #tpu.memory_space<vmem>>, vector<20x20x4xf32>
    %78 = vector.extract_strided_slice %77 {offsets = [0, 0, 0], sizes = [20, 16, 4], strides = [1, 1, 1]} : vector<20x20x4xf32> to vector<20x16x4xf32>
    %79 = vector.extract_strided_slice %77 {offsets = [0, 1, 0], sizes = [20, 16, 4], strides = [1, 1, 1]} : vector<20x20x4xf32> to vector<20x16x4xf32>
    %80 = arith.maximumf %78, %79 : vector<20x16x4xf32>
    %81 = vector.extract_strided_slice %77 {offsets = [0, 2, 0], sizes = [20, 16, 4], strides = [1, 1, 1]} : vector<20x20x4xf32> to vector<20x16x4xf32>
    %82 = arith.maximumf %80, %81 : vector<20x16x4xf32>
    %83 = vector.extract_strided_slice %77 {offsets = [0, 3, 0], sizes = [20, 16, 4], strides = [1, 1, 1]} : vector<20x20x4xf32> to vector<20x16x4xf32>
    %84 = arith.maximumf %82, %83 : vector<20x16x4xf32>
    %85 = vector.extract_strided_slice %77 {offsets = [0, 4, 0], sizes = [20, 16, 4], strides = [1, 1, 1]} : vector<20x20x4xf32> to vector<20x16x4xf32>
    %86 = arith.maximumf %84, %85 : vector<20x16x4xf32>
    %87 = vector.extract_strided_slice %86 {offsets = [0, 0, 0], sizes = [16, 16, 4], strides = [1, 1, 1]} : vector<20x16x4xf32> to vector<16x16x4xf32>
    %88 = vector.extract_strided_slice %86 {offsets = [1, 0, 0], sizes = [16, 16, 4], strides = [1, 1, 1]} : vector<20x16x4xf32> to vector<16x16x4xf32>
    %89 = arith.maximumf %87, %88 : vector<16x16x4xf32>
    %90 = vector.extract_strided_slice %86 {offsets = [2, 0, 0], sizes = [16, 16, 4], strides = [1, 1, 1]} : vector<20x16x4xf32> to vector<16x16x4xf32>
    %91 = arith.maximumf %89, %90 : vector<16x16x4xf32>
    %92 = vector.extract_strided_slice %86 {offsets = [3, 0, 0], sizes = [16, 16, 4], strides = [1, 1, 1]} : vector<20x16x4xf32> to vector<16x16x4xf32>
    %93 = arith.maximumf %91, %92 : vector<16x16x4xf32>
    %94 = vector.extract_strided_slice %86 {offsets = [4, 0, 0], sizes = [16, 16, 4], strides = [1, 1, 1]} : vector<20x16x4xf32> to vector<16x16x4xf32>
    %95 = arith.maximumf %93, %94 : vector<16x16x4xf32>
    %c1_106 = arith.constant 1 : index
    %c1_107 = arith.constant 1 : index
    %c4_108 = arith.constant 4 : index
    %96 = vector.load %arg9[%c1_106, %c1_107, %c4_108] : memref<18x18x16xf32, #tpu.memory_space<vmem>>, vector<16x16x4xf32>
    tpu.vector_store %arg9[%c1_106, %c1_107, %c4_108], %95 {strides = array<i32>} : memref<18x18x16xf32, #tpu.memory_space<vmem>>, vector<16x16x4xf32>,
    %c2_109 = arith.constant 2 : index
    %c2_110 = arith.constant 2 : index
    %c0_111 = arith.constant 0 : index
    %97 = vector.load %arg8[%c2_109, %c2_110, %c0_111] : memref<20x20x4xf32, #tpu.memory_space<vmem>>, vector<16x16x4xf32>
    tpu.vector_store %arg8[%c2_109, %c2_110, %c0_111], %95 {strides = array<i32>} : memref<20x20x4xf32, #tpu.memory_space<vmem>>, vector<16x16x4xf32>,
    %c0_112 = arith.constant 0 : index
    %c0_113 = arith.constant 0 : index
    %c0_114 = arith.constant 0 : index
    %98 = vector.load %arg8[%c0_112, %c0_113, %c0_114] : memref<20x20x4xf32, #tpu.memory_space<vmem>>, vector<20x20x4xf32>
    %99 = vector.extract_strided_slice %98 {offsets = [0, 0, 0], sizes = [20, 16, 4], strides = [1, 1, 1]} : vector<20x20x4xf32> to vector<20x16x4xf32>
    %100 = vector.extract_strided_slice %98 {offsets = [0, 1, 0], sizes = [20, 16, 4], strides = [1, 1, 1]} : vector<20x20x4xf32> to vector<20x16x4xf32>
    %101 = arith.maximumf %99, %100 : vector<20x16x4xf32>
    %102 = vector.extract_strided_slice %98 {offsets = [0, 2, 0], sizes = [20, 16, 4], strides = [1, 1, 1]} : vector<20x20x4xf32> to vector<20x16x4xf32>
    %103 = arith.maximumf %101, %102 : vector<20x16x4xf32>
    %104 = vector.extract_strided_slice %98 {offsets = [0, 3, 0], sizes = [20, 16, 4], strides = [1, 1, 1]} : vector<20x20x4xf32> to vector<20x16x4xf32>
    %105 = arith.maximumf %103, %104 : vector<20x16x4xf32>
    %106 = vector.extract_strided_slice %98 {offsets = [0, 4, 0], sizes = [20, 16, 4], strides = [1, 1, 1]} : vector<20x20x4xf32> to vector<20x16x4xf32>
    %107 = arith.maximumf %105, %106 : vector<20x16x4xf32>
    %108 = vector.extract_strided_slice %107 {offsets = [0, 0, 0], sizes = [16, 16, 4], strides = [1, 1, 1]} : vector<20x16x4xf32> to vector<16x16x4xf32>
    %109 = vector.extract_strided_slice %107 {offsets = [1, 0, 0], sizes = [16, 16, 4], strides = [1, 1, 1]} : vector<20x16x4xf32> to vector<16x16x4xf32>
    %110 = arith.maximumf %108, %109 : vector<16x16x4xf32>
    %111 = vector.extract_strided_slice %107 {offsets = [2, 0, 0], sizes = [16, 16, 4], strides = [1, 1, 1]} : vector<20x16x4xf32> to vector<16x16x4xf32>
    %112 = arith.maximumf %110, %111 : vector<16x16x4xf32>
    %113 = vector.extract_strided_slice %107 {offsets = [3, 0, 0], sizes = [16, 16, 4], strides = [1, 1, 1]} : vector<20x16x4xf32> to vector<16x16x4xf32>
    %114 = arith.maximumf %112, %113 : vector<16x16x4xf32>
    %115 = vector.extract_strided_slice %107 {offsets = [4, 0, 0], sizes = [16, 16, 4], strides = [1, 1, 1]} : vector<20x16x4xf32> to vector<16x16x4xf32>
    %116 = arith.maximumf %114, %115 : vector<16x16x4xf32>
    %c1_115 = arith.constant 1 : index
    %c1_116 = arith.constant 1 : index
    %c8_117 = arith.constant 8 : index
    %117 = vector.load %arg9[%c1_115, %c1_116, %c8_117] : memref<18x18x16xf32, #tpu.memory_space<vmem>>, vector<16x16x4xf32>
    tpu.vector_store %arg9[%c1_115, %c1_116, %c8_117], %116 {strides = array<i32>} : memref<18x18x16xf32, #tpu.memory_space<vmem>>, vector<16x16x4xf32>,
    %c2_118 = arith.constant 2 : index
    %c2_119 = arith.constant 2 : index
    %c0_120 = arith.constant 0 : index
    %118 = vector.load %arg8[%c2_118, %c2_119, %c0_120] : memref<20x20x4xf32, #tpu.memory_space<vmem>>, vector<16x16x4xf32>
    tpu.vector_store %arg8[%c2_118, %c2_119, %c0_120], %116 {strides = array<i32>} : memref<20x20x4xf32, #tpu.memory_space<vmem>>, vector<16x16x4xf32>,
    %c0_121 = arith.constant 0 : index
    %c0_122 = arith.constant 0 : index
    %c0_123 = arith.constant 0 : index
    %119 = vector.load %arg8[%c0_121, %c0_122, %c0_123] : memref<20x20x4xf32, #tpu.memory_space<vmem>>, vector<20x20x4xf32>
    %120 = vector.extract_strided_slice %119 {offsets = [0, 0, 0], sizes = [20, 16, 4], strides = [1, 1, 1]} : vector<20x20x4xf32> to vector<20x16x4xf32>
    %121 = vector.extract_strided_slice %119 {offsets = [0, 1, 0], sizes = [20, 16, 4], strides = [1, 1, 1]} : vector<20x20x4xf32> to vector<20x16x4xf32>
    %122 = arith.maximumf %120, %121 : vector<20x16x4xf32>
    %123 = vector.extract_strided_slice %119 {offsets = [0, 2, 0], sizes = [20, 16, 4], strides = [1, 1, 1]} : vector<20x20x4xf32> to vector<20x16x4xf32>
    %124 = arith.maximumf %122, %123 : vector<20x16x4xf32>
    %125 = vector.extract_strided_slice %119 {offsets = [0, 3, 0], sizes = [20, 16, 4], strides = [1, 1, 1]} : vector<20x20x4xf32> to vector<20x16x4xf32>
    %126 = arith.maximumf %124, %125 : vector<20x16x4xf32>
    %127 = vector.extract_strided_slice %119 {offsets = [0, 4, 0], sizes = [20, 16, 4], strides = [1, 1, 1]} : vector<20x20x4xf32> to vector<20x16x4xf32>
    %128 = arith.maximumf %126, %127 : vector<20x16x4xf32>
    %129 = vector.extract_strided_slice %128 {offsets = [0, 0, 0], sizes = [16, 16, 4], strides = [1, 1, 1]} : vector<20x16x4xf32> to vector<16x16x4xf32>
    %130 = vector.extract_strided_slice %128 {offsets = [1, 0, 0], sizes = [16, 16, 4], strides = [1, 1, 1]} : vector<20x16x4xf32> to vector<16x16x4xf32>
    %131 = arith.maximumf %129, %130 : vector<16x16x4xf32>
    %132 = vector.extract_strided_slice %128 {offsets = [2, 0, 0], sizes = [16, 16, 4], strides = [1, 1, 1]} : vector<20x16x4xf32> to vector<16x16x4xf32>
    %133 = arith.maximumf %131, %132 : vector<16x16x4xf32>
    %134 = vector.extract_strided_slice %128 {offsets = [3, 0, 0], sizes = [16, 16, 4], strides = [1, 1, 1]} : vector<20x16x4xf32> to vector<16x16x4xf32>
    %135 = arith.maximumf %133, %134 : vector<16x16x4xf32>
    %136 = vector.extract_strided_slice %128 {offsets = [4, 0, 0], sizes = [16, 16, 4], strides = [1, 1, 1]} : vector<20x16x4xf32> to vector<16x16x4xf32>
    %137 = arith.maximumf %135, %136 : vector<16x16x4xf32>
    %c1_124 = arith.constant 1 : index
    %c1_125 = arith.constant 1 : index
    %c12_126 = arith.constant 12 : index
    %138 = vector.load %arg9[%c1_124, %c1_125, %c12_126] : memref<18x18x16xf32, #tpu.memory_space<vmem>>, vector<16x16x4xf32>
    tpu.vector_store %arg9[%c1_124, %c1_125, %c12_126], %137 {strides = array<i32>} : memref<18x18x16xf32, #tpu.memory_space<vmem>>, vector<16x16x4xf32>,
    %c0_127 = arith.constant 0 : index
    %c0_128 = arith.constant 0 : index
    %c0_129 = arith.constant 0 : index
    %139 = vector.load %arg9[%c0_127, %c0_128, %c0_129] : memref<18x18x16xf32, #tpu.memory_space<vmem>>, vector<16x16x16xf32>
    %140 = vector.shape_cast %139 : vector<16x16x16xf32> to vector<256x16xf32>
    %c0_130 = arith.constant 0 : index
    %c0_131 = arith.constant 0 : index
    %141 = vector.load %arg4[%c0_130, %c0_131] : memref<144x4xf32, #tpu.memory_space<vmem>>, vector<16x4xf32>
    %cst_132 = arith.constant dense<0.000000e+00> : vector<256x4xf32>
    %142 = tpu.matmul %140, %141, %cst_132 {dimension_numbers = #tpu.dot_dimension_numbers<[1], [0], [0], [1], [0, 0, 1, 1], [], []>} : vector<256x16xf32>, vector<16x4xf32>, vector<256x4xf32> -> vector<256x4xf32>
    %c0_133 = arith.constant 0 : index
    %c1_134 = arith.constant 1 : index
    %c0_135 = arith.constant 0 : index
    %143 = vector.load %arg9[%c0_133, %c1_134, %c0_135] : memref<18x18x16xf32, #tpu.memory_space<vmem>>, vector<16x16x16xf32>
    %144 = vector.shape_cast %143 : vector<16x16x16xf32> to vector<256x16xf32>
    %c16_136 = arith.constant 16 : index
    %c0_137 = arith.constant 0 : index
    %145 = vector.load %arg4[%c16_136, %c0_137] : memref<144x4xf32, #tpu.memory_space<vmem>>, vector<16x4xf32>
    %cst_138 = arith.constant dense<0.000000e+00> : vector<256x4xf32>
    %146 = tpu.matmul %144, %145, %cst_138 {dimension_numbers = #tpu.dot_dimension_numbers<[1], [0], [0], [1], [0, 0, 1, 1], [], []>} : vector<256x16xf32>, vector<16x4xf32>, vector<256x4xf32> -> vector<256x4xf32>
    %147 = arith.addf %142, %146 : vector<256x4xf32>
    %c0_139 = arith.constant 0 : index
    %c2_140 = arith.constant 2 : index
    %c0_141 = arith.constant 0 : index
    %148 = vector.load %arg9[%c0_139, %c2_140, %c0_141] : memref<18x18x16xf32, #tpu.memory_space<vmem>>, vector<16x16x16xf32>
    %149 = vector.shape_cast %148 : vector<16x16x16xf32> to vector<256x16xf32>
    %c32_142 = arith.constant 32 : index
    %c0_143 = arith.constant 0 : index
    %150 = vector.load %arg4[%c32_142, %c0_143] : memref<144x4xf32, #tpu.memory_space<vmem>>, vector<16x4xf32>
    %cst_144 = arith.constant dense<0.000000e+00> : vector<256x4xf32>
    %151 = tpu.matmul %149, %150, %cst_144 {dimension_numbers = #tpu.dot_dimension_numbers<[1], [0], [0], [1], [0, 0, 1, 1], [], []>} : vector<256x16xf32>, vector<16x4xf32>, vector<256x4xf32> -> vector<256x4xf32>
    %152 = arith.addf %147, %151 : vector<256x4xf32>
    %c1_145 = arith.constant 1 : index
    %c0_146 = arith.constant 0 : index
    %c0_147 = arith.constant 0 : index
    %153 = vector.load %arg9[%c1_145, %c0_146, %c0_147] : memref<18x18x16xf32, #tpu.memory_space<vmem>>, vector<16x16x16xf32>
    %154 = vector.shape_cast %153 : vector<16x16x16xf32> to vector<256x16xf32>
    %c48 = arith.constant 48 : index
    %c0_148 = arith.constant 0 : index
    %155 = vector.load %arg4[%c48, %c0_148] : memref<144x4xf32, #tpu.memory_space<vmem>>, vector<16x4xf32>
    %cst_149 = arith.constant dense<0.000000e+00> : vector<256x4xf32>
    %156 = tpu.matmul %154, %155, %cst_149 {dimension_numbers = #tpu.dot_dimension_numbers<[1], [0], [0], [1], [0, 0, 1, 1], [], []>} : vector<256x16xf32>, vector<16x4xf32>, vector<256x4xf32> -> vector<256x4xf32>
    %157 = arith.addf %152, %156 : vector<256x4xf32>
    %c1_150 = arith.constant 1 : index
    %c1_151 = arith.constant 1 : index
    %c0_152 = arith.constant 0 : index
    %158 = vector.load %arg9[%c1_150, %c1_151, %c0_152] : memref<18x18x16xf32, #tpu.memory_space<vmem>>, vector<16x16x16xf32>
    %159 = vector.shape_cast %158 : vector<16x16x16xf32> to vector<256x16xf32>
    %c64 = arith.constant 64 : index
    %c0_153 = arith.constant 0 : index
    %160 = vector.load %arg4[%c64, %c0_153] : memref<144x4xf32, #tpu.memory_space<vmem>>, vector<16x4xf32>
    %cst_154 = arith.constant dense<0.000000e+00> : vector<256x4xf32>
    %161 = tpu.matmul %159, %160, %cst_154 {dimension_numbers = #tpu.dot_dimension_numbers<[1], [0], [0], [1], [0, 0, 1, 1], [], []>} : vector<256x16xf32>, vector<16x4xf32>, vector<256x4xf32> -> vector<256x4xf32>
    %162 = arith.addf %157, %161 : vector<256x4xf32>
    %c1_155 = arith.constant 1 : index
    %c2_156 = arith.constant 2 : index
    %c0_157 = arith.constant 0 : index
    %163 = vector.load %arg9[%c1_155, %c2_156, %c0_157] : memref<18x18x16xf32, #tpu.memory_space<vmem>>, vector<16x16x16xf32>
    %164 = vector.shape_cast %163 : vector<16x16x16xf32> to vector<256x16xf32>
    %c80 = arith.constant 80 : index
    %c0_158 = arith.constant 0 : index
    %165 = vector.load %arg4[%c80, %c0_158] : memref<144x4xf32, #tpu.memory_space<vmem>>, vector<16x4xf32>
    %cst_159 = arith.constant dense<0.000000e+00> : vector<256x4xf32>
    %166 = tpu.matmul %164, %165, %cst_159 {dimension_numbers = #tpu.dot_dimension_numbers<[1], [0], [0], [1], [0, 0, 1, 1], [], []>} : vector<256x16xf32>, vector<16x4xf32>, vector<256x4xf32> -> vector<256x4xf32>
    %167 = arith.addf %162, %166 : vector<256x4xf32>
    %c2_160 = arith.constant 2 : index
    %c0_161 = arith.constant 0 : index
    %c0_162 = arith.constant 0 : index
    %168 = vector.load %arg9[%c2_160, %c0_161, %c0_162] : memref<18x18x16xf32, #tpu.memory_space<vmem>>, vector<16x16x16xf32>
    %169 = vector.shape_cast %168 : vector<16x16x16xf32> to vector<256x16xf32>
    %c96 = arith.constant 96 : index
    %c0_163 = arith.constant 0 : index
    %170 = vector.load %arg4[%c96, %c0_163] : memref<144x4xf32, #tpu.memory_space<vmem>>, vector<16x4xf32>
    %cst_164 = arith.constant dense<0.000000e+00> : vector<256x4xf32>
    %171 = tpu.matmul %169, %170, %cst_164 {dimension_numbers = #tpu.dot_dimension_numbers<[1], [0], [0], [1], [0, 0, 1, 1], [], []>} : vector<256x16xf32>, vector<16x4xf32>, vector<256x4xf32> -> vector<256x4xf32>
    %172 = arith.addf %167, %171 : vector<256x4xf32>
    %c2_165 = arith.constant 2 : index
    %c1_166 = arith.constant 1 : index
    %c0_167 = arith.constant 0 : index
    %173 = vector.load %arg9[%c2_165, %c1_166, %c0_167] : memref<18x18x16xf32, #tpu.memory_space<vmem>>, vector<16x16x16xf32>
    %174 = vector.shape_cast %173 : vector<16x16x16xf32> to vector<256x16xf32>
    %c112 = arith.constant 112 : index
    %c0_168 = arith.constant 0 : index
    %175 = vector.load %arg4[%c112, %c0_168] : memref<144x4xf32, #tpu.memory_space<vmem>>, vector<16x4xf32>
    %cst_169 = arith.constant dense<0.000000e+00> : vector<256x4xf32>
    %176 = tpu.matmul %174, %175, %cst_169 {dimension_numbers = #tpu.dot_dimension_numbers<[1], [0], [0], [1], [0, 0, 1, 1], [], []>} : vector<256x16xf32>, vector<16x4xf32>, vector<256x4xf32> -> vector<256x4xf32>
    %177 = arith.addf %172, %176 : vector<256x4xf32>
    %c2_170 = arith.constant 2 : index
    %c2_171 = arith.constant 2 : index
    %c0_172 = arith.constant 0 : index
    %178 = vector.load %arg9[%c2_170, %c2_171, %c0_172] : memref<18x18x16xf32, #tpu.memory_space<vmem>>, vector<16x16x16xf32>
    %179 = vector.shape_cast %178 : vector<16x16x16xf32> to vector<256x16xf32>
    %c128 = arith.constant 128 : index
    %c0_173 = arith.constant 0 : index
    %180 = vector.load %arg4[%c128, %c0_173] : memref<144x4xf32, #tpu.memory_space<vmem>>, vector<16x4xf32>
    %cst_174 = arith.constant dense<0.000000e+00> : vector<256x4xf32>
    %181 = tpu.matmul %179, %180, %cst_174 {dimension_numbers = #tpu.dot_dimension_numbers<[1], [0], [0], [1], [0, 0, 1, 1], [], []>} : vector<256x16xf32>, vector<16x4xf32>, vector<256x4xf32> -> vector<256x4xf32>
    %182 = arith.addf %177, %181 : vector<256x4xf32>
    %c0_175 = arith.constant 0 : index
    %c0_176 = arith.constant 0 : index
    %183 = vector.load %arg5[%c0_175, %c0_176] : memref<1x4xf32, #tpu.memory_space<vmem>>, vector<1x4xf32>
    %184 = vector.broadcast %183 : vector<1x4xf32> to vector<256x4xf32>
    %185 = arith.addf %182, %184 : vector<256x4xf32>
    %186 = tpu.transpose %185, [1, 0] : vector<256x4xf32> -> vector<4x256xf32>
    %c0_177 = arith.constant 0 : index
    %c0_178 = arith.constant 0 : index
    %c0_179 = arith.constant 0 : index
    %187 = vector.load %arg6[%c0_177, %c0_178, %c0_179] : memref<1x4x256xf32, #tpu.memory_space<vmem>>, vector<1x4x256xf32>
    %188 = vector.shape_cast %187 : vector<1x4x256xf32> to vector<4x256xf32>
    %189 = vector.shape_cast %186 : vector<4x256xf32> to vector<1x4x256xf32>
    tpu.vector_store %arg6[%c0_177, %c0_178, %c0_179], %189 {strides = array<i32>} : memref<1x4x256xf32, #tpu.memory_space<vmem>>, vector<1x4x256xf32>,
    return
  }
  func.func @transform_0(%arg0: i32) -> (i32, i32, i32, i32) {
    %c0_i32 = arith.constant 0 : i32
    %c0_i32_0 = arith.constant 0 : i32
    %c0_i32_1 = arith.constant 0 : i32
    %c0_i32_2 = arith.constant 0 : i32
    return %arg0, %c0_i32, %c0_i32_0, %c0_i32_1 : i32, i32, i32, i32
  }
  func.func @transform_1(%arg0: i32) -> (i32, i32) {
    %c0_i32 = arith.constant 0 : i32
    %c0_i32_0 = arith.constant 0 : i32
    %c0_i32_1 = arith.constant 0 : i32
    return %c0_i32, %c0_i32_0 : i32, i32
  }
  func.func @transform_2(%arg0: i32) -> (i32, i32) {
    %c0_i32 = arith.constant 0 : i32
    %c0_i32_0 = arith.constant 0 : i32
    %c0_i32_1 = arith.constant 0 : i32
    return %c0_i32, %c0_i32_0 : i32, i32
  }
  func.func @transform_3(%arg0: i32) -> (i32, i32) {
    %c0_i32 = arith.constant 0 : i32
    %c0_i32_0 = arith.constant 0 : i32
    %c0_i32_1 = arith.constant 0 : i32
    return %c0_i32, %c0_i32_0 : i32, i32
  }
  func.func @transform_4(%arg0: i32) -> (i32, i32) {
    %c0_i32 = arith.constant 0 : i32
    %c0_i32_0 = arith.constant 0 : i32
    %c0_i32_1 = arith.constant 0 : i32
    return %c0_i32, %c0_i32_0 : i32, i32
  }
  func.func @transform_5(%arg0: i32) -> (i32, i32, i32) {
    %c0_i32 = arith.constant 0 : i32
    %c0_i32_0 = arith.constant 0 : i32
    %c0_i32_1 = arith.constant 0 : i32
    return %arg0, %c0_i32, %c0_i32_0 : i32, i32, i32
  }
}

</mosaic_0001>

<bundles_post_ra>
// kernel: sppf_forward.1
= control target key start
LH: loop header
LB: loop body
LE: loop exit
PB: predicated region body
PF: predicated region fallthrough
CT: control target
= control target key end

     0   :  { %s13180_s18 = smov 0   ;;  %s18933_s0 = inlined_call_operand.vmem [shape: f32[2,16,16,4], index: 0, kind: input, shape index: {}]   ;;  %s18934_s1 = inlined_call_operand.vmem [shape: f32[36,4], index: 1, kind: input, shape index: {}]   ;;  %s18935_s2 = inlined_call_operand.vmem [shape: f32[1,4], index: 2, kind: input, shape index: {}]   ;;  %s18936_s3 = inlined_call_operand.vmem [shape: f32[144,4], index: 3, kind: input, shape index: {}]   ;;  %s18937_s4 = inlined_call_operand.vmem [shape: f32[1,4], index: 4, kind: input, shape index: {}]   ;;  %s18938_s5 = inlined_call_operand.vmem [shape: f32[2,4,256], index: 5, kind: output, shape index: {}]  }
   0x1 LB: > { %s11001_s19 = sadd.s32 4294967295, %s13143_s18   ;;  %p11005_p0 = scmp.ge.s32.totalorder %s13143_s18, 1  ;;  %s13143_s18 = sphi %s13180_s18, %s15_s18  }
   0x2   : > { %p187_p1 = scmp.lt.s32.totalorder %s13143_s18, 3 }
   0x4   : > { %p188_p2 = pnand %p11005_p0, %p187_p1 }
   0x6   : > { %191 = sbr.rel (%p188_p2) target bundleno = 1678 (0x68e), region = 40 }
   0xb   : > { %v487_v0 = vld [vmem:[%s18934_s1 + $0x4] sm:$0xf]  ;;  %vm584_vm0 = vcmask 1043456   ;;  %v454_v1 = vld [vmem:[%s18934_s1] sm:$0xf]  ;;  %vm225_vm1 = vcmask 31744  }
   0xc   : > { %12204 = vmatprep.subr.msk.mxu0 %vm584_vm0, %v487_v0  ;;  %12254 = vmatprep.subr.msk.mxu1 %vm584_vm0, %v454_v1  ;;  %vm228_vm2 = vcmask 25600   ;;  %v13199_v2 = vld [vmem:[%s18934_s1 + $0x8] sm:$0xf]  ;;  %p13203_p3 = scmp.lt.s32.totalorder %s11001_s19, 1  ;;  %vm235_vm3 = vcmask 24576   ;;  %v18939_v3 = vmov 0.0  }
   0xd   : > { %12205 = vmatpush3.msk.msra.mxu0 %vm584_vm0, %v487_v0  ;;  %226 = vst.msk [vmem:[#allocation2] sm:$0xff] %vm225_vm1, %v18939_v3  ;;  %227 = vst.msk [vmem:[#allocation2 + $0x8] sm:$0xff] %vm225_vm1, %v18939_v3  ;;  %12255 = vmatpush3.msk.msra.mxu1 %vm584_vm0, %v454_v1  ;;  %v1558_v4 = vld [vmem:[%s18934_s1 + $0xc] sm:$0xf]  ;;  %v13315_v11 = vld [vmem:[%s18934_s1 + $0x10] sm:$0xf] }
   0xe   : > { %231 = vst.msk [vmem:[#allocation2 + $0x198] sm:$0xff] %vm225_vm1, %v18939_v3  ;;  %232 = vst.msk [vmem:[#allocation2 + $0x1a0] sm:$0xff] %vm225_vm1, %v18939_v3  ;;  %12304 = vmatprep.subr.msk.mxu0 %vm584_vm0, %v13199_v2  ;;  %s19366_s19 = smov (!%p13203_p3, %s11001_s19), 1  ;;  %12354 = vmatprep.subr.msk.mxu1 %vm584_vm0, %v1558_v4  ;;  %vm270_vm4 = vcmask 27648   ;;  %vm4084_vm5 = vcmask 1046528   ;;  %vm4265_vm6 = vcmask 1045504  }
   0xf   : > { %229 = vst.msk [vmem:[#allocation2 + $0x10] sm:$0x3] %vm228_vm2, %v18939_v3  ;;  %233 = vst.msk [vmem:[#allocation2 + $0x1a8] sm:$0x3] %vm228_vm2, %v18939_v3  ;;  %s11599_s29 = sshll.u32 %s19366_s19, 8  ;;  %vm4446_vm7 = vcmask 1044480  }
  0x10   : > { %236 = vst.msk [vmem:[#allocation2 + $0x18] sm:$0x1] %vm235_vm3, %v18939_v3  ;;  %237 = vst.msk [vmem:[#allocation2 + $0x30] sm:$0x1] %vm235_vm3, %v18939_v3  ;;  %s13301_s7 = scalar_lea.vmem %s18933_s0, %s11599_s29  ;;  %s13147_s22 = smov 4   ;;  %vm5063_vm8 = vcmask 64544  }
  0x11   : > { %238 = vst.msk [vmem:[#allocation2 + $0x48] sm:$0x1] %vm235_vm3, %v18939_v3  ;;  %239 = vst.msk [vmem:[#allocation2 + $0x60] sm:$0x1] %vm235_vm3, %v18939_v3  ;;  %v358_v5 = vld [vmem:[%s13301_s7] sm:$0xff]  ;;  %v359_v6 = vld [vmem:[%s13301_s7 + $0x8] sm:$0xff] }
  0x12   : > { %240 = vst.msk [vmem:[#allocation2 + $0x78] sm:$0x1] %vm235_vm3, %v18939_v3  ;;  %241 = vst.msk [vmem:[#allocation2 + $0x90] sm:$0x1] %vm235_vm3, %v18939_v3  ;;  %v360_v7 = vld [vmem:[%s13301_s7 + $0x10] sm:$0xff]  ;;  %v361_v8 = vld [vmem:[%s13301_s7 + $0x18] sm:$0xff] }
  0x13   : > { %242 = vst.msk [vmem:[#allocation2 + $0xa8] sm:$0x1] %vm235_vm3, %v18939_v3  ;;  %243 = vst.msk [vmem:[#allocation2 + $0xc0] sm:$0x1] %vm235_vm3, %v18939_v3  ;;  %v362_v9 = vld [vmem:[%s13301_s7 + $0x20] sm:$0xff]  ;;  %v363_v10 = vld [vmem:[%s13301_s7 + $0x28] sm:$0xff] }
  0x14   : > { %244 = vst.msk [vmem:[#allocation2 + $0xd8] sm:$0x1] %vm235_vm3, %v18939_v3  ;;  %245 = vst.msk [vmem:[#allocation2 + $0xf0] sm:$0x1] %vm235_vm3, %v18939_v3  ;;  %v455_v12 = vld [vmem:[#allocation2 + $0x1] sm:$0xff]  ;;  %v364_v16 = vld [vmem:[%s13301_s7 + $0x30] sm:$0xff] }
  0x15   : > { %246 = vst.msk [vmem:[#allocation2 + $0x108] sm:$0x1] %vm235_vm3, %v18939_v3  ;;  %247 = vst.msk [vmem:[#allocation2 + $0x120] sm:$0x1] %vm235_vm3, %v18939_v3  ;;  %v422_v13 = vld [vmem:[#allocation2] sm:$0xff]  ;;  %12206 = vmatprep.mubr.msk.f32.mxu0 %vm225_vm1, %v455_v12  ;;  %v423_v15 = vld [vmem:[#allocation2 + $0x8] sm:$0xff] }
  0x16   : > { %248 = vst.msk [vmem:[#allocation2 + $0x138] sm:$0x1] %vm235_vm3, %v18939_v3  ;;  %249 = vst.msk [vmem:[#allocation2 + $0x150] sm:$0x1] %vm235_vm3, %v18939_v3  ;;  %v456_v14 = vld [vmem:[#allocation2 + $0x9] sm:$0xff]  ;;  %12256 = vmatprep.mubr.msk.f32.mxu1 %vm225_vm1, %v422_v13  ;;  %v365_v17 = vld [vmem:[%s13301_s7 + $0x38] sm:$0xff] }
  0x17   : > { %250 = vst.msk [vmem:[#allocation2 + $0x168] sm:$0x1] %vm235_vm3, %v18939_v3  ;;  %251 = vst.msk [vmem:[#allocation2 + $0x180] sm:$0x1] %vm235_vm3, %v18939_v3  ;;  %12207 = vmatmul.mubr.msk.f32.vlgmr.msra.gmra.mxu0 %vm225_vm1, %v456_v14  ;;  %12257 = vmatmul.mubr.msk.f32.vlgmr.msra.gmra.mxu1 %vm225_vm1, %v423_v15  ;;  %v366_v18 = vld [vmem:[%s13301_s7 + $0x40] sm:$0xff]  ;;  %v367_v19 = vld [vmem:[%s13301_s7 + $0x48] sm:$0xff] }
  0x18   : > { %252 = vst.msk [vmem:[#allocation2 + $0x29] sm:$0x1] %vm235_vm3, %v18939_v3  ;;  %253 = vst.msk [vmem:[#allocation2 + $0x41] sm:$0x1] %vm235_vm3, %v18939_v3  ;;  %v368_v20 = vld [vmem:[%s13301_s7 + $0x50] sm:$0xff]  ;;  %12305 = vmatpush3.msk.msra.mxu0 %vm584_vm0, %v13199_v2  ;;  %v369_v21 = vld [vmem:[%s13301_s7 + $0x58] sm:$0xff]  ;;  %12355 = vmatpush3.msk.msra.mxu1 %vm584_vm0, %v1558_v4 }
  0x19   : > { %254 = vst.msk [vmem:[#allocation2 + $0x59] sm:$0x1] %vm235_vm3, %v18939_v3  ;;  %255 = vst.msk [vmem:[#allocation2 + $0x71] sm:$0x1] %vm235_vm3, %v18939_v3  ;;  %v370_v22 = vld [vmem:[%s13301_s7 + $0x60] sm:$0xff]  ;;  %v371_v23 = vld [vmem:[%s13301_s7 + $0x68] sm:$0xff]  ;;  %12404 = vmatprep.subr.msk.mxu0 %vm584_vm0, %v13315_v11 }
  0x1a   : > { %256 = vst.msk [vmem:[#allocation2 + $0x89] sm:$0x1] %vm235_vm3, %v18939_v3  ;;  %257 = vst.msk [vmem:[#allocation2 + $0xa1] sm:$0x1] %vm235_vm3, %v18939_v3  ;;  %v372_v24 = vld [vmem:[%s13301_s7 + $0x70] sm:$0xff]  ;;  %v373_v25 = vld [vmem:[%s13301_s7 + $0x78] sm:$0xff] }
  0x1b   : > { %258 = vst.msk [vmem:[#allocation2 + $0xb9] sm:$0x1] %vm235_vm3, %v18939_v3  ;;  %259 = vst.msk [vmem:[#allocation2 + $0xd1] sm:$0x1] %vm235_vm3, %v18939_v3  ;;  %v374_v26 = vld [vmem:[%s13301_s7 + $0x80] sm:$0xff]  ;;  %v375_v27 = vld [vmem:[%s13301_s7 + $0x88] sm:$0xff] }
  0x1c   : > { %260 = vst.msk [vmem:[#allocation2 + $0xe9] sm:$0x1] %vm235_vm3, %v18939_v3  ;;  %261 = vst.msk [vmem:[#allocation2 + $0x101] sm:$0x1] %vm235_vm3, %v18939_v3  ;;  %v376_v28 = vld [vmem:[%s13301_s7 + $0x90] sm:$0xff]  ;;  %v377_v29 = vld [vmem:[%s13301_s7 + $0x98] sm:$0xff] }
  0x1d   : > { %262 = vst.msk [vmem:[#allocation2 + $0x119] sm:$0x1] %vm235_vm3, %v18939_v3  ;;  %263 = vst.msk [vmem:[#allocation2 + $0x131] sm:$0x1] %vm235_vm3, %v18939_v3  ;;  %v378_v50 = vld [vmem:[%s13301_s7 + $0xa0] sm:$0xff]  ;;  %v379_v51 = vld [vmem:[%s13301_s7 + $0xa8] sm:$0xff] }
  0x1e   : > { %264 = vst.msk [vmem:[#allocation2 + $0x149] sm:$0x1] %vm235_vm3, %v18939_v3  ;;  %265 = vst.msk [vmem:[#allocation2 + $0x161] sm:$0x1] %vm235_vm3, %v18939_v3  ;;  %v380_v53 = vld [vmem:[%s13301_s7 + $0xb0] sm:$0xff]  ;;  %v381_v54 = vld [vmem:[%s13301_s7 + $0xb8] sm:$0xff] }
  0x1f   : > { %266 = vst.msk [vmem:[#allocation2 + $0x179] sm:$0x1] %vm235_vm3, %v18939_v3  ;;  %267 = vst.msk [vmem:[#allocation2 + $0x191] sm:$0x1] %vm235_vm3, %v18939_v3  ;;  %v382_v55 = vld [vmem:[%s13301_s7 + $0xc0] sm:$0xff]  ;;  %v383_v56 = vld [vmem:[%s13301_s7 + $0xc8] sm:$0xff] }
  0x20   : > { %390 = vst.msk [vmem:[#allocation2 + $0x19] sm:$0xff] %vm225_vm1, %v358_v5  ;;  %391 = vst.msk [vmem:[#allocation2 + $0x21] sm:$0xff] %vm225_vm1, %v359_v6  ;;  %v384_v57 = vld [vmem:[%s13301_s7 + $0xd0] sm:$0xff]  ;;  %v385_v58 = vld [vmem:[%s13301_s7 + $0xd8] sm:$0xff]  ;;  %s13148_s25 = smov 8   ;;  %s13149_s26 = smov 12  }
  0x21   : > { %392 = vst.msk [vmem:[#allocation2 + $0x31] sm:$0xff] %vm225_vm1, %v360_v7  ;;  %393 = vst.msk [vmem:[#allocation2 + $0x39] sm:$0xff] %vm225_vm1, %v361_v8  ;;  %v386_v60 = vld [vmem:[%s13301_s7 + $0xe0] sm:$0xff]  ;;  %v387_v61 = vld [vmem:[%s13301_s7 + $0xe8] sm:$0xff]  ;;  %vm6224_vm9 = vcmask 97344   ;;  %vm7385_vm10 = vcmask 130144  }
  0x22   : > { %394 = vst.msk [vmem:[#allocation2 + $0x49] sm:$0xff] %vm225_vm1, %v362_v9  ;;  %395 = vst.msk [vmem:[#allocation2 + $0x51] sm:$0xff] %vm225_vm1, %v363_v10  ;;  %v1138_v3 = vld [vmem:[#allocation2 + $0xa] sm:$0xff]  ;;  %vm315_vm11 = vcmask 130048   ;;  %vm318_vm12 = vcmask 123904   ;;  %vm325_vm13 = vcmask 122880  }
  0x23   : > { %396 = vst.msk [vmem:[#allocation2 + $0x61] sm:$0xff] %vm225_vm1, %v364_v16  ;;  %397 = vst.msk [vmem:[#allocation2 + $0x69] sm:$0xff] %vm225_vm1, %v365_v17  ;;  %v388_v16 = vld [vmem:[%s13301_s7 + $0xf0] sm:$0xff]  ;;  %s11600_s21 = sshll.u32 %s19366_s19, 3 }
  0x24   : > { %398 = vst.msk [vmem:[#allocation2 + $0x79] sm:$0xff] %vm225_vm1, %v366_v18  ;;  %399 = vst.msk [vmem:[#allocation2 + $0x81] sm:$0xff] %vm225_vm1, %v367_v19  ;;  %v13529_v17 = vld [vmem:[%s18934_s1 + $0x14] sm:$0xf]  ;;  %v389_v18 = vld [vmem:[%s13301_s7 + $0xf8] sm:$0xff]  ;;  %s224_s24 = scalar_lea.vmem %s18938_s5, %s11600_s21 }
  0x25   : > { %400 = vst.msk [vmem:[#allocation2 + $0x91] sm:$0xff] %vm225_vm1, %v368_v20  ;;  %401 = vst.msk [vmem:[#allocation2 + $0x99] sm:$0xff] %vm225_vm1, %v369_v21  ;;  %12454 = vmatprep.subr.msk.mxu1 %vm584_vm0, %v13529_v17 }
  0x26   : > { %402 = vst.msk [vmem:[#allocation2 + $0xa9] sm:$0xff] %vm225_vm1, %v370_v22  ;;  %403 = vst.msk [vmem:[#allocation2 + $0xb1] sm:$0xff] %vm225_vm1, %v371_v23 }
  0x27   : > { %404 = vst.msk [vmem:[#allocation2 + $0xc1] sm:$0xff] %vm225_vm1, %v372_v24  ;;  %405 = vst.msk [vmem:[#allocation2 + $0xc9] sm:$0xff] %vm225_vm1, %v373_v25  ;;  %v13354_v30 = vld [vmem:[#allocation2 + $0x19] sm:$0xff]  ;;  %v13358_v32 = vld [vmem:[#allocation2 + $0x21] sm:$0xff] }
  0x28   : > { %406 = vst.msk [vmem:[#allocation2 + $0xd9] sm:$0xff] %vm225_vm1, %v374_v26  ;;  %v13356_v31 = vld [vmem:[#allocation2 + $0x18] sm:$0xff]  ;;  %407 = vst.msk [vmem:[#allocation2 + $0xe1] sm:$0xff] %vm225_vm1, %v375_v27  ;;  %12209 = vmatprep.mubr.msk.f32.mxu0 %vm225_vm1, %v13354_v30  ;;  %v13367_v33 = vld [vmem:[#allocation2 + $0x20] sm:$0xff] }
  0x29   : > { %408 = vst.msk [vmem:[#allocation2 + $0xf1] sm:$0xff] %vm225_vm1, %v376_v28  ;;  %409 = vst.msk [vmem:[#allocation2 + $0xf9] sm:$0xff] %vm225_vm1, %v377_v29  ;;  %12259 = vmatprep.mubr.msk.f32.mxu1 %vm225_vm1, %v13356_v31  ;;  %v13369_v34 = vld [vmem:[#allocation2 + $0x31] sm:$0xff]  ;;  %12210 = vmatmul.mubr.msk.f32.gmra.mxu0 %vm225_vm1, %v13358_v32  ;;  %v13381_v36 = vld [vmem:[#allocation2 + $0x39] sm:$0xff] }
  0x2a   : > { %v13371_v35 = vld [vmem:[#allocation2 + $0x30] sm:$0xff]  ;;  %12260 = vmatmul.mubr.msk.f32.gmra.mxu1 %vm225_vm1, %v13367_v33  ;;  %12212 = vmatprep.mubr.msk.f32.mxu0 %vm225_vm1, %v13369_v34  ;;  %v13383_v37 = vld [vmem:[#allocation2 + $0x38] sm:$0xff]  ;;  %v13387_v39 = vld [vmem:[#allocation2 + $0x48] sm:$0xff]  ;;  %410 = vst.msk [vmem:[#allocation2 + $0x109] sm:$0xff] %vm225_vm1, %v378_v50 }
  0x2b   : > { %19021 = vst [vmem:[#allocation5_spill] sm:$0xff] %v13371_v35  ;;  %12262 = vmatprep.mubr.msk.f32.mxu1 %vm225_vm1, %v13371_v35  ;;  %19022 = vst [vmem:[#allocation6_spill] sm:$0xff] %v13383_v37  ;;  %v13385_v38 = vld [vmem:[#allocation2 + $0x49] sm:$0xff]  ;;  %v13397_v40 = vld [vmem:[#allocation2 + $0x51] sm:$0xff] }
  0x2c   : > { %19023 = vst [vmem:[#allocation7_spill] sm:$0xff] %v13387_v39  ;;  %v13399_v41 = vld [vmem:[#allocation2 + $0x50] sm:$0xff]  ;;  %v13401_v42 = vld [vmem:[#allocation2 + $0x61] sm:$0xff]  ;;  %v13417_v46 = vld [vmem:[#allocation2 + $0x79] sm:$0xff] }
  0x2d   : > { %12213 = vmatmul.mubr.msk.f32.gmra.mxu0 %vm225_vm1, %v13381_v36  ;;  %19024 = vst [vmem:[#allocation8_spill] sm:$0xff] %v13399_v41  ;;  %v13403_v43 = vld [vmem:[#allocation2 + $0x60] sm:$0xff]  ;;  %v13413_v44 = vld [vmem:[#allocation2 + $0x69] sm:$0xff]  ;;  %v13419_v47 = vld [vmem:[#allocation2 + $0x78] sm:$0xff] }
  0x2e   : > { %12263 = vmatmul.mubr.msk.f32.gmra.mxu1 %vm225_vm1, %v13383_v37  ;;  %12215 = vmatprep.mubr.msk.f32.mxu0 %vm225_vm1, %v13385_v38  ;;  %19025 = vst [vmem:[#allocation9_spill] sm:$0xff] %v13403_v43  ;;  %v13415_v45 = vld [vmem:[#allocation2 + $0x68] sm:$0xff]  ;;  %19027 = vst [vmem:[#allocation11_spill] sm:$0xff] %v13419_v47  ;;  %v13423_v49 = vld [vmem:[#allocation2 + $0x80] sm:$0xff] }
  0x2f   : > { %12265 = vmatprep.mubr.msk.f32.mxu1 %vm225_vm1, %v13387_v39  ;;  %19026 = vst [vmem:[#allocation10_spill] sm:$0xff] %v13415_v45  ;;  %v13421_v48 = vld [vmem:[#allocation2 + $0x81] sm:$0xff]  ;;  %19028 = vst [vmem:[#allocation12_spill] sm:$0xff] %v13423_v49  ;;  %v13431_v52 = vld [vmem:[#allocation2 + $0x91] sm:$0xff] }
  0x30   : > { %411 = vst.msk [vmem:[#allocation2 + $0x111] sm:$0xff] %vm225_vm1, %v379_v51  ;;  %412 = vst.msk [vmem:[#allocation2 + $0x121] sm:$0xff] %vm225_vm1, %v380_v53  ;;  %v13448_v59 = vld [vmem:[#allocation2 + $0x90] sm:$0xff]  ;;  %v13465_v62 = vld [vmem:[#allocation2 + $0x99] sm:$0xff] }
  0x31   : > { %12216 = vmatmul.mubr.msk.f32.gmra.mxu0 %vm225_vm1, %v13397_v40  ;;  %413 = vst.msk [vmem:[#allocation2 + $0x129] sm:$0xff] %vm225_vm1, %v381_v54  ;;  %414 = vst.msk [vmem:[#allocation2 + $0x139] sm:$0xff] %vm225_vm1, %v382_v55  ;;  %v13467_v63 = vld [vmem:[#allocation2 + $0x98] sm:$0xff]  ;;  %v13469_v0 = vld [vmem:[#allocation2 + $0xa9] sm:$0xff] }
  0x32   : > { %12266 = vmatmul.mubr.msk.f32.gmra.mxu1 %vm225_vm1, %v13399_v41  ;;  %12218 = vmatprep.mubr.msk.f32.mxu0 %vm225_vm1, %v13401_v42  ;;  %19029 = vst [vmem:[#allocation13_spill] sm:$0xff] %v13448_v59  ;;  %415 = vst.msk [vmem:[#allocation2 + $0x141] sm:$0xff] %vm225_vm1, %v383_v56  ;;  %v13471_v1 = vld [vmem:[#allocation2 + $0xa8] sm:$0xff]  ;;  %v13481_v2 = vld [vmem:[#allocation2 + $0xb1] sm:$0xff] }
  0x33   : > { %12268 = vmatprep.mubr.msk.f32.mxu1 %vm225_vm1, %v13403_v43  ;;  %416 = vst.msk [vmem:[#allocation2 + $0x151] sm:$0xff] %vm225_vm1, %v384_v57  ;;  %417 = vst.msk [vmem:[#allocation2 + $0x159] sm:$0xff] %vm225_vm1, %v385_v58  ;;  %v13483_v4 = vld [vmem:[#allocation2 + $0xb0] sm:$0xff]  ;;  %v13485_v5 = vld [vmem:[#allocation2 + $0xc1] sm:$0xff] }
  0x34   : > { %418 = vst.msk [vmem:[#allocation2 + $0x169] sm:$0xff] %vm225_vm1, %v386_v60  ;;  %419 = vst.msk [vmem:[#allocation2 + $0x171] sm:$0xff] %vm225_vm1, %v387_v61  ;;  %v13487_v6 = vld [vmem:[#allocation2 + $0xc0] sm:$0xff]  ;;  %v13497_v7 = vld [vmem:[#allocation2 + $0xc9] sm:$0xff] }
  0x35   : > { %12219 = vmatmul.mubr.msk.f32.gmra.mxu0 %vm225_vm1, %v13413_v44  ;;  %19030 = vst [vmem:[#allocation14_spill] sm:$0xff] %v13467_v63  ;;  %19031 = vst [vmem:[#allocation15_spill] sm:$0xff] %v13471_v1  ;;  %v13499_v8 = vld [vmem:[#allocation2 + $0xc8] sm:$0xff]  ;;  %v13501_v9 = vld [vmem:[#allocation2 + $0xd9] sm:$0xff] }
  0x36   : > { %12269 = vmatmul.mubr.msk.f32.gmra.mxu1 %vm225_vm1, %v13415_v45  ;;  %12221 = vmatprep.mubr.msk.f32.mxu0 %vm225_vm1, %v13417_v46  ;;  %19032 = vst [vmem:[#allocation16_spill] sm:$0xff] %v13483_v4  ;;  %19033 = vst [vmem:[#allocation17_spill] sm:$0xff] %v13487_v6  ;;  %v13503_v10 = vld [vmem:[#allocation2 + $0xd8] sm:$0xff]  ;;  %v13513_v12 = vld [vmem:[#allocation2 + $0xe1] sm:$0xff] }
  0x37   : > { %12271 = vmatprep.mubr.msk.f32.mxu1 %vm225_vm1, %v13419_v47  ;;  %19034 = vst [vmem:[#allocation18_spill] sm:$0xff] %v13499_v8  ;;  %19035 = vst [vmem:[#allocation19_spill] sm:$0xff] %v13503_v10  ;;  %v13515_v13 = vld [vmem:[#allocation2 + $0xe0] sm:$0xff]  ;;  %v13517_v14 = vld [vmem:[#allocation2 + $0xf1] sm:$0xff] }
  0x38   : > { %19036 = vst [vmem:[#allocation20_spill] sm:$0xff] %v13515_v13  ;;  %v13519_v15 = vld [vmem:[#allocation2 + $0xf0] sm:$0xff]  ;;  %v13536_v19 = vld [vmem:[#allocation2 + $0xf9] sm:$0xff]  ;;  %420 = vst.msk [vmem:[#allocation2 + $0x181] sm:$0xff] %vm225_vm1, %v388_v16 }
  0x39   : > { %12222 = vmatmul.mubr.msk.f32.gmra.mxu0 %vm225_vm1, %v13421_v48  ;;  %19037 = vst [vmem:[#allocation21_spill] sm:$0xff] %v13519_v15  ;;  %v13538_v20 = vld [vmem:[#allocation2 + $0xf8] sm:$0xff]  ;;  %421 = vst.msk [vmem:[#allocation2 + $0x189] sm:$0xff] %vm225_vm1, %v389_v18  ;;  %v13542_v21 = vld [vmem:[#allocation2 + $0x109] sm:$0xff] }
  0x3a   : > { %12272 = vmatmul.mubr.msk.f32.gmra.mxu1 %vm225_vm1, %v13423_v49  ;;  %12224 = vmatprep.mubr.msk.f32.mxu0 %vm225_vm1, %v13431_v52  ;;  %19038 = vst [vmem:[#allocation22_spill] sm:$0xff] %v13538_v20  ;;  %v13544_v22 = vld [vmem:[#allocation2 + $0x108] sm:$0xff]  ;;  %v13556_v23 = vld [vmem:[#allocation2 + $0x111] sm:$0xff]  ;;  %v13562_v26 = vld [vmem:[#allocation2 + $0x120] sm:$0xff] }
  0x3b   : > { %12274 = vmatprep.mubr.msk.f32.mxu1 %vm225_vm1, %v13448_v59  ;;  %19039 = vst [vmem:[#allocation23_spill] sm:$0xff] %v13544_v22  ;;  %v13558_v24 = vld [vmem:[#allocation2 + $0x110] sm:$0xff]  ;;  %v13560_v25 = vld [vmem:[#allocation2 + $0x121] sm:$0xff]  ;;  %19041 = vst [vmem:[#allocation25_spill] sm:$0xff] %v13562_v26 }
  0x3c   : > { %19040 = vst [vmem:[#allocation24_spill] sm:$0xff] %v13558_v24  ;;  %v13572_v27 = vld [vmem:[#allocation2 + $0x129] sm:$0xff]  ;;  %v13576_v29 = vld [vmem:[#allocation2 + $0x139] sm:$0xff]  ;;  %v13588_v51 = vld [vmem:[#allocation2 + $0x141] sm:$0xff] }
  0x3d   : > { %12225 = vmatmul.mubr.msk.f32.gmra.mxu0 %vm225_vm1, %v13465_v62  ;;  %v13574_v28 = vld [vmem:[#allocation2 + $0x128] sm:$0xff]  ;;  %v13578_v50 = vld [vmem:[#allocation2 + $0x138] sm:$0xff]  ;;  %v13590_v53 = vld [vmem:[#allocation2 + $0x140] sm:$0xff] }
  0x3e   : > { %12275 = vmatmul.mubr.msk.f32.gmra.mxu1 %vm225_vm1, %v13467_v63  ;;  %12227 = vmatprep.mubr.msk.f32.mxu0 %vm225_vm1, %v13469_v0  ;;  %19042 = vst [vmem:[#allocation26_spill] sm:$0xff] %v13574_v28  ;;  %19043 = vst [vmem:[#allocation27_spill] sm:$0xff] %v13578_v50  ;;  %v13592_v54 = vld [vmem:[#allocation2 + $0x151] sm:$0xff]  ;;  %v13604_v56 = vld [vmem:[#allocation2 + $0x159] sm:$0xff] }
  0x3f   : > { %12277 = vmatprep.mubr.msk.f32.mxu1 %vm225_vm1, %v13471_v1  ;;  %19044 = vst [vmem:[#allocation28_spill] sm:$0xff] %v13590_v53  ;;  %v13594_v55 = vld [vmem:[#allocation2 + $0x150] sm:$0xff]  ;;  %v13606_v57 = vld [vmem:[#allocation2 + $0x158] sm:$0xff]  ;;  %v13610_v60 = vld [vmem:[#allocation2 + $0x168] sm:$0xff] }
  0x40   : > { %19045 = vst [vmem:[#allocation29_spill] sm:$0xff] %v13594_v55  ;;  %19046 = vst [vmem:[#allocation30_spill] sm:$0xff] %v13606_v57  ;;  %v13608_v58 = vld [vmem:[#allocation2 + $0x169] sm:$0xff]  ;;  %v13620_v61 = vld [vmem:[#allocation2 + $0x171] sm:$0xff] }
  0x41   : > { %12228 = vmatmul.mubr.msk.f32.gmra.mxu0 %vm225_vm1, %v13481_v2  ;;  %19047 = vst [vmem:[#allocation31_spill] sm:$0xff] %v13608_v58  ;;  %19048 = vst [vmem:[#allocation32_spill] sm:$0xff] %v13620_v61  ;;  %v13622_v16 = vld [vmem:[#allocation2 + $0x170] sm:$0xff]  ;;  %v1137_v18 = vld [vmem:[#allocation2 + $0x2] sm:$0xff] }
  0x42   : > { %12278 = vmatmul.mubr.msk.f32.gmra.mxu1 %vm225_vm1, %v13483_v4  ;;  %12230 = vmatprep.mubr.msk.f32.mxu0 %vm225_vm1, %v13485_v5 }
  0x43   : > { %12280 = vmatprep.mubr.msk.f32.mxu1 %vm225_vm1, %v13487_v6 }
  0x45   : > { %12231 = vmatmul.mubr.msk.f32.gmra.mxu0 %vm225_vm1, %v13497_v7 }
  0x46   : > { %12281 = vmatmul.mubr.msk.f32.gmra.mxu1 %vm225_vm1, %v13499_v8  ;;  %12233 = vmatprep.mubr.msk.f32.mxu0 %vm225_vm1, %v13501_v9 }
  0x47   : > { %12283 = vmatprep.mubr.msk.f32.mxu1 %vm225_vm1, %v13503_v10 }
  0x49   : > { %12234 = vmatmul.mubr.msk.f32.gmra.mxu0 %vm225_vm1, %v13513_v12 }
  0x4a   : > { %12284 = vmatmul.mubr.msk.f32.gmra.mxu1 %vm225_vm1, %v13515_v13  ;;  %12236 = vmatprep.mubr.msk.f32.mxu0 %vm225_vm1, %v13517_v14 }
  0x4b   : > { %12286 = vmatprep.mubr.msk.f32.mxu1 %vm225_vm1, %v13519_v15 }
  0x4d   : > { %12237 = vmatmul.mubr.msk.f32.gmra.mxu0 %vm225_vm1, %v13536_v19 }
  0x4e   : > { %12287 = vmatmul.mubr.msk.f32.gmra.mxu1 %vm225_vm1, %v13538_v20  ;;  %12239 = vmatprep.mubr.msk.f32.mxu0 %vm225_vm1, %v13542_v21 }
  0x4f   : > { %12289 = vmatprep.mubr.msk.f32.mxu1 %vm225_vm1, %v13544_v22 }
  0x51   : > { %12240 = vmatmul.mubr.msk.f32.gmra.mxu0 %vm225_vm1, %v13556_v23 }
  0x52   : > { %12290 = vmatmul.mubr.msk.f32.gmra.mxu1 %vm225_vm1, %v13558_v24  ;;  %12242 = vmatprep.mubr.msk.f32.mxu0 %vm225_vm1, %v13560_v25 }
  0x53   : > { %12292 = vmatprep.mubr.msk.f32.mxu1 %vm225_vm1, %v13562_v26 }
  0x55   : > { %12243 = vmatmul.mubr.msk.f32.gmra.mxu0 %vm225_vm1, %v13572_v27 }
  0x56   : > { %12293 = vmatmul.mubr.msk.f32.gmra.mxu1 %vm225_vm1, %v13574_v28  ;;  %12245 = vmatprep.mubr.msk.f32.mxu0 %vm225_vm1, %v13576_v29 }
  0x57   : > { %12295 = vmatprep.mubr.msk.f32.mxu1 %vm225_vm1, %v13578_v50 }
  0x59   : > { %12246 = vmatmul.mubr.msk.f32.gmra.mxu0 %vm225_vm1, %v13588_v51 }
  0x5a   : > { %12296 = vmatmul.mubr.msk.f32.gmra.mxu1 %vm225_vm1, %v13590_v53  ;;  %12248 = vmatprep.mubr.msk.f32.mxu0 %vm225_vm1, %v13592_v54 }
  0x5b   : > { %12298 = vmatprep.mubr.msk.f32.mxu1 %vm225_vm1, %v13594_v55 }
  0x5d   : > { %12249 = vmatmul.mubr.msk.f32.gmra.mxu0 %vm225_vm1, %v13604_v56 }
  0x5e   : > { %12299 = vmatmul.mubr.msk.f32.gmra.mxu1 %vm225_vm1, %v13606_v57  ;;  %12251 = vmatprep.mubr.msk.f32.mxu0 %vm225_vm1, %v13608_v58  ;;  %v13631_v58 = vld [vmem:[#allocation2 + $0x1a] sm:$0xff] }
  0x5f   : > { %12301 = vmatprep.mubr.msk.f32.mxu1 %vm225_vm1, %v13610_v60 }
  0x61   : > { %12252 = vmatmul.mubr.msk.f32.gmra.mxu0 %vm225_vm1, %v13620_v61  ;;  %v13639_v61 = vld [vmem:[%s18934_s1 + $0x18] sm:$0xf] }
  0x62   : > { %12302 = vmatmul.mubr.msk.f32.gmra.mxu1 %vm225_vm1, %v13622_v16  ;;  %12306 = vmatprep.mubr.msk.f32.mxu0 %vm225_vm1, %v1137_v18  ;;  %v13644_v18 = vld [vmem:[%s18934_s1 + $0x1c] sm:$0xf] }
  0x63   : > { %12356 = vmatprep.mubr.msk.f32.mxu1 %vm225_vm1, %v13356_v31  ;;  %v13654_v31 = vld [vmem:[#allocation2 + $0x32] sm:$0xff] }
  0x65   : > { %12307 = vmatmul.mubr.msk.f32.vlgmr.msra.gmra.mxu0 %vm225_vm1, %v1138_v3  ;;  %v13650_v3 = vld [vmem:[#allocation2 + $0x22] sm:$0xff] }
  0x66   : > { %12357 = vmatmul.mubr.msk.f32.vlgmr.msra.gmra.mxu1 %vm225_vm1, %v13367_v33  ;;  %12405 = vmatpush3.msk.msra.mxu0 %vm584_vm0, %v13315_v11  ;;  %v13668_v11 = vld [vmem:[#allocation2 + $0x3a] sm:$0xff]  ;;  %v13672_v33 = vld [vmem:[#allocation2 + $0x4a] sm:$0xff] }
  0x67   : > { %12309 = vmatprep.mubr.msk.f32.mxu0 %vm225_vm1, %v13631_v58  ;;  %12359 = vmatprep.mubr.msk.f32.mxu1 %vm225_vm1, %v13371_v35  ;;  %v13818_v35 = vld [vmem:[#allocation2 + $0x180] sm:$0xff] }
  0x68   : > { %12455 = vmatpush3.msk.msra.mxu1 %vm584_vm0, %v13529_v17  ;;  %12504 = vmatprep.subr.msk.mxu0 %vm584_vm0, %v13639_v61  ;;  %v13680_v17 = vld [vmem:[#allocation2 + $0x52] sm:$0xff]  ;;  %19049 = vst [vmem:[#allocation33_spill] sm:$0xff] %v13818_v35 }
  0x69   : > { %12554 = vmatprep.subr.msk.mxu1 %vm584_vm0, %v13644_v18  ;;  %12310 = vmatmul.mubr.msk.f32.gmra.mxu0 %vm225_vm1, %v13650_v3 }
  0x6a   : > { %12360 = vmatmul.mubr.msk.f32.gmra.mxu1 %vm225_vm1, %v13383_v37  ;;  %12312 = vmatprep.mubr.msk.f32.mxu0 %vm225_vm1, %v13654_v31  ;;  %v13684_v37 = vld [vmem:[#allocation2 + $0x62] sm:$0xff] }
  0x6b   : > { %12362 = vmatprep.mubr.msk.f32.mxu1 %vm225_vm1, %v13387_v39  ;;  %v13696_v39 = vld [vmem:[#allocation2 + $0x7a] sm:$0xff] }
  0x6d   : > { %12313 = vmatmul.mubr.msk.f32.gmra.mxu0 %vm225_vm1, %v13668_v11 }
  0x6e   : > { %12363 = vmatmul.mubr.msk.f32.gmra.mxu1 %vm225_vm1, %v13399_v41  ;;  %12315 = vmatprep.mubr.msk.f32.mxu0 %vm225_vm1, %v13672_v33  ;;  %v13692_v41 = vld [vmem:[#allocation2 + $0x6a] sm:$0xff] }
  0x6f   : > { %12365 = vmatprep.mubr.msk.f32.mxu1 %vm225_vm1, %v13403_v43  ;;  %v13708_v43 = vld [vmem:[#allocation2 + $0x92] sm:$0xff] }
  0x71   : > { %12316 = vmatmul.mubr.msk.f32.gmra.mxu0 %vm225_vm1, %v13680_v17 }
  0x72   : > { %12366 = vmatmul.mubr.msk.f32.gmra.mxu1 %vm225_vm1, %v13415_v45  ;;  %12318 = vmatprep.mubr.msk.f32.mxu0 %vm225_vm1, %v13684_v37  ;;  %v13704_v45 = vld [vmem:[#allocation2 + $0x82] sm:$0xff] }
  0x73   : > { %12368 = vmatprep.mubr.msk.f32.mxu1 %vm225_vm1, %v13419_v47  ;;  %v13720_v47 = vld [vmem:[#allocation2 + $0xaa] sm:$0xff] }
  0x75   : > { %12319 = vmatmul.mubr.msk.f32.gmra.mxu0 %vm225_vm1, %v13692_v41 }
  0x76   : > { %12369 = vmatmul.mubr.msk.f32.gmra.mxu1 %vm225_vm1, %v13423_v49  ;;  %12321 = vmatprep.mubr.msk.f32.mxu0 %vm225_vm1, %v13696_v39  ;;  %v13716_v49 = vld [vmem:[#allocation2 + $0x9a] sm:$0xff] }
  0x77   : > { %12371 = vmatprep.mubr.msk.f32.mxu1 %vm225_vm1, %v13448_v59  ;;  %v13732_v59 = vld [vmem:[#allocation2 + $0xc2] sm:$0xff] }
  0x79   : > { %12322 = vmatmul.mubr.msk.f32.gmra.mxu0 %vm225_vm1, %v13704_v45 }
  0x7a   : > { %12372 = vmatmul.mubr.msk.f32.gmra.mxu1 %vm225_vm1, %v13467_v63  ;;  %12324 = vmatprep.mubr.msk.f32.mxu0 %vm225_vm1, %v13708_v43  ;;  %v13728_v63 = vld [vmem:[#allocation2 + $0xb2] sm:$0xff] }
  0x7b   : > { %12374 = vmatprep.mubr.msk.f32.mxu1 %vm225_vm1, %v13471_v1  ;;  %v13744_v1 = vld [vmem:[#allocation2 + $0xda] sm:$0xff] }
  0x7d   : > { %12325 = vmatmul.mubr.msk.f32.gmra.mxu0 %vm225_vm1, %v13716_v49 }
  0x7e   : > { %12375 = vmatmul.mubr.msk.f32.gmra.mxu1 %vm225_vm1, %v13483_v4  ;;  %12327 = vmatprep.mubr.msk.f32.mxu0 %vm225_vm1, %v13720_v47  ;;  %v13740_v4 = vld [vmem:[#allocation2 + $0xca] sm:$0xff] }
  0x7f   : > { %12377 = vmatprep.mubr.msk.f32.mxu1 %vm225_vm1, %v13487_v6  ;;  %v13756_v6 = vld [vmem:[#allocation2 + $0xf2] sm:$0xff] }
  0x81   : > { %12328 = vmatmul.mubr.msk.f32.gmra.mxu0 %vm225_vm1, %v13728_v63 }
  0x82   : > { %12378 = vmatmul.mubr.msk.f32.gmra.mxu1 %vm225_vm1, %v13499_v8  ;;  %12330 = vmatprep.mubr.msk.f32.mxu0 %vm225_vm1, %v13732_v59  ;;  %v13752_v8 = vld [vmem:[#allocation2 + $0xe2] sm:$0xff] }
  0x83   : > { %12380 = vmatprep.mubr.msk.f32.mxu1 %vm225_vm1, %v13503_v10  ;;  %v13768_v10 = vld [vmem:[#allocation2 + $0x10a] sm:$0xff] }
  0x85   : > { %12331 = vmatmul.mubr.msk.f32.gmra.mxu0 %vm225_vm1, %v13740_v4 }
  0x86   : > { %12381 = vmatmul.mubr.msk.f32.gmra.mxu1 %vm225_vm1, %v13515_v13  ;;  %12333 = vmatprep.mubr.msk.f32.mxu0 %vm225_vm1, %v13744_v1  ;;  %v13764_v13 = vld [vmem:[#allocation2 + $0xfa] sm:$0xff] }
  0x87   : > { %12383 = vmatprep.mubr.msk.f32.mxu1 %vm225_vm1, %v13519_v15  ;;  %v13780_v15 = vld [vmem:[#allocation2 + $0x122] sm:$0xff] }
  0x89   : > { %12334 = vmatmul.mubr.msk.f32.gmra.mxu0 %vm225_vm1, %v13752_v8 }
  0x8a   : > { %12384 = vmatmul.mubr.msk.f32.gmra.mxu1 %vm225_vm1, %v13538_v20  ;;  %12336 = vmatprep.mubr.msk.f32.mxu0 %vm225_vm1, %v13756_v6  ;;  %v13776_v20 = vld [vmem:[#allocation2 + $0x112] sm:$0xff] }
  0x8b   : > { %12386 = vmatprep.mubr.msk.f32.mxu1 %vm225_vm1, %v13544_v22  ;;  %v13792_v22 = vld [vmem:[#allocation2 + $0x13a] sm:$0xff] }
  0x8d   : > { %12337 = vmatmul.mubr.msk.f32.gmra.mxu0 %vm225_vm1, %v13764_v13 }
  0x8e   : > { %12387 = vmatmul.mubr.msk.f32.gmra.mxu1 %vm225_vm1, %v13558_v24  ;;  %12339 = vmatprep.mubr.msk.f32.mxu0 %vm225_vm1, %v13768_v10  ;;  %v13788_v24 = vld [vmem:[#allocation2 + $0x12a] sm:$0xff] }
  0x8f   : > { %12389 = vmatprep.mubr.msk.f32.mxu1 %vm225_vm1, %v13562_v26  ;;  %v13804_v26 = vld [vmem:[#allocation2 + $0x152] sm:$0xff] }
  0x91   : > { %12340 = vmatmul.mubr.msk.f32.gmra.mxu0 %vm225_vm1, %v13776_v20 }
  0x92   : > { %12390 = vmatmul.mubr.msk.f32.gmra.mxu1 %vm225_vm1, %v13574_v28  ;;  %12342 = vmatprep.mubr.msk.f32.mxu0 %vm225_vm1, %v13780_v15  ;;  %v13800_v28 = vld [vmem:[#allocation2 + $0x142] sm:$0xff] }
  0x93   : > { %12392 = vmatprep.mubr.msk.f32.mxu1 %vm225_vm1, %v13578_v50  ;;  %v13816_v50 = vld [vmem:[#allocation2 + $0x16a] sm:$0xff] }
  0x95   : > { %12343 = vmatmul.mubr.msk.f32.gmra.mxu0 %vm225_vm1, %v13788_v24 }
  0x96   : > { %12393 = vmatmul.mubr.msk.f32.gmra.mxu1 %vm225_vm1, %v13590_v53  ;;  %12345 = vmatprep.mubr.msk.f32.mxu0 %vm225_vm1, %v13792_v22  ;;  %v13812_v53 = vld [vmem:[#allocation2 + $0x15a] sm:$0xff] }
  0x97   : > { %12395 = vmatprep.mubr.msk.f32.mxu1 %vm225_vm1, %v13594_v55  ;;  %v13830_v55 = vld [vmem:[#allocation2 + $0x188] sm:$0xff] }
  0x99   : > { %12346 = vmatmul.mubr.msk.f32.gmra.mxu0 %vm225_vm1, %v13800_v28 }
  0x9a   : > { %12396 = vmatmul.mubr.msk.f32.gmra.mxu1 %vm225_vm1, %v13606_v57  ;;  %12348 = vmatprep.mubr.msk.f32.mxu0 %vm225_vm1, %v13804_v26  ;;  %v13826_v57 = vld [vmem:[#allocation2 + $0x172] sm:$0xff] }
  0x9b   : > { %12398 = vmatprep.mubr.msk.f32.mxu1 %vm225_vm1, %v13610_v60 }
  0x9d   : > { %12349 = vmatmul.mubr.msk.f32.gmra.mxu0 %vm225_vm1, %v13812_v53 }
  0x9e   : > { %12399 = vmatmul.mubr.msk.f32.gmra.mxu1 %vm225_vm1, %v13622_v16  ;;  %12351 = vmatprep.mubr.msk.f32.mxu0 %vm225_vm1, %v13816_v50 }
  0x9f   : > { %12401 = vmatprep.mubr.msk.f32.mxu1 %vm225_vm1, %v13818_v35  ;;  %v13847_v35 = vld [vmem:[%s18934_s1 + $0x20] sm:$0xf] }
  0xa1   : > { %12352 = vmatmul.mubr.msk.f32.gmra.mxu0 %vm225_vm1, %v13826_v57 }
  0xa2   : > { %12402 = vmatmul.mubr.msk.f32.gmra.mxu1 %vm225_vm1, %v13830_v55  ;;  %12406 = vmatprep.mubr.msk.f32.mxu0 %vm225_vm1, %v13354_v30  ;;  %v19050_v30 = vld [vmem:[#allocation31_spill] sm:$0xff] }
  0xa3   : > { %12456 = vmatprep.mubr.msk.f32.mxu1 %vm225_vm1, %v13631_v58 }
  0xa5   : > { %12407 = vmatmul.mubr.msk.f32.vlgmr.msra.gmra.mxu0 %vm225_vm1, %v13358_v32  ;;  %v13963_v32 = vld [vmem:[#allocation2 + $0x181] sm:$0xff] }
  0xa6   : > { %12457 = vmatmul.mubr.msk.f32.vlgmr.msra.gmra.mxu1 %vm225_vm1, %v13650_v3  ;;  %12505 = vmatpush3.msk.msra.mxu0 %vm584_vm0, %v13639_v61  ;;  %v19054_v61 = vld [vmem:[#allocation7_spill] sm:$0xff]  ;;  %v19055_v3 = vld [vmem:[#allocation8_spill] sm:$0xff] }
  0xa7   : > { %12409 = vmatprep.mubr.msk.f32.mxu0 %vm225_vm1, %v13369_v34  ;;  %12459 = vmatprep.mubr.msk.f32.mxu1 %vm225_vm1, %v13654_v31 }
  0xa8   : > { %12555 = vmatpush3.msk.msra.mxu1 %vm584_vm0, %v13644_v18  ;;  %12604 = vmatprep.subr.msk.mxu0 %vm584_vm0, %v13847_v35 }
  0xa9   : > { %12410 = vmatmul.mubr.msk.f32.gmra.mxu0 %vm225_vm1, %v13381_v36 }
  0xaa   : > { %12460 = vmatmul.mubr.msk.f32.gmra.mxu1 %vm225_vm1, %v13668_v11  ;;  %12412 = vmatprep.mubr.msk.f32.mxu0 %vm225_vm1, %v13385_v38 }
  0xab   : > { %12462 = vmatprep.mubr.msk.f32.mxu1 %vm225_vm1, %v13672_v33 }
  0xad   : > { %12413 = vmatmul.mubr.msk.f32.gmra.mxu0 %vm225_vm1, %v13397_v40 }
  0xae   : > { %12463 = vmatmul.mubr.msk.f32.gmra.mxu1 %vm225_vm1, %v13680_v17  ;;  %12415 = vmatprep.mubr.msk.f32.mxu0 %vm225_vm1, %v13401_v42 }
  0xaf   : > { %12465 = vmatprep.mubr.msk.f32.mxu1 %vm225_vm1, %v13684_v37 }
  0xb1   : > { %12416 = vmatmul.mubr.msk.f32.gmra.mxu0 %vm225_vm1, %v13413_v44 }
  0xb2   : > { %12466 = vmatmul.mubr.msk.f32.gmra.mxu1 %vm225_vm1, %v13692_v41  ;;  %12418 = vmatprep.mubr.msk.f32.mxu0 %vm225_vm1, %v13417_v46 }
  0xb3   : > { %12468 = vmatprep.mubr.msk.f32.mxu1 %vm225_vm1, %v13696_v39 }
  0xb5   : > { %12419 = vmatmul.mubr.msk.f32.gmra.mxu0 %vm225_vm1, %v13421_v48 }
  0xb6   : > { %12469 = vmatmul.mubr.msk.f32.gmra.mxu1 %vm225_vm1, %v13704_v45  ;;  %12421 = vmatprep.mubr.msk.f32.mxu0 %vm225_vm1, %v13431_v52 }
  0xb7   : > { %12471 = vmatprep.mubr.msk.f32.mxu1 %vm225_vm1, %v13708_v43 }
  0xb9   : > { %12422 = vmatmul.mubr.msk.f32.gmra.mxu0 %vm225_vm1, %v13465_v62 }
  0xba   : > { %12472 = vmatmul.mubr.msk.f32.gmra.mxu1 %vm225_vm1, %v13716_v49  ;;  %12424 = vmatprep.mubr.msk.f32.mxu0 %vm225_vm1, %v13469_v0 }
  0xbb   : > { %12474 = vmatprep.mubr.msk.f32.mxu1 %vm225_vm1, %v13720_v47 }
  0xbd   : > { %12425 = vmatmul.mubr.msk.f32.gmra.mxu0 %vm225_vm1, %v13481_v2 }
  0xbe   : > { %12475 = vmatmul.mubr.msk.f32.gmra.mxu1 %vm225_vm1, %v13728_v63  ;;  %12427 = vmatprep.mubr.msk.f32.mxu0 %vm225_vm1, %v13485_v5 }
  0xbf   : > { %12477 = vmatprep.mubr.msk.f32.mxu1 %vm225_vm1, %v13732_v59 }
  0xc1   : > { %12428 = vmatmul.mubr.msk.f32.gmra.mxu0 %vm225_vm1, %v13497_v7 }
  0xc2   : > { %12478 = vmatmul.mubr.msk.f32.gmra.mxu1 %vm225_vm1, %v13740_v4  ;;  %12430 = vmatprep.mubr.msk.f32.mxu0 %vm225_vm1, %v13501_v9 }
  0xc3   : > { %12480 = vmatprep.mubr.msk.f32.mxu1 %vm225_vm1, %v13744_v1 }
  0xc5   : > { %12431 = vmatmul.mubr.msk.f32.gmra.mxu0 %vm225_vm1, %v13513_v12 }
  0xc6   : > { %12481 = vmatmul.mubr.msk.f32.gmra.mxu1 %vm225_vm1, %v13752_v8  ;;  %12433 = vmatprep.mubr.msk.f32.mxu0 %vm225_vm1, %v13517_v14 }
  0xc7   : > { %12483 = vmatprep.mubr.msk.f32.mxu1 %vm225_vm1, %v13756_v6 }
  0xc9   : > { %12434 = vmatmul.mubr.msk.f32.gmra.mxu0 %vm225_vm1, %v13536_v19 }
  0xca   : > { %12484 = vmatmul.mubr.msk.f32.gmra.mxu1 %vm225_vm1, %v13764_v13  ;;  %12436 = vmatprep.mubr.msk.f32.mxu0 %vm225_vm1, %v13542_v21  ;;  %v19051_v13 = vld [vmem:[#allocation32_spill] sm:$0xff] }
  0xcb   : > { %12486 = vmatprep.mubr.msk.f32.mxu1 %vm225_vm1, %v13768_v10  ;;  %v13965_v10 = vld [vmem:[#allocation2 + $0x182] sm:$0xff] }
  0xcd   : > { %12437 = vmatmul.mubr.msk.f32.gmra.mxu0 %vm225_vm1, %v13556_v23 }
  0xce   : > { %12487 = vmatmul.mubr.msk.f32.gmra.mxu1 %vm225_vm1, %v13776_v20  ;;  %12439 = vmatprep.mubr.msk.f32.mxu0 %vm225_vm1, %v13560_v25  ;;  %v13977_v20 = vld [vmem:[#allocation2 + $0x18a] sm:$0xff] }
  0xcf   : > { %12489 = vmatprep.mubr.msk.f32.mxu1 %vm225_vm1, %v13780_v15  ;;  %v13973_v15 = vld [vmem:[#allocation2 + $0x189] sm:$0xff] }
  0xd1   : > { %12440 = vmatmul.mubr.msk.f32.gmra.mxu0 %vm225_vm1, %v13572_v27 }
  0xd2   : > { %12490 = vmatmul.mubr.msk.f32.gmra.mxu1 %vm225_vm1, %v13788_v24  ;;  %12442 = vmatprep.mubr.msk.f32.mxu0 %vm225_vm1, %v13576_v29 }
  0xd3   : > { %12492 = vmatprep.mubr.msk.f32.mxu1 %vm225_vm1, %v13792_v22  ;;  %v19052_v22 = vld [vmem:[#allocation5_spill] sm:$0xff] }
  0xd5   : > { %12443 = vmatmul.mubr.msk.f32.gmra.mxu0 %vm225_vm1, %v13588_v51 }
  0xd6   : > { %12493 = vmatmul.mubr.msk.f32.gmra.mxu1 %vm225_vm1, %v13800_v28  ;;  %12445 = vmatprep.mubr.msk.f32.mxu0 %vm225_vm1, %v13592_v54 }
  0xd7   : > { %12495 = vmatprep.mubr.msk.f32.mxu1 %vm225_vm1, %v13804_v26  ;;  %v12208_v24 = vpop.f32.mrf.mxu0  ;;  %v12258_v26 = vpop.f32.mrf.mxu1 }
  0xd8   : > { %v13987_v28 = vadd.f32 %v12258_v26, %v12208_v24 }
  0xd9   : > { %12446 = vmatmul.mubr.msk.f32.gmra.mxu0 %vm225_vm1, %v13604_v56 }
  0xda   : > { %12496 = vmatmul.mubr.msk.f32.gmra.mxu1 %vm225_vm1, %v13812_v53  ;;  %12448 = vmatprep.mubr.msk.f32.mxu0 %vm225_vm1, %v19050_v30  ;;  %v978_v53 = vpop.f32.mrf.mxu1 }
  0xdb   : > { %12498 = vmatprep.mubr.msk.f32.mxu1 %vm225_vm1, %v13816_v50  ;;  %v654_v50 = vpop.f32.mrf.mxu0 }
  0xdc   : > { %v13993_v58 = vadd.f32 %v978_v53, %v654_v50  ;;  %v19057_v53 = vld [vmem:[#allocation10_spill] sm:$0xff] }
  0xdd   : > { %12449 = vmatmul.mubr.msk.f32.gmra.mxu0 %vm225_vm1, %v19051_v13 }
  0xde   : > { %12499 = vmatmul.mubr.msk.f32.gmra.mxu1 %vm225_vm1, %v13826_v57  ;;  %12451 = vmatprep.mubr.msk.f32.mxu0 %vm225_vm1, %v13963_v32  ;;  %v19053_v57 = vld [vmem:[#allocation6_spill] sm:$0xff] }
  0xdf   : > { %12501 = vmatprep.mubr.msk.f32.mxu1 %vm225_vm1, %v13965_v10 }
  0xe1   : > { %12452 = vmatmul.mubr.msk.f32.gmra.mxu0 %vm225_vm1, %v13973_v15 }
  0xe2   : > { %12502 = vmatmul.mubr.msk.f32.gmra.mxu1 %vm225_vm1, %v13977_v20  ;;  %12506 = vmatprep.mubr.msk.f32.mxu0 %vm225_vm1, %v19052_v22  ;;  %v19056_v22 = vld [vmem:[#allocation9_spill] sm:$0xff] }
  0xe3   : > { %12556 = vmatprep.mubr.msk.f32.mxu1 %vm225_vm1, %v13369_v34 }
  0xe5   : > { %12507 = vmatmul.mubr.msk.f32.vlgmr.msra.gmra.mxu0 %vm225_vm1, %v19053_v57  ;;  %v19058_v57 = vld [vmem:[#allocation11_spill] sm:$0xff] }
  0xe6   : > { %12557 = vmatmul.mubr.msk.f32.vlgmr.msra.gmra.mxu1 %vm225_vm1, %v13381_v36  ;;  %12605 = vmatpush3.msk.msra.mxu0 %vm584_vm0, %v13847_v35 }
  0xe7   : > { %12509 = vmatprep.mubr.msk.f32.mxu0 %vm225_vm1, %v19054_v61  ;;  %12559 = vmatprep.mubr.msk.f32.mxu1 %vm225_vm1, %v13385_v38 }
  0xe9   : > { %v12211_v34 = vpop.f32.mrf.mxu0  ;;  %12510 = vmatmul.mubr.msk.f32.gmra.mxu0 %vm225_vm1, %v19055_v3 }
  0xea   : > { %v12261_v18 = vpop.f32.mrf.mxu1  ;;  %12560 = vmatmul.mubr.msk.f32.gmra.mxu1 %vm225_vm1, %v13397_v40  ;;  %12512 = vmatprep.mubr.msk.f32.mxu0 %vm225_vm1, %v19056_v22  ;;  %v19059_v22 = vld [vmem:[#allocation12_spill] sm:$0xff] }
  0xeb   : > { %v14005_v36 = vadd.f32 %v12261_v18, %v12211_v34  ;;  %12562 = vmatprep.mubr.msk.f32.mxu1 %vm225_vm1, %v13401_v42  ;;  %v664_v35 = vpop.f32.mrf.mxu0 }
  0xec   : > { %v988_v24 = vpop.f32.mrf.mxu1 }
  0xed   : > { %v14011_v26 = vadd.f32 %v988_v24, %v664_v35  ;;  %v12214_v38 = vpop.f32.mrf.mxu0  ;;  %12513 = vmatmul.mubr.msk.f32.gmra.mxu0 %vm225_vm1, %v19057_v53  ;;  %v19060_v35 = vld [vmem:[#allocation13_spill] sm:$0xff] }
  0xee   : > { %v12264_v50 = vpop.f32.mrf.mxu1  ;;  %12563 = vmatmul.mubr.msk.f32.gmra.mxu1 %vm225_vm1, %v13413_v44  ;;  %12515 = vmatprep.mubr.msk.f32.mxu0 %vm225_vm1, %v19058_v57  ;;  %v19061_v57 = vld [vmem:[#allocation14_spill] sm:$0xff] }
  0xef   : > { %v14017_v40 = vadd.f32 %v12264_v50, %v12214_v38  ;;  %12565 = vmatprep.mubr.msk.f32.mxu1 %vm225_vm1, %v13417_v46  ;;  %v674_v42 = vpop.f32.mrf.mxu0 }
  0xf0   : > { %v998_v61 = vpop.f32.mrf.mxu1 }
  0xf1   : > { %v14023_v34 = vadd.f32 %v998_v61, %v674_v42  ;;  %v12217_v18 = vpop.f32.mrf.mxu0  ;;  %12516 = vmatmul.mubr.msk.f32.gmra.mxu0 %vm225_vm1, %v19059_v22  ;;  %v19062_v42 = vld [vmem:[#allocation15_spill] sm:$0xff] }
  0xf2   : > { %v12267_v3 = vpop.f32.mrf.mxu1  ;;  %12566 = vmatmul.mubr.msk.f32.gmra.mxu1 %vm225_vm1, %v13421_v48  ;;  %12518 = vmatprep.mubr.msk.f32.mxu0 %vm225_vm1, %v19060_v35  ;;  %v19063_v35 = vld [vmem:[#allocation16_spill] sm:$0xff] }
  0xf3   : > { %v14029_v44 = vadd.f32 %v12267_v3, %v12217_v18  ;;  %12568 = vmatprep.mubr.msk.f32.mxu1 %vm225_vm1, %v13431_v52  ;;  %v684_v46 = vpop.f32.mrf.mxu0 }
  0xf4   : > { %v1008_v24 = vpop.f32.mrf.mxu1 }
  0xf5   : > { %v14035_v38 = vadd.f32 %v1008_v24, %v684_v46  ;;  %v12220_v50 = vpop.f32.mrf.mxu0  ;;  %12519 = vmatmul.mubr.msk.f32.gmra.mxu0 %vm225_vm1, %v19061_v57  ;;  %v19064_v46 = vld [vmem:[#allocation17_spill] sm:$0xff] }
  0xf6   : > { %v12270_v53 = vpop.f32.mrf.mxu1  ;;  %12569 = vmatmul.mubr.msk.f32.gmra.mxu1 %vm225_vm1, %v13465_v62  ;;  %12521 = vmatprep.mubr.msk.f32.mxu0 %vm225_vm1, %v19062_v42  ;;  %v19065_v42 = vld [vmem:[#allocation18_spill] sm:$0xff] }
  0xf7   : > { %v14041_v48 = vadd.f32 %v12270_v53, %v12220_v50  ;;  %12571 = vmatprep.mubr.msk.f32.mxu1 %vm225_vm1, %v13469_v0  ;;  %v694_v52 = vpop.f32.mrf.mxu0 }
  0xf8   : > { %v1018_v61 = vpop.f32.mrf.mxu1 }
  0xf9   : > { %v14047_v18 = vadd.f32 %v1018_v61, %v694_v52  ;;  %v12223_v3 = vpop.f32.mrf.mxu0  ;;  %12522 = vmatmul.mubr.msk.f32.gmra.mxu0 %vm225_vm1, %v19063_v35  ;;  %v19066_v52 = vld [vmem:[#allocation19_spill] sm:$0xff] }
  0xfa   : > { %v12273_v22 = vpop.f32.mrf.mxu1  ;;  %12572 = vmatmul.mubr.msk.f32.gmra.mxu1 %vm225_vm1, %v13481_v2  ;;  %12524 = vmatprep.mubr.msk.f32.mxu0 %vm225_vm1, %v19064_v46  ;;  %v19067_v46 = vld [vmem:[#allocation20_spill] sm:$0xff] }
  0xfb   : > { %v14053_v62 = vadd.f32 %v12273_v22, %v12223_v3  ;;  %12574 = vmatprep.mubr.msk.f32.mxu1 %vm225_vm1, %v13485_v5  ;;  %v704_v0 = vpop.f32.mrf.mxu0 }
  0xfc   : > { %v1028_v24 = vpop.f32.mrf.mxu1 }
  0xfd   : > { %v14059_v50 = vadd.f32 %v1028_v24, %v704_v0  ;;  %v12226_v53 = vpop.f32.mrf.mxu0  ;;  %12525 = vmatmul.mubr.msk.f32.gmra.mxu0 %vm225_vm1, %v19065_v42  ;;  %v19068_v0 = vld [vmem:[#allocation21_spill] sm:$0xff] }
  0xfe   : > { %v12276_v57 = vpop.f32.mrf.mxu1  ;;  %12575 = vmatmul.mubr.msk.f32.gmra.mxu1 %vm225_vm1, %v13497_v7  ;;  %12527 = vmatprep.mubr.msk.f32.mxu0 %vm225_vm1, %v19066_v52  ;;  %v19069_v52 = vld [vmem:[#allocation22_spill] sm:$0xff] }
  0xff   : > { %v14065_v2 = vadd.f32 %v12276_v57, %v12226_v53  ;;  %12577 = vmatprep.mubr.msk.f32.mxu1 %vm225_vm1, %v13501_v9  ;;  %v714_v5 = vpop.f32.mrf.mxu0 }
 0x100   : > { %v1038_v61 = vpop.f32.mrf.mxu1 }
 0x101   : > { %v14071_v3 = vadd.f32 %v1038_v61, %v714_v5  ;;  %v12229_v22 = vpop.f32.mrf.mxu0  ;;  %12528 = vmatmul.mubr.msk.f32.gmra.mxu0 %vm225_vm1, %v19067_v46  ;;  %v19070_v5 = vld [vmem:[#allocation23_spill] sm:$0xff]  ;;  %v19071_v46 = vld [vmem:[#allocation24_spill] sm:$0xff] }
 0x102   : > { %v12279_v35 = vpop.f32.mrf.mxu1  ;;  %12578 = vmatmul.mubr.msk.f32.gmra.mxu1 %vm225_vm1, %v13513_v12  ;;  %12530 = vmatprep.mubr.msk.f32.mxu0 %vm225_vm1, %v19068_v0  ;;  %v19072_v0 = vld [vmem:[#allocation25_spill] sm:$0xff] }
 0x103   : > { %v14077_v7 = vadd.f32 %v12279_v35, %v12229_v22  ;;  %12580 = vmatprep.mubr.msk.f32.mxu1 %vm225_vm1, %v13517_v14  ;;  %v724_v9 = vpop.f32.mrf.mxu0 }
 0x104   : > { %v1048_v24 = vpop.f32.mrf.mxu1 }
 0x105   : > { %v14083_v53 = vadd.f32 %v1048_v24, %v724_v9  ;;  %v12232_v57 = vpop.f32.mrf.mxu0  ;;  %12531 = vmatmul.mubr.msk.f32.gmra.mxu0 %vm225_vm1, %v19069_v52  ;;  %v19074_v52 = vld [vmem:[#allocation27_spill] sm:$0xff] }
 0x106   : > { %v12282_v42 = vpop.f32.mrf.mxu1  ;;  %12581 = vmatmul.mubr.msk.f32.gmra.mxu1 %vm225_vm1, %v13536_v19  ;;  %12533 = vmatprep.mubr.msk.f32.mxu0 %vm225_vm1, %v19070_v5 }
 0x107   : > { %v14089_v12 = vadd.f32 %v12282_v42, %v12232_v57  ;;  %12583 = vmatprep.mubr.msk.f32.mxu1 %vm225_vm1, %v13542_v21  ;;  %v14095_v14 = vpop.f32.mrf.mxu0  ;;  %v19073_v42 = vld [vmem:[#allocation26_spill] sm:$0xff] }
 0x108   : > { %v14097_v61 = vpop.f32.mrf.mxu1 }
 0x109   : > { %v12235_v22 = vpop.f32.mrf.mxu0  ;;  %12534 = vmatmul.mubr.msk.f32.gmra.mxu0 %vm225_vm1, %v19071_v46  ;;  %v19075_v46 = vld [vmem:[#allocation28_spill] sm:$0xff] }
 0x10a   : > { %v12285_v35 = vpop.f32.mrf.mxu1  ;;  %12584 = vmatmul.mubr.msk.f32.gmra.mxu1 %vm225_vm1, %v13556_v23  ;;  %12536 = vmatprep.mubr.msk.f32.mxu0 %vm225_vm1, %v19072_v0  ;;  %v19076_v0 = vld [vmem:[#allocation29_spill] sm:$0xff] }
 0x10b   : > { %v14103_v19 = vadd.f32 %v12285_v35, %v12235_v22  ;;  %12586 = vmatprep.mubr.msk.f32.mxu1 %vm225_vm1, %v13560_v25  ;;  %v14109_v21 = vpop.f32.mrf.mxu0 }
 0x10c   : > { %v14111_v9 = vpop.f32.mrf.mxu1 }
 0x10d   : > { %v12238_v24 = vpop.f32.mrf.mxu0  ;;  %12537 = vmatmul.mubr.msk.f32.gmra.mxu0 %vm225_vm1, %v19073_v42 }
 0x10e   : > { %v12288_v57 = vpop.f32.mrf.mxu1  ;;  %12587 = vmatmul.mubr.msk.f32.gmra.mxu1 %vm225_vm1, %v13572_v27  ;;  %12539 = vmatprep.mubr.msk.f32.mxu0 %vm225_vm1, %v19074_v52  ;;  %v19077_v52 = vld [vmem:[#allocation30_spill] sm:$0xff] }
 0x10f   : > { %v14117_v23 = vadd.f32 %v12288_v57, %v12238_v24  ;;  %12589 = vmatprep.mubr.msk.f32.mxu1 %vm225_vm1, %v13576_v29  ;;  %v14123_v25 = vpop.f32.mrf.mxu0 }
 0x110   : > { %v14125_v5 = vpop.f32.mrf.mxu1 }
 0x111   : > { %v12241_v22 = vpop.f32.mrf.mxu0  ;;  %12540 = vmatmul.mubr.msk.f32.gmra.mxu0 %vm225_vm1, %v19075_v46 }
 0x112   : > { %v12291_v35 = vpop.f32.mrf.mxu1  ;;  %12590 = vmatmul.mubr.msk.f32.gmra.mxu1 %vm225_vm1, %v13588_v51  ;;  %12542 = vmatprep.mubr.msk.f32.mxu0 %vm225_vm1, %v19076_v0  ;;  %v19079_v0 = vld [vmem:[#allocation33_spill] sm:$0xff] }
 0x113   : > { %v14131_v27 = vadd.f32 %v12291_v35, %v12241_v22  ;;  %12592 = vmatprep.mubr.msk.f32.mxu1 %vm225_vm1, %v13592_v54  ;;  %v14137_v29 = vpop.f32.mrf.mxu0 }
 0x114   : > { %v14139_v24 = vpop.f32.mrf.mxu1 }
 0x115   : > { %v12244_v57 = vpop.f32.mrf.mxu0  ;;  %12543 = vmatmul.mubr.msk.f32.gmra.mxu0 %vm225_vm1, %v19077_v52 }
 0x116   : > { %v12294_v42 = vpop.f32.mrf.mxu1  ;;  %12593 = vmatmul.mubr.msk.f32.gmra.mxu1 %vm225_vm1, %v13604_v56  ;;  %12545 = vmatprep.mubr.msk.f32.mxu0 %vm225_vm1, %v13610_v60 }
 0x117   : > { %v14145_v51 = vadd.f32 %v12294_v42, %v12244_v57  ;;  %12595 = vmatprep.mubr.msk.f32.mxu1 %vm225_vm1, %v19050_v30  ;;  %v14151_v54 = vpop.f32.mrf.mxu0  ;;  %v2724_v57 = vld [vmem:[#allocation2 + $0x198] sm:$0xff] }
 0x118   : > { %v14153_v22 = vpop.f32.mrf.mxu1  ;;  %v3113_v42 = vld [vmem:[#allocation2 + $0x199] sm:$0xff] }
 0x119   : > { %19078 = vst [vmem:[#allocation31_spill] sm:$0xff] %v14153_v22  ;;  %v12247_v35 = vpop.f32.mrf.mxu0  ;;  %12546 = vmatmul.mubr.msk.f32.gmra.mxu0 %vm225_vm1, %v13622_v16 }
 0x11a   : > { %v12297_v46 = vpop.f32.mrf.mxu1  ;;  %12596 = vmatmul.mubr.msk.f32.gmra.mxu1 %vm225_vm1, %v19051_v13  ;;  %12548 = vmatprep.mubr.msk.f32.mxu0 %vm225_vm1, %v19079_v0  ;;  %v2725_v13 = vld [vmem:[#allocation2 + $0x1a0] sm:$0xff] }
 0x11b   : > { %v14159_v56 = vadd.f32 %v12297_v46, %v12247_v35  ;;  %12598 = vmatprep.mubr.msk.f32.mxu1 %vm225_vm1, %v13963_v32  ;;  %v14165_v60 = vpop.f32.mrf.mxu0  ;;  %v3114_v32 = vld [vmem:[#allocation2 + $0x1a1] sm:$0xff] }
 0x11c   : > { %v14167_v30 = vpop.f32.mrf.mxu1 }
 0x11d   : > { %19080 = vst [vmem:[#allocation32_spill] sm:$0xff] %v14167_v30  ;;  %v12250_v52 = vpop.f32.mrf.mxu0  ;;  %12549 = vmatmul.mubr.msk.f32.gmra.mxu0 %vm225_vm1, %v13830_v55 }
 0x11e   : > { %v12300_v22 = vpop.f32.mrf.mxu1  ;;  %12599 = vmatmul.mubr.msk.f32.gmra.mxu1 %vm225_vm1, %v13973_v15  ;;  %12551 = vmatprep.mubr.msk.f32.mxu0 %vm225_vm1, %v2724_v57 }
 0x11f   : > { %v14173_v16 = vadd.f32 %v12300_v22, %v12250_v52  ;;  %12601 = vmatprep.mubr.msk.f32.mxu1 %vm225_vm1, %v3113_v42  ;;  %v14177_v35 = vpop.f32.mrf.mxu0 }
 0x120   : > { %v14179_v46 = vpop.f32.mrf.mxu1 }
 0x121   : > { %v12253_v0 = vpop.f32.mrf.mxu0  ;;  %12552 = vmatmul.mubr.msk.f32.gmra.mxu0 %vm225_vm1, %v2725_v13 }
 0x122   : > { %v12303_v30 = vpop.f32.mrf.mxu1  ;;  %12602 = vmatmul.mubr.msk.f32.gmra.mxu1 %vm225_vm1, %v3114_v32  ;;  %12606 = vmatprep.mubr.msk.f32.mxu0 %vm225_vm1, %v13654_v31 }
 0x123   : > { %v14183_v55 = vadd.f32 %v12303_v30, %v12253_v0  ;;  %v14187_v15 = vpop.f32.mrf.mxu0 }
 0x124   : > { %v14189_v22 = vpop.f32.mrf.mxu1 }
 0x125   : > { %19081 = vst [vmem:[#allocation5_spill] sm:$0xff] %v14189_v22  ;;  %v12308_v57 = vpop.f32.mrf.mxu0  ;;  %12607 = vmatmul.mubr.msk.f32.vlgmr.msra.gmra.mxu0 %vm225_vm1, %v13668_v11 }
 0x126   : > { %v12358_v42 = vpop.f32.mrf.mxu1  ;;  %v1495_v52 = vadd.f32 %v12308_v57, %v13987_v28  ;;  %12609 = vmatprep.mubr.msk.f32.mxu0 %vm225_vm1, %v13672_v33 }
 0x127   : > { %v1335_v13 = vpop.f32.mrf.mxu0 }
 0x128   : > { %v14196_v30 = vpop.f32.mrf.mxu1  ;;  %v14199_v32 = vadd.f32 %v1335_v13, %v13993_v58  ;;  %v14201_v31 = vadd.f32 %v12358_v42, %v1495_v52 }
 0x129   : > { %v12311_v0 = vpop.f32.mrf.mxu0  ;;  %12610 = vmatmul.mubr.msk.f32.gmra.mxu0 %vm225_vm1, %v13680_v17 }
 0x12a   : > { %v12361_v22 = vpop.f32.mrf.mxu1  ;;  %v1497_v11 = vadd.f32 %v12311_v0, %v14005_v36  ;;  %12612 = vmatprep.mubr.msk.f32.mxu0 %vm225_vm1, %v13684_v37 }
 0x12b   : > { %v1345_v28 = vpop.f32.mrf.mxu0 }
 0x12c   : > { %v14208_v33 = vpop.f32.mrf.mxu1  ;;  %v14211_v57 = vadd.f32 %v1345_v28, %v14011_v26  ;;  %v14213_v58 = vadd.f32 %v12361_v22, %v1497_v11 }
 0x12d   : > { %v12314_v42 = vpop.f32.mrf.mxu0  ;;  %12613 = vmatmul.mubr.msk.f32.gmra.mxu0 %vm225_vm1, %v13692_v41 }
 0x12e   : > { %v12364_v52 = vpop.f32.mrf.mxu1  ;;  %v1499_v17 = vadd.f32 %v12314_v42, %v14017_v40  ;;  %12615 = vmatprep.mubr.msk.f32.mxu0 %vm225_vm1, %v13696_v39 }
 0x12f   : > { %v1355_v36 = vpop.f32.mrf.mxu0 }
 0x130   : > { %v14220_v37 = vpop.f32.mrf.mxu1  ;;  %v14223_v13 = vadd.f32 %v1355_v36, %v14023_v34  ;;  %v14225_v26 = vadd.f32 %v12364_v52, %v1499_v17 }
 0x131   : > { %v12317_v22 = vpop.f32.mrf.mxu0  ;;  %12616 = vmatmul.mubr.msk.f32.gmra.mxu0 %vm225_vm1, %v13704_v45 }
 0x132   : > { %v12367_v0 = vpop.f32.mrf.mxu1  ;;  %v1501_v41 = vadd.f32 %v12317_v22, %v14029_v44  ;;  %12618 = vmatprep.mubr.msk.f32.mxu0 %vm225_vm1, %v13708_v43 }
 0x133   : > { %v1365_v40 = vpop.f32.mrf.mxu0 }
 0x134   : > { %v14232_v39 = vpop.f32.mrf.mxu1  ;;  %v14235_v11 = vadd.f32 %v1365_v40, %v14035_v38  ;;  %v14237_v34 = vadd.f32 %v12367_v0, %v1501_v41 }
 0x135   : > { %v12320_v28 = vpop.f32.mrf.mxu0  ;;  %12619 = vmatmul.mubr.msk.f32.gmra.mxu0 %vm225_vm1, %v13716_v49 }
 0x136   : > { %v12370_v42 = vpop.f32.mrf.mxu1  ;;  %v1503_v45 = vadd.f32 %v12320_v28, %v14041_v48  ;;  %12621 = vmatprep.mubr.msk.f32.mxu0 %vm225_vm1, %v13720_v47 }
 0x137   : > { %v1375_v44 = vpop.f32.mrf.mxu0 }
 0x138   : > { %v14244_v43 = vpop.f32.mrf.mxu1  ;;  %v14247_v52 = vadd.f32 %v1375_v44, %v14047_v18  ;;  %v14249_v38 = vadd.f32 %v12370_v42, %v1503_v45  ;;  %v3490_v44 = vld [vmem:[#allocation2 + $0x10a] sm:$0xff] }
 0x139   : > { %v12323_v17 = vpop.f32.mrf.mxu0  ;;  %12622 = vmatmul.mubr.msk.f32.gmra.mxu0 %vm225_vm1, %v13728_v63 }
 0x13a   : > { %v12373_v36 = vpop.f32.mrf.mxu1  ;;  %v1505_v49 = vadd.f32 %v12323_v17, %v14053_v62  ;;  %12624 = vmatprep.mubr.msk.f32.mxu0 %vm225_vm1, %v13732_v59 }
 0x13b   : > { %v1385_v48 = vpop.f32.mrf.mxu0 }
 0x13c   : > { %v14256_v47 = vpop.f32.mrf.mxu1  ;;  %v14259_v22 = vadd.f32 %v1385_v48, %v14059_v50  ;;  %v14261_v18 = vadd.f32 %v12373_v36, %v1505_v49 }
 0x13d   : > { %v12326_v0 = vpop.f32.mrf.mxu0  ;;  %12625 = vmatmul.mubr.msk.f32.gmra.mxu0 %vm225_vm1, %v13740_v4 }
 0x13e   : > { %v12376_v41 = vpop.f32.mrf.mxu1  ;;  %v1507_v63 = vadd.f32 %v12326_v0, %v14065_v2  ;;  %12627 = vmatprep.mubr.msk.f32.mxu0 %vm225_vm1, %v13744_v1  ;;  %v3489_v2 = vld [vmem:[#allocation2 + $0xfa] sm:$0xff]  ;;  %v3492_v0 = vld [vmem:[#allocation2 + $0x122] sm:$0xff] }
 0x13f   : > { %v1395_v62 = vpop.f32.mrf.mxu0 }
 0x140   : > { %v14268_v59 = vpop.f32.mrf.mxu1  ;;  %v14271_v40 = vadd.f32 %v1395_v62, %v14071_v3  ;;  %v14273_v50 = vadd.f32 %v12376_v41, %v1507_v63 }
 0x141   : > { %v12329_v28 = vpop.f32.mrf.mxu0  ;;  %12628 = vmatmul.mubr.msk.f32.gmra.mxu0 %vm225_vm1, %v13752_v8 }
 0x142   : > { %v12379_v42 = vpop.f32.mrf.mxu1  ;;  %v1509_v4 = vadd.f32 %v12329_v28, %v14077_v7  ;;  %12630 = vmatprep.mubr.msk.f32.mxu0 %vm225_vm1, %v13756_v6  ;;  %v3491_v7 = vld [vmem:[#allocation2 + $0x112] sm:$0xff]  ;;  %v3493_v28 = vld [vmem:[#allocation2 + $0x12a] sm:$0xff] }
 0x143   : > { %v1405_v1 = vpop.f32.mrf.mxu0 }
 0x144   : > { %v14280_v45 = vpop.f32.mrf.mxu1  ;;  %v14283_v3 = vadd.f32 %v1405_v1, %v14083_v53  ;;  %v14285_v17 = vadd.f32 %v12379_v42, %v1509_v4  ;;  %v3494_v4 = vld [vmem:[#allocation2 + $0x13a] sm:$0xff] }
 0x145   : > { %v12332_v36 = vpop.f32.mrf.mxu0  ;;  %12631 = vmatmul.mubr.msk.f32.gmra.mxu0 %vm225_vm1, %v3489_v2 }
 0x146   : > { %v12382_v8 = vpop.f32.mrf.mxu1  ;;  %v1511_v49 = vadd.f32 %v12332_v36, %v14089_v12  ;;  %12633 = vmatprep.mubr.msk.f32.mxu0 %vm225_vm1, %v3490_v44 }
 0x147   : > { %v14290_v6 = vpop.f32.mrf.mxu0 }
 0x148   : > { %v14292_v48 = vpop.f32.mrf.mxu1  ;;  %v14294_v41 = vadd.f32 %v12382_v8, %v1511_v49  ;;  %v3495_v8 = vld [vmem:[#allocation2 + $0x142] sm:$0xff] }
 0x149   : > { %19082 = vst [vmem:[#allocation6_spill] sm:$0xff] %v14292_v48  ;;  %v12335_v53 = vpop.f32.mrf.mxu0  ;;  %12634 = vmatmul.mubr.msk.f32.gmra.mxu0 %vm225_vm1, %v3491_v7  ;;  %v3496_v7 = vld [vmem:[#allocation2 + $0x152] sm:$0xff] }
 0x14a   : > { %v12385_v63 = vpop.f32.mrf.mxu1  ;;  %v1513_v62 = vadd.f32 %v12335_v53, %v14103_v19  ;;  %12636 = vmatprep.mubr.msk.f32.mxu0 %vm225_vm1, %v3492_v0 }
 0x14b   : > { %v14299_v12 = vpop.f32.mrf.mxu0 }
 0x14c   : > { %v14301_v42 = vpop.f32.mrf.mxu1  ;;  %v14303_v2 = vadd.f32 %v12385_v63, %v1513_v62 }
 0x14d   : > { %19083 = vst [vmem:[#allocation7_spill] sm:$0xff] %v14301_v42  ;;  %v12338_v1 = vpop.f32.mrf.mxu0  ;;  %12637 = vmatmul.mubr.msk.f32.gmra.mxu0 %vm225_vm1, %v3493_v28  ;;  %v3497_v28 = vld [vmem:[#allocation2 + $0x15a] sm:$0xff] }
 0x14e   : > { %v12388_v44 = vpop.f32.mrf.mxu1  ;;  %v1515_v36 = vadd.f32 %v12338_v1, %v14117_v23  ;;  %12639 = vmatprep.mubr.msk.f32.mxu0 %vm225_vm1, %v3494_v4  ;;  %v3498_v1 = vld [vmem:[#allocation2 + $0x16a] sm:$0xff] }
 0x14f   : > { %v14308_v19 = vpop.f32.mrf.mxu0 }
 0x150   : > { %v14310_v49 = vpop.f32.mrf.mxu1  ;;  %v14312_v0 = vadd.f32 %v12388_v44, %v1515_v36 }
 0x151   : > { %19084 = vst [vmem:[#allocation8_spill] sm:$0xff] %v14310_v49  ;;  %v12341_v53 = vpop.f32.mrf.mxu0  ;;  %12640 = vmatmul.mubr.msk.f32.gmra.mxu0 %vm225_vm1, %v3495_v8  ;;  %v3499_v8 = vld [vmem:[#allocation2 + $0x172] sm:$0xff] }
 0x152   : > { %v12391_v63 = vpop.f32.mrf.mxu1  ;;  %v1517_v62 = vadd.f32 %v12341_v53, %v14131_v27  ;;  %12642 = vmatprep.mubr.msk.f32.mxu0 %vm225_vm1, %v3496_v7 }
 0x153   : > { %v14317_v23 = vpop.f32.mrf.mxu0 }
 0x154   : > { %v14319_v4 = vpop.f32.mrf.mxu1  ;;  %v14321_v42 = vadd.f32 %v12391_v63, %v1517_v62 }
 0x155   : > { %19085 = vst [vmem:[#allocation9_spill] sm:$0xff] %v14319_v4  ;;  %v12344_v49 = vpop.f32.mrf.mxu0  ;;  %12643 = vmatmul.mubr.msk.f32.gmra.mxu0 %vm225_vm1, %v3497_v28 }
 0x156   : > { %v12394_v44 = vpop.f32.mrf.mxu1  ;;  %v1519_v36 = vadd.f32 %v12344_v49, %v14145_v51  ;;  %12645 = vmatprep.mubr.msk.f32.mxu0 %vm225_vm1, %v3498_v1  ;;  %v3502_v49 = vld [vmem:[#allocation2 + $0x19a] sm:$0xff] }
 0x157   : > { %v14326_v27 = vpop.f32.mrf.mxu0 }
 0x158   : > { %v14328_v7 = vpop.f32.mrf.mxu1  ;;  %v14330_v53 = vadd.f32 %v12394_v44, %v1519_v36 }
 0x159   : > { %19086 = vst [vmem:[#allocation10_spill] sm:$0xff] %v14328_v7  ;;  %v12347_v48 = vpop.f32.mrf.mxu0  ;;  %12646 = vmatmul.mubr.msk.f32.gmra.mxu0 %vm225_vm1, %v3499_v8 }
 0x15a   : > { %v12397_v63 = vpop.f32.mrf.mxu1  ;;  %v1521_v62 = vadd.f32 %v12347_v48, %v14159_v56  ;;  %12648 = vmatprep.mubr.msk.f32.mxu0 %vm225_vm1, %v13965_v10  ;;  %v3503_v56 = vld [vmem:[#allocation2 + $0x1a2] sm:$0xff] }
 0x15b   : > { %v14336_v28 = vpop.f32.mrf.mxu0 }
 0x15c   : > { %v14338_v51 = vpop.f32.mrf.mxu1  ;;  %v14340_v1 = vadd.f32 %v12397_v63, %v1521_v62 }
 0x15d   : > { %19087 = vst [vmem:[#allocation11_spill] sm:$0xff] %v14338_v51  ;;  %v12350_v4 = vpop.f32.mrf.mxu0  ;;  %12649 = vmatmul.mubr.msk.f32.gmra.mxu0 %vm225_vm1, %v13977_v20 }
 0x15e   : > { %v12400_v44 = vpop.f32.mrf.mxu1  ;;  %v1523_v36 = vadd.f32 %v12350_v4, %v14173_v16  ;;  %12651 = vmatprep.mubr.msk.f32.mxu0 %vm225_vm1, %v3502_v49 }
 0x15f   : > { %v14346_v48 = vpop.f32.mrf.mxu0 }
 0x160   : > { %19088 = vst [vmem:[#allocation12_spill] sm:$0xff] %v14346_v48  ;;  %v14348_v10 = vpop.f32.mrf.mxu1  ;;  %v14350_v8 = vadd.f32 %v12400_v44, %v1523_v36 }
 0x161   : > { %19089 = vst [vmem:[#allocation13_spill] sm:$0xff] %v14348_v10  ;;  %v12353_v51 = vpop.f32.mrf.mxu0  ;;  %12652 = vmatmul.mubr.msk.f32.gmra.mxu0 %vm225_vm1, %v3503_v56 }
 0x162   : > { %v12403_v63 = vpop.f32.mrf.mxu1  ;;  %v1525_v62 = vadd.f32 %v12353_v51, %v14183_v55  ;;  %v13146_v51 = vmov -inf  }
 0x163   : > { %v14354_v7 = vpop.f32.mrf.mxu0  ;;  %268 = vst.msk [vmem:[#allocation3] sm:$0xff] %vm225_vm1, %v13146_v51  ;;  %269 = vst.msk [vmem:[#allocation3 + $0x8] sm:$0xff] %vm225_vm1, %v13146_v51 }
 0x164   : > { %v14356_v20 = vpop.f32.mrf.mxu1  ;;  %v14358_v16 = vadd.f32 %v12403_v63, %v1525_v62  ;;  %272 = vst.msk [vmem:[#allocation3 + $0x18] sm:$0xff] %vm225_vm1, %v13146_v51  ;;  %273 = vst.msk [vmem:[#allocation3 + $0x20] sm:$0xff] %vm225_vm1, %v13146_v51 }
 0x165   : > { %v12408_v4 = vpop.f32.mrf.mxu0  ;;  %283 = vst.msk [vmem:[#allocation3 + $0x30] sm:$0x3] %vm228_vm2, %v13146_v51  ;;  %284 = vst.msk [vmem:[#allocation3 + $0x48] sm:$0x3] %vm228_vm2, %v13146_v51 }
 0x166   : > { %v14360_v49 = vpop.f32.mrf.mxu1  ;;  %v14363_v48 = vadd.f32 %v12408_v4, %v14201_v31  ;;  %285 = vst.msk [vmem:[#allocation3 + $0x60] sm:$0x3] %vm228_vm2, %v13146_v51  ;;  %286 = vst.msk [vmem:[#allocation3 + $0x78] sm:$0x3] %vm228_vm2, %v13146_v51 }
 0x167   : > { %19090 = vst [vmem:[#allocation14_spill] sm:$0xff] %v14360_v49  ;;  %v14365_v44 = vpop.f32.mrf.mxu0  ;;  %276 = vst.msk [vmem:[#allocation3 + $0x1b0] sm:$0xff] %vm225_vm1, %v13146_v51 }
 0x168   : > { %v14367_v36 = vpop.f32.mrf.mxu1  ;;  %277 = vst.msk [vmem:[#allocation3 + $0x1b8] sm:$0xff] %vm225_vm1, %v13146_v51  ;;  %279 = vst.msk [vmem:[#allocation3 + $0x1c8] sm:$0xff] %vm225_vm1, %v13146_v51 }
 0x169   : > { %19091 = vst [vmem:[#allocation15_spill] sm:$0xff] %v14367_v36  ;;  %v12411_v56 = vpop.f32.mrf.mxu0  ;;  %280 = vst.msk [vmem:[#allocation3 + $0x1d0] sm:$0xff] %vm225_vm1, %v13146_v51 }
 0x16a   : > { %v14369_v10 = vpop.f32.mrf.mxu1  ;;  %v14372_v55 = vadd.f32 %v12411_v56, %v14213_v58  ;;  %287 = vst.msk [vmem:[#allocation3 + $0x90] sm:$0x3] %vm228_vm2, %v13146_v51  ;;  %288 = vst.msk [vmem:[#allocation3 + $0xa8] sm:$0x3] %vm228_vm2, %v13146_v51 }
 0x16b   : > { %19092 = vst [vmem:[#allocation16_spill] sm:$0xff] %v14369_v10  ;;  %289 = vst.msk [vmem:[#allocation3 + $0xc0] sm:$0x3] %vm228_vm2, %v13146_v51  ;;  %v14414_v31 = vpop.f32.mrf.mxu0 }
 0x16c   : > { %19093 = vst [vmem:[#allocation17_spill] sm:$0xff] %v14372_v55  ;;  %290 = vst.msk [vmem:[#allocation3 + $0xd8] sm:$0x3] %vm228_vm2, %v13146_v51  ;;  %v14416_v58 = vpop.f32.mrf.mxu1 }
 0x16d   : > { %291 = vst.msk [vmem:[#allocation3 + $0xf0] sm:$0x3] %vm228_vm2, %v13146_v51  ;;  %292 = vst.msk [vmem:[#allocation3 + $0x108] sm:$0x3] %vm228_vm2, %v13146_v51  ;;  %v12414_v63 = vpop.f32.mrf.mxu0 }
 0x16e   : > { %293 = vst.msk [vmem:[#allocation3 + $0x120] sm:$0x3] %vm228_vm2, %v13146_v51  ;;  %294 = vst.msk [vmem:[#allocation3 + $0x138] sm:$0x3] %vm228_vm2, %v13146_v51  ;;  %v14418_v62 = vpop.f32.mrf.mxu1  ;;  %v14421_v4 = vadd.f32 %v12414_v63, %v14225_v26 }
 0x16f   : > { %295 = vst.msk [vmem:[#allocation3 + $0x150] sm:$0x3] %vm228_vm2, %v13146_v51  ;;  %296 = vst.msk [vmem:[#allocation3 + $0x168] sm:$0x3] %vm228_vm2, %v13146_v51  ;;  %v14423_v56 = vpop.f32.mrf.mxu0 }
 0x170   : > { %297 = vst.msk [vmem:[#allocation3 + $0x180] sm:$0x3] %vm228_vm2, %v13146_v51  ;;  %298 = vst.msk [vmem:[#allocation3 + $0x198] sm:$0x3] %vm228_vm2, %v13146_v51  ;;  %v14425_v10 = vpop.f32.mrf.mxu1 }
 0x171   : > { %299 = vst.msk [vmem:[#allocation3 + $0x42] sm:$0x3] %vm228_vm2, %v13146_v51  ;;  %300 = vst.msk [vmem:[#allocation3 + $0x5a] sm:$0x3] %vm228_vm2, %v13146_v51  ;;  %v12417_v55 = vpop.f32.mrf.mxu0 }
 0x172   : > { %301 = vst.msk [vmem:[#allocation3 + $0x72] sm:$0x3] %vm228_vm2, %v13146_v51  ;;  %302 = vst.msk [vmem:[#allocation3 + $0x8a] sm:$0x3] %vm228_vm2, %v13146_v51  ;;  %v14427_v36 = vpop.f32.mrf.mxu1  ;;  %v14430_v49 = vadd.f32 %v12417_v55, %v14237_v34 }
 0x173   : > { %303 = vst.msk [vmem:[#allocation3 + $0xa2] sm:$0x3] %vm228_vm2, %v13146_v51  ;;  %304 = vst.msk [vmem:[#allocation3 + $0xba] sm:$0x3] %vm228_vm2, %v13146_v51 }
 0x174   : > { %305 = vst.msk [vmem:[#allocation3 + $0xd2] sm:$0x3] %vm228_vm2, %v13146_v51  ;;  %306 = vst.msk [vmem:[#allocation3 + $0xea] sm:$0x3] %vm228_vm2, %v13146_v51 }
 0x175   : > { %307 = vst.msk [vmem:[#allocation3 + $0x102] sm:$0x3] %vm228_vm2, %v13146_v51  ;;  %308 = vst.msk [vmem:[#allocation3 + $0x11a] sm:$0x3] %vm228_vm2, %v13146_v51 }
 0x176   : > { %309 = vst.msk [vmem:[#allocation3 + $0x132] sm:$0x3] %vm228_vm2, %v13146_v51  ;;  %310 = vst.msk [vmem:[#allocation3 + $0x14a] sm:$0x3] %vm228_vm2, %v13146_v51 }
 0x177   : > { %311 = vst.msk [vmem:[#allocation3 + $0x162] sm:$0x3] %vm228_vm2, %v13146_v51  ;;  %312 = vst.msk [vmem:[#allocation3 + $0x17a] sm:$0x3] %vm228_vm2, %v13146_v51 }
 0x178   : > { %313 = vst.msk [vmem:[#allocation3 + $0x192] sm:$0x3] %vm228_vm2, %v13146_v51  ;;  %314 = vst.msk [vmem:[#allocation3 + $0x1aa] sm:$0x3] %vm228_vm2, %v13146_v51 }
 0x179   : > { %19094 = vst [vmem:[#allocation18_spill] sm:$0xff] %v14416_v58  ;;  %19095 = vst [vmem:[#allocation19_spill] sm:$0xff] %v14418_v62  ;;  %v14432_v58 = vpop.f32.mrf.mxu0  ;;  %v14434_v62 = vpop.f32.mrf.mxu1 }
 0x17a   : > { %19096 = vst [vmem:[#allocation20_spill] sm:$0xff] %v14421_v4  ;;  %19097 = vst [vmem:[#allocation21_spill] sm:$0xff] %v14423_v56 }
 0x17b   : > { %19098 = vst [vmem:[#allocation22_spill] sm:$0xff] %v14425_v10  ;;  %19099 = vst [vmem:[#allocation23_spill] sm:$0xff] %v14427_v36  ;;  %v12420_v26 = vpop.f32.mrf.mxu0  ;;  %v14436_v63 = vpop.f32.mrf.mxu1 }
 0x17c   : > { %19100 = vst [vmem:[#allocation24_spill] sm:$0xff] %v14430_v49  ;;  %274 = vst.msk [vmem:[#allocation3 + $0x28] sm:$0xf] %vm270_vm4, %v13146_v51  ;;  %v14439_v10 = vadd.f32 %v12420_v26, %v14249_v38 }
 0x17d   : > { %271 = vst.msk [vmem:[#allocation3 + $0x10] sm:$0xf] %vm270_vm4, %v13146_v51  ;;  %278 = vst.msk [vmem:[#allocation3 + $0x1c0] sm:$0xf] %vm270_vm4, %v13146_v51  ;;  %v14441_v4 = vpop.f32.mrf.mxu0  ;;  %v14443_v36 = vpop.f32.mrf.mxu1 }
 0x17e   : > { %281 = vst.msk [vmem:[#allocation3 + $0x1d8] sm:$0xf] %vm270_vm4, %v13146_v51  ;;  %19101 = vst [vmem:[#allocation25_spill] sm:$0xff] %v14432_v58 }
 0x17f   : > { %19102 = vst [vmem:[#allocation26_spill] sm:$0xff] %v14434_v62  ;;  %19103 = vst [vmem:[#allocation27_spill] sm:$0xff] %v14436_v63  ;;  %v12423_v34 = vpop.f32.mrf.mxu0  ;;  %v14445_v55 = vpop.f32.mrf.mxu1 }
 0x180   : > { %19104 = vst [vmem:[#allocation28_spill] sm:$0xff] %v14439_v10  ;;  %19105 = vst [vmem:[#allocation29_spill] sm:$0xff] %v14443_v36  ;;  %v14448_v49 = vadd.f32 %v12423_v34, %v14261_v18 }
 0x181   : > { %19106 = vst [vmem:[#allocation30_spill] sm:$0xff] %v14445_v55  ;;  %v14450_v51 = vpop.f32.mrf.mxu0  ;;  %v14452_v58 = vpop.f32.mrf.mxu1 }
 0x182   : > { %19107 = vst [vmem:[#allocation33_spill] sm:$0xff] %v14448_v49  ;;  %19108 = vst [vmem:[#allocation34_spill] sm:$0xff] %v14452_v58 }
 0x183   : > { %v12426_v62 = vpop.f32.mrf.mxu0  ;;  %v14454_v56 = vpop.f32.mrf.mxu1 }
 0x184   : > { %19109 = vst [vmem:[#allocation35_spill] sm:$0xff] %v14454_v56  ;;  %v14457_v38 = vadd.f32 %v12426_v62, %v14273_v50 }
 0x185   : > { %v14459_v26 = vpop.f32.mrf.mxu0  ;;  %v14461_v63 = vpop.f32.mrf.mxu1 }
 0x186   : > { %19110 = vst [vmem:[#allocation36_spill] sm:$0xff] %v14457_v38  ;;  %19111 = vst [vmem:[#allocation37_spill] sm:$0xff] %v14461_v63 }
 0x187   : > { %v12429_v36 = vpop.f32.mrf.mxu0  ;;  %v14463_v10 = vpop.f32.mrf.mxu1 }
 0x188   : > { %19112 = vst [vmem:[#allocation38_spill] sm:$0xff] %v14463_v10  ;;  %v14466_v18 = vadd.f32 %v12429_v36, %v14285_v17 }
 0x189   : > { %v14468_v34 = vpop.f32.mrf.mxu0  ;;  %v14470_v55 = vpop.f32.mrf.mxu1 }
 0x18a   : > { %19113 = vst [vmem:[#allocation39_spill] sm:$0xff] %v14466_v18  ;;  %19114 = vst [vmem:[#allocation40_spill] sm:$0xff] %v14470_v55 }
 0x18b   : > { %v12432_v58 = vpop.f32.mrf.mxu0  ;;  %v14472_v49 = vpop.f32.mrf.mxu1 }
 0x18c   : > { %19115 = vst [vmem:[#allocation41_spill] sm:$0xff] %v14472_v49  ;;  %v14475_v50 = vadd.f32 %v12432_v58, %v14294_v41 }
 0x18d   : > { %v14477_v62 = vpop.f32.mrf.mxu0  ;;  %v14479_v56 = vpop.f32.mrf.mxu1 }
 0x18e   : > { %19116 = vst [vmem:[#allocation42_spill] sm:$0xff] %v14475_v50  ;;  %19117 = vst [vmem:[#allocation43_spill] sm:$0xff] %v14479_v56 }
 0x18f   : > { %v12435_v63 = vpop.f32.mrf.mxu0  ;;  %v14481_v38 = vpop.f32.mrf.mxu1 }
 0x190   : > { %19118 = vst [vmem:[#allocation44_spill] sm:$0xff] %v14481_v38  ;;  %v14484_v17 = vadd.f32 %v12435_v63, %v14303_v2 }
 0x191   : > { %v14486_v36 = vpop.f32.mrf.mxu0  ;;  %v14488_v10 = vpop.f32.mrf.mxu1 }
 0x192   : > { %19119 = vst [vmem:[#allocation45_spill] sm:$0xff] %v14484_v17  ;;  %19120 = vst [vmem:[#allocation46_spill] sm:$0xff] %v14488_v10 }
 0x193   : > { %v12438_v55 = vpop.f32.mrf.mxu0  ;;  %v14490_v18 = vpop.f32.mrf.mxu1 }
 0x194   : > { %19121 = vst [vmem:[#allocation47_spill] sm:$0xff] %v14490_v18  ;;  %v14493_v41 = vadd.f32 %v12438_v55, %v14312_v0 }
 0x195   : > { %v14495_v58 = vpop.f32.mrf.mxu0  ;;  %v14497_v49 = vpop.f32.mrf.mxu1 }
 0x196   : > { %19122 = vst [vmem:[#allocation48_spill] sm:$0xff] %v14493_v41  ;;  %19123 = vst [vmem:[#allocation49_spill] sm:$0xff] %v14495_v58 }
 0x197   : > { %19124 = vst [vmem:[#allocation50_spill] sm:$0xff] %v14497_v49  ;;  %v12441_v56 = vpop.f32.mrf.mxu0  ;;  %v14499_v50 = vpop.f32.mrf.mxu1 }
 0x198   : > { %19125 = vst [vmem:[#allocation51_spill] sm:$0xff] %v14499_v50  ;;  %v14502_v2 = vadd.f32 %v12441_v56, %v14321_v42 }
 0x199   : > { %v14504_v63 = vpop.f32.mrf.mxu0  ;;  %v14506_v38 = vpop.f32.mrf.mxu1 }
 0x19a   : > { %19126 = vst [vmem:[#allocation52_spill] sm:$0xff] %v14502_v2  ;;  %19127 = vst [vmem:[#allocation53_spill] sm:$0xff] %v14504_v63 }
 0x19b   : > { %19128 = vst [vmem:[#allocation54_spill] sm:$0xff] %v14506_v38  ;;  %v12444_v10 = vpop.f32.mrf.mxu0  ;;  %v12494_v17 = vpop.f32.mrf.mxu1 }
 0x19c   : > { %v2297_v18 = vadd.f32 %v12444_v10, %v14330_v53 }
 0x19d   : > { %v14509_v0 = vpop.f32.mrf.mxu0  ;;  %v14511_v55 = vpop.f32.mrf.mxu1 }
 0x19e   : > { %19129 = vst [vmem:[#allocation55_spill] sm:$0xff] %v14509_v0  ;;  %19130 = vst [vmem:[#allocation56_spill] sm:$0xff] %v14511_v55  ;;  %v14513_v41 = vadd.f32 %v12494_v17, %v2297_v18 }
 0x19f   : > { %v12447_v49 = vpop.f32.mrf.mxu0  ;;  %v12497_v58 = vpop.f32.mrf.mxu1 }
 0x1a0   : > { %19131 = vst [vmem:[#allocation57_spill] sm:$0xff] %v14513_v41  ;;  %v2299_v50 = vadd.f32 %v12447_v49, %v14340_v1 }
 0x1a1   : > { %v14516_v42 = vpop.f32.mrf.mxu0  ;;  %v14518_v56 = vpop.f32.mrf.mxu1 }
 0x1a2   : > { %19132 = vst [vmem:[#allocation58_spill] sm:$0xff] %v14518_v56  ;;  %v14520_v2 = vadd.f32 %v12497_v58, %v2299_v50 }
 0x1a3   : > { %v12450_v38 = vpop.f32.mrf.mxu0  ;;  %v12500_v63 = vpop.f32.mrf.mxu1 }
 0x1a4   : > { %19133 = vst [vmem:[#allocation59_spill] sm:$0xff] %v14520_v2  ;;  %v2301_v53 = vadd.f32 %v12450_v38, %v14350_v8 }
 0x1a5   : > { %v14523_v10 = vpop.f32.mrf.mxu0  ;;  %v14525_v0 = vpop.f32.mrf.mxu1 }
 0x1a6   : > { %19134 = vst [vmem:[#allocation60_spill] sm:$0xff] %v14525_v0  ;;  %v14527_v18 = vadd.f32 %v12500_v63, %v2301_v53 }
 0x1a7   : > { %v12453_v17 = vpop.f32.mrf.mxu0  ;;  %v12503_v41 = vpop.f32.mrf.mxu1 }
 0x1a8   : > { %19135 = vst [vmem:[#allocation61_spill] sm:$0xff] %v14527_v18  ;;  %v2303_v1 = vadd.f32 %v12453_v17, %v14358_v16 }
 0x1a9   : > { %v14530_v49 = vpop.f32.mrf.mxu0  ;;  %v14532_v55 = vpop.f32.mrf.mxu1 }
 0x1aa   : > { %19136 = vst [vmem:[#allocation62_spill] sm:$0xff] %v14532_v55  ;;  %v14534_v50 = vadd.f32 %v12503_v41, %v2303_v1  ;;  %v1059_v1 = vadd.f32 %v14097_v61, %v14095_v14  ;;  %v1119_v14 = vadd.f32 %v14179_v46, %v14177_v35  ;;  %v19147_v61 = vld [vmem:[#allocation5_spill] sm:$0xff]  ;;  %v14593_v46 = vld [vmem:[#allocation3 + $0x18] sm:$0xff] }
 0x1ab   : > { %v14536_v58 = vpop.f32.mrf.mxu0  ;;  %v14538_v2 = vpop.f32.mrf.mxu1 }
 0x1ac   : > { %19137 = vst [vmem:[#allocation63_spill] sm:$0xff] %v14534_v50  ;;  %19138 = vst [vmem:[#allocation64_spill] sm:$0xff] %v14538_v2  ;;  %v1069_v50 = vadd.f32 %v14111_v9, %v14109_v21  ;;  %v1129_v21 = vadd.f32 %v19147_v61, %v14187_v15  ;;  %v14576_v9 = vld [vmem:[#allocation3] sm:$0xff]  ;;  %v19157_v61 = vld [vmem:[#allocation12_spill] sm:$0xff] }
 0x1ad   : > { %v14540_v8 = vpop.f32.mrf.mxu0  ;;  %v14542_v38 = vpop.f32.mrf.mxu1  ;;  %v14595_v15 = vld [vmem:[#allocation3 + $0x20] sm:$0xff] }
 0x1ae   : > { %19139 = vst [vmem:[#allocation65_spill] sm:$0xff] %v14542_v38  ;;  %v1079_v38 = vadd.f32 %v14125_v5, %v14123_v25  ;;  %v14578_v25 = vld [vmem:[#allocation3 + $0x8] sm:$0xff]  ;;  %v1883_v5 = vadd.f32 %v14196_v30, %v14199_v32  ;;  %v14599_v30 = vadd.f32 %v14232_v39, %v14235_v11  ;;  %v14603_v32 = vadd.f32 %v14244_v43, %v14247_v52 }
 0x1af   : > { %v14544_v63 = vpop.f32.mrf.mxu0  ;;  %v14546_v53 = vpop.f32.mrf.mxu1  ;;  %v4085_v39 = vrot.slane %v14576_v9, 1  ;;  %v4086_v11 = vrot.slane %v14578_v25, 1  ;;  %v14620_v43 = vadd.f32 %v14268_v59, %v14271_v40  ;;  %v4090_v52 = vrot.slane %v14593_v46, 1  ;;  %v19155_v40 = vld [vmem:[#allocation7_spill] sm:$0xff] }
 0x1b0   : > { %19140 = vst [vmem:[#allocation66_spill] sm:$0xff] %v14546_v53  ;;  %v1089_v53 = vadd.f32 %v14139_v24, %v14137_v29  ;;  %v1885_v29 = vadd.f32 %v14208_v33, %v14211_v57  ;;  %v14586_v24 = vadd.f32 %v14220_v37, %v14223_v13  ;;  %v1512_v33 = vadd.f32 %v14299_v12, %v1069_v50  ;;  %v19152_v12 = vld [vmem:[#allocation6_spill] sm:$0xff] }
 0x1b1   : > { %v14548_v18 = vpop.f32.mrf.mxu0  ;;  %v14550_v16 = vpop.f32.mrf.mxu1  ;;  %v1514_v57 = vadd.f32 %v14308_v19, %v1079_v38  ;;  %v14609_v37 = vadd.f32 %v14256_v47, %v14259_v22  ;;  %v4091_v47 = vrot.slane %v14595_v15, 1  ;;  %v14626_v22 = vadd.f32 %v14280_v45, %v14283_v3 }
 0x1b2   : > { %19141 = vst [vmem:[#allocation67_spill] sm:$0xff] %v14550_v16  ;;  %v19145_v16 = vld [vmem:[#allocation31_spill] sm:$0xff]  ;;  %v1516_v13 = vadd.f32 %v14317_v23, %v1089_v53  ;;  %v14638_v53 = vadd.f32 %v19155_v40, %v1512_v33  ;;  %v1522_v45 = vadd.f32 %v19157_v61, %v1119_v14  ;;  %v1524_v3 = vadd.f32 %v14354_v7, %v1129_v21  ;;  %v14655_v40 = vld [vmem:[#allocation3 + $0x28] sm:$0xf] }
 0x1b3   : > { %v14552_v17 = vpop.f32.mrf.mxu0  ;;  %v14554_v41 = vpop.f32.mrf.mxu1  ;;  %v1099_v0 = vadd.f32 %v19145_v16, %v14151_v54  ;;  %v1510_v54 = vadd.f32 %v14290_v6, %v1059_v1  ;;  %v4267_v33 = vrot.slane %v14578_v25, 2  ;;  %v4092_v14 = vsel %vm4084_vm5, %v4090_v52, %v4091_v47  ;;  %v19162_v61 = vld [vmem:[#allocation11_spill] sm:$0xff]  ;;  %v19165_v52 = vld [vmem:[#allocation13_spill] sm:$0xff] }
 0x1b4   : > { %19142 = vst [vmem:[#allocation68_spill] sm:$0xff] %v14554_v41  ;;  %v19146_v41 = vld [vmem:[#allocation32_spill] sm:$0xff]  ;;  %v4271_v7 = vrot.slane %v14593_v46, 2  ;;  %v4272_v21 = vrot.slane %v14595_v15, 2 }
 0x1b5   : > { %v14564_v2 = vpop.f32.mrf.mxu0  ;;  %v14566_v55 = vpop.f32.mrf.mxu1  ;;  %v1109_v56 = vadd.f32 %v19146_v41, %v14165_v60  ;;  %v14629_v19 = vadd.f32 %v19152_v12, %v1510_v54  ;;  %v1518_v23 = vadd.f32 %v14326_v27, %v1099_v0  ;;  %v19156_v41 = vld [vmem:[#allocation8_spill] sm:$0xff]  ;;  %v19158_v54 = vld [vmem:[#allocation9_spill] sm:$0xff]  ;;  %v4087_v0 = vsel %vm4084_vm5, %v4085_v39, %v4086_v11 }
 0x1b6   : > { %19143 = vst [vmem:[#allocation69_spill] sm:$0xff] %v14564_v2  ;;  %19144 = vst [vmem:[#allocation70_spill] sm:$0xff] %v14566_v55  ;;  %v14641_v1 = vadd.f32 %v19156_v41, %v1514_v57  ;;  %v14646_v12 = vadd.f32 %v19158_v54, %v1516_v13  ;;  %v14657_v57 = vld [vmem:[#allocation3 + $0x10] sm:$0xf]  ;;  %v19161_v13 = vld [vmem:[#allocation10_spill] sm:$0xff]  ;;  %v2272_v54 = vadd.f32 %v14365_v44, %v1883_v5  ;;  %v4274_v2 = vrot.slane %v14655_v40, 2 }
 0x1b7   : > { %v14589_v60 = vpop.f32.mrf.mxu0  ;;  %v14591_v35 = vpop.f32.mrf.mxu1  ;;  %v1520_v50 = vadd.f32 %v14336_v28, %v1109_v56  ;;  %v4266_v56 = vrot.slane %v14576_v9, 2  ;;  %v14663_v41 = vadd.f32 %v19161_v13, %v1518_v23  ;;  %v14678_v55 = vadd.f32 %v14356_v20, %v1524_v3 }
 0x1b8   : > { %19148 = vst [vmem:[#allocation31_spill] sm:$0xff] %v14589_v60  ;;  %19149 = vst [vmem:[#allocation32_spill] sm:$0xff] %v14591_v35  ;;  %v14675_v35 = vadd.f32 %v19165_v52, %v1522_v45  ;;  %v4093_v23 = vrot.slane %v14655_v40, 1  ;;  %v4088_v13 = vrot.slane %v14657_v57, 1  ;;  %v4225_v44 = vmax.f32 %v14576_v9, %v4087_v0 }
 0x1b9   : > { %v14612_v6 = vpop.f32.mrf.mxu0  ;;  %v14614_v16 = vpop.f32.mrf.mxu1  ;;  %v14666_v39 = vadd.f32 %v19162_v61, %v1520_v50  ;;  %v4268_v5 = vsel %vm4265_vm6, %v4266_v56, %v4267_v33  ;;  %v4273_v45 = vsel %vm4265_vm6, %v4271_v7, %v4272_v21  ;;  %v4448_v20 = vrot.slane %v14578_v25, 3 }
 0x1ba   : > { %19150 = vst [vmem:[#allocation5_spill] sm:$0xff] %v14612_v6  ;;  %19151 = vst [vmem:[#allocation71_spill] sm:$0xff] %v14614_v16  ;;  %v4452_v3 = vrot.slane %v14593_v46, 3  ;;  %v4453_v52 = vrot.slane %v14595_v15, 3  ;;  %v4094_v60 = vsel %vm4084_vm5, %v4091_v47, %v4093_v23  ;;  %v4627_v23 = vrot.slane %v14576_v9, 4 }
 0x1bb   : > { %v14633_v38 = vpop.f32.mrf.mxu0  ;;  %v14635_v59 = vpop.f32.mrf.mxu1 }
 0x1bc   : > { %19153 = vst [vmem:[#allocation6_spill] sm:$0xff] %v14633_v38  ;;  %19154 = vst [vmem:[#allocation72_spill] sm:$0xff] %v14635_v59  ;;  %v4454_v47 = vsel %vm4446_vm7, %v4452_v3, %v4453_v52  ;;  %v19180_v3 = vld [vmem:[#allocation20_spill] sm:$0xff] }
 0x1bd   : > { %v14648_v27 = vpop.f32.mrf.mxu0  ;;  %v14650_v28 = vpop.f32.mrf.mxu1 }
 0x1be   : > { %19159 = vst [vmem:[#allocation7_spill] sm:$0xff] %v14648_v27  ;;  %19160 = vst [vmem:[#allocation8_spill] sm:$0xff] %v14650_v28  ;;  %v2274_v28 = vadd.f32 %v14414_v31, %v1885_v29  ;;  %v4227_v31 = vmax.f32 %v14593_v46, %v4092_v14  ;;  %v4447_v29 = vrot.slane %v14576_v9, 3  ;;  %v19170_v14 = vld [vmem:[#allocation17_spill] sm:$0xff]  ;;  %v19172_v27 = vld [vmem:[#allocation18_spill] sm:$0xff] }
 0x1bf   : > { %v14670_v59 = vpop.f32.mrf.mxu0  ;;  %v14672_v16 = vpop.f32.mrf.mxu1 }
 0x1c0   : > { %19163 = vst [vmem:[#allocation12_spill] sm:$0xff] %v14670_v59  ;;  %19164 = vst [vmem:[#allocation9_spill] sm:$0xff] %v14672_v16  ;;  %v19168_v16 = vld [vmem:[#allocation14_spill] sm:$0xff]  ;;  %v19171_v59 = vld [vmem:[#allocation16_spill] sm:$0xff]  ;;  %v14706_v38 = vadd.f32 %v19172_v27, %v2274_v28  ;;  %v4406_v27 = vmax.f32 %v4225_v44, %v4268_v5  ;;  %v4408_v28 = vmax.f32 %v4227_v31, %v4273_v45  ;;  %v4450_v45 = vrot.slane %v14657_v57, 3 }
 0x1c1   : > { %v14682_v50 = vpop.f32.mrf.mxu0  ;;  %v14684_v61 = vpop.f32.mrf.mxu1  ;;  %v14703_v56 = vadd.f32 %v19171_v59, %v19170_v14  ;;  %v4228_v44 = vmax.f32 %v14595_v15, %v4094_v60  ;;  %v4275_v5 = vsel %vm4265_vm6, %v4272_v21, %v4274_v2  ;;  %v19186_v21 = vld [vmem:[#allocation23_spill] sm:$0xff] }
 0x1c2   : > { %19166 = vst [vmem:[#allocation10_spill] sm:$0xff] %v14682_v50  ;;  %19167 = vst [vmem:[#allocation11_spill] sm:$0xff] %v14684_v61  ;;  %v14696_v50 = vadd.f32 %v19168_v16, %v14363_v48  ;;  %v19169_v61 = vld [vmem:[#allocation15_spill] sm:$0xff]  ;;  %v4089_v48 = vsel %vm4084_vm5, %v4086_v11, %v4088_v13  ;;  %v4269_v16 = vrot.slane %v14657_v57, 2  ;;  %v4628_v11 = vrot.slane %v14578_v25, 4 }
 0x1c3   : > { %v14699_v0 = vadd.f32 %v19169_v61, %v2272_v54  ;;  %v14708_v7 = vpop.f32.mrf.mxu0  ;;  %v14710_v6 = vpop.f32.mrf.mxu1  ;;  %v19175_v54 = vld [vmem:[#allocation21_spill] sm:$0xff]  ;;  %v4226_v31 = vmax.f32 %v14578_v25, %v4089_v48  ;;  %v2280_v25 = vadd.f32 %v14441_v4, %v14603_v32  ;;  %v4409_v32 = vmax.f32 %v4228_v44, %v4275_v5  ;;  %v19196_v5 = vld [vmem:[#allocation30_spill] sm:$0xff] }
 0x1c4   : > { %19173 = vst [vmem:[#allocation13_spill] sm:$0xff] %v14708_v7  ;;  %19174 = vst [vmem:[#allocation14_spill] sm:$0xff] %v14710_v6  ;;  %v2276_v61 = vadd.f32 %v19175_v54, %v14586_v24  ;;  %v4449_v6 = vsel %vm4446_vm7, %v4447_v29, %v4448_v20  ;;  %v4632_v24 = vrot.slane %v14593_v46, 4  ;;  %v4633_v54 = vrot.slane %v14595_v15, 4 }
 0x1c5   : > { %v14718_v59 = vpop.f32.mrf.mxu0  ;;  %v14720_v14 = vpop.f32.mrf.mxu1  ;;  %v4455_v29 = vrot.slane %v14655_v40, 3  ;;  %v4270_v9 = vsel %vm4265_vm6, %v4267_v33, %v4269_v16  ;;  %v19185_v33 = vld [vmem:[#allocation24_spill] sm:$0xff]  ;;  %v2282_v16 = vadd.f32 %v14450_v51, %v14609_v37  ;;  %v4630_v51 = vrot.slane %v14657_v57, 4  ;;  %v19189_v37 = vld [vmem:[#allocation26_spill] sm:$0xff] }
 0x1c6   : > { %19176 = vst [vmem:[#allocation15_spill] sm:$0xff] %v14718_v59  ;;  %19177 = vst [vmem:[#allocation17_spill] sm:$0xff] %v14720_v14  ;;  %v19181_v14 = vld [vmem:[#allocation19_spill] sm:$0xff]  ;;  %v19183_v59 = vld [vmem:[#allocation25_spill] sm:$0xff]  ;;  %v14755_v48 = vadd.f32 %v19186_v21, %v19185_v33  ;;  %v4634_v4 = vsel %vm584_vm0, %v4632_v24, %v4633_v54  ;;  %v4635_v33 = vrot.slane %v14655_v40, 4  ;;  %v4451_v21 = vsel %vm4446_vm7, %v4448_v20, %v4450_v45 }
 0x1c7   : > { %v14726_v13 = vpop.f32.mrf.mxu0  ;;  %v14728_v7 = vpop.f32.mrf.mxu1  ;;  %v2278_v60 = vadd.f32 %v19183_v59, %v14599_v30  ;;  %v4629_v30 = vsel %vm584_vm0, %v4627_v23, %v4628_v11  ;;  %v4407_v59 = vmax.f32 %v4226_v31, %v4270_v9  ;;  %v2284_v23 = vadd.f32 %v14459_v26, %v14620_v43  ;;  %v19195_v31 = vld [vmem:[#allocation33_spill] sm:$0xff]  ;;  %v19197_v9 = vld [vmem:[#allocation34_spill] sm:$0xff] }
 0x1c8   : > { %19178 = vst [vmem:[#allocation16_spill] sm:$0xff] %v14726_v13  ;;  %19179 = vst [vmem:[#allocation18_spill] sm:$0xff] %v14728_v7  ;;  %v14740_v13 = vadd.f32 %v19181_v14, %v19180_v3  ;;  %v19182_v7 = vld [vmem:[#allocation22_spill] sm:$0xff]  ;;  %v4587_v14 = vmax.f32 %v4406_v27, %v4449_v6  ;;  %v19190_v27 = vld [vmem:[#allocation28_spill] sm:$0xff]  ;;  %v2286_v40 = vadd.f32 %v14468_v34, %v14626_v22 }
 0x1c9   : > { %v14743_v46 = vadd.f32 %v19182_v7, %v2276_v61  ;;  %v14749_v2 = vpop.f32.mrf.mxu0  ;;  %v14751_v15 = vpop.f32.mrf.mxu1  ;;  %v4589_v7 = vmax.f32 %v4408_v28, %v4454_v47  ;;  %v2667_v6 = vadd.f32 %v19189_v37, %v2278_v60  ;;  %v19191_v28 = vld [vmem:[#allocation27_spill] sm:$0xff]  ;;  %v2288_v57 = vadd.f32 %v14477_v62, %v14629_v19 }
 0x1ca   : > { %19184 = vst [vmem:[#allocation21_spill] sm:$0xff] %v14751_v15  ;;  %v4456_v15 = vsel %vm4446_vm7, %v4453_v52, %v4455_v29  ;;  %v2670_v47 = vadd.f32 %v19191_v28, %v19190_v27  ;;  %v14783_v20 = vmax.f32 %v4587_v14, %v4629_v30  ;;  %v2672_v29 = vadd.f32 %v19196_v5, %v19195_v31  ;;  %v19199_v34 = vld [vmem:[#allocation35_spill] sm:$0xff]  ;;  %v19203_v27 = vld [vmem:[#allocation49_spill] sm:$0xff]  ;;  %v19210_v5 = vld [vmem:[#allocation44_spill] sm:$0xff] }
 0x1cb   : > { %v14759_v61 = vpop.f32.mrf.mxu0  ;;  %v14761_v3 = vpop.f32.mrf.mxu1  ;;  %v14785_v52 = vmax.f32 %v4589_v7, %v4634_v4  ;;  %v2671_v45 = vadd.f32 %v19197_v9, %v2282_v16  ;;  %v4590_v60 = vmax.f32 %v4409_v32, %v4456_v15  ;;  %v2290_v62 = vadd.f32 %v14486_v36, %v14638_v53  ;;  %v19200_v7 = vld [vmem:[#allocation37_spill] sm:$0xff]  ;;  %v19201_v4 = vld [vmem:[#allocation39_spill] sm:$0xff]  ;;  %v19202_v16 = vld [vmem:[#allocation38_spill] sm:$0xff] }
 0x1cc   : > { %19187 = vst [vmem:[#allocation20_spill] sm:$0xff] %v14759_v61  ;;  %19188 = vst [vmem:[#allocation19_spill] sm:$0xff] %v14761_v3  ;;  %v19192_v3 = vld [vmem:[#allocation29_spill] sm:$0xff]  ;;  %v4636_v19 = vsel %vm584_vm0, %v4633_v54, %v4635_v33  ;;  %v4631_v14 = vsel %vm584_vm0, %v4628_v11, %v4630_v51  ;;  %v2673_v30 = vadd.f32 %v19200_v7, %v2284_v23  ;;  %v19205_v36 = vld [vmem:[#allocation40_spill] sm:$0xff] }
 0x1cd   : > { %v2669_v61 = vadd.f32 %v19192_v3, %v2280_v25  ;;  %v14775_v24 = vpop.f32.mrf.mxu0  ;;  %v14777_v44 = vpop.f32.mrf.mxu1  ;;  %19193 = vst [vmem:[#allocation22_spill] sm:$0xff] %v14783_v20  ;;  %19194 = vst [vmem:[#allocation25_spill] sm:$0xff] %v14785_v52  ;;  %v4588_v25 = vmax.f32 %v4407_v59, %v4451_v21  ;;  %v19198_v3 = vld [vmem:[#allocation36_spill] sm:$0xff]  ;;  %v14803_v37 = vadd.f32 %v19202_v16, %v19201_v4  ;;  %v19204_v32 = vld [vmem:[#allocation53_spill] sm:$0xff] }
 0x1ce   : > { %v2674_v22 = vadd.f32 %v19199_v34, %v19198_v3  ;;  %v2292_v15 = vadd.f32 %v19203_v27, %v14641_v1  ;;  %v2294_v59 = vadd.f32 %v19204_v32, %v14646_v12  ;;  %v14814_v53 = vadd.f32 %v19205_v36, %v2286_v40  ;;  %v19206_v11 = vld [vmem:[#allocation42_spill] sm:$0xff]  ;;  %v19207_v54 = vld [vmem:[#allocation41_spill] sm:$0xff]  ;;  %v19208_v51 = vld [vmem:[#allocation43_spill] sm:$0xff] }
 0x1cf   : > { %v14790_v26 = vpop.f32.mrf.mxu0  ;;  %v14792_v43 = vpop.f32.mrf.mxu1  ;;  %v14818_v33 = vadd.f32 %v19207_v54, %v19206_v11  ;;  %v14821_v23 = vadd.f32 %v19208_v51, %v2288_v57  ;;  %v19209_v31 = vld [vmem:[#allocation45_spill] sm:$0xff]  ;;  %v19211_v9 = vld [vmem:[#allocation55_spill] sm:$0xff]  ;;  %v14835_v7 = vmax.f32 %v4590_v60, %v4636_v19  ;;  %v14837_v4 = vmax.f32 %v4588_v25, %v4631_v14  ;;  %v19214_v57 = vld [vmem:[#allocation46_spill] sm:$0xff] }
 0x1d0   : > { %v14827_v12 = vadd.f32 %v19210_v5, %v19209_v31  ;;  %v2296_v3 = vadd.f32 %v19211_v9, %v14663_v41  ;;  %v14840_v16 = vadd.f32 %v19214_v57, %v2290_v62  ;;  %v19215_v27 = vld [vmem:[#allocation48_spill] sm:$0xff]  ;;  %v19216_v32 = vld [vmem:[#allocation47_spill] sm:$0xff]  ;;  %v2298_v11 = vadd.f32 %v14516_v42, %v14666_v39  ;;  %v19217_v54 = vld [vmem:[#allocation50_spill] sm:$0xff] }
 0x1d1   : > { %v14809_v21 = vpop.f32.mrf.mxu0  ;;  %v14811_v28 = vpop.f32.mrf.mxu1  ;;  %19212 = vst [vmem:[#allocation24_spill] sm:$0xff] %v14835_v7  ;;  %19213 = vst [vmem:[#allocation23_spill] sm:$0xff] %v14837_v4  ;;  %v14844_v36 = vadd.f32 %v19216_v32, %v19215_v27  ;;  %v2300_v41 = vadd.f32 %v14523_v10, %v14675_v35  ;;  %v14851_v51 = vadd.f32 %v19217_v54, %v2292_v15  ;;  %v19218_v60 = vld [vmem:[#allocation52_spill] sm:$0xff]  ;;  %v19219_v19 = vld [vmem:[#allocation51_spill] sm:$0xff] }
 0x1d2   : > { %v14855_v25 = vadd.f32 %v19219_v19, %v19218_v60  ;;  %v19220_v14 = vld [vmem:[#allocation54_spill] sm:$0xff]  ;;  %v2302_v31 = vadd.f32 %v14530_v49, %v14678_v55  ;;  %v3052_v42 = vadd.f32 %v14536_v58, %v14696_v50  ;;  %v3051_v10 = vadd.f32 %v14540_v8, %v14699_v0  ;;  %v19221_v15 = vld [vmem:[#allocation56_spill] sm:$0xff]  ;;  %v19222_v49 = vld [vmem:[#allocation69_spill] sm:$0xff] }
 0x1d3   : > { %v14831_v34 = vpop.f32.mrf.mxu0  ;;  %v14833_v40 = vpop.f32.mrf.mxu1  ;;  %v14858_v62 = vadd.f32 %v19220_v14, %v2294_v59  ;;  %v3054_v35 = vadd.f32 %v14544_v63, %v14703_v56  ;;  %v3053_v39 = vadd.f32 %v14548_v18, %v14706_v38  ;;  %v14875_v59 = vadd.f32 %v19221_v15, %v2296_v3  ;;  %v19223_v63 = vld [vmem:[#allocation58_spill] sm:$0xff]  ;;  %v19224_v18 = vld [vmem:[#allocation60_spill] sm:$0xff]  ;;  %v19225_v0 = vld [vmem:[#allocation31_spill] sm:$0xff] }
 0x1d4   : > { %v3056_v55 = vadd.f32 %v14552_v17, %v14740_v13  ;;  %v3055_v57 = vadd.f32 %v19222_v49, %v14743_v46  ;;  %v14888_v50 = vadd.f32 %v19223_v63, %v2298_v11  ;;  %v14891_v38 = vadd.f32 %v19224_v18, %v2300_v41  ;;  %v19226_v17 = vld [vmem:[#allocation5_spill] sm:$0xff]  ;;  %v19227_v3 = vld [vmem:[#allocation62_spill] sm:$0xff]  ;;  %v19229_v60 = vld [vmem:[#allocation7_spill] sm:$0xff] }
 0x1d5   : > { %v14862_v5 = vpop.f32.mrf.mxu0  ;;  %v14864_v9 = vpop.f32.mrf.mxu1  ;;  %v3058_v56 = vadd.f32 %v19225_v0, %v14755_v48  ;;  %v3057_v13 = vadd.f32 %v19226_v17, %v2667_v6  ;;  %v14897_v46 = vadd.f32 %v19227_v3, %v2302_v31  ;;  %v19228_v32 = vld [vmem:[#allocation6_spill] sm:$0xff]  ;;  %v3059_v19 = vadd.f32 %v19229_v60, %v2669_v61  ;;  %v19230_v14 = vld [vmem:[#allocation12_spill] sm:$0xff]  ;;  %v19232_v18 = vld [vmem:[#allocation65_spill] sm:$0xff] }
 0x1d6   : > { %v3060_v54 = vadd.f32 %v19228_v32, %v2670_v47  ;;  %v3062_v15 = vadd.f32 %v19230_v14, %v2672_v29  ;;  %v19231_v41 = vld [vmem:[#allocation64_spill] sm:$0xff]  ;;  %v14910_v48 = vadd.f32 %v19232_v18, %v3051_v10  ;;  %v19233_v6 = vld [vmem:[#allocation66_spill] sm:$0xff]  ;;  %v19234_v31 = vld [vmem:[#allocation67_spill] sm:$0xff] }
 0x1d7   : > { %v14881_v27 = vpop.f32.mrf.mxu0  ;;  %v14883_v58 = vpop.f32.mrf.mxu1  ;;  %v14907_v63 = vadd.f32 %v19231_v41, %v3052_v42  ;;  %v14913_v0 = vadd.f32 %v19233_v6, %v3054_v35  ;;  %v14916_v17 = vadd.f32 %v19234_v31, %v3053_v39  ;;  %v19235_v47 = vld [vmem:[#allocation68_spill] sm:$0xff]  ;;  %v19236_v29 = vld [vmem:[#allocation70_spill] sm:$0xff]  ;;  %v19238_v14 = vld [vmem:[#allocation13_spill] sm:$0xff] }
 0x1d8   : > { %v14919_v61 = vadd.f32 %v19235_v47, %v3056_v55  ;;  %v14922_v3 = vadd.f32 %v19236_v29, %v3055_v57  ;;  %v19237_v32 = vld [vmem:[#allocation10_spill] sm:$0xff]  ;;  %v3064_v42 = vadd.f32 %v19238_v14, %v2674_v22  ;;  %v14928_v10 = vld [vmem:[#allocation3] sm:$0xff]  ;;  %v14930_v35 = vld [vmem:[#allocation3 + $0x8] sm:$0xff] }
 0x1d9   : > { %v14902_v49 = vpop.f32.mrf.mxu0  ;;  %v14904_v11 = vpop.f32.mrf.mxu1  ;;  %v3061_v60 = vadd.f32 %v19237_v32, %v2671_v45  ;;  %v19239_v18 = vld [vmem:[#allocation32_spill] sm:$0xff]  ;;  %v19240_v6 = vld [vmem:[#allocation71_spill] sm:$0xff]  ;;  %v19242_v47 = vld [vmem:[#allocation57_spill] sm:$0xff] }
 0x1da   : > { %v14933_v39 = vadd.f32 %v19239_v18, %v3058_v56  ;;  %v14936_v55 = vadd.f32 %v19240_v6, %v3057_v13  ;;  %v19241_v31 = vld [vmem:[#allocation15_spill] sm:$0xff]  ;;  %v19243_v45 = vld [vmem:[#allocation72_spill] sm:$0xff]  ;;  %v19245_v1 = vld [vmem:[#allocation9_spill] sm:$0xff] }
 0x1db   : > { %v12544_v41 = vpop.f32.mrf.mxu0  ;;  %v14926_v8 = vpop.f32.mrf.mxu1  ;;  %v3063_v57 = vadd.f32 %v19241_v31, %v2673_v30  ;;  %v14943_v22 = vadd.f32 %v19243_v45, %v3060_v54  ;;  %v19244_v32 = vld [vmem:[#allocation8_spill] sm:$0xff]  ;;  %v14949_v4 = vadd.f32 %v19245_v1, %v3062_v15  ;;  %v14955_v6 = vld [vmem:[#allocation3 + $0x18] sm:$0xff]  ;;  %v14957_v30 = vld [vmem:[#allocation3 + $0x20] sm:$0xff]  ;;  %v3065_v54 = vadd.f32 %v14749_v2, %v14814_v53 }
 0x1dc   : > { %v14940_v29 = vadd.f32 %v12544_v41, %v19242_v47  ;;  %v14946_v14 = vadd.f32 %v19244_v32, %v3059_v19  ;;  %v19246_v56 = vld [vmem:[#allocation16_spill] sm:$0xff]  ;;  %v5248_v31 = vrot.slane %v14928_v10, 1  ;;  %v5249_v1 = vrot.slane %v14930_v35, 1  ;;  %v19248_v15 = vld [vmem:[#allocation11_spill] sm:$0xff]  ;;  %v19250_v53 = vld [vmem:[#allocation17_spill] sm:$0xff] }
 0x1dd   : > { %v3066_v18 = vadd.f32 %v19246_v56, %v14803_v37  ;;  %v3012_v7 = vpop.f32.mrf.mxu0  ;;  %v14953_v13 = vpop.f32.mrf.mxu1  ;;  %v19247_v41 = vld [vmem:[#allocation20_spill] sm:$0xff]  ;;  %v14966_v47 = vadd.f32 %v19248_v15, %v3061_v60  ;;  %v19249_v37 = vld [vmem:[#allocation14_spill] sm:$0xff]  ;;  %v3067_v32 = vadd.f32 %v14775_v24, %v14821_v23  ;;  %v3070_v56 = vadd.f32 %v14790_v26, %v14827_v12 }
 0x1de   : > { %v3068_v19 = vadd.f32 %v19247_v41, %v14818_v33  ;;  %v14969_v45 = vadd.f32 %v19249_v37, %v3064_v42  ;;  %v14976_v52 = vadd.f32 %v19250_v53, %v3063_v57  ;;  %v19252_v33 = vld [vmem:[#allocation59_spill] sm:$0xff]  ;;  %v5253_v20 = vrot.slane %v14955_v6, 1  ;;  %v19253_v15 = vld [vmem:[#allocation18_spill] sm:$0xff] }
 0x1df   : > { %v12547_v2 = vpop.f32.mrf.mxu0  ;;  %v5254_v60 = vrot.slane %v14957_v30, 1  ;;  %v3069_v42 = vadd.f32 %v14809_v21, %v14840_v16  ;;  %v3072_v24 = vadd.f32 %v14831_v34, %v14844_v36  ;;  %v14989_v26 = vpop.f32.mrf.mxu1  ;;  %v5428_v12 = vrot.slane %v14928_v10, 2 }
 0x1e0   : > { %19251 = vst [vmem:[#allocation26_spill] sm:$0xff] %v14976_v52  ;;  %v14979_v41 = vadd.f32 %v12547_v2, %v19252_v33  ;;  %v18978_v57 = vrot.slane %v14930_v35, 2  ;;  %v14994_v37 = vadd.f32 %v19253_v15, %v3066_v18  ;;  %v19254_v2 = vld [vmem:[#allocation21_spill] sm:$0xff]  ;;  %v19255_v33 = vld [vmem:[#allocation19_spill] sm:$0xff]  ;;  %v5250_v21 = vsel %vm4084_vm5, %v5248_v31, %v5249_v1 }
 0x1e1   : > { %v14987_v23 = vpop.f32.mrf.mxu0  ;;  %v14997_v53 = vadd.f32 %v19254_v2, %v3065_v54  ;;  %v15000_v52 = vadd.f32 %v19255_v33, %v3068_v19  ;;  %v15004_v34 = vadd.f32 %v14777_v44, %v3067_v32  ;;  %v15007_v16 = vadd.f32 %v14792_v43, %v3070_v56  ;;  %v15013_v54 = vld [vmem:[#allocation3 + $0x10] sm:$0xf]  ;;  %v15015_v2 = vld [vmem:[#allocation3 + $0x28] sm:$0xf] }
 0x1e2   : > { %v3071_v36 = vadd.f32 %v14862_v5, %v14851_v51  ;;  %v3074_v18 = vadd.f32 %v14881_v27, %v14855_v25  ;;  %v19257_v19 = vld [vmem:[#allocation61_spill] sm:$0xff]  ;;  %v5255_v44 = vsel %vm4084_vm5, %v5253_v20, %v5254_v60  ;;  %v5433_v31 = vrot.slane %v14955_v6, 2  ;;  %v15029_v25 = vpop.f32.mrf.mxu1 }
 0x1e3   : > { %19256 = vst [vmem:[#allocation28_spill] sm:$0xff] %v15007_v16  ;;  %v12550_v15 = vpop.f32.mrf.mxu0  ;;  %v5434_v43 = vrot.slane %v14957_v30, 2  ;;  %v15024_v32 = vadd.f32 %v14811_v28, %v3069_v42  ;;  %v15027_v51 = vadd.f32 %v14833_v40, %v3072_v24  ;;  %v5388_v27 = vmax.f32 %v14928_v10, %v5250_v21 }
 0x1e4   : > { %v15018_v33 = vadd.f32 %v12550_v15, %v19257_v19  ;;  %v5430_v56 = vsel %vm4265_vm6, %v5428_v12, %v18978_v57  ;;  %v5608_v20 = vrot.slane %v14928_v10, 3  ;;  %v5251_v19 = vrot.slane %v15013_v54, 1  ;;  %v19262_v57 = vld [vmem:[#allocation63_spill] sm:$0xff] }
 0x1e5   : > { %19258 = vst [vmem:[#allocation27_spill] sm:$0xff] %v15024_v32  ;;  %19259 = vst [vmem:[#allocation29_spill] sm:$0xff] %v15027_v51  ;;  %v3032_v5 = vpop.f32.mrf.mxu0  ;;  %v5256_v28 = vrot.slane %v15015_v2, 1  ;;  %v15040_v40 = vadd.f32 %v14864_v9, %v3071_v36  ;;  %v3073_v42 = vadd.f32 %v14902_v49, %v14858_v62  ;;  %v15045_v24 = vadd.f32 %v14883_v58, %v3074_v18  ;;  %v15055_v36 = vpop.f32.mrf.mxu1 }
 0x1e6   : > { %v5390_v12 = vmax.f32 %v14955_v6, %v5255_v44  ;;  %v5435_v15 = vsel %vm4265_vm6, %v5433_v31, %v5434_v43  ;;  %v5613_v32 = vrot.slane %v14955_v6, 3  ;;  %v5614_v16 = vrot.slane %v14957_v30, 3 }
 0x1e7   : > { %19260 = vst [vmem:[#allocation33_spill] sm:$0xff] %v15040_v40  ;;  %19261 = vst [vmem:[#allocation30_spill] sm:$0xff] %v15045_v24  ;;  %v12553_v21 = vpop.f32.mrf.mxu0  ;;  %v3075_v9 = vadd.f32 %v3012_v7, %v14875_v59  ;;  %v5568_v49 = vmax.f32 %v5388_v27, %v5430_v56  ;;  %v5788_v58 = vrot.slane %v14928_v10, 4  ;;  %v5789_v18 = vrot.slane %v14930_v35, 4  ;;  %v15068_v7 = vld [vmem:[%s18935_s2] ss:$0 sm:$0xff] }
 0x1e8   : > { %v15049_v51 = vadd.f32 %v12553_v21, %v19262_v57  ;;  %v19263_v44 = vrot.slane %v14930_v35, 3  ;;  %v5252_v31 = vsel %vm4084_vm5, %v5249_v1, %v5251_v19  ;;  %v5257_v21 = vsel %vm4084_vm5, %v5254_v60, %v5256_v28  ;;  %v3421_v28 = vpop.f32.mrf.mxu1 }
 0x1e9   : > { %v3042_v62 = vpop.f32.mrf.mxu0  ;;  %v5431_v24 = vrot.slane %v15013_v54, 2  ;;  %v5570_v59 = vmax.f32 %v5390_v12, %v5435_v15  ;;  %v5793_v10 = vrot.slane %v14955_v6, 4  ;;  %v5794_v27 = vrot.slane %v14957_v30, 4 }
 0x1ea   : > { %v5610_v57 = vsel %vm4446_vm7, %v5608_v20, %v19263_v44  ;;  %v5436_v56 = vrot.slane %v15015_v2, 2  ;;  %v15074_v20 = vadd.f32 %v14904_v11, %v3073_v42  ;;  %v15078_v1 = vadd.f32 %v14926_v8, %v14940_v29 }
 0x1eb   : > { %v12608_v40 = vpop.f32.mrf.mxu0  ;;  %v5615_v19 = vsel %vm4446_vm7, %v5613_v32, %v5614_v16  ;;  %v5748_v15 = vmax.f32 %v5568_v49, %v5610_v57  ;;  %v5790_v6 = vsel %vm584_vm0, %v5788_v58, %v5789_v18  ;;  %v5389_v12 = vmax.f32 %v14930_v35, %v5252_v31  ;;  %v12603_v31 = vpop.f32.mrf.mxu1 }
 0x1ec   : > { %v3830_v60 = vadd.f32 %v12608_v40, %v14907_v63  ;;  %v5391_v11 = vmax.f32 %v14957_v30, %v5257_v21  ;;  %v19264_v29 = vrot.slane %v14930_v35, 2  ;;  %v5437_v32 = vsel %vm4265_vm6, %v5434_v43, %v5436_v56 }
 0x1ed   : > { %v3670_v44 = vpop.f32.mrf.mxu0  ;;  %v15094_v40 = vadd.f32 %v14953_v13, %v3075_v9  ;;  %v3077_v49 = vadd.f32 %v14987_v23, %v14888_v50  ;;  %v5750_v57 = vmax.f32 %v5570_v59, %v5615_v19  ;;  %v5795_v30 = vsel %vm584_vm0, %v5793_v10, %v5794_v27 }
 0x1ee   : > { %v3869_v42 = vadd.f32 %v15068_v7, %v3830_v60  ;;  %v3829_v8 = vadd.f32 %v3670_v44, %v14910_v48  ;;  %v5432_v63 = vsel %vm4265_vm6, %v19264_v29, %v5431_v24  ;;  %v5611_v43 = vrot.slane %v15013_v54, 3  ;;  %v3431_v29 = vpop.f32.mrf.mxu1 }
 0x1ef   : > { %v12611_v58 = vpop.f32.mrf.mxu0  ;;  %v5616_v13 = vrot.slane %v15015_v2, 3  ;;  %v3079_v9 = vadd.f32 %v3032_v5, %v14891_v38  ;;  %v15106_v23 = vmax.f32 %v5748_v15, %v5790_v6  ;;  %v5569_v21 = vmax.f32 %v5389_v12, %v5432_v63 }
 0x1f0   : > { %3933 = vst.msk [vmem:[#allocation3 + $0x3a] sm:$0xff] %vm225_vm1, %v3869_v42  ;;  %3901 = vst.msk [vmem:[#allocation4 + $0x21] sm:$0xff] %vm225_vm1, %v3869_v42  ;;  %v3868_v48 = vadd.f32 %v15068_v7, %v3829_v8  ;;  %v3832_v24 = vadd.f32 %v12611_v58, %v14913_v0  ;;  %v5571_v59 = vmax.f32 %v5391_v11, %v5437_v32  ;;  %v19265_v56 = vrot.slane %v14930_v35, 3 }
 0x1f1   : > { %v3680_v50 = vpop.f32.mrf.mxu0  ;;  %v5617_v38 = vsel %vm4446_vm7, %v5614_v16, %v5616_v13  ;;  %v3081_v5 = vadd.f32 %v3042_v62, %v14897_v46  ;;  %v15117_v44 = vmax.f32 %v5750_v57, %v5795_v30  ;;  %v5791_v11 = vrot.slane %v15013_v54, 4 }
 0x1f2   : > { %3932 = vst.msk [vmem:[#allocation3 + $0x32] sm:$0xff] %vm225_vm1, %v3868_v48  ;;  %3900 = vst.msk [vmem:[#allocation4 + $0x19] sm:$0xff] %vm225_vm1, %v3868_v48  ;;  %v3871_v10 = vadd.f32 %v15068_v7, %v3832_v24  ;;  %v3831_v0 = vadd.f32 %v3680_v50, %v14916_v17  ;;  %v5612_v60 = vsel %vm4446_vm7, %v19265_v56, %v5611_v43  ;;  %v5796_v42 = vrot.slane %v15015_v2, 4 }
 0x1f3   : > { %v12614_v19 = vpop.f32.mrf.mxu0  ;;  %v5749_v15 = vmax.f32 %v5569_v21, %v5612_v60  ;;  %v5751_v6 = vmax.f32 %v5571_v59, %v5617_v38  ;;  %v15127_v46 = vadd.f32 %v14989_v26, %v14979_v41  ;;  %v15130_v16 = vadd.f32 %v15029_v25, %v3077_v49 }
 0x1f4   : > { %3935 = vst.msk [vmem:[#allocation3 + $0x52] sm:$0xff] %vm225_vm1, %v3871_v10  ;;  %3903 = vst.msk [vmem:[#allocation4 + $0x39] sm:$0xff] %vm225_vm1, %v3871_v10  ;;  %v3870_v12 = vadd.f32 %v15068_v7, %v3831_v0  ;;  %v3834_v17 = vadd.f32 %v12614_v19, %v14919_v61  ;;  %v15134_v62 = vadd.f32 %v15055_v36, %v15018_v33 }
 0x1f5   : > { %v15136_v8 = vadd.f32 %v3421_v28, %v3079_v9  ;;  %v3690_v63 = vpop.f32.mrf.mxu0  ;;  %v5792_v26 = vsel %vm584_vm0, %v5789_v18, %v5791_v11  ;;  %v5797_v54 = vsel %vm584_vm0, %v5794_v27, %v5796_v42  ;;  %v15147_v2 = vadd.f32 %v12603_v31, %v15049_v51 }
 0x1f6   : > { %3934 = vst.msk [vmem:[#allocation3 + $0x4a] sm:$0xff] %vm225_vm1, %v3870_v12  ;;  %3902 = vst.msk [vmem:[#allocation4 + $0x31] sm:$0xff] %vm225_vm1, %v3870_v12  ;;  %v3873_v61 = vadd.f32 %v15068_v7, %v3834_v17  ;;  %v3833_v41 = vadd.f32 %v3690_v63, %v14922_v3  ;;  %v5968_v36 = vmax.f32 %v15106_v23, %v15117_v44 }
 0x1f7   : > { %v12617_v33 = vpop.f32.mrf.mxu0  ;;  %v15149_v25 = vld [vmem:[#allocation3 + $0x40] sm:$0xf]  ;;  %v15153_v28 = vmax.f32 %v5749_v15, %v5792_v26  ;;  %v15155_v32 = vmax.f32 %v5751_v6, %v5797_v54  ;;  %v15157_v3 = vadd.f32 %v3431_v29, %v3081_v5 }
 0x1f8   : > { %3937 = vst.msk [vmem:[#allocation3 + $0x6a] sm:$0xff] %vm225_vm1, %v3873_v61  ;;  %3905 = vst.msk [vmem:[#allocation4 + $0x51] sm:$0xff] %vm225_vm1, %v3873_v61  ;;  %v3872_v35 = vadd.f32 %v15068_v7, %v3833_v41  ;;  %v3836_v51 = vadd.f32 %v12617_v33, %v14933_v39  ;;  %v4098_v18 = vrot.slane %v15149_v25, 1  ;;  %v4279_v57 = vrot.slane %v15149_v25, 2 }
 0x1f9   : > { %v3700_v27 = vpop.f32.mrf.mxu0  ;;  %v3970_v49 = vld [vmem:[#allocation3 + $0x30] sm:$0xff]  ;;  %v15164_v58 = vld [vmem:[#allocation3 + $0x38] sm:$0xff]  ;;  %v4460_v30 = vrot.slane %v15149_v25, 3  ;;  %v4640_v48 = vrot.slane %v15149_v25, 4  ;;  %v5969_v24 = vmax.f32 %v15153_v28, %v15155_v32 }
 0x1fa   : > { %3936 = vst.msk [vmem:[#allocation3 + $0x62] sm:$0xff] %vm225_vm1, %v3872_v35  ;;  %3904 = vst.msk [vmem:[#allocation4 + $0x49] sm:$0xff] %vm225_vm1, %v3872_v35  ;;  %v3875_v39 = vadd.f32 %v15068_v7, %v3836_v51  ;;  %v3835_v43 = vadd.f32 %v3700_v27, %v14936_v55  ;;  %v4095_v13 = vrot.slane %v3970_v49, 1  ;;  %v4096_v9 = vrot.slane %v15164_v58, 1 }
 0x1fb   : > { %v12620_v31 = vpop.f32.mrf.mxu0  ;;  %v4276_v50 = vrot.slane %v3970_v49, 2  ;;  %v4277_v21 = vrot.slane %v15164_v58, 2  ;;  %v4457_v59 = vrot.slane %v3970_v49, 3  ;;  %v4458_v10 = vrot.slane %v15164_v58, 3 }
 0x1fc   : > { %3939 = vst.msk [vmem:[#allocation3 + $0x82] sm:$0xff] %vm225_vm1, %v3875_v39  ;;  %3907 = vst.msk [vmem:[#allocation4 + $0x69] sm:$0xff] %vm225_vm1, %v3875_v39  ;;  %v3874_v0 = vadd.f32 %v15068_v7, %v3835_v43  ;;  %v3838_v56 = vadd.f32 %v12620_v31, %v14943_v22  ;;  %v4097_v55 = vsel %vm4084_vm5, %v4095_v13, %v4096_v9  ;;  %v4637_v60 = vrot.slane %v3970_v49, 4 }
 0x1fd   : > { %v3710_v38 = vpop.f32.mrf.mxu0  ;;  %v15185_v5 = vld [vmem:[#allocation3 + $0x48] sm:$0xff]  ;;  %v15187_v19 = vld [vmem:[#allocation3 + $0x50] sm:$0xff]  ;;  %v4229_v15 = vmax.f32 %v3970_v49, %v4097_v55  ;;  %v4278_v6 = vsel %vm4265_vm6, %v4276_v50, %v4277_v21  ;;  %v15195_v12 = vsel %vm4446_vm7, %v4457_v59, %v4458_v10  ;;  %v4638_v22 = vrot.slane %v15164_v58, 4 }
 0x1fe   : > { %3938 = vst.msk [vmem:[#allocation3 + $0x7a] sm:$0xff] %vm225_vm1, %v3874_v0  ;;  %3906 = vst.msk [vmem:[#allocation4 + $0x61] sm:$0xff] %vm225_vm1, %v3874_v0  ;;  %v3877_v17 = vadd.f32 %v15068_v7, %v3838_v56  ;;  %v3837_v11 = vadd.f32 %v3710_v38, %v14946_v14  ;;  %v4100_v42 = vrot.slane %v15185_v5, 1  ;;  %v4101_v29 = vrot.slane %v15187_v19, 1 }
 0x1ff   : > { %v12623_v63 = vpop.f32.mrf.mxu0  ;;  %v4281_v61 = vrot.slane %v15185_v5, 2  ;;  %v4282_v41 = vrot.slane %v15187_v19, 2  ;;  %v4410_v26 = vmax.f32 %v4229_v15, %v4278_v6  ;;  %v4462_v54 = vrot.slane %v15185_v5, 3 }
 0x200   : > { %3941 = vst.msk [vmem:[#allocation3 + $0x9a] sm:$0xff] %vm225_vm1, %v3877_v17  ;;  %3909 = vst.msk [vmem:[#allocation4 + $0x81] sm:$0xff] %vm225_vm1, %v3877_v17  ;;  %v3876_v33 = vadd.f32 %v15068_v7, %v3837_v11  ;;  %v3840_v14 = vadd.f32 %v12623_v63, %v14949_v4  ;;  %v4102_v35 = vsel %vm4084_vm5, %v4100_v42, %v4101_v29  ;;  %v4463_v51 = vrot.slane %v15187_v19, 3 }
 0x201   : > { %v15215_v27 = vld [vmem:[#allocation3 + $0x68] sm:$0xff]  ;;  %v3720_v49 = vpop.f32.mrf.mxu0  ;;  %v3976_v39 = vld [vmem:[#allocation3 + $0x60] sm:$0xff]  ;;  %v4231_v43 = vmax.f32 %v15185_v5, %v4102_v35  ;;  %v4283_v13 = vsel %vm4265_vm6, %v4281_v61, %v4282_v41  ;;  %v4591_v31 = vmax.f32 %v4410_v26, %v15195_v12  ;;  %v4639_v4 = vsel %vm584_vm0, %v4637_v60, %v4638_v22 }
 0x202   : > { %3940 = vst.msk [vmem:[#allocation3 + $0x92] sm:$0xff] %vm225_vm1, %v3876_v33  ;;  %3908 = vst.msk [vmem:[#allocation4 + $0x79] sm:$0xff] %vm225_vm1, %v3876_v33  ;;  %v3879_v50 = vadd.f32 %v15068_v7, %v3840_v14  ;;  %v3839_v59 = vadd.f32 %v3720_v49, %v14966_v47  ;;  %v4105_v0 = vrot.slane %v3976_v39, 1  ;;  %v4106_v56 = vrot.slane %v15215_v27, 1  ;;  %v19266_v14 = vld [vmem:[#allocation26_spill] sm:$0xff] }
 0x203   : > { %v12626_v55 = vpop.f32.mrf.mxu0  ;;  %v4286_v38 = vrot.slane %v3976_v39, 2  ;;  %v4287_v15 = vrot.slane %v15215_v27, 2  ;;  %v4412_v6 = vmax.f32 %v4231_v43, %v4283_v13  ;;  %v4464_v60 = vsel %vm4446_vm7, %v4462_v54, %v4463_v51 }
 0x204   : > { %3943 = vst.msk [vmem:[#allocation3 + $0xb2] sm:$0xff] %vm225_vm1, %v3879_v50  ;;  %3911 = vst.msk [vmem:[#allocation4 + $0x99] sm:$0xff] %vm225_vm1, %v3879_v50  ;;  %v3878_v12 = vadd.f32 %v15068_v7, %v3839_v59  ;;  %v3842_v47 = vadd.f32 %v12626_v55, %v14969_v45  ;;  %v4107_v17 = vsel %vm4084_vm5, %v4105_v0, %v4106_v56  ;;  %v4467_v11 = vrot.slane %v3976_v39, 3  ;;  %v15253_v55 = vld [vmem:[#allocation3 + $0x58] sm:$0xf] }
 0x205   : > { %v3730_v42 = vpop.f32.mrf.mxu0  ;;  %v4233_v63 = vmax.f32 %v3976_v39, %v4107_v17  ;;  %v4288_v61 = vsel %vm4265_vm6, %v4286_v38, %v4287_v15  ;;  %v4468_v26 = vrot.slane %v15215_v27, 3  ;;  %v4593_v54 = vmax.f32 %v4412_v6, %v4464_v60  ;;  %v15255_v38 = vld [vmem:[#allocation3 + $0x80] sm:$0xff] }
 0x206   : > { %3942 = vst.msk [vmem:[#allocation3 + $0xaa] sm:$0xff] %vm225_vm1, %v3878_v12  ;;  %3910 = vst.msk [vmem:[#allocation4 + $0x91] sm:$0xff] %vm225_vm1, %v3878_v12  ;;  %v3881_v33 = vadd.f32 %v15068_v7, %v3842_v47  ;;  %v3841_v45 = vadd.f32 %v3730_v42, %v19266_v14  ;;  %v4642_v35 = vrot.slane %v15185_v5, 4  ;;  %v4643_v49 = vrot.slane %v15187_v19, 4  ;;  %v15268_v47 = vld [vmem:[#allocation3 + $0x88] sm:$0xf] }
 0x207   : > { %v12629_v43 = vpop.f32.mrf.mxu0  ;;  %v4414_v13 = vmax.f32 %v4233_v63, %v4288_v61  ;;  %v4469_v50 = vsel %vm4446_vm7, %v4467_v11, %v4468_v26  ;;  %v4647_v59 = vrot.slane %v3976_v39, 4  ;;  %v4648_v0 = vrot.slane %v15215_v27, 4  ;;  %v15266_v39 = vld [vmem:[#allocation3 + $0x70] sm:$0xf]  ;;  %v19267_v61 = vld [vmem:[#allocation22_spill] sm:$0xff] }
 0x208   : > { %3945 = vst.msk [vmem:[#allocation3 + $0xca] sm:$0xff] %vm225_vm1, %v3881_v33  ;;  %3913 = vst.msk [vmem:[#allocation4 + $0xb1] sm:$0xff] %vm225_vm1, %v3881_v33  ;;  %v3880_v5 = vadd.f32 %v15068_v7, %v3841_v45  ;;  %v3844_v6 = vadd.f32 %v12629_v43, %v14994_v37  ;;  %v4644_v60 = vsel %vm584_vm0, %v4642_v35, %v4643_v49  ;;  %v19268_v33 = vld [vmem:[#allocation25_spill] sm:$0xff]  ;;  %v4103_v45 = vrot.slane %v15253_v55, 1  ;;  %v3984_v25 = vld [vmem:[#allocation3 + $0xa0] sm:$0xf] }
 0x209   : > { %v15264_v12 = vmax.f32 %v4591_v31, %v4639_v4  ;;  %v3740_v17 = vpop.f32.mrf.mxu0  ;;  %v4595_v11 = vmax.f32 %v4414_v13, %v4469_v50  ;;  %v4649_v42 = vsel %vm584_vm0, %v4647_v59, %v4648_v0  ;;  %v15273_v63 = vmax.f32 %v4593_v54, %v4644_v60 }
 0x20a   : > { %v4099_v37 = vsel %vm4084_vm5, %v4096_v9, %v4098_v18  ;;  %3944 = vst.msk [vmem:[#allocation3 + $0xc2] sm:$0xff] %vm225_vm1, %v3880_v5  ;;  %3912 = vst.msk [vmem:[#allocation4 + $0xa9] sm:$0xff] %vm225_vm1, %v3880_v5  ;;  %v3883_v31 = vadd.f32 %v15068_v7, %v3844_v6  ;;  %v3843_v4 = vadd.f32 %v3740_v17, %v14997_v53  ;;  %v4108_v18 = vrot.slane %v15266_v39, 1 }
 0x20b   : > { %v19269_v14 = vmax.f32 %v19267_v61, %v19268_v33  ;;  %v12632_v35 = vpop.f32.mrf.mxu0  ;;  %v15289_v43 = vmax.f32 %v4595_v11, %v4649_v42  ;;  %v4111_v9 = vrot.slane %v15255_v38, 1  ;;  %v4113_v13 = vrot.slane %v15268_v47, 1 }
 0x20c   : > { %3947 = vst.msk [vmem:[#allocation3 + $0xe2] sm:$0xff] %vm225_vm1, %v3883_v31  ;;  %3915 = vst.msk [vmem:[#allocation4 + $0xc9] sm:$0xff] %vm225_vm1, %v3883_v31  ;;  %v3882_v53 = vadd.f32 %v15068_v7, %v3843_v4  ;;  %v3846_v50 = vadd.f32 %v12632_v35, %v15000_v52  ;;  %v4104_v5 = vsel %vm4084_vm5, %v4101_v29, %v4103_v45  ;;  %v19270_v45 = vld [vmem:[#allocation28_spill] sm:$0xff] }
 0x20d   : > { %v4839_v54 = vmax.f32 %v19269_v14, %v15264_v12  ;;  %v3750_v6 = vpop.f32.mrf.mxu0  ;;  %v4109_v60 = vsel %vm4084_vm5, %v4106_v56, %v4108_v18  ;;  %v4114_v17 = vsel %vm4084_vm5, %v4111_v9, %v4113_v13  ;;  %v4230_v11 = vmax.f32 %v15164_v58, %v4099_v37 }
 0x20e   : > { %v4232_v42 = vmax.f32 %v15187_v19, %v4104_v5  ;;  %3946 = vst.msk [vmem:[#allocation3 + $0xda] sm:$0xff] %vm225_vm1, %v3882_v53  ;;  %3914 = vst.msk [vmem:[#allocation4 + $0xc1] sm:$0xff] %vm225_vm1, %v3882_v53  ;;  %v3885_v52 = vadd.f32 %v15068_v7, %v3846_v50  ;;  %v3845_v31 = vadd.f32 %v3750_v6, %v15004_v34  ;;  %v4284_v14 = vrot.slane %v15253_v55, 2  ;;  %v19271_v6 = vld [vmem:[#allocation27_spill] sm:$0xff] }
 0x20f   : > { %v4871_v59 = vmax.f32 %v4839_v54, %v15273_v63  ;;  %v4234_v56 = vmax.f32 %v15215_v27, %v4109_v60  ;;  %v12635_v4 = vpop.f32.mrf.mxu0  ;;  %v4236_v61 = vmax.f32 %v15255_v38, %v4114_v17  ;;  %v4280_v37 = vsel %vm4265_vm6, %v4277_v21, %v4279_v57 }
 0x210   : > { %v4289_v54 = vrot.slane %v15266_v39, 2  ;;  %3949 = vst.msk [vmem:[#allocation3 + $0xfa] sm:$0xff] %vm225_vm1, %v3885_v52  ;;  %3917 = vst.msk [vmem:[#allocation4 + $0xe1] sm:$0xff] %vm225_vm1, %v3885_v52  ;;  %v3884_v34 = vadd.f32 %v15068_v7, %v3845_v31  ;;  %v3848_v35 = vadd.f32 %v12635_v4, %v19270_v45  ;;  %v4292_v18 = vrot.slane %v15255_v38, 2  ;;  %v15367_v45 = vld [vmem:[#allocation3 + $0x98] sm:$0xff] }
 0x211   : > { %v4903_v29 = vmax.f32 %v4871_v59, %v15289_v43  ;;  %v4294_v57 = vrot.slane %v15268_v47, 2  ;;  %v3760_v21 = vpop.f32.mrf.mxu0  ;;  %v4285_v13 = vsel %vm4265_vm6, %v4282_v41, %v4284_v14  ;;  %v4411_v50 = vmax.f32 %v4230_v11, %v4280_v37 }
 0x212   : > { %v4290_v53 = vsel %vm4265_vm6, %v4287_v15, %v4289_v54  ;;  %v4461_v59 = vsel %vm4446_vm7, %v4458_v10, %v4460_v30  ;;  %3948 = vst.msk [vmem:[#allocation3 + $0xf2] sm:$0xff] %vm225_vm1, %v3884_v34  ;;  %3916 = vst.msk [vmem:[#allocation4 + $0xd9] sm:$0xff] %vm225_vm1, %v3884_v34  ;;  %v3887_v5 = vadd.f32 %v15068_v7, %v3848_v35  ;;  %v4465_v31 = vrot.slane %v15253_v55, 3 }
 0x213   : > { %4967 = vrot.lane.b32.xlu0 %v4903_v29, %s13147_s22  ;;  %5096 = vst.msk [vmem:[#allocation3 + $0x32] sm:$0xff] %vm225_vm1, %v4903_v29  ;;  %v3847_v60 = vadd.f32 %v3760_v21, %v19271_v6  ;;  %v4295_v41 = vsel %vm4265_vm6, %v4292_v18, %v4294_v57  ;;  %v4413_v15 = vmax.f32 %v4232_v42, %v4285_v13  ;;  %v12638_v17 = vpop.f32.mrf.mxu0  ;;  %v4470_v30 = vrot.slane %v15266_v39, 3  ;;  %v19272_v29 = vld [vmem:[#allocation29_spill] sm:$0xff]  ;;  %v19274_v6 = vld [vmem:[#allocation30_spill] sm:$0xff] }
 0x214   : > { %v4415_v11 = vmax.f32 %v4234_v56, %v4290_v53  ;;  %v4417_v52 = vmax.f32 %v4236_v61, %v4295_v41  ;;  %3951 = vst.msk [vmem:[#allocation3 + $0x112] sm:$0xff] %vm225_vm1, %v3887_v5  ;;  %3919 = vst.msk [vmem:[#allocation4 + $0xf9] sm:$0xff] %vm225_vm1, %v3887_v5  ;;  %v3850_v4 = vadd.f32 %v12638_v17, %v19272_v29  ;;  %v4473_v37 = vrot.slane %v15255_v38, 3 }
 0x215   : > { %v3886_v10 = vadd.f32 %v15068_v7, %v3847_v60  ;;  %v4475_v14 = vrot.slane %v15268_v47, 3  ;;  %v4466_v42 = vsel %vm4446_vm7, %v4463_v51, %v4465_v31  ;;  %v4471_v56 = vsel %vm4446_vm7, %v4468_v26, %v4470_v30  ;;  %v3770_v34 = vpop.f32.mrf.mxu0 }
 0x216   : > { %v4592_v61 = vmax.f32 %v4411_v50, %v4461_v59  ;;  %v4641_v54 = vsel %vm584_vm0, %v4638_v22, %v4640_v48  ;;  %v3889_v51 = vadd.f32 %v15068_v7, %v3850_v4  ;;  %v4594_v35 = vmax.f32 %v4413_v15, %v4466_v42  ;;  %v19273_v59 = vld [vmem:[#allocation33_spill] sm:$0xff] }
 0x217   : > { %3950 = vst.msk [vmem:[#allocation3 + $0x10a] sm:$0xff] %vm225_vm1, %v3886_v10  ;;  %3918 = vst.msk [vmem:[#allocation4 + $0xf1] sm:$0xff] %vm225_vm1, %v3886_v10  ;;  %v4476_v26 = vsel %vm4446_vm7, %v4473_v37, %v4475_v14  ;;  %v4596_v57 = vmax.f32 %v4415_v11, %v4471_v56  ;;  %v4645_v58 = vrot.slane %v15253_v55, 4  ;;  %v4650_v48 = vrot.slane %v15266_v39, 4  ;;  %v12641_v13 = vpop.f32.mrf.mxu0 }
 0x218   : > { %v4598_v21 = vmax.f32 %v4417_v52, %v4476_v26  ;;  %v4653_v22 = vrot.slane %v15255_v38, 4  ;;  %3953 = vst.msk [vmem:[#allocation3 + $0x12a] sm:$0xff] %vm225_vm1, %v3889_v51  ;;  %3921 = vst.msk [vmem:[#allocation4 + $0x111] sm:$0xff] %vm225_vm1, %v3889_v51  ;;  %v4655_v53 = vrot.slane %v15268_v47, 4  ;;  %v4772_v50 = vmax.f32 %v4592_v61, %v4641_v54  ;;  %v19275_v52 = vld [vmem:[#allocation24_spill] sm:$0xff]  ;;  %v3979_v51 = vld [vmem:[#allocation3 + $0x78] sm:$0xff] }
 0x219   : > { %v3849_v5 = vadd.f32 %v3770_v34, %v19273_v59  ;;  %v3852_v60 = vadd.f32 %v12641_v13, %v19274_v6  ;;  %v4646_v55 = vsel %vm584_vm0, %v4643_v49, %v4645_v58  ;;  %v4651_v39 = vsel %vm584_vm0, %v4648_v0, %v4650_v48  ;;  %v19276_v49 = vld [vmem:[#allocation23_spill] sm:$0xff]  ;;  %v3780_v26 = vpop.f32.mrf.mxu0 }
 0x21a   : > { %v4116_v41 = vrot.slane %v15367_v45, 1  ;;  %v4118_v15 = vrot.slane %v3984_v25, 1  ;;  %v4656_v47 = vsel %vm584_vm0, %v4653_v22, %v4655_v53  ;;  %v15393_v17 = vmax.f32 %v4594_v35, %v4646_v55 }
 0x21b   : > { %v15395_v11 = vmax.f32 %v4596_v57, %v4651_v39  ;;  %v4810_v31 = vmax.f32 %v19275_v52, %v4772_v50  ;;  %v15398_v19 = vmax.f32 %v4598_v21, %v4656_v47  ;;  %v19277_v27 = vmax.f32 %v19276_v49, %v19275_v52  ;;  %v12644_v52 = vpop.f32.mrf.mxu0 }
 0x21c   : > { %v3888_v0 = vadd.f32 %v15068_v7, %v3849_v5  ;;  %v3891_v10 = vadd.f32 %v15068_v7, %v3852_v60  ;;  %v4119_v4 = vsel %vm4084_vm5, %v4116_v41, %v4118_v15  ;;  %v4297_v14 = vrot.slane %v15367_v45, 2 }
 0x21d   : > { %v4840_v30 = vmax.f32 %v19277_v27, %v4772_v50  ;;  %v4842_v29 = vmax.f32 %v4810_v31, %v15393_v17  ;;  %v4299_v42 = vrot.slane %v3984_v25, 2  ;;  %v4238_v61 = vmax.f32 %v15367_v45, %v4119_v4  ;;  %v15434_v31 = vld [vmem:[#allocation3 + $0xb0] sm:$0xff] }
 0x21e   : > { %3952 = vst.msk [vmem:[#allocation3 + $0x122] sm:$0xff] %vm225_vm1, %v3888_v0  ;;  %3920 = vst.msk [vmem:[#allocation4 + $0x109] sm:$0xff] %vm225_vm1, %v3888_v0  ;;  %v4478_v54 = vrot.slane %v15367_v45, 3  ;;  %v4480_v34 = vrot.slane %v3984_v25, 3  ;;  %v4658_v21 = vrot.slane %v15367_v45, 4  ;;  %v4660_v58 = vrot.slane %v3984_v25, 4 }
 0x21f   : > { %v4872_v56 = vmax.f32 %v4840_v30, %v15393_v17  ;;  %3955 = vst.msk [vmem:[#allocation3 + $0x142] sm:$0xff] %vm225_vm1, %v3891_v10  ;;  %3923 = vst.msk [vmem:[#allocation4 + $0x129] sm:$0xff] %vm225_vm1, %v3891_v10  ;;  %v4874_v35 = vmax.f32 %v4842_v29, %v15395_v11  ;;  %v4300_v57 = vsel %vm4265_vm6, %v4297_v14, %v4299_v42  ;;  %v4110_v60 = vrot.slane %v3979_v51, 1  ;;  %v3987_v0 = vld [vmem:[#allocation3 + $0xb8] sm:$0xf] }
 0x220   : > { %v4419_v13 = vmax.f32 %v4238_v61, %v4300_v57  ;;  %v4481_v53 = vsel %vm4446_vm7, %v4478_v54, %v4480_v34  ;;  %v4812_v59 = vmax.f32 %v4772_v50, %v15393_v17  ;;  %v4661_v6 = vsel %vm584_vm0, %v4658_v21, %v4660_v58 }
 0x221   : > { %v4904_v48 = vmax.f32 %v4872_v56, %v15395_v11  ;;  %v4906_v5 = vmax.f32 %v4874_v35, %v15398_v19  ;;  %v4291_v55 = vrot.slane %v3979_v51, 2  ;;  %v4472_v15 = vrot.slane %v3979_v51, 3  ;;  %v3982_v35 = vld [vmem:[#allocation3 + $0x90] sm:$0xff] }
 0x222   : > { %v4600_v25 = vmax.f32 %v4419_v13, %v4481_v53  ;;  %v4844_v39 = vmax.f32 %v4812_v59, %v15395_v11  ;;  %v4652_v47 = vrot.slane %v3979_v51, 4  ;;  %v4112_v50 = vsel %vm4084_vm5, %v4110_v60, %v4111_v9  ;;  %v3790_v13 = vpop.f32.mrf.mxu0 }
 0x223   : > { %5097 = vst.msk [vmem:[#allocation3 + $0x3a] sm:$0xff] %vm225_vm1, %v4904_v48  ;;  %4969 = vrot.lane.b32.xlu0 %v4904_v48, %s13147_s22  ;;  %4973 = vrot.lane.b32.xlu1 %v4906_v5, %s13147_s22  ;;  %5099 = vst.msk [vmem:[#allocation3 + $0x52] sm:$0xff] %vm225_vm1, %v4906_v5  ;;  %v4293_v49 = vsel %vm4265_vm6, %v4291_v55, %v4292_v18  ;;  %v4809_v27 = vmax.f32 %v19268_v33, %v15264_v12  ;;  %v4121_v34 = vrot.slane %v15434_v31, 1 }
 0x224   : > { %v3851_v30 = vadd.f32 %v3780_v26, %v15074_v20  ;;  %v15447_v10 = vmax.f32 %v4600_v25, %v4661_v6  ;;  %v4876_v29 = vmax.f32 %v4844_v39, %v15398_v19  ;;  %v4235_v4 = vmax.f32 %v3979_v51, %v4112_v50 }
 0x225   : > { %v4474_v42 = vsel %vm4446_vm7, %v4472_v15, %v4473_v37  ;;  %v4654_v9 = vsel %vm584_vm0, %v4652_v47, %v4653_v22  ;;  %v4841_v18 = vmax.f32 %v4809_v27, %v15273_v63  ;;  %v3854_v20 = vadd.f32 %v12644_v52, %v15078_v1 }
 0x226   : > { %v3890_v33 = vadd.f32 %v15068_v7, %v3851_v30  ;;  %v4908_v56 = vmax.f32 %v4876_v29, %v15447_v10  ;;  %v4416_v61 = vmax.f32 %v4235_v4, %v4293_v49  ;;  %v4123_v51 = vrot.slane %v3987_v0, 1  ;;  %v15489_v49 = vld [vmem:[#allocation3 + $0xc8] sm:$0xff] }
 0x227   : > { %v4873_v26 = vmax.f32 %v4841_v18, %v15289_v43  ;;  %v3893_v38 = vadd.f32 %v15068_v7, %v3854_v20  ;;  %v4302_v37 = vrot.slane %v15434_v31, 2  ;;  %v4304_v22 = vrot.slane %v3987_v0, 2 }
 0x228   : > { %3954 = vst.msk [vmem:[#allocation3 + $0x13a] sm:$0xff] %vm225_vm1, %v3890_v33  ;;  %3922 = vst.msk [vmem:[#allocation4 + $0x121] sm:$0xff] %vm225_vm1, %v3890_v33  ;;  %4977 = vrot.lane.b32.xlu1 %v4908_v56, %s13147_s22  ;;  %v4597_v1 = vmax.f32 %v4416_v61, %v4474_v42  ;;  %v4124_v57 = vsel %vm4084_vm5, %v4121_v34, %v4123_v51  ;;  %v4483_v58 = vrot.slane %v15434_v31, 3  ;;  %v4485_v48 = vrot.slane %v3987_v0, 3  ;;  %v3990_v33 = vld [vmem:[#allocation3 + $0xd0] sm:$0xf] }
 0x229   : > { %5101 = vst.msk [vmem:[#allocation3 + $0x6a] sm:$0xff] %vm225_vm1, %v4908_v56  ;;  %3957 = vst.msk [vmem:[#allocation3 + $0x15a] sm:$0xff] %vm225_vm1, %v3893_v38  ;;  %v4240_v53 = vmax.f32 %v15434_v31, %v4124_v57  ;;  %v4305_v59 = vsel %vm4265_vm6, %v4302_v37, %v4304_v22  ;;  %v4663_v5 = vrot.slane %v15434_v31, 4  ;;  %v4665_v6 = vrot.slane %v3987_v0, 4  ;;  %v3985_v57 = vld [vmem:[#allocation3 + $0xa8] sm:$0xff] }
 0x22a   : > { %3925 = vst.msk [vmem:[#allocation4 + $0x141] sm:$0xff] %vm225_vm1, %v3893_v38  ;;  %v15479_v60 = vmax.f32 %v4597_v1, %v4654_v9  ;;  %v4486_v55 = vsel %vm4446_vm7, %v4483_v58, %v4485_v48  ;;  %v4814_v25 = vmax.f32 %v15393_v17, %v15395_v11  ;;  %v4115_v39 = vrot.slane %v3982_v35, 1  ;;  %v12647_v17 = vpop.f32.mrf.mxu0 }
 0x22b   : > { %v4421_v15 = vmax.f32 %v4240_v53, %v4305_v59  ;;  %v4666_v47 = vsel %vm584_vm0, %v4663_v5, %v4665_v6  ;;  %v4296_v52 = vrot.slane %v3982_v35, 2  ;;  %v4477_v50 = vrot.slane %v3982_v35, 3 }
 0x22c   : > { %v4905_v27 = vmax.f32 %v4873_v26, %v15479_v60  ;;  %v4846_v30 = vmax.f32 %v4814_v25, %v15398_v19  ;;  %v4117_v0 = vsel %vm4084_vm5, %v4115_v39, %v4116_v41  ;;  %v4657_v29 = vrot.slane %v3982_v35, 4  ;;  %v3800_v59 = vpop.f32.mrf.mxu0 }
 0x22d   : > { %v4602_v4 = vmax.f32 %v4421_v15, %v4486_v55  ;;  %v4237_v42 = vmax.f32 %v3982_v35, %v4117_v0  ;;  %v4298_v9 = vsel %vm4265_vm6, %v4296_v52, %v4297_v14  ;;  %v4479_v18 = vsel %vm4446_vm7, %v4477_v50, %v4478_v54 }
 0x22e   : > { %4971 = vrot.lane.b32.xlu0 %v4905_v27, %s13147_s22  ;;  %5098 = vst.msk [vmem:[#allocation3 + $0x4a] sm:$0xff] %vm225_vm1, %v4905_v27  ;;  %v4878_v20 = vmax.f32 %v4846_v30, %v15447_v10  ;;  %v4659_v41 = vsel %vm584_vm0, %v4657_v29, %v4658_v21  ;;  %v4811_v56 = vmax.f32 %v15264_v12, %v15273_v63  ;;  %v4126_v26 = vrot.slane %v15489_v49, 1 }
 0x22f   : > { %v3853_v14 = vadd.f32 %v3790_v13, %v15094_v40  ;;  %v15511_v61 = vmax.f32 %v4602_v4, %v4666_v47  ;;  %v4418_v51 = vmax.f32 %v4237_v42, %v4298_v9  ;;  %v3856_v54 = vadd.f32 %v12647_v17, %v15127_v46  ;;  %v15544_v17 = vld [vmem:[#allocation3 + $0xe0] sm:$0xff] }
 0x230   : > { %v4843_v38 = vmax.f32 %v4811_v56, %v15289_v43  ;;  %v4128_v35 = vrot.slane %v3990_v33, 1  ;;  %v4307_v45 = vrot.slane %v15489_v49, 2  ;;  %v4309_v40 = vrot.slane %v3990_v33, 2 }
 0x231   : > { %v3892_v22 = vadd.f32 %v15068_v7, %v3853_v14  ;;  %v4910_v21 = vmax.f32 %v4878_v20, %v15511_v61  ;;  %v4599_v1 = vmax.f32 %v4418_v51, %v4479_v18  ;;  %v3895_v12 = vadd.f32 %v15068_v7, %v3856_v54  ;;  %v3993_v14 = vld [vmem:[#allocation3 + $0xe8] sm:$0xf] }
 0x232   : > { %v4875_v48 = vmax.f32 %v4843_v38, %v15479_v60  ;;  %v4129_v46 = vsel %vm4084_vm5, %v4126_v26, %v4128_v35  ;;  %v4488_v13 = vrot.slane %v15489_v49, 3  ;;  %v4490_v53 = vrot.slane %v3990_v33, 3 }
 0x233   : > { %3956 = vst.msk [vmem:[#allocation3 + $0x152] sm:$0xff] %vm225_vm1, %v3892_v22  ;;  %3924 = vst.msk [vmem:[#allocation4 + $0x139] sm:$0xff] %vm225_vm1, %v3892_v22  ;;  %4981 = vrot.lane.b32.xlu1 %v4910_v21, %s13147_s22  ;;  %v15529_v6 = vmax.f32 %v4599_v1, %v4659_v41  ;;  %v4242_v55 = vmax.f32 %v15489_v49, %v4129_v46  ;;  %v4310_v25 = vsel %vm4265_vm6, %v4307_v45, %v4309_v40 }
 0x234   : > { %5103 = vst.msk [vmem:[#allocation3 + $0x82] sm:$0xff] %vm225_vm1, %v4910_v21  ;;  %3959 = vst.msk [vmem:[#allocation3 + $0x172] sm:$0xff] %vm225_vm1, %v3895_v12  ;;  %v4668_v39 = vrot.slane %v15489_v49, 4  ;;  %v4491_v15 = vsel %vm4446_vm7, %v4488_v13, %v4490_v53  ;;  %v4670_v47 = vrot.slane %v3990_v33, 4  ;;  %v4816_v52 = vmax.f32 %v15395_v11, %v15398_v19  ;;  %v12650_v11 = vpop.f32.mrf.mxu0 }
 0x235   : > { %3927 = vst.msk [vmem:[#allocation4 + $0x159] sm:$0xff] %vm225_vm1, %v3895_v12  ;;  %v4120_v50 = vrot.slane %v3985_v57, 1  ;;  %v4907_v27 = vmax.f32 %v4875_v48, %v15529_v6  ;;  %v4423_v30 = vmax.f32 %v4242_v55, %v4310_v25  ;;  %v4301_v0 = vrot.slane %v3985_v57, 2 }
 0x236   : > { %v4482_v29 = vrot.slane %v3985_v57, 3  ;;  %v4671_v4 = vsel %vm584_vm0, %v4668_v39, %v4670_v47  ;;  %v4848_v42 = vmax.f32 %v4816_v52, %v15447_v10  ;;  %v4662_v18 = vrot.slane %v3985_v57, 4 }
 0x237   : > { %v4122_v9 = vsel %vm4084_vm5, %v4120_v50, %v4121_v34  ;;  %4975 = vrot.lane.b32.xlu0 %v4907_v27, %s13147_s22  ;;  %5100 = vst.msk [vmem:[#allocation3 + $0x62] sm:$0xff] %vm225_vm1, %v4907_v27  ;;  %v4604_v33 = vmax.f32 %v4423_v30, %v4491_v15  ;;  %v4303_v41 = vsel %vm4265_vm6, %v4301_v0, %v4302_v37  ;;  %v4131_v21 = vrot.slane %v15544_v17, 1 }
 0x238   : > { %v4239_v20 = vmax.f32 %v3985_v57, %v4122_v9  ;;  %v4484_v56 = vsel %vm4446_vm7, %v4482_v29, %v4483_v58  ;;  %v4880_v51 = vmax.f32 %v4848_v42, %v15511_v61  ;;  %v4664_v34 = vsel %vm584_vm0, %v4662_v18, %v4663_v5  ;;  %v3988_v57 = vld [vmem:[#allocation3 + $0xc0] sm:$0xff]  ;;  %v15601_v9 = vld [vmem:[#allocation3 + $0xf8] sm:$0xff] }
 0x239   : > { %v4813_v54 = vmax.f32 %v15273_v63, %v15289_v43  ;;  %v3855_v38 = vadd.f32 %v3800_v59, %v15130_v16  ;;  %v15568_v22 = vmax.f32 %v4604_v33, %v4671_v4  ;;  %v3858_v37 = vadd.f32 %v12650_v11, %v15134_v62  ;;  %v3810_v59 = vpop.f32.mrf.mxu0 }
 0x23a   : > { %v4420_v35 = vmax.f32 %v4239_v20, %v4303_v41  ;;  %v4133_v12 = vrot.slane %v3993_v14, 1  ;;  %v4312_v31 = vrot.slane %v15544_v17, 2  ;;  %v4314_v16 = vrot.slane %v3993_v14, 2 }
 0x23b   : > { %v4845_v58 = vmax.f32 %v4813_v54, %v15479_v60  ;;  %v3894_v1 = vadd.f32 %v15068_v7, %v3855_v38  ;;  %v4912_v5 = vmax.f32 %v4880_v51, %v15568_v22  ;;  %v3897_v63 = vadd.f32 %v15068_v7, %v3858_v37 }
 0x23c   : > { %v4601_v40 = vmax.f32 %v4420_v35, %v4484_v56  ;;  %v4134_v62 = vsel %vm4084_vm5, %v4131_v21, %v4133_v12  ;;  %v4493_v46 = vrot.slane %v15544_v17, 3  ;;  %v4495_v53 = vrot.slane %v3993_v14, 3 }
 0x23d   : > { %v4877_v48 = vmax.f32 %v4845_v58, %v15529_v6  ;;  %3958 = vst.msk [vmem:[#allocation3 + $0x16a] sm:$0xff] %vm225_vm1, %v3894_v1  ;;  %3926 = vst.msk [vmem:[#allocation4 + $0x151] sm:$0xff] %vm225_vm1, %v3894_v1  ;;  %4985 = vrot.lane.b32.xlu1 %v4912_v5, %s13147_s22  ;;  %v4244_v25 = vmax.f32 %v15544_v17, %v4134_v62  ;;  %v4315_v15 = vsel %vm4265_vm6, %v4312_v31, %v4314_v16 }
 0x23e   : > { %5105 = vst.msk [vmem:[#allocation3 + $0x9a] sm:$0xff] %vm225_vm1, %v4912_v5  ;;  %v15586_v55 = vmax.f32 %v4601_v40, %v4664_v34  ;;  %3961 = vst.msk [vmem:[#allocation3 + $0x18a] sm:$0xff] %vm225_vm1, %v3897_v63  ;;  %v4673_v47 = vrot.slane %v15544_v17, 4  ;;  %v4496_v52 = vsel %vm4446_vm7, %v4493_v46, %v4495_v53  ;;  %v4675_v50 = vrot.slane %v3993_v14, 4  ;;  %v3996_v34 = vld [vmem:[#allocation3 + $0x100] sm:$0xf] }
 0x23f   : > { %3929 = vst.msk [vmem:[#allocation4 + $0x171] sm:$0xff] %vm225_vm1, %v3897_v63  ;;  %v4818_v27 = vmax.f32 %v15398_v19, %v15447_v10  ;;  %v4125_v30 = vrot.slane %v3988_v57, 1  ;;  %v4425_v29 = vmax.f32 %v4244_v25, %v4315_v15  ;;  %v4306_v4 = vrot.slane %v3988_v57, 2  ;;  %v12653_v19 = vpop.f32.mrf.mxu0  ;;  %v3991_v63 = vld [vmem:[#allocation3 + $0xd8] sm:$0xff] }
 0x240   : > { %v4909_v0 = vmax.f32 %v4877_v48, %v15586_v55  ;;  %v4487_v42 = vrot.slane %v3988_v57, 3  ;;  %v4676_v18 = vsel %vm584_vm0, %v4673_v47, %v4675_v50  ;;  %v4667_v20 = vrot.slane %v3988_v57, 4 }
 0x241   : > { %v4850_v11 = vmax.f32 %v4818_v27, %v15511_v61  ;;  %v4127_v33 = vsel %vm4084_vm5, %v4125_v30, %v4126_v26  ;;  %v4606_v41 = vmax.f32 %v4425_v29, %v4496_v52  ;;  %v4308_v14 = vsel %vm4265_vm6, %v4306_v4, %v4307_v45  ;;  %v3820_v4 = vpop.f32.mrf.mxu0 }
 0x242   : > { %5102 = vst.msk [vmem:[#allocation3 + $0x7a] sm:$0xff] %vm225_vm1, %v4909_v0  ;;  %4979 = vrot.lane.b32.xlu0 %v4909_v0, %s13147_s22  ;;  %v4241_v56 = vmax.f32 %v3988_v57, %v4127_v33  ;;  %v4489_v51 = vsel %vm4446_vm7, %v4487_v42, %v4488_v13  ;;  %v4669_v26 = vsel %vm584_vm0, %v4667_v20, %v4668_v39  ;;  %v4136_v1 = vrot.slane %v15601_v9, 1  ;;  %v15658_v42 = vld [vmem:[#allocation3 + $0x110] sm:$0xff]  ;;  %v3999_v20 = vld [vmem:[#allocation3 + $0x118] sm:$0xf] }
 0x243   : > { %v4882_v54 = vmax.f32 %v4850_v11, %v15568_v22  ;;  %v4815_v38 = vmax.f32 %v15289_v43, %v15479_v60  ;;  %v3857_v35 = vadd.f32 %v3810_v59, %v15136_v8  ;;  %v15625_v37 = vmax.f32 %v4606_v41, %v4676_v18 }
 0x244   : > { %v4422_v58 = vmax.f32 %v4241_v56, %v4308_v14  ;;  %v3860_v45 = vadd.f32 %v12653_v19, %v15147_v2  ;;  %v4138_v5 = vrot.slane %v3996_v34, 1  ;;  %v4317_v49 = vrot.slane %v15601_v9, 2 }
 0x245   : > { %v4847_v13 = vmax.f32 %v4815_v38, %v15529_v6  ;;  %v3896_v12 = vadd.f32 %v15068_v7, %v3857_v35  ;;  %v4914_v39 = vmax.f32 %v4882_v54, %v15625_v37  ;;  %v4319_v8 = vrot.slane %v3996_v34, 2 }
 0x246   : > { %v4603_v40 = vmax.f32 %v4422_v58, %v4489_v51  ;;  %v3899_v43 = vadd.f32 %v15068_v7, %v3860_v45  ;;  %v4139_v2 = vsel %vm4084_vm5, %v4136_v1, %v4138_v5  ;;  %v4498_v57 = vrot.slane %v15601_v9, 3  ;;  %v3994_v5 = vld [vmem:[#allocation3 + $0xf0] sm:$0xff] }
 0x247   : > { %v4879_v16 = vmax.f32 %v4847_v13, %v15586_v55  ;;  %3960 = vst.msk [vmem:[#allocation3 + $0x182] sm:$0xff] %vm225_vm1, %v3896_v12  ;;  %3928 = vst.msk [vmem:[#allocation4 + $0x169] sm:$0xff] %vm225_vm1, %v3896_v12  ;;  %v4500_v48 = vrot.slane %v3996_v34, 3  ;;  %4989 = vrot.lane.b32.xlu1 %v4914_v39, %s13147_s22  ;;  %v4246_v62 = vmax.f32 %v15601_v9, %v4139_v2  ;;  %v4678_v59 = vrot.slane %v15601_v9, 4 }
 0x248   : > { %5107 = vst.msk [vmem:[#allocation3 + $0xb2] sm:$0xff] %vm225_vm1, %v4914_v39  ;;  %v15643_v7 = vmax.f32 %v4603_v40, %v4669_v26  ;;  %3963 = vst.msk [vmem:[#allocation3 + $0x1a2] sm:$0xff] %vm225_vm1, %v3899_v43  ;;  %v4320_v53 = vsel %vm4265_vm6, %v4317_v49, %v4319_v8  ;;  %v4680_v15 = vrot.slane %v3996_v34, 4  ;;  %v4820_v52 = vmax.f32 %v15447_v10, %v15511_v61 }
 0x249   : > { %3931 = vst.msk [vmem:[#allocation4 + $0x189] sm:$0xff] %vm225_vm1, %v3899_v43  ;;  %v4501_v25 = vsel %vm4446_vm7, %v4498_v57, %v4500_v48  ;;  %v4130_v50 = vrot.slane %v3991_v63, 1  ;;  %v4427_v30 = vmax.f32 %v4246_v62, %v4320_v53  ;;  %v4311_v0 = vrot.slane %v3991_v63, 2 }
 0x24a   : > { %v4911_v27 = vmax.f32 %v4879_v16, %v15643_v7  ;;  %v4492_v29 = vrot.slane %v3991_v63, 3  ;;  %v4681_v18 = vsel %vm584_vm0, %v4678_v59, %v4680_v15  ;;  %v4852_v11 = vmax.f32 %v4820_v52, %v15568_v22 }
 0x24b   : > { %v4132_v33 = vsel %vm4084_vm5, %v4130_v50, %v4131_v21  ;;  %v4672_v10 = vrot.slane %v3991_v63, 4  ;;  %v4608_v19 = vmax.f32 %v4427_v30, %v4501_v25  ;;  %v4313_v56 = vsel %vm4265_vm6, %v4311_v0, %v4312_v31  ;;  %v3997_v0 = vld [vmem:[#allocation3 + $0x108] sm:$0xff] }
 0x24c   : > { %5104 = vst.msk [vmem:[#allocation3 + $0x92] sm:$0xff] %vm225_vm1, %v4911_v27  ;;  %4983 = vrot.lane.b32.xlu0 %v4911_v27, %s13147_s22  ;;  %v4243_v41 = vmax.f32 %v3991_v63, %v4132_v33  ;;  %v4494_v14 = vsel %vm4446_vm7, %v4492_v29, %v4493_v46  ;;  %v4884_v51 = vmax.f32 %v4852_v11, %v15625_v37  ;;  %v4141_v31 = vrot.slane %v15658_v42, 1  ;;  %v13135_v46 = vld [vmem:[%s18935_s2] ss:$0 sm:$0xff] }
 0x24d   : > { %v4674_v21 = vsel %vm584_vm0, %v4672_v10, %v4673_v47  ;;  %v4817_v34 = vmax.f32 %v15479_v60, %v15529_v6  ;;  %v3859_v54 = vadd.f32 %v3820_v4, %v15157_v3  ;;  %v15682_v26 = vmax.f32 %v4608_v19, %v4681_v18 }
 0x24e   : > { %v4424_v38 = vmax.f32 %v4243_v41, %v4313_v56  ;;  %v4143_v35 = vrot.slane %v3999_v20, 1  ;;  %v4322_v47 = vrot.slane %v15658_v42, 2  ;;  %v4324_v45 = vrot.slane %v3999_v20, 2 }
 0x24f   : > { %v4849_v58 = vmax.f32 %v4817_v34, %v15586_v55  ;;  %v3898_v17 = vadd.f32 %v13135_v46, %v3859_v54  ;;  %v4916_v60 = vmax.f32 %v4884_v51, %v15682_v26  ;;  %v4503_v12 = vrot.slane %v15658_v42, 3  ;;  %v15731_v34 = vld [vmem:[#allocation3 + $0x38] sm:$0xff] }
 0x250   : > { %v4605_v13 = vmax.f32 %v4424_v38, %v4494_v14  ;;  %v4144_v3 = vsel %vm4084_vm5, %v4141_v31, %v4143_v35  ;;  %v4325_v43 = vsel %vm4265_vm6, %v4322_v47, %v4324_v45  ;;  %v4505_v8 = vrot.slane %v3999_v20, 3  ;;  %v15740_v38 = vld [vmem:[#allocation3 + $0x50] sm:$0xff]  ;;  %v15744_v45 = vld [vmem:[#allocation3 + $0x60] sm:$0xff] }
 0x251   : > { %v4881_v39 = vmax.f32 %v4849_v58, %v15643_v7  ;;  %3962 = vst.msk [vmem:[#allocation3 + $0x19a] sm:$0xff] %vm225_vm1, %v3898_v17  ;;  %3930 = vst.msk [vmem:[#allocation4 + $0x181] sm:$0xff] %vm225_vm1, %v3898_v17  ;;  %v4248_v40 = vmax.f32 %v15658_v42, %v4144_v3  ;;  %4993 = vrot.lane.b32.xlu1 %v4916_v60, %s13147_s22  ;;  %v4683_v16 = vrot.slane %v15658_v42, 4  ;;  %v4685_v2 = vrot.slane %v3999_v20, 4 }
 0x252   : > { %5109 = vst.msk [vmem:[#allocation3 + $0xca] sm:$0xff] %vm225_vm1, %v4916_v60  ;;  %v15700_v63 = vmax.f32 %v4605_v13, %v4674_v21  ;;  %v4822_v48 = vmax.f32 %v15511_v61, %v15568_v22  ;;  %v4506_v53 = vsel %vm4446_vm7, %v4503_v12, %v4505_v8  ;;  %v4135_v25 = vrot.slane %v3994_v5, 1  ;;  %v15729_v21 = vld [vmem:[#allocation3 + $0x30] sm:$0xff]  ;;  %v15746_v60 = vld [vmem:[#allocation3 + $0x68] sm:$0xff] }
 0x253   : > { %v4429_v62 = vmax.f32 %v4248_v40, %v4325_v43  ;;  %v4316_v15 = vrot.slane %v3994_v5, 2  ;;  %v4686_v50 = vsel %vm584_vm0, %v4683_v16, %v4685_v2  ;;  %v4497_v30 = vrot.slane %v3994_v5, 3 }
 0x254   : > { %v4913_v52 = vmax.f32 %v4881_v39, %v15700_v63  ;;  %v4854_v27 = vmax.f32 %v4822_v48, %v15625_v37  ;;  %v4137_v4 = vsel %vm4084_vm5, %v4135_v25, %v4136_v1  ;;  %v4677_v42 = vrot.slane %v3994_v5, 4 }
 0x255   : > { %v4610_v29 = vmax.f32 %v4429_v62, %v4506_v53  ;;  %v4318_v61 = vsel %vm4265_vm6, %v4316_v15, %v4317_v49  ;;  %v4245_v11 = vmax.f32 %v3994_v5, %v4137_v4  ;;  %v4499_v33 = vsel %vm4446_vm7, %v4497_v30, %v4498_v57 }
 0x256   : > { %5106 = vst.msk [vmem:[#allocation3 + $0xaa] sm:$0xff] %vm225_vm1, %v4913_v52  ;;  %4987 = vrot.lane.b32.xlu0 %v4913_v52, %s13147_s22  ;;  %v4886_v18 = vmax.f32 %v4854_v27, %v15682_v26  ;;  %v4819_v10 = vmax.f32 %v15529_v6, %v15586_v55  ;;  %v4679_v49 = vsel %vm584_vm0, %v4677_v42, %v4678_v59  ;;  %v4140_v20 = vrot.slane %v3997_v0, 1  ;;  %v15738_v59 = vld [vmem:[#allocation3 + $0x48] sm:$0xff] }
 0x257   : > { %v15723_v1 = vmax.f32 %v4610_v29, %v4686_v50  ;;  %v4321_v19 = vrot.slane %v3997_v0, 2  ;;  %v4426_v41 = vmax.f32 %v4245_v11, %v4318_v61  ;;  %v4502_v14 = vrot.slane %v3997_v0, 3 }
 0x258   : > { %v4851_v56 = vmax.f32 %v4819_v10, %v15643_v7  ;;  %v4682_v51 = vrot.slane %v3997_v0, 4  ;;  %v4142_v6 = vsel %vm4084_vm5, %v4140_v20, %v4141_v31  ;;  %v4821_v9 = vmax.f32 %v15586_v55, %v15643_v7 }
 0x259   : > { %v4918_v57 = vmax.f32 %v4886_v18, %v15723_v1  ;;  %v4323_v54 = vsel %vm4265_vm6, %v4321_v19, %v4322_v47  ;;  %v4607_v35 = vmax.f32 %v4426_v41, %v4499_v33  ;;  %v4247_v46 = vmax.f32 %v3997_v0, %v4142_v6 }
 0x25a   : > { %v4883_v58 = vmax.f32 %v4851_v56, %v15700_v63  ;;  %v4504_v17 = vsel %vm4446_vm7, %v4502_v14, %v4503_v12  ;;  %v4684_v55 = vsel %vm584_vm0, %v4682_v51, %v4683_v16  ;;  %v4853_v31 = vmax.f32 %v4821_v9, %v15700_v63 }
 0x25b   : > { %5111 = vst.msk [vmem:[#allocation3 + $0xe2] sm:$0xff] %vm225_vm1, %v4918_v57  ;;  %4997 = vrot.lane.b32.xlu1 %v4918_v57, %s13147_s22  ;;  %v5258_v47 = vrot.slane %v15729_v21, 1  ;;  %v5259_v13 = vrot.slane %v15731_v34, 1  ;;  %v15754_v3 = vmax.f32 %v4607_v35, %v4679_v49  ;;  %v4428_v5 = vmax.f32 %v4247_v46, %v4323_v54  ;;  %v15805_v54 = vld [vmem:[#allocation3 + $0x128] sm:$0xff] }
 0x25c   : > { %v5263_v12 = vrot.slane %v15738_v59, 1  ;;  %v5264_v39 = vrot.slane %v15740_v38, 1  ;;  %v5268_v43 = vrot.slane %v15744_v45, 1  ;;  %v5269_v8 = vrot.slane %v15746_v60, 1 }
 0x25d   : > { %v5260_v40 = vsel %vm4084_vm5, %v5258_v47, %v5259_v13  ;;  %v5438_v16 = vrot.slane %v15729_v21, 2  ;;  %v4915_v2 = vmax.f32 %v4883_v58, %v15754_v3  ;;  %v4609_v48 = vmax.f32 %v4428_v5, %v4504_v17  ;;  %v4000_v17 = vld [vmem:[#allocation3 + $0x120] sm:$0xff] }
 0x25e   : > { %v4885_v62 = vmax.f32 %v4853_v31, %v15754_v3  ;;  %v5265_v53 = vsel %vm4084_vm5, %v5263_v12, %v5264_v39  ;;  %v5270_v25 = vsel %vm4084_vm5, %v5268_v43, %v5269_v8  ;;  %v5392_v15 = vmax.f32 %v15729_v21, %v5260_v40 }
 0x25f   : > { %v5394_v52 = vmax.f32 %v15738_v59, %v5265_v53  ;;  %v5439_v50 = vrot.slane %v15731_v34, 2  ;;  %5108 = vst.msk [vmem:[#allocation3 + $0xc2] sm:$0xff] %vm225_vm1, %v4915_v2  ;;  %4991 = vrot.lane.b32.xlu0 %v4915_v2, %s13147_s22  ;;  %v15777_v27 = vmax.f32 %v4609_v48, %v4684_v55  ;;  %v5396_v30 = vmax.f32 %v15744_v45, %v5270_v25 }
 0x260   : > { %v5443_v0 = vrot.slane %v15738_v59, 2  ;;  %v5444_v29 = vrot.slane %v15740_v38, 2  ;;  %v5448_v61 = vrot.slane %v15744_v45, 2  ;;  %v5449_v42 = vrot.slane %v15746_v60, 2 }
 0x261   : > { %v5440_v4 = vsel %vm4265_vm6, %v5438_v16, %v5439_v50  ;;  %v5618_v18 = vrot.slane %v15729_v21, 3  ;;  %v4917_v11 = vmax.f32 %v4885_v62, %v15777_v27  ;;  %v5619_v49 = vrot.slane %v15731_v34, 3 }
 0x262   : > { %v5445_v33 = vsel %vm4265_vm6, %v5443_v0, %v5444_v29  ;;  %v5572_v10 = vmax.f32 %v5392_v15, %v5440_v4  ;;  %v5450_v20 = vsel %vm4265_vm6, %v5448_v61, %v5449_v42  ;;  %v5623_v41 = vrot.slane %v15738_v59, 3  ;;  %v5136_v15 = vld [vmem:[#allocation3 + $0x40] sm:$0xf]  ;;  %v5139_v61 = vld [vmem:[#allocation3 + $0x58] sm:$0xf] }
 0x263   : > { %v5574_v19 = vmax.f32 %v5394_v52, %v5445_v33  ;;  %v5624_v56 = vrot.slane %v15740_v38, 3  ;;  %5110 = vst.msk [vmem:[#allocation3 + $0xda] sm:$0xff] %vm225_vm1, %v4917_v11  ;;  %4995 = vrot.lane.b32.xlu0 %v4917_v11, %s13147_s22  ;;  %v5576_v14 = vmax.f32 %v5396_v30, %v5450_v20  ;;  %v5620_v51 = vsel %vm4446_vm7, %v5618_v18, %v5619_v49  ;;  %v5142_v18 = vld [vmem:[#allocation3 + $0x70] sm:$0xf] }
 0x264   : > { %v5628_v57 = vrot.slane %v15744_v45, 3  ;;  %v5629_v6 = vrot.slane %v15746_v60, 3  ;;  %v5752_v35 = vmax.f32 %v5572_v10, %v5620_v51  ;;  %v5798_v58 = vrot.slane %v15729_v21, 4 }
 0x265   : > { %v5625_v9 = vsel %vm4446_vm7, %v5623_v41, %v5624_v56  ;;  %v5799_v46 = vrot.slane %v15731_v34, 4  ;;  %v5803_v47 = vrot.slane %v15738_v59, 4  ;;  %v5804_v5 = vrot.slane %v15740_v38, 4 }
 0x266   : > { %v5630_v55 = vsel %vm4446_vm7, %v5628_v57, %v5629_v6  ;;  %v5754_v31 = vmax.f32 %v5574_v19, %v5625_v9  ;;  %v5808_v43 = vrot.slane %v15744_v45, 4  ;;  %v5809_v21 = vrot.slane %v15746_v60, 4 }
 0x267   : > { %v5756_v12 = vmax.f32 %v5576_v14, %v5630_v55  ;;  %v5800_v40 = vsel %vm584_vm0, %v5798_v58, %v5799_v46  ;;  %v5805_v16 = vsel %vm584_vm0, %v5803_v47, %v5804_v5  ;;  %v4145_v48 = vrot.slane %v4000_v17, 1 }
 0x268   : > { %v15825_v2 = vmax.f32 %v5752_v35, %v5800_v40  ;;  %v4146_v59 = vrot.slane %v15805_v54, 1  ;;  %v5810_v62 = vsel %vm584_vm0, %v5808_v43, %v5809_v21  ;;  %v15831_v53 = vmax.f32 %v5754_v31, %v5805_v16 }
 0x269   : > { %v4326_v25 = vrot.slane %v4000_v17, 2  ;;  %v4327_v45 = vrot.slane %v15805_v54, 2  ;;  %v15834_v52 = vmax.f32 %v5756_v12, %v5810_v62  ;;  %v4507_v4 = vrot.slane %v4000_v17, 3 }
 0x26a   : > { %v6000_v30 = vmax.f32 %v5968_v36, %v15825_v2  ;;  %v4147_v0 = vsel %vm4084_vm5, %v4145_v48, %v4146_v59  ;;  %v4508_v10 = vrot.slane %v15805_v54, 3  ;;  %v4687_v20 = vrot.slane %v4000_v17, 4 }
 0x26b   : > { %v4249_v11 = vmax.f32 %v4000_v17, %v4147_v0  ;;  %v4328_v33 = vsel %vm4265_vm6, %v4326_v25, %v4327_v45  ;;  %v4688_v23 = vrot.slane %v15805_v54, 4  ;;  %v4823_v36 = vmax.f32 %v15643_v7, %v15700_v63 }
 0x26c   : > { %v6032_v19 = vmax.f32 %v6000_v30, %v15831_v53  ;;  %v5261_v41 = vrot.slane %v5136_v15, 1  ;;  %v4509_v51 = vsel %vm4446_vm7, %v4507_v4, %v4508_v10  ;;  %v5266_v57 = vrot.slane %v5139_v61, 1 }
 0x26d   : > { %v4430_v14 = vmax.f32 %v4249_v11, %v4328_v33  ;;  %v5271_v9 = vrot.slane %v5142_v18, 1  ;;  %v4689_v58 = vsel %vm584_vm0, %v4687_v20, %v4688_v23  ;;  %v4855_v17 = vmax.f32 %v4823_v36, %v15754_v3  ;;  %v4002_v36 = vld [vmem:[#allocation3 + $0x130] sm:$0xf] }
 0x26e   : > { %v6064_v35 = vmax.f32 %v6032_v19, %v15834_v52  ;;  %v5262_v7 = vsel %vm4084_vm5, %v5259_v13, %v5261_v41  ;;  %v5267_v31 = vsel %vm4084_vm5, %v5264_v39, %v5266_v57  ;;  %v5441_v16 = vrot.slane %v5136_v15, 2 }
 0x26f   : > { %v4611_v55 = vmax.f32 %v4430_v14, %v4509_v51  ;;  %v5272_v47 = vsel %vm4084_vm5, %v5269_v8, %v5271_v9  ;;  %v5393_v12 = vmax.f32 %v15731_v34, %v5262_v7  ;;  %v4887_v40 = vmax.f32 %v4855_v17, %v15777_v27 }
 0x270   : > { %6128 = vrot.lane.b32.xlu1 %v6064_v35, %s13148_s25  ;;  %6257 = vst.msk [vmem:[#allocation3 + $0x32] sm:$0xff] %vm225_vm1, %v6064_v35  ;;  %v5395_v13 = vmax.f32 %v15740_v38, %v5267_v31  ;;  %v5397_v43 = vmax.f32 %v15746_v60, %v5272_v47  ;;  %v5446_v39 = vrot.slane %v5139_v61, 2  ;;  %v5451_v62 = vrot.slane %v5142_v18, 2  ;;  %v5143_v31 = vld [vmem:[#allocation3 + $0x78] sm:$0xff] }
 0x271   : > { %v15874_v48 = vmax.f32 %v4611_v55, %v4689_v58  ;;  %v5621_v25 = vrot.slane %v5136_v15, 3  ;;  %v5442_v8 = vsel %vm4265_vm6, %v5439_v50, %v5441_v16  ;;  %v5626_v30 = vrot.slane %v5139_v61, 3 }
 0x272   : > { %v5631_v0 = vrot.slane %v5142_v18, 3  ;;  %v5801_v4 = vrot.slane %v5136_v15, 4  ;;  %v5447_v33 = vsel %vm4265_vm6, %v5444_v29, %v5446_v39  ;;  %v5452_v20 = vsel %vm4265_vm6, %v5449_v42, %v5451_v62 }
 0x273   : > { %v4919_v11 = vmax.f32 %v4887_v40, %v15874_v48  ;;  %v5573_v19 = vmax.f32 %v5393_v12, %v5442_v8  ;;  %v5575_v41 = vmax.f32 %v5395_v13, %v5447_v33  ;;  %v5577_v14 = vmax.f32 %v5397_v43, %v5452_v20 }
 0x274   : > { %v5622_v50 = vsel %vm4446_vm7, %v5619_v49, %v5621_v25  ;;  %v5627_v15 = vsel %vm4446_vm7, %v5624_v56, %v5626_v30  ;;  %v5632_v29 = vsel %vm4446_vm7, %v5629_v6, %v5631_v0  ;;  %v5802_v51 = vsel %vm584_vm0, %v5799_v46, %v5801_v4  ;;  %v5145_v25 = vld [vmem:[#allocation3 + $0x88] sm:$0xf] }
 0x275   : > { %5112 = vst.msk [vmem:[#allocation3 + $0xf2] sm:$0xff] %vm225_vm1, %v4919_v11  ;;  %4999 = vrot.lane.b32.xlu0 %v4919_v11, %s13147_s22  ;;  %v5753_v42 = vmax.f32 %v5573_v19, %v5622_v50  ;;  %v5806_v57 = vrot.slane %v5139_v61, 4  ;;  %v5755_v9 = vmax.f32 %v5575_v41, %v5627_v15  ;;  %v5757_v49 = vmax.f32 %v5577_v14, %v5632_v29  ;;  %v4003_v15 = vld [vmem:[#allocation3 + $0x138] sm:$0xff]  ;;  %v4004_v29 = vld [vmem:[#allocation3 + $0x140] sm:$0xff] }
 0x276   : > { %v5811_v35 = vrot.slane %v5142_v18, 4  ;;  %v4148_v58 = vrot.slane %v4002_v36, 1  ;;  %v4329_v7 = vrot.slane %v4002_v36, 2  ;;  %v4510_v55 = vrot.slane %v4002_v36, 3  ;;  %v5144_v18 = vld [vmem:[#allocation3 + $0x80] sm:$0xff] }
 0x277   : > { %v5807_v56 = vsel %vm584_vm0, %v5804_v5, %v5806_v57  ;;  %v15903_v17 = vmax.f32 %v5753_v42, %v5802_v51  ;;  %v4690_v61 = vrot.slane %v4002_v36, 4  ;;  %v4824_v12 = vmax.f32 %v15568_v22, %v15625_v37 }
 0x278   : > { %v5812_v34 = vsel %vm584_vm0, %v5809_v21, %v5811_v35  ;;  %v15908_v6 = vmax.f32 %v5755_v9, %v5807_v56  ;;  %v4149_v46 = vsel %vm4084_vm5, %v4146_v59, %v4148_v58  ;;  %v4330_v60 = vsel %vm4265_vm6, %v4327_v45, %v4329_v7 }
 0x279   : > { %v15913_v38 = vmax.f32 %v5757_v49, %v5812_v34  ;;  %v6001_v5 = vmax.f32 %v5969_v24, %v15903_v17  ;;  %v4250_v47 = vmax.f32 %v15805_v54, %v4149_v46  ;;  %v4511_v21 = vsel %vm4446_vm7, %v4508_v10, %v4510_v55 }
 0x27a   : > { %v4691_v59 = vsel %vm584_vm0, %v4688_v23, %v4690_v61  ;;  %v5273_v40 = vrot.slane %v5143_v31, 1  ;;  %v5274_v13 = vrot.slane %v5144_v18, 1  ;;  %v5453_v43 = vrot.slane %v5143_v31, 2 }
 0x27b   : > { %v6033_v28 = vmax.f32 %v6001_v5, %v15908_v6  ;;  %v4431_v24 = vmax.f32 %v4250_v47, %v4330_v60  ;;  %v4856_v16 = vmax.f32 %v4824_v12, %v15682_v26  ;;  %v5454_v45 = vrot.slane %v5144_v18, 2 }
 0x27c   : > { %v5633_v39 = vrot.slane %v5143_v31, 3  ;;  %v5634_v62 = vrot.slane %v5144_v18, 3  ;;  %v5275_v23 = vsel %vm4084_vm5, %v5273_v40, %v5274_v13  ;;  %v5813_v8 = vrot.slane %v5143_v31, 4 }
 0x27d   : > { %v6065_v10 = vmax.f32 %v6033_v28, %v15913_v38  ;;  %v4612_v54 = vmax.f32 %v4431_v24, %v4511_v21  ;;  %v4888_v22 = vmax.f32 %v4856_v16, %v15723_v1  ;;  %v5398_v30 = vmax.f32 %v5143_v31, %v5275_v23 }
 0x27e   : > { %v5455_v0 = vsel %vm4265_vm6, %v5453_v43, %v5454_v45  ;;  %v5635_v4 = vsel %vm4446_vm7, %v5633_v39, %v5634_v62  ;;  %v5814_v33 = vrot.slane %v5144_v18, 4  ;;  %v5970_v20 = vmax.f32 %v15117_v44, %v15825_v2 }
 0x27f   : > { %6258 = vst.msk [vmem:[#allocation3 + $0x3a] sm:$0xff] %vm225_vm1, %v6065_v10  ;;  %6130 = vrot.lane.b32.xlu1 %v6065_v10, %s13148_s25  ;;  %v15940_v11 = vmax.f32 %v4612_v54, %v4691_v59  ;;  %v5276_v19 = vrot.slane %v5145_v25, 1  ;;  %v5578_v36 = vmax.f32 %v5398_v30, %v5455_v0  ;;  %v5456_v41 = vrot.slane %v5145_v25, 2  ;;  %v4005_v59 = vld [vmem:[#allocation3 + $0x148] sm:$0xf] }
 0x280   : > { %v5636_v14 = vrot.slane %v5145_v25, 3  ;;  %v5816_v50 = vrot.slane %v5145_v25, 4  ;;  %v5815_v51 = vsel %vm584_vm0, %v5813_v8, %v5814_v33  ;;  %v6002_v57 = vmax.f32 %v5970_v20, %v15831_v53  ;;  %v5147_v20 = vld [vmem:[#allocation3 + $0x98] sm:$0xff] }
 0x281   : > { %v4920_v42 = vmax.f32 %v4888_v22, %v15940_v11  ;;  %v5277_v9 = vsel %vm4084_vm5, %v5274_v13, %v5276_v19  ;;  %v5758_v49 = vmax.f32 %v5578_v36, %v5635_v4  ;;  %v5457_v58 = vsel %vm4265_vm6, %v5454_v45, %v5456_v41  ;;  %v5146_v22 = vld [vmem:[#allocation3 + $0x90] sm:$0xff] }
 0x282   : > { %v5399_v35 = vmax.f32 %v5144_v18, %v5277_v9  ;;  %v5637_v44 = vsel %vm4446_vm7, %v5634_v62, %v5636_v14  ;;  %v6034_v56 = vmax.f32 %v6002_v57, %v15834_v52  ;;  %v5817_v7 = vsel %vm584_vm0, %v5814_v33, %v5816_v50 }
 0x283   : > { %5113 = vst.msk [vmem:[#allocation3 + $0xfa] sm:$0xff] %vm225_vm1, %v4920_v42  ;;  %5001 = vrot.lane.b32.xlu1 %v4920_v42, %s13147_s22  ;;  %v5971_v55 = vmax.f32 %v15155_v32, %v15903_v17  ;;  %v4150_v31 = vrot.slane %v4003_v15, 1  ;;  %v15956_v34 = vmax.f32 %v5758_v49, %v5815_v51  ;;  %v4151_v61 = vrot.slane %v4004_v29, 1 }
 0x284   : > { %v5579_v46 = vmax.f32 %v5399_v35, %v5457_v58  ;;  %v4331_v18 = vrot.slane %v4003_v15, 2  ;;  %v4332_v47 = vrot.slane %v4004_v29, 2  ;;  %v4512_v60 = vrot.slane %v4003_v15, 3 }
 0x285   : > { %v6003_v5 = vmax.f32 %v5971_v55, %v15908_v6  ;;  %v4513_v21 = vrot.slane %v4004_v29, 3  ;;  %v6066_v12 = vmax.f32 %v6034_v56, %v15956_v34  ;;  %v4152_v28 = vsel %vm4084_vm5, %v4150_v31, %v4151_v61  ;;  %v5148_v56 = vld [vmem:[#allocation3 + $0xa0] sm:$0xf] }
 0x286   : > { %v5759_v40 = vmax.f32 %v5579_v46, %v5637_v44  ;;  %v4692_v24 = vrot.slane %v4003_v15, 4  ;;  %v4251_v13 = vmax.f32 %v4003_v15, %v4152_v28  ;;  %v4333_v43 = vsel %vm4265_vm6, %v4331_v18, %v4332_v47 }
 0x287   : > { %v6035_v32 = vmax.f32 %v6003_v5, %v15913_v38  ;;  %v4514_v16 = vsel %vm4446_vm7, %v4512_v60, %v4513_v21  ;;  %6132 = vrot.lane.b32.xlu0 %v6066_v12, %s13148_s25  ;;  %6259 = vst.msk [vmem:[#allocation3 + $0x4a] sm:$0xff] %vm225_vm1, %v6066_v12  ;;  %v4693_v39 = vrot.slane %v4004_v29, 4  ;;  %v4825_v62 = vmax.f32 %v15700_v63, %v15754_v3 }
 0x288   : > { %v15966_v45 = vmax.f32 %v5759_v40, %v5817_v7  ;;  %v4153_v25 = vrot.slane %v4005_v59, 1  ;;  %v4432_v10 = vmax.f32 %v4251_v13, %v4333_v43  ;;  %v4334_v54 = vrot.slane %v4005_v59, 2  ;;  %v4007_v13 = vld [vmem:[#allocation3 + $0x158] sm:$0xff] }
 0x289   : > { %v4515_v23 = vrot.slane %v4005_v59, 3  ;;  %v4695_v8 = vrot.slane %v4005_v59, 4  ;;  %v4694_v0 = vsel %vm584_vm0, %v4692_v24, %v4693_v39  ;;  %v4857_v4 = vmax.f32 %v4825_v62, %v15777_v27 }
 0x28a   : > { %v6067_v30 = vmax.f32 %v6035_v32, %v15966_v45  ;;  %v4154_v33 = vsel %vm4084_vm5, %v4151_v61, %v4153_v25  ;;  %v4613_v19 = vmax.f32 %v4432_v10, %v4514_v16  ;;  %v4335_v41 = vsel %vm4265_vm6, %v4332_v47, %v4334_v54  ;;  %v4006_v32 = vld [vmem:[#allocation3 + $0x150] sm:$0xff] }
 0x28b   : > { %v4252_v36 = vmax.f32 %v4004_v29, %v4154_v33  ;;  %v4516_v63 = vsel %vm4446_vm7, %v4513_v21, %v4515_v23  ;;  %v4889_v14 = vmax.f32 %v4857_v4, %v15874_v48  ;;  %v4696_v50 = vsel %vm584_vm0, %v4693_v39, %v4695_v8 }
 0x28c   : > { %6260 = vst.msk [vmem:[#allocation3 + $0x52] sm:$0xff] %vm225_vm1, %v6067_v30  ;;  %6134 = vrot.lane.b32.xlu1 %v6067_v30, %s13148_s25  ;;  %v4826_v15 = vmax.f32 %v15625_v37, %v15682_v26  ;;  %v5278_v42 = vrot.slane %v5146_v22, 1  ;;  %v15982_v51 = vmax.f32 %v4613_v19, %v4694_v0  ;;  %v5279_v29 = vrot.slane %v5147_v20, 1 }
 0x28d   : > { %v4433_v57 = vmax.f32 %v4252_v36, %v4335_v41  ;;  %v5458_v9 = vrot.slane %v5146_v22, 2  ;;  %v5459_v35 = vrot.slane %v5147_v20, 2  ;;  %v5638_v58 = vrot.slane %v5146_v22, 3 }
 0x28e   : > { %v4858_v49 = vmax.f32 %v4826_v15, %v15723_v1  ;;  %v5639_v44 = vrot.slane %v5147_v20, 3  ;;  %v4921_v7 = vmax.f32 %v4889_v14, %v15982_v51  ;;  %v5280_v31 = vsel %vm4084_vm5, %v5278_v42, %v5279_v29  ;;  %v4008_v14 = vld [vmem:[#allocation3 + $0x160] sm:$0xf] }
 0x28f   : > { %v4614_v55 = vmax.f32 %v4433_v57, %v4516_v63  ;;  %v5818_v46 = vrot.slane %v5146_v22, 4  ;;  %v5400_v61 = vmax.f32 %v5146_v22, %v5280_v31  ;;  %v5460_v18 = vsel %vm4265_vm6, %v5458_v9, %v5459_v35 }
 0x290   : > { %v4890_v37 = vmax.f32 %v4858_v49, %v15940_v11  ;;  %v5640_v5 = vsel %vm4446_vm7, %v5638_v58, %v5639_v44  ;;  %5114 = vst.msk [vmem:[#allocation3 + $0x10a] sm:$0xff] %vm225_vm1, %v4921_v7  ;;  %5003 = vrot.lane.b32.xlu0 %v4921_v7, %s13147_s22  ;;  %v5819_v60 = vrot.slane %v5147_v20, 4  ;;  %v5972_v21 = vmax.f32 %v15825_v2, %v15831_v53 }
 0x291   : > { %v15992_v47 = vmax.f32 %v4614_v55, %v4696_v50  ;;  %v5281_v59 = vrot.slane %v5148_v56, 1  ;;  %v5580_v12 = vmax.f32 %v5400_v61, %v5460_v18  ;;  %v5461_v40 = vrot.slane %v5148_v56, 2 }
 0x292   : > { %v5641_v28 = vrot.slane %v5148_v56, 3  ;;  %v5821_v24 = vrot.slane %v5148_v56, 4  ;;  %v5820_v16 = vsel %vm584_vm0, %v5818_v46, %v5819_v60  ;;  %v6004_v39 = vmax.f32 %v5972_v21, %v15834_v52  ;;  %v5150_v21 = vld [vmem:[#allocation3 + $0xb0] sm:$0xff] }
 0x293   : > { %v4922_v43 = vmax.f32 %v4890_v37, %v15992_v47  ;;  %v5282_v62 = vsel %vm4084_vm5, %v5279_v29, %v5281_v59  ;;  %v5760_v25 = vmax.f32 %v5580_v12, %v5640_v5  ;;  %v5462_v54 = vsel %vm4265_vm6, %v5459_v35, %v5461_v40  ;;  %v5149_v37 = vld [vmem:[#allocation3 + $0xa8] sm:$0xff] }
 0x294   : > { %v5401_v10 = vmax.f32 %v5147_v20, %v5282_v62  ;;  %v5642_v2 = vsel %vm4446_vm7, %v5639_v44, %v5641_v28  ;;  %v6036_v23 = vmax.f32 %v6004_v39, %v15956_v34  ;;  %v5822_v8 = vsel %vm584_vm0, %v5819_v60, %v5821_v24 }
 0x295   : > { %5115 = vst.msk [vmem:[#allocation3 + $0x112] sm:$0xff] %vm225_vm1, %v4922_v43  ;;  %5005 = vrot.lane.b32.xlu1 %v4922_v43, %s13147_s22  ;;  %v5973_v22 = vmax.f32 %v15903_v17, %v15908_v6  ;;  %v4155_v30 = vrot.slane %v4006_v32, 1  ;;  %v16008_v0 = vmax.f32 %v5760_v25, %v5820_v16  ;;  %v4156_v33 = vrot.slane %v4007_v13, 1 }
 0x296   : > { %v5581_v4 = vmax.f32 %v5401_v10, %v5462_v54  ;;  %v4336_v20 = vrot.slane %v4006_v32, 2  ;;  %v4337_v36 = vrot.slane %v4007_v13, 2  ;;  %v4517_v41 = vrot.slane %v4006_v32, 3 }
 0x297   : > { %v6005_v19 = vmax.f32 %v5973_v22, %v15913_v38  ;;  %v4518_v63 = vrot.slane %v4007_v13, 3  ;;  %v6068_v50 = vmax.f32 %v6036_v23, %v16008_v0  ;;  %v4157_v42 = vsel %vm4084_vm5, %v4155_v30, %v4156_v33  ;;  %v5151_v23 = vld [vmem:[#allocation3 + $0xb8] sm:$0xf] }
 0x298   : > { %v5761_v15 = vmax.f32 %v5581_v4, %v5642_v2  ;;  %v4697_v57 = vrot.slane %v4006_v32, 4  ;;  %v4253_v29 = vmax.f32 %v4006_v32, %v4157_v42  ;;  %v4338_v9 = vsel %vm4265_vm6, %v4336_v20, %v4337_v36 }
 0x299   : > { %v6037_v17 = vmax.f32 %v6005_v19, %v15966_v45  ;;  %v4519_v49 = vsel %vm4446_vm7, %v4517_v41, %v4518_v63  ;;  %6136 = vrot.lane.b32.xlu0 %v6068_v50, %s13148_s25  ;;  %6261 = vst.msk [vmem:[#allocation3 + $0x62] sm:$0xff] %vm225_vm1, %v6068_v50  ;;  %v4698_v58 = vrot.slane %v4007_v13, 4  ;;  %v4827_v44 = vmax.f32 %v15754_v3, %v15777_v27 }
 0x29a   : > { %v16018_v35 = vmax.f32 %v5761_v15, %v5822_v8  ;;  %v4158_v56 = vrot.slane %v4008_v14, 1  ;;  %v4434_v7 = vmax.f32 %v4253_v29, %v4338_v9  ;;  %v4339_v55 = vrot.slane %v4008_v14, 2  ;;  %v4010_v29 = vld [vmem:[#allocation3 + $0x170] sm:$0xff] }
 0x29b   : > { %v4520_v31 = vrot.slane %v4008_v14, 3  ;;  %v4700_v46 = vrot.slane %v4008_v14, 4  ;;  %v4699_v18 = vsel %vm584_vm0, %v4697_v57, %v4698_v58  ;;  %v4859_v5 = vmax.f32 %v4827_v44, %v15874_v48 }
 0x29c   : > { %v6069_v61 = vmax.f32 %v6037_v17, %v16018_v35  ;;  %v4159_v60 = vsel %vm4084_vm5, %v4156_v33, %v4158_v56  ;;  %v4615_v59 = vmax.f32 %v4434_v7, %v4519_v49  ;;  %v4340_v40 = vsel %vm4265_vm6, %v4337_v36, %v4339_v55  ;;  %v4009_v17 = vld [vmem:[#allocation3 + $0x168] sm:$0xff] }
 0x29d   : > { %v4254_v12 = vmax.f32 %v4007_v13, %v4159_v60  ;;  %v4521_v3 = vsel %vm4446_vm7, %v4518_v63, %v4520_v31  ;;  %v4891_v28 = vmax.f32 %v4859_v5, %v15982_v51  ;;  %v4701_v24 = vsel %vm584_vm0, %v4698_v58, %v4700_v46 }
 0x29e   : > { %6262 = vst.msk [vmem:[#allocation3 + $0x6a] sm:$0xff] %vm225_vm1, %v6069_v61  ;;  %6138 = vrot.lane.b32.xlu1 %v6069_v61, %s13148_s25  ;;  %v4828_v32 = vmax.f32 %v15682_v26, %v15723_v1  ;;  %v5283_v43 = vrot.slane %v5149_v37, 1  ;;  %v16034_v16 = vmax.f32 %v4615_v59, %v4699_v18  ;;  %v5284_v13 = vrot.slane %v5150_v21, 1 }
 0x29f   : > { %v4435_v39 = vmax.f32 %v4254_v12, %v4340_v40  ;;  %v5463_v62 = vrot.slane %v5149_v37, 2  ;;  %v5464_v10 = vrot.slane %v5150_v21, 2  ;;  %v5643_v54 = vrot.slane %v5149_v37, 3 }
 0x2a0   : > { %v4860_v25 = vmax.f32 %v4828_v32, %v15940_v11  ;;  %v5644_v2 = vrot.slane %v5150_v21, 3  ;;  %v4923_v8 = vmax.f32 %v4891_v28, %v16034_v16  ;;  %v5285_v30 = vsel %vm4084_vm5, %v5283_v43, %v5284_v13  ;;  %v4011_v28 = vld [vmem:[#allocation3 + $0x178] sm:$0xf] }
 0x2a1   : > { %v4616_v22 = vmax.f32 %v4435_v39, %v4521_v3  ;;  %v5823_v4 = vrot.slane %v5149_v37, 4  ;;  %v5402_v33 = vmax.f32 %v5149_v37, %v5285_v30  ;;  %v5465_v20 = vsel %vm4265_vm6, %v5463_v62, %v5464_v10 }
 0x2a2   : > { %v4892_v26 = vmax.f32 %v4860_v25, %v15992_v47  ;;  %v5645_v19 = vsel %vm4446_vm7, %v5643_v54, %v5644_v2  ;;  %5116 = vst.msk [vmem:[#allocation3 + $0x122] sm:$0xff] %vm225_vm1, %v4923_v8  ;;  %5007 = vrot.lane.b32.xlu0 %v4923_v8, %s13147_s22  ;;  %v5824_v41 = vrot.slane %v5150_v21, 4  ;;  %v5974_v63 = vmax.f32 %v15831_v53, %v15834_v52 }
 0x2a3   : > { %v16044_v36 = vmax.f32 %v4616_v22, %v4701_v24  ;;  %v5286_v14 = vrot.slane %v5151_v23, 1  ;;  %v5582_v50 = vmax.f32 %v5402_v33, %v5465_v20  ;;  %v5466_v15 = vrot.slane %v5151_v23, 2 }
 0x2a4   : > { %v5646_v42 = vrot.slane %v5151_v23, 3  ;;  %v5826_v57 = vrot.slane %v5151_v23, 4  ;;  %v5825_v49 = vsel %vm584_vm0, %v5823_v4, %v5824_v41  ;;  %v6006_v58 = vmax.f32 %v5974_v63, %v15956_v34  ;;  %v5153_v63 = vld [vmem:[#allocation3 + $0xc8] sm:$0xff] }
 0x2a5   : > { %v4924_v9 = vmax.f32 %v4892_v26, %v16044_v36  ;;  %v5287_v44 = vsel %vm4084_vm5, %v5284_v13, %v5286_v14  ;;  %v5762_v56 = vmax.f32 %v5582_v50, %v5645_v19  ;;  %v5467_v55 = vsel %vm4265_vm6, %v5464_v10, %v5466_v15  ;;  %v5152_v26 = vld [vmem:[#allocation3 + $0xc0] sm:$0xff] }
 0x2a6   : > { %v5403_v7 = vmax.f32 %v5150_v21, %v5287_v44  ;;  %v5647_v53 = vsel %vm4446_vm7, %v5644_v2, %v5646_v42  ;;  %v6038_v31 = vmax.f32 %v6006_v58, %v16008_v0  ;;  %v5827_v46 = vsel %vm584_vm0, %v5824_v41, %v5826_v57 }
 0x2a7   : > { %5117 = vst.msk [vmem:[#allocation3 + $0x12a] sm:$0xff] %vm225_vm1, %v4924_v9  ;;  %5009 = vrot.lane.b32.xlu1 %v4924_v9, %s13147_s22  ;;  %v5975_v37 = vmax.f32 %v15908_v6, %v15913_v38  ;;  %v4160_v61 = vrot.slane %v4009_v17, 1  ;;  %v16060_v18 = vmax.f32 %v5762_v56, %v5825_v49  ;;  %v4161_v60 = vrot.slane %v4010_v29, 1 }
 0x2a8   : > { %v5583_v5 = vmax.f32 %v5403_v7, %v5467_v55  ;;  %v4341_v21 = vrot.slane %v4009_v17, 2  ;;  %v4342_v12 = vrot.slane %v4010_v29, 2  ;;  %v4522_v40 = vrot.slane %v4009_v17, 3 }
 0x2a9   : > { %v6007_v59 = vmax.f32 %v5975_v37, %v15966_v45  ;;  %v4523_v3 = vrot.slane %v4010_v29, 3  ;;  %v6070_v24 = vmax.f32 %v6038_v31, %v16060_v18  ;;  %v4162_v43 = vsel %vm4084_vm5, %v4160_v61, %v4161_v60  ;;  %v5154_v31 = vld [vmem:[#allocation3 + $0xd0] sm:$0xf] }
 0x2aa   : > { %v5763_v32 = vmax.f32 %v5583_v5, %v5647_v53  ;;  %v4702_v39 = vrot.slane %v4009_v17, 4  ;;  %v4255_v13 = vmax.f32 %v4009_v17, %v4162_v43  ;;  %v4343_v62 = vsel %vm4265_vm6, %v4341_v21, %v4342_v12 }
 0x2ab   : > { %v6039_v6 = vmax.f32 %v6007_v59, %v16018_v35  ;;  %v4524_v25 = vsel %vm4446_vm7, %v4522_v40, %v4523_v3  ;;  %6140 = vrot.lane.b32.xlu0 %v6070_v24, %s13148_s25  ;;  %6263 = vst.msk [vmem:[#allocation3 + $0x7a] sm:$0xff] %vm225_vm1, %v6070_v24  ;;  %v4703_v54 = vrot.slane %v4010_v29, 4  ;;  %v4829_v2 = vmax.f32 %v15777_v27, %v15874_v48 }
 0x2ac   : > { %v16070_v10 = vmax.f32 %v5763_v32, %v5827_v46  ;;  %v4163_v23 = vrot.slane %v4011_v28, 1  ;;  %v4436_v8 = vmax.f32 %v4255_v13, %v4343_v62  ;;  %v4344_v22 = vrot.slane %v4011_v28, 2 }
 0x2ad   : > { %v4525_v30 = vrot.slane %v4011_v28, 3  ;;  %v4705_v4 = vrot.slane %v4011_v28, 4  ;;  %v4704_v20 = vsel %vm584_vm0, %v4702_v39, %v4703_v54  ;;  %v4861_v19 = vmax.f32 %v4829_v2, %v15982_v51  ;;  %v4013_v2 = vld [vmem:[#allocation3 + $0x188] sm:$0xff] }
 0x2ae   : > { %v6071_v33 = vmax.f32 %v6039_v6, %v16070_v10  ;;  %v4164_v41 = vsel %vm4084_vm5, %v4161_v60, %v4163_v23  ;;  %v4617_v14 = vmax.f32 %v4436_v8, %v4524_v25  ;;  %v4345_v15 = vsel %vm4265_vm6, %v4342_v12, %v4344_v22  ;;  %v4012_v6 = vld [vmem:[#allocation3 + $0x180] sm:$0xff] }
 0x2af   : > { %v4256_v50 = vmax.f32 %v4010_v29, %v4164_v41  ;;  %v4526_v27 = vsel %vm4446_vm7, %v4523_v3, %v4525_v30  ;;  %v4893_v42 = vmax.f32 %v4861_v19, %v16034_v16  ;;  %v4706_v57 = vsel %vm584_vm0, %v4703_v54, %v4705_v4 }
 0x2b0   : > { %6264 = vst.msk [vmem:[#allocation3 + $0x82] sm:$0xff] %vm225_vm1, %v6071_v33  ;;  %6142 = vrot.lane.b32.xlu1 %v6071_v33, %s13148_s25  ;;  %v4830_v17 = vmax.f32 %v15723_v1, %v15940_v11  ;;  %v5288_v9 = vrot.slane %v5152_v26, 1  ;;  %v16086_v49 = vmax.f32 %v4617_v14, %v4704_v20  ;;  %v5289_v29 = vrot.slane %v5153_v63, 1 }
 0x2b1   : > { %v4437_v58 = vmax.f32 %v4256_v50, %v4345_v15  ;;  %v5468_v44 = vrot.slane %v5152_v26, 2  ;;  %v5469_v7 = vrot.slane %v5153_v63, 2  ;;  %v5648_v55 = vrot.slane %v5152_v26, 3 }
 0x2b2   : > { %v4862_v56 = vmax.f32 %v4830_v17, %v15992_v47  ;;  %v5649_v53 = vrot.slane %v5153_v63, 3  ;;  %v4925_v46 = vmax.f32 %v4893_v42, %v16086_v49  ;;  %v5290_v61 = vsel %vm4084_vm5, %v5288_v9, %v5289_v29  ;;  %v4014_v42 = vld [vmem:[#allocation3 + $0x190] sm:$0xf] }
 0x2b3   : > { %v4618_v37 = vmax.f32 %v4437_v58, %v4526_v27  ;;  %v5828_v5 = vrot.slane %v5152_v26, 4  ;;  %v5404_v60 = vmax.f32 %v5152_v26, %v5290_v61  ;;  %v5470_v21 = vsel %vm4265_vm6, %v5468_v44, %v5469_v7 }
 0x2b4   : > { %v4894_v1 = vmax.f32 %v4862_v56, %v16044_v36  ;;  %v5650_v59 = vsel %vm4446_vm7, %v5648_v55, %v5649_v53  ;;  %5118 = vst.msk [vmem:[#allocation3 + $0x13a] sm:$0xff] %vm225_vm1, %v4925_v46  ;;  %5011 = vrot.lane.b32.xlu0 %v4925_v46, %s13147_s22  ;;  %v5829_v40 = vrot.slane %v5153_v63, 4  ;;  %v5976_v3 = vmax.f32 %v15834_v52, %v15956_v34 }
 0x2b5   : > { %v16096_v12 = vmax.f32 %v4618_v37, %v4706_v57  ;;  %v5291_v28 = vrot.slane %v5154_v31, 1  ;;  %v5584_v24 = vmax.f32 %v5404_v60, %v5470_v21  ;;  %v5471_v32 = vrot.slane %v5154_v31, 2 }
 0x2b6   : > { %v5651_v43 = vrot.slane %v5154_v31, 3  ;;  %v5831_v39 = vrot.slane %v5154_v31, 4  ;;  %v5830_v62 = vsel %vm584_vm0, %v5828_v5, %v5829_v40  ;;  %v6008_v25 = vmax.f32 %v5976_v3, %v16008_v0  ;;  %v5156_v3 = vld [vmem:[#allocation3 + $0xe0] sm:$0xff] }
 0x2b7   : > { %v4926_v13 = vmax.f32 %v4894_v1, %v16096_v12  ;;  %v5292_v54 = vsel %vm4084_vm5, %v5289_v29, %v5291_v28  ;;  %v5764_v23 = vmax.f32 %v5584_v24, %v5650_v59  ;;  %v5472_v22 = vsel %vm4265_vm6, %v5469_v7, %v5471_v32  ;;  %v5155_v1 = vld [vmem:[#allocation3 + $0xd8] sm:$0xff] }
 0x2b8   : > { %v5405_v8 = vmax.f32 %v5153_v63, %v5292_v54  ;;  %v5652_v52 = vsel %vm4446_vm7, %v5649_v53, %v5651_v43  ;;  %v6040_v30 = vmax.f32 %v6008_v25, %v16060_v18  ;;  %v5832_v4 = vsel %vm584_vm0, %v5829_v40, %v5831_v39 }
 0x2b9   : > { %5119 = vst.msk [vmem:[#allocation3 + $0x142] sm:$0xff] %vm225_vm1, %v4926_v13  ;;  %5013 = vrot.lane.b32.xlu1 %v4926_v13, %s13147_s22  ;;  %v5977_v26 = vmax.f32 %v15913_v38, %v15966_v45  ;;  %v4165_v33 = vrot.slane %v4012_v6, 1  ;;  %v16112_v20 = vmax.f32 %v5764_v23, %v5830_v62  ;;  %v4166_v41 = vrot.slane %v4013_v2, 1 }
 0x2ba   : > { %v5585_v19 = vmax.f32 %v5405_v8, %v5472_v22  ;;  %v4346_v63 = vrot.slane %v4012_v6, 2  ;;  %v4347_v50 = vrot.slane %v4013_v2, 2  ;;  %v4527_v15 = vrot.slane %v4012_v6, 3 }
 0x2bb   : > { %v6009_v14 = vmax.f32 %v5977_v26, %v16018_v35  ;;  %v4528_v27 = vrot.slane %v4013_v2, 3  ;;  %v6072_v57 = vmax.f32 %v6040_v30, %v16112_v20  ;;  %v4167_v9 = vsel %vm4084_vm5, %v4165_v33, %v4166_v41  ;;  %v5157_v30 = vld [vmem:[#allocation3 + $0xe8] sm:$0xf] }
 0x2bc   : > { %v5765_v17 = vmax.f32 %v5585_v19, %v5652_v52  ;;  %v4707_v58 = vrot.slane %v4012_v6, 4  ;;  %v4257_v29 = vmax.f32 %v4012_v6, %v4167_v9  ;;  %v4348_v44 = vsel %vm4265_vm6, %v4346_v63, %v4347_v50 }
 0x2bd   : > { %v6041_v38 = vmax.f32 %v6009_v14, %v16070_v10  ;;  %v4529_v56 = vsel %vm4446_vm7, %v4527_v15, %v4528_v27  ;;  %6265 = vst.msk [vmem:[#allocation3 + $0x92] sm:$0xff] %vm225_vm1, %v6072_v57  ;;  %6144 = vrot.lane.b32.xlu0 %v6072_v57, %s13148_s25  ;;  %v4708_v55 = vrot.slane %v4013_v2, 4  ;;  %v4831_v53 = vmax.f32 %v15874_v48, %v15982_v51 }
 0x2be   : > { %v16122_v7 = vmax.f32 %v5765_v17, %v5832_v4  ;;  %v4168_v31 = vrot.slane %v4014_v42, 1  ;;  %v4438_v46 = vmax.f32 %v4257_v29, %v4348_v44  ;;  %v4349_v37 = vrot.slane %v4014_v42, 2 }
 0x2bf   : > { %v4530_v61 = vrot.slane %v4014_v42, 3  ;;  %v4710_v5 = vrot.slane %v4014_v42, 4  ;;  %v4709_v21 = vsel %vm584_vm0, %v4707_v58, %v4708_v55  ;;  %v4863_v59 = vmax.f32 %v4831_v53, %v16034_v16  ;;  %v4016_v53 = vld [vmem:[#allocation3 + $0x1a0] sm:$0xff] }
 0x2c0   : > { %v6073_v60 = vmax.f32 %v6041_v38, %v16122_v7  ;;  %v4169_v40 = vsel %vm4084_vm5, %v4166_v41, %v4168_v31  ;;  %v4619_v28 = vmax.f32 %v4438_v46, %v4529_v56  ;;  %v4350_v32 = vsel %vm4265_vm6, %v4347_v50, %v4349_v37  ;;  %v4015_v38 = vld [vmem:[#allocation3 + $0x198] sm:$0xff] }
 0x2c1   : > { %v4258_v24 = vmax.f32 %v4013_v2, %v4169_v40  ;;  %v4531_v48 = vsel %vm4446_vm7, %v4528_v27, %v4530_v61  ;;  %v4895_v43 = vmax.f32 %v4863_v59, %v16086_v49  ;;  %v4711_v39 = vsel %vm584_vm0, %v4708_v55, %v4710_v5 }
 0x2c2   : > { %6266 = vst.msk [vmem:[#allocation3 + $0x9a] sm:$0xff] %vm225_vm1, %v6073_v60  ;;  %6146 = vrot.lane.b32.xlu1 %v6073_v60, %s13148_s25  ;;  %v4832_v6 = vmax.f32 %v15940_v11, %v15992_v47  ;;  %v5293_v13 = vrot.slane %v5155_v1, 1  ;;  %v16138_v62 = vmax.f32 %v4619_v28, %v4709_v21  ;;  %v5294_v54 = vrot.slane %v5156_v3, 1 }
 0x2c3   : > { %v4439_v25 = vmax.f32 %v4258_v24, %v4350_v32  ;;  %v5473_v2 = vrot.slane %v5155_v1, 2  ;;  %v5474_v8 = vrot.slane %v5156_v3, 2  ;;  %v5653_v22 = vrot.slane %v5155_v1, 3 }
 0x2c4   : > { %v4864_v23 = vmax.f32 %v4832_v6, %v16044_v36  ;;  %v5654_v52 = vrot.slane %v5156_v3, 3  ;;  %v4927_v4 = vmax.f32 %v4895_v43, %v16138_v62  ;;  %v5295_v33 = vsel %vm4084_vm5, %v5293_v13, %v5294_v54  ;;  %v4017_v43 = vld [vmem:[#allocation3 + $0x1a8] sm:$0xf] }
 0x2c5   : > { %v4620_v26 = vmax.f32 %v4439_v25, %v4531_v48  ;;  %v5833_v19 = vrot.slane %v5155_v1, 4  ;;  %v5406_v41 = vmax.f32 %v5155_v1, %v5295_v33  ;;  %v5475_v63 = vsel %vm4265_vm6, %v5473_v2, %v5474_v8 }
 0x2c6   : > { %v4896_v11 = vmax.f32 %v4864_v23, %v16096_v12  ;;  %v5655_v14 = vsel %vm4446_vm7, %v5653_v22, %v5654_v52  ;;  %5120 = vst.msk [vmem:[#allocation3 + $0x152] sm:$0xff] %vm225_vm1, %v4927_v4  ;;  %5015 = vrot.lane.b32.xlu0 %v4927_v4, %s13147_s22  ;;  %v5834_v15 = vrot.slane %v5156_v3, 4  ;;  %v5978_v27 = vmax.f32 %v15956_v34, %v16008_v0 }
 0x2c7   : > { %v16148_v50 = vmax.f32 %v4620_v26, %v4711_v39  ;;  %v5296_v42 = vrot.slane %v5157_v30, 1  ;;  %v5586_v57 = vmax.f32 %v5406_v41, %v5475_v63  ;;  %v5476_v17 = vrot.slane %v5157_v30, 2 }
 0x2c8   : > { %v5656_v9 = vrot.slane %v5157_v30, 3  ;;  %v5836_v58 = vrot.slane %v5157_v30, 4  ;;  %v5835_v44 = vsel %vm584_vm0, %v5833_v19, %v5834_v15  ;;  %v6010_v56 = vmax.f32 %v5978_v27, %v16060_v18  ;;  %v5159_v27 = vld [vmem:[#allocation3 + $0xf8] sm:$0xff] }
 0x2c9   : > { %v4928_v29 = vmax.f32 %v4896_v11, %v16148_v50  ;;  %v5297_v55 = vsel %vm4084_vm5, %v5294_v54, %v5296_v42  ;;  %v5766_v31 = vmax.f32 %v5586_v57, %v5655_v14  ;;  %v5477_v37 = vsel %vm4265_vm6, %v5474_v8, %v5476_v17  ;;  %v5158_v11 = vld [vmem:[#allocation3 + $0xf0] sm:$0xff] }
 0x2ca   : > { %v5407_v46 = vmax.f32 %v5156_v3, %v5297_v55  ;;  %v5657_v34 = vsel %vm4446_vm7, %v5654_v52, %v5656_v9  ;;  %v6042_v61 = vmax.f32 %v6010_v56, %v16112_v20  ;;  %v5837_v5 = vsel %vm584_vm0, %v5834_v15, %v5836_v58 }
 0x2cb   : > { %5121 = vst.msk [vmem:[#allocation3 + $0x15a] sm:$0xff] %vm225_vm1, %v4928_v29  ;;  %5017 = vrot.lane.b32.xlu1 %v4928_v29, %s13147_s22  ;;  %v5979_v1 = vmax.f32 %v15966_v45, %v16018_v35  ;;  %v4170_v60 = vrot.slane %v4015_v38, 1  ;;  %v16164_v21 = vmax.f32 %v5766_v31, %v5835_v44  ;;  %v4171_v40 = vrot.slane %v4016_v53, 1 }
 0x2cc   : > { %v5587_v59 = vmax.f32 %v5407_v46, %v5477_v37  ;;  %v4351_v3 = vrot.slane %v4015_v38, 2  ;;  %v4352_v24 = vrot.slane %v4016_v53, 2  ;;  %v4532_v32 = vrot.slane %v4015_v38, 3 }
 0x2cd   : > { %v6011_v28 = vmax.f32 %v5979_v1, %v16070_v10  ;;  %v4533_v48 = vrot.slane %v4016_v53, 3  ;;  %v6074_v39 = vmax.f32 %v6042_v61, %v16164_v21  ;;  %v4172_v13 = vsel %vm4084_vm5, %v4170_v60, %v4171_v40  ;;  %v5160_v61 = vld [vmem:[#allocation3 + $0x100] sm:$0xf] }
 0x2ce   : > { %v5767_v6 = vmax.f32 %v5587_v59, %v5657_v34  ;;  %v4712_v25 = vrot.slane %v4015_v38, 4  ;;  %v4259_v54 = vmax.f32 %v4015_v38, %v4172_v13  ;;  %v4353_v2 = vsel %vm4265_vm6, %v4351_v3, %v4352_v24 }
 0x2cf   : > { %v6043_v45 = vmax.f32 %v6011_v28, %v16122_v7  ;;  %v4534_v23 = vsel %vm4446_vm7, %v4532_v32, %v4533_v48  ;;  %6267 = vst.msk [vmem:[#allocation3 + $0xaa] sm:$0xff] %vm225_vm1, %v6074_v39  ;;  %6148 = vrot.lane.b32.xlu0 %v6074_v39, %s13148_s25  ;;  %v4713_v22 = vrot.slane %v4016_v53, 4  ;;  %v4833_v52 = vmax.f32 %v15982_v51, %v16034_v16 }
 0x2d0   : > { %v16174_v8 = vmax.f32 %v5767_v6, %v5837_v5  ;;  %v4173_v30 = vrot.slane %v4017_v43, 1  ;;  %v4440_v4 = vmax.f32 %v4259_v54, %v4353_v2  ;;  %v4354_v26 = vrot.slane %v4017_v43, 2 }
 0x2d1   : > { %v4535_v33 = vrot.slane %v4017_v43, 3  ;;  %v4715_v19 = vrot.slane %v4017_v43, 4  ;;  %v4714_v63 = vsel %vm584_vm0, %v4712_v25, %v4713_v22  ;;  %v4865_v14 = vmax.f32 %v4833_v52, %v16086_v49  ;;  %v16208_v52 = vld [vmem:[#allocation3 + $0x1b8] sm:$0xff] }
 0x2d2   : > { %v6075_v41 = vmax.f32 %v6043_v45, %v16174_v8  ;;  %v4174_v15 = vsel %vm4084_vm5, %v4171_v40, %v4173_v30  ;;  %v4621_v42 = vmax.f32 %v4440_v4, %v4534_v23  ;;  %v4355_v17 = vsel %vm4265_vm6, %v4352_v24, %v4354_v26  ;;  %v4018_v45 = vld [vmem:[#allocation3 + $0x1b0] sm:$0xff]  ;;  %v4021_v30 = vld [vmem:[#allocation3 + $0x1c8] sm:$0xff] }
 0x2d3   : > { %v4260_v57 = vmax.f32 %v4016_v53, %v4174_v15  ;;  %v4536_v51 = vsel %vm4446_vm7, %v4533_v48, %v4535_v33  ;;  %v4897_v9 = vmax.f32 %v4865_v14, %v16138_v62  ;;  %v4716_v58 = vsel %vm584_vm0, %v4713_v22, %v4715_v19  ;;  %v16212_v19 = vld [vmem:[#allocation3 + $0x1d0] sm:$0xff] }
 0x2d4   : > { %6268 = vst.msk [vmem:[#allocation3 + $0xb2] sm:$0xff] %vm225_vm1, %v6075_v41  ;;  %6150 = vrot.lane.b32.xlu1 %v6075_v41, %s13148_s25  ;;  %v4834_v38 = vmax.f32 %v15992_v47, %v16044_v36  ;;  %v5298_v29 = vrot.slane %v5158_v11, 1  ;;  %v16190_v44 = vmax.f32 %v4621_v42, %v4714_v63  ;;  %v5299_v55 = vrot.slane %v5159_v27, 1 }
 0x2d5   : > { %v4441_v56 = vmax.f32 %v4260_v57, %v4355_v17  ;;  %v5478_v53 = vrot.slane %v5158_v11, 2  ;;  %v5479_v46 = vrot.slane %v5159_v27, 2  ;;  %v5658_v37 = vrot.slane %v5158_v11, 3 }
 0x2d6   : > { %v4866_v31 = vmax.f32 %v4834_v38, %v16096_v12  ;;  %v5659_v34 = vrot.slane %v5159_v27, 3  ;;  %v4929_v5 = vmax.f32 %v4897_v9, %v16190_v44  ;;  %v5300_v60 = vsel %vm4084_vm5, %v5298_v29, %v5299_v55 }
 0x2d7   : > { %v4622_v1 = vmax.f32 %v4441_v56, %v4536_v51  ;;  %v5838_v59 = vrot.slane %v5158_v11, 4  ;;  %v5408_v40 = vmax.f32 %v5158_v11, %v5300_v60  ;;  %v5480_v3 = vsel %vm4265_vm6, %v5478_v53, %v5479_v46 }
 0x2d8   : > { %v4898_v47 = vmax.f32 %v4866_v31, %v16148_v50  ;;  %v5660_v28 = vsel %vm4446_vm7, %v5658_v37, %v5659_v34  ;;  %5122 = vst.msk [vmem:[#allocation3 + $0x16a] sm:$0xff] %vm225_vm1, %v4929_v5  ;;  %5019 = vrot.lane.b32.xlu0 %v4929_v5, %s13147_s22  ;;  %v5839_v32 = vrot.slane %v5159_v27, 4  ;;  %v5980_v48 = vmax.f32 %v16008_v0, %v16060_v18 }
 0x2d9   : > { %v16200_v24 = vmax.f32 %v4622_v1, %v4716_v58  ;;  %v5301_v43 = vrot.slane %v5160_v61, 1  ;;  %v5588_v39 = vmax.f32 %v5408_v40, %v5480_v3  ;;  %v5481_v6 = vrot.slane %v5160_v61, 2 }
 0x2da   : > { %v5661_v13 = vrot.slane %v5160_v61, 3  ;;  %v5841_v25 = vrot.slane %v5160_v61, 4  ;;  %v5840_v2 = vsel %vm584_vm0, %v5838_v59, %v5839_v32  ;;  %v6012_v23 = vmax.f32 %v5980_v48, %v16112_v20  ;;  %v4020_v48 = vld [vmem:[#allocation3 + $0x1c0] sm:$0xf] }
 0x2db   : > { %v4930_v54 = vmax.f32 %v4898_v47, %v16200_v24  ;;  %v5302_v22 = vsel %vm4084_vm5, %v5299_v55, %v5301_v43  ;;  %v5768_v4 = vmax.f32 %v5588_v39, %v5660_v28  ;;  %v5482_v0 = vsel %vm4265_vm6, %v5479_v46, %v5481_v6  ;;  %v4023_v43 = vld [vmem:[#allocation3 + $0x1d8] sm:$0xf] }
 0x2dc   : > { %v5409_v26 = vmax.f32 %v5159_v27, %v5302_v22  ;;  %v5662_v33 = vsel %vm4446_vm7, %v5659_v34, %v5661_v13  ;;  %v6044_v11 = vmax.f32 %v6012_v23, %v16164_v21  ;;  %v5842_v41 = vsel %vm584_vm0, %v5839_v32, %v5841_v25 }
 0x2dd   : > { %5123 = vst.msk [vmem:[#allocation3 + $0x172] sm:$0xff] %vm225_vm1, %v4930_v54  ;;  %5021 = vrot.lane.b32.xlu1 %v4930_v54, %s13147_s22  ;;  %v5981_v63 = vmax.f32 %v16018_v35, %v16070_v10  ;;  %v4175_v14 = vrot.slane %v4018_v45, 1  ;;  %v16220_v15 = vmax.f32 %v5768_v4, %v5840_v2  ;;  %v4176_v42 = vrot.slane %v16208_v52, 1 }
 0x2de   : > { %v5589_v27 = vmax.f32 %v5409_v26, %v5482_v0  ;;  %v4180_v57 = vrot.slane %v4021_v30, 1  ;;  %v4181_v51 = vrot.slane %v16212_v19, 1  ;;  %v4356_v9 = vrot.slane %v4018_v45, 2 }
 0x2df   : > { %v6013_v17 = vmax.f32 %v5981_v63, %v16122_v7  ;;  %v4357_v58 = vrot.slane %v16208_v52, 2  ;;  %v6076_v38 = vmax.f32 %v6044_v11, %v16220_v15  ;;  %v4177_v56 = vsel %vm4084_vm5, %v4175_v14, %v4176_v42 }
 0x2e0   : > { %v5769_v29 = vmax.f32 %v5589_v27, %v5662_v33  ;;  %v4361_v35 = vrot.slane %v4021_v30, 2  ;;  %v4182_v53 = vsel %vm4084_vm5, %v4180_v57, %v4181_v51  ;;  %v4261_v31 = vmax.f32 %v4018_v45, %v4177_v56 }
 0x2e1   : > { %v6045_v55 = vmax.f32 %v6013_v17, %v16174_v8  ;;  %v4358_v46 = vsel %vm4265_vm6, %v4356_v9, %v4357_v58  ;;  %6269 = vst.msk [vmem:[#allocation3 + $0xc2] sm:$0xff] %vm225_vm1, %v6076_v38  ;;  %6152 = vrot.lane.b32.xlu0 %v6076_v38, %s13148_s25  ;;  %v4263_v34 = vmax.f32 %v4021_v30, %v4182_v53  ;;  %v4362_v61 = vrot.slane %v16212_v19, 2 }
 0x2e2   : > { %v16233_v37 = vmax.f32 %v5769_v29, %v5842_v41  ;;  %v4537_v5 = vrot.slane %v4018_v45, 3  ;;  %v4442_v1 = vmax.f32 %v4261_v31, %v4358_v46  ;;  %v4538_v60 = vrot.slane %v16208_v52, 3  ;;  %v5161_v46 = vld [vmem:[#allocation3 + $0x108] sm:$0xff] }
 0x2e3   : > { %v4542_v59 = vrot.slane %v4021_v30, 3  ;;  %v4543_v47 = vrot.slane %v16212_v19, 3  ;;  %v4363_v3 = vsel %vm4265_vm6, %v4361_v35, %v4362_v61  ;;  %v4717_v28 = vrot.slane %v4018_v45, 4 }
 0x2e4   : > { %v6077_v40 = vmax.f32 %v6045_v55, %v16233_v37  ;;  %v4718_v32 = vrot.slane %v16208_v52, 4  ;;  %v4444_v39 = vmax.f32 %v4263_v34, %v4363_v3  ;;  %v4539_v6 = vsel %vm4446_vm7, %v4537_v5, %v4538_v60 }
 0x2e5   : > { %v4544_v13 = vsel %vm4446_vm7, %v4542_v59, %v4543_v47  ;;  %v4722_v25 = vrot.slane %v4021_v30, 4  ;;  %v4623_v54 = vmax.f32 %v4442_v1, %v4539_v6  ;;  %v4723_v23 = vrot.slane %v16212_v19, 4 }
 0x2e6   : > { %6270 = vst.msk [vmem:[#allocation3 + $0xca] sm:$0xff] %vm225_vm1, %v6077_v40  ;;  %6154 = vrot.lane.b32.xlu1 %v6077_v40, %s13148_s25  ;;  %v4719_v2 = vsel %vm584_vm0, %v4717_v28, %v4718_v32  ;;  %v4835_v45 = vmax.f32 %v16034_v16, %v16086_v49  ;;  %v4625_v22 = vmax.f32 %v4444_v39, %v4544_v13  ;;  %v4178_v26 = vrot.slane %v4020_v48, 1  ;;  %v5163_v13 = vld [vmem:[#allocation3 + $0x118] sm:$0xf] }
 0x2e7   : > { %v4837_v4 = vmax.f32 %v16086_v49, %v16138_v62  ;;  %v4183_v0 = vrot.slane %v4023_v43, 1  ;;  %v4724_v30 = vsel %vm584_vm0, %v4722_v25, %v4723_v23  ;;  %v4803_v33 = vmax.f32 %v4623_v54, %v4719_v2 }
 0x2e8   : > { %v4867_v11 = vmax.f32 %v4835_v45, %v16138_v62  ;;  %v4359_v41 = vrot.slane %v4020_v48, 2  ;;  %v4805_v63 = vmax.f32 %v4625_v22, %v4724_v30  ;;  %v4179_v27 = vsel %vm4084_vm5, %v4176_v42, %v4178_v26  ;;  %v16260_v42 = vld [vmem:[#allocation3 + $0x110] sm:$0xff] }
 0x2e9   : > { %v4869_v14 = vmax.f32 %v4837_v4, %v16190_v44  ;;  %v4184_v57 = vsel %vm4084_vm5, %v4181_v51, %v4183_v0  ;;  %v4262_v17 = vmax.f32 %v16208_v52, %v4179_v27  ;;  %v4364_v29 = vrot.slane %v4023_v43, 2 }
 0x2ea   : > { %v4899_v16 = vmax.f32 %v4867_v11, %v16190_v44  ;;  %v4264_v49 = vmax.f32 %v16212_v19, %v4184_v57  ;;  %v4360_v9 = vsel %vm4265_vm6, %v4357_v58, %v4359_v41  ;;  %v4540_v56 = vrot.slane %v4020_v48, 3 }
 0x2eb   : > { %v4901_v38 = vmax.f32 %v4869_v14, %v4803_v33  ;;  %v4545_v62 = vrot.slane %v4023_v43, 3  ;;  %v4443_v55 = vmax.f32 %v4262_v17, %v4360_v9  ;;  %v4720_v53 = vrot.slane %v4020_v48, 4 }
 0x2ec   : > { %v4931_v35 = vmax.f32 %v4899_v16, %v4803_v33  ;;  %v4725_v31 = vrot.slane %v4023_v43, 4  ;;  %v4365_v44 = vsel %vm4265_vm6, %v4362_v61, %v4364_v29  ;;  %v4541_v52 = vsel %vm4446_vm7, %v4538_v60, %v4540_v56  ;;  %v16296_v16 = vld [vmem:[#allocation3 + $0x8] sm:$0xff]  ;;  %v16308_v29 = vld [vmem:[#allocation3 + $0x20] sm:$0xff]  ;;  %v16310_v56 = vld [vmem:[#allocation3 + $0x30] sm:$0xff] }
 0x2ed   : > { %v16262_v51 = vmax.f32 %v4901_v38, %v4805_v63  ;;  %v4546_v19 = vsel %vm4446_vm7, %v4543_v47, %v4545_v62  ;;  %v4445_v58 = vmax.f32 %v4264_v49, %v4365_v44  ;;  %v4624_v34 = vmax.f32 %v4443_v55, %v4541_v52  ;;  %v16292_v63 = vld [vmem:[#allocation3] sm:$0xff]  ;;  %v16306_v38 = vld [vmem:[#allocation3 + $0x18] sm:$0xff]  ;;  %v16321_v44 = vld [vmem:[#allocation3 + $0x48] sm:$0xff] }
 0x2ee   : > { %5124 = vst.msk [vmem:[#allocation3 + $0x182] sm:$0xff] %vm225_vm1, %v4931_v35  ;;  %5023 = vrot.lane.b32.xlu0 %v4931_v35, %s13147_s22  ;;  %v4721_v5 = vsel %vm584_vm0, %v4718_v32, %v4720_v53  ;;  %v4726_v1 = vsel %vm584_vm0, %v4723_v23, %v4725_v31  ;;  %v4836_v61 = vmax.f32 %v16044_v36, %v16096_v12  ;;  %v5303_v59 = vrot.slane %v5161_v46, 1  ;;  %v16316_v53 = vld [vmem:[#allocation3 + $0x38] sm:$0xff]  ;;  %v16323_v52 = vld [vmem:[#allocation3 + $0x50] sm:$0xff] }
 0x2ef   : > { %5126 = vst.msk [vmem:[#allocation3 + $0x19a] sm:$0xff] %vm225_vm1, %v16262_v51  ;;  %v4838_v60 = vmax.f32 %v16096_v12, %v16148_v50  ;;  %v5304_v47 = vrot.slane %v16260_v42, 1  ;;  %v4626_v40 = vmax.f32 %v4445_v58, %v4546_v19  ;;  %v4804_v3 = vmax.f32 %v4624_v34, %v4721_v5  ;;  %v16325_v19 = vld [vmem:[#allocation3 + $0x60] sm:$0xff]  ;;  %v16329_v5 = vld [vmem:[#allocation3 + $0x68] sm:$0xff] }
 0x2f0   : > { %v5483_v28 = vrot.slane %v5161_v46, 2  ;;  %v5484_v48 = vrot.slane %v16260_v42, 2  ;;  %v4868_v32 = vmax.f32 %v4836_v61, %v16148_v50  ;;  %v5663_v6 = vrot.slane %v5161_v46, 3 }
 0x2f1   : > { %v4870_v43 = vmax.f32 %v4838_v60, %v16200_v24  ;;  %v5305_v39 = vsel %vm4084_vm5, %v5303_v59, %v5304_v47  ;;  %v4806_v36 = vmax.f32 %v4626_v40, %v4726_v1  ;;  %v5664_v54 = vrot.slane %v16260_v42, 3 }
 0x2f2   : > { %v5410_v25 = vmax.f32 %v5161_v46, %v5305_v39  ;;  %v5485_v12 = vsel %vm4265_vm6, %v5483_v28, %v5484_v48  ;;  %v4900_v2 = vmax.f32 %v4868_v32, %v16200_v24  ;;  %v5843_v45 = vrot.slane %v5161_v46, 4 }
 0x2f3   : > { %v4902_v23 = vmax.f32 %v4870_v43, %v4804_v3  ;;  %v5844_v22 = vrot.slane %v16260_v42, 4  ;;  %v5665_v50 = vsel %vm4446_vm7, %v5663_v6, %v5664_v54  ;;  %v5982_v26 = vmax.f32 %v16060_v18, %v16112_v20 }
 0x2f4   : > { %v5590_v4 = vmax.f32 %v5410_v25, %v5485_v12  ;;  %v5306_v0 = vrot.slane %v5163_v13, 1  ;;  %v4932_v30 = vmax.f32 %v4900_v2, %v4804_v3  ;;  %v5486_v41 = vrot.slane %v5163_v13, 2 }
 0x2f5   : > { %v16289_v33 = vmax.f32 %v4902_v23, %v4806_v36  ;;  %v5845_v11 = vsel %vm584_vm0, %v5843_v45, %v5844_v22  ;;  %v6014_v14 = vmax.f32 %v5982_v26, %v16164_v21  ;;  %v5666_v57 = vrot.slane %v5163_v13, 3 }
 0x2f6   : > { %v5770_v24 = vmax.f32 %v5590_v4, %v5665_v50  ;;  %v5307_v27 = vsel %vm4084_vm5, %v5304_v47, %v5306_v0  ;;  %5125 = vst.msk [vmem:[#allocation3 + $0x18a] sm:$0xff] %vm225_vm1, %v4932_v30  ;;  %5025 = vrot.lane.b32.xlu1 %v4932_v30, %s13147_s22  ;;  %v5487_v17 = vsel %vm4265_vm6, %v5484_v48, %v5486_v41  ;;  %v5846_v49 = vrot.slane %v5163_v13, 4  ;;  %v16366_v50 = vpop.permute.xlu0 %4967 }
 0x2f7   : > { %5127 = vst.msk [vmem:[#allocation3 + $0x1a2] sm:$0xff] %vm225_vm1, %v16289_v33  ;;  %v5411_v18 = vmax.f32 %v16260_v42, %v5307_v27  ;;  %v5983_v9 = vmax.f32 %v16070_v10, %v16122_v7  ;;  %v6046_v35 = vmax.f32 %v6014_v14, %v16220_v15  ;;  %v5667_v55 = vsel %vm4446_vm7, %v5664_v54, %v5666_v57 }
 0x2f8   : > { %v16312_v62 = vmax.f32 %v5770_v24, %v5845_v11  ;;  %v6409_v31 = vrot.slane %v16292_v63, 1  ;;  %v5847_v42 = vsel %vm584_vm0, %v5844_v22, %v5846_v49  ;;  %v6410_v58 = vrot.slane %v16296_v16, 1  ;;  %5064 = vst.msk [vmem:[#allocation4 + $0x19] sm:$0xff] %vm5063_vm8, %v16366_v50 }
 0x2f9   : > { %v5591_v46 = vmax.f32 %v5411_v18, %v5487_v17  ;;  %v6015_v10 = vmax.f32 %v5983_v9, %v16174_v8  ;;  %v6414_v1 = vrot.slane %v16306_v38, 1  ;;  %v6415_v61 = vrot.slane %v16308_v29, 1  ;;  %v16385_v9 = vpop.permute.xlu1 %4973 }
 0x2fa   : > { %v6078_v34 = vmax.f32 %v6046_v35, %v16312_v62  ;;  %v6419_v60 = vrot.slane %v16310_v56, 1  ;;  %v6411_v40 = vsel %vm4084_vm5, %v6409_v31, %v6410_v58  ;;  %v6420_v3 = vrot.slane %v16316_v53, 1  ;;  %5067 = vst.msk [vmem:[#allocation4 + $0x39] sm:$0xff] %vm5063_vm8, %v16385_v9 }
 0x2fb   : > { %v5771_v59 = vmax.f32 %v5591_v46, %v5667_v55  ;;  %v6047_v47 = vmax.f32 %v6015_v10, %v16233_v37  ;;  %v6416_v28 = vsel %vm4084_vm5, %v6414_v1, %v6415_v61  ;;  %v6424_v48 = vrot.slane %v16321_v44, 1 }
 0x2fc   : > { %6271 = vst.msk [vmem:[#allocation3 + $0xda] sm:$0xff] %vm225_vm1, %v6078_v34  ;;  %6156 = vrot.lane.b32.xlu0 %v6078_v34, %s13148_s25  ;;  %v6425_v32 = vrot.slane %v16323_v52, 1  ;;  %v6429_v43 = vrot.slane %v16325_v19, 1  ;;  %v6421_v6 = vsel %vm4084_vm5, %v6419_v60, %v6420_v3  ;;  %v6430_v13 = vrot.slane %v16329_v5, 1 }
 0x2fd   : > { %v16347_v39 = vmax.f32 %v5771_v59, %v5847_v42  ;;  %v6549_v36 = vmax.f32 %v16292_v63, %v6411_v40  ;;  %v6551_v12 = vmax.f32 %v16306_v38, %v6416_v28  ;;  %v6553_v54 = vmax.f32 %v16310_v56, %v6421_v6  ;;  %v16401_v28 = vpop.permute.xlu0 %4969 }
 0x2fe   : > { %v6426_v25 = vsel %vm4084_vm5, %v6424_v48, %v6425_v32  ;;  %v6589_v2 = vrot.slane %v16292_v63, 2  ;;  %v6431_v45 = vsel %vm4084_vm5, %v6429_v43, %v6430_v13  ;;  %v6590_v4 = vrot.slane %v16296_v16, 2  ;;  %5065 = vst.msk [vmem:[#allocation4 + $0x21] sm:$0xff] %vm5063_vm8, %v16401_v28 }
 0x2ff   : > { %v6079_v23 = vmax.f32 %v6047_v47, %v16347_v39  ;;  %v6555_v22 = vmax.f32 %v16321_v44, %v6426_v25  ;;  %v6557_v26 = vmax.f32 %v16325_v19, %v6431_v45  ;;  %v6594_v0 = vrot.slane %v16306_v38, 2 }
 0x300   : > { %v6595_v30 = vrot.slane %v16308_v29, 2  ;;  %v6599_v11 = vrot.slane %v16310_v56, 2  ;;  %v6591_v41 = vsel %vm4265_vm6, %v6589_v2, %v6590_v4  ;;  %v6600_v24 = vrot.slane %v16316_v53, 2 }
 0x301   : > { %6272 = vst.msk [vmem:[#allocation3 + $0xe2] sm:$0xff] %vm225_vm1, %v6079_v23  ;;  %6158 = vrot.lane.b32.xlu1 %v6079_v23, %s13148_s25  ;;  %v6604_v14 = vrot.slane %v16321_v44, 2  ;;  %v6605_v27 = vrot.slane %v16323_v52, 2  ;;  %v6609_v18 = vrot.slane %v16325_v19, 2  ;;  %v6610_v17 = vrot.slane %v16329_v5, 2 }
 0x302   : > { %v6596_v57 = vsel %vm4265_vm6, %v6594_v0, %v6595_v30  ;;  %v6729_v49 = vmax.f32 %v6549_v36, %v6591_v41  ;;  %v6601_v35 = vsel %vm4265_vm6, %v6599_v11, %v6600_v24  ;;  %v6769_v46 = vrot.slane %v16292_v63, 3  ;;  %v16421_v0 = vpop.permute.xlu1 %4977 }
 0x303   : > { %v6606_v55 = vsel %vm4265_vm6, %v6604_v14, %v6605_v27  ;;  %v6731_v31 = vmax.f32 %v6551_v12, %v6596_v57  ;;  %v6611_v42 = vsel %vm4265_vm6, %v6609_v18, %v6610_v17  ;;  %v6733_v10 = vmax.f32 %v6553_v54, %v6601_v35  ;;  %5069 = vst.msk [vmem:[#allocation4 + $0x51] sm:$0xff] %vm5063_vm8, %v16421_v0 }
 0x304   : > { %v6735_v34 = vmax.f32 %v6555_v22, %v6606_v55  ;;  %v6770_v1 = vrot.slane %v16296_v16, 3  ;;  %v6737_v60 = vmax.f32 %v6557_v26, %v6611_v42  ;;  %v6774_v59 = vrot.slane %v16306_v38, 3 }
 0x305   : > { %v6775_v47 = vrot.slane %v16308_v29, 3  ;;  %v6779_v40 = vrot.slane %v16310_v56, 3  ;;  %v6780_v43 = vrot.slane %v16316_v53, 3  ;;  %v6784_v6 = vrot.slane %v16321_v44, 3 }
 0x306   : > { %v6771_v48 = vsel %vm4446_vm7, %v6769_v46, %v6770_v1  ;;  %v6785_v36 = vrot.slane %v16323_v52, 3  ;;  %v6789_v12 = vrot.slane %v16325_v19, 3  ;;  %v6790_v54 = vrot.slane %v16329_v5, 3 }
 0x307   : > { %v6776_v25 = vsel %vm4446_vm7, %v6774_v59, %v6775_v47  ;;  %v6909_v2 = vmax.f32 %v6729_v49, %v6771_v48  ;;  %v6781_v23 = vsel %vm4446_vm7, %v6779_v40, %v6780_v43  ;;  %v6949_v26 = vrot.slane %v16292_v63, 4  ;;  %v16447_v48 = vld [vmem:[#allocation3 + $0x40] sm:$0xf] }
 0x308   : > { %v6786_v45 = vsel %vm4446_vm7, %v6784_v6, %v6785_v36  ;;  %v6911_v22 = vmax.f32 %v6731_v31, %v6776_v25  ;;  %v6791_v11 = vsel %vm4446_vm7, %v6789_v12, %v6790_v54  ;;  %v6913_v41 = vmax.f32 %v6733_v10, %v6781_v23  ;;  %v16430_v31 = vld [vmem:[#allocation3 + $0x10] sm:$0xf]  ;;  %v16457_v12 = vld [vmem:[#allocation3 + $0x58] sm:$0xf] }
 0x309   : > { %v6915_v14 = vmax.f32 %v6735_v34, %v6786_v45  ;;  %v6950_v57 = vrot.slane %v16296_v16, 4  ;;  %v6917_v18 = vmax.f32 %v6737_v60, %v6791_v11  ;;  %v6954_v49 = vrot.slane %v16306_v38, 4  ;;  %v16438_v34 = vld [vmem:[#allocation3 + $0x28] sm:$0xf]  ;;  %v16440_v60 = vpop.permute.xlu0 %4971  ;;  %v16459_v23 = vld [vmem:[#allocation3 + $0x70] sm:$0xf] }
 0x30a   : > { %v6955_v35 = vrot.slane %v16308_v29, 4  ;;  %v6959_v55 = vrot.slane %v16310_v56, 4  ;;  %v6960_v46 = vrot.slane %v16316_v53, 4  ;;  %v6964_v42 = vrot.slane %v16321_v44, 4  ;;  %5066 = vst.msk [vmem:[#allocation4 + $0x31] sm:$0xff] %vm5063_vm8, %v16440_v60  ;;  %v6310_v60 = vld [vmem:[#allocation3 + $0xa8] sm:$0xff] }
 0x30b   : > { %v6951_v63 = vsel %vm584_vm0, %v6949_v26, %v6950_v57  ;;  %v6965_v10 = vrot.slane %v16323_v52, 4  ;;  %v6969_v56 = vrot.slane %v16325_v19, 4  ;;  %v6970_v59 = vrot.slane %v16329_v5, 4 }
 0x30c   : > { %v6956_v38 = vsel %vm584_vm0, %v6954_v49, %v6955_v35  ;;  %v7089_v40 = vmax.f32 %v6909_v2, %v6951_v63  ;;  %v6961_v44 = vsel %vm584_vm0, %v6959_v55, %v6960_v46  ;;  %v6412_v19 = vrot.slane %v16430_v31, 1  ;;  %v16470_v49 = vpop.permute.xlu1 %4981 }
 0x30d   : > { %v6966_v6 = vsel %vm584_vm0, %v6964_v42, %v6965_v10  ;;  %v16455_v25 = vmax.f32 %v6911_v22, %v6956_v38  ;;  %v6971_v2 = vsel %vm584_vm0, %v6969_v56, %v6970_v59  ;;  %v16465_v45 = vmax.f32 %v6913_v41, %v6961_v44  ;;  %5071 = vst.msk [vmem:[#allocation4 + $0x69] sm:$0xff] %vm5063_vm8, %v16470_v49  ;;  %v6311_v49 = vld [vmem:[#allocation3 + $0xb0] sm:$0xff] }
 0x30e   : > { %v16467_v26 = vmax.f32 %v6915_v14, %v6966_v6  ;;  %v6417_v11 = vrot.slane %v16438_v34, 1  ;;  %v16472_v22 = vmax.f32 %v6917_v18, %v6971_v2  ;;  %v6413_v63 = vsel %vm4084_vm5, %v6410_v58, %v6412_v19  ;;  %v16491_v6 = vpop.permute.xlu0 %4975 }
 0x30f   : > { %v7129_v55 = vmax.f32 %v7089_v40, %v16455_v25  ;;  %v6422_v42 = vrot.slane %v16447_v48, 1  ;;  %v6427_v14 = vrot.slane %v16457_v12, 1  ;;  %v6432_v38 = vrot.slane %v16459_v23, 1  ;;  %5068 = vst.msk [vmem:[#allocation4 + $0x49] sm:$0xff] %vm5063_vm8, %v16491_v6 }
 0x310   : > { %v6418_v41 = vsel %vm4084_vm5, %v6415_v61, %v6417_v11  ;;  %v6550_v56 = vmax.f32 %v16296_v16, %v6413_v63  ;;  %v6592_v44 = vrot.slane %v16430_v31, 2  ;;  %v6597_v11 = vrot.slane %v16438_v34, 2 }
 0x311   : > { %v7161_v18 = vmax.f32 %v7129_v55, %v16465_v45  ;;  %v6423_v40 = vsel %vm4084_vm5, %v6420_v3, %v6422_v42  ;;  %v6552_v58 = vmax.f32 %v16308_v29, %v6418_v41  ;;  %v6428_v61 = vsel %vm4084_vm5, %v6425_v32, %v6427_v14 }
 0x312   : > { %v6433_v19 = vsel %vm4084_vm5, %v6430_v13, %v6432_v38  ;;  %v6554_v2 = vmax.f32 %v16316_v53, %v6423_v40  ;;  %v6556_v55 = vmax.f32 %v16323_v52, %v6428_v61  ;;  %v6593_v42 = vsel %vm4265_vm6, %v6590_v4, %v6592_v44  ;;  %v16513_v38 = vpop.permute.xlu1 %4985 }
 0x313   : > { %v7193_v3 = vmax.f32 %v7161_v18, %v16467_v26  ;;  %v6558_v63 = vmax.f32 %v16329_v5, %v6433_v19  ;;  %v6598_v32 = vsel %vm4265_vm6, %v6595_v30, %v6597_v11  ;;  %v6602_v13 = vrot.slane %v16447_v48, 2  ;;  %5073 = vst.msk [vmem:[#allocation4 + $0x81] sm:$0xff] %vm5063_vm8, %v16513_v38 }
 0x314   : > { %v6607_v41 = vrot.slane %v16457_v12, 2  ;;  %v6612_v14 = vrot.slane %v16459_v23, 2  ;;  %v6730_v40 = vmax.f32 %v6550_v56, %v6593_v42  ;;  %v6732_v61 = vmax.f32 %v6552_v58, %v6598_v32  ;;  %v16531_v42 = vpop.permute.xlu0 %4979 }
 0x315   : > { %v7225_v18 = vmax.f32 %v7193_v3, %v16472_v22  ;;  %v6772_v19 = vrot.slane %v16430_v31, 3  ;;  %v6603_v4 = vsel %vm4265_vm6, %v6600_v24, %v6602_v13  ;;  %v6777_v11 = vrot.slane %v16438_v34, 3  ;;  %5070 = vst.msk [vmem:[#allocation4 + $0x61] sm:$0xff] %vm5063_vm8, %v16531_v42 }
 0x316   : > { %v6608_v30 = vsel %vm4265_vm6, %v6605_v27, %v6607_v41  ;;  %v6613_v44 = vsel %vm4265_vm6, %v6610_v17, %v6612_v14  ;;  %v6734_v56 = vmax.f32 %v6554_v2, %v6603_v4  ;;  %v6782_v17 = vrot.slane %v16447_v48, 3  ;;  %v5165_v4 = vld [vmem:[#allocation3 + $0x128] sm:$0xff] }
 0x317   : > { %7289 = vrot.lane.b32.xlu0 %v7225_v18, %s13149_s26  ;;  %v6736_v58 = vmax.f32 %v6556_v55, %v6608_v30  ;;  %v6738_v3 = vmax.f32 %v6558_v63, %v6613_v44  ;;  %v6773_v24 = vsel %vm4446_vm7, %v6770_v1, %v6772_v19  ;;  %v6778_v27 = vsel %vm4446_vm7, %v6775_v47, %v6777_v11 }
 0x318   : > { %v6787_v32 = vrot.slane %v16457_v12, 3  ;;  %v6792_v13 = vrot.slane %v16459_v23, 3  ;;  %v6910_v41 = vmax.f32 %v6730_v40, %v6773_v24  ;;  %v6912_v2 = vmax.f32 %v6732_v61, %v6778_v27  ;;  %v5164_v40 = vld [vmem:[#allocation3 + $0x120] sm:$0xff]  ;;  %v16551_v61 = vpop.permute.xlu1 %4989  ;;  %v5166_v24 = vld [vmem:[#allocation3 + $0x130] sm:$0xf] }
 0x319   : > { %v6952_v55 = vrot.slane %v16430_v31, 4  ;;  %v6957_v63 = vrot.slane %v16438_v34, 4  ;;  %v6783_v1 = vsel %vm4446_vm7, %v6780_v43, %v6782_v17  ;;  %v6962_v18 = vrot.slane %v16447_v48, 4  ;;  %5075 = vst.msk [vmem:[#allocation4 + $0x99] sm:$0xff] %vm5063_vm8, %v16551_v61 }
 0x31a   : > { %v6788_v47 = vsel %vm4446_vm7, %v6785_v36, %v6787_v32  ;;  %v6793_v14 = vsel %vm4446_vm7, %v6790_v54, %v6792_v13  ;;  %v6914_v31 = vmax.f32 %v6734_v56, %v6783_v1  ;;  %v6967_v48 = vrot.slane %v16457_v12, 4 }
 0x31b   : > { %v6916_v19 = vmax.f32 %v6736_v58, %v6788_v47  ;;  %v6918_v34 = vmax.f32 %v6738_v3, %v6793_v14  ;;  %v6953_v43 = vsel %vm584_vm0, %v6950_v57, %v6952_v55  ;;  %v6958_v36 = vsel %vm584_vm0, %v6955_v35, %v6957_v63  ;;  %v16568_v57 = vpop.permute.xlu0 %4983 }
 0x31c   : > { %v6963_v54 = vsel %vm584_vm0, %v6960_v46, %v6962_v18  ;;  %v6972_v30 = vrot.slane %v16459_v23, 4  ;;  %v7090_v44 = vmax.f32 %v6910_v41, %v6953_v43  ;;  %v16564_v11 = vmax.f32 %v6912_v2, %v6958_v36  ;;  %5072 = vst.msk [vmem:[#allocation4 + $0x79] sm:$0xff] %vm5063_vm8, %v16568_v57 }
 0x31d   : > { %v16566_v56 = vmax.f32 %v6914_v31, %v6963_v54  ;;  %v5308_v16 = vrot.slane %v5164_v40, 1  ;;  %v6968_v29 = vsel %vm584_vm0, %v6965_v10, %v6967_v48  ;;  %v5309_v35 = vrot.slane %v5165_v4, 1  ;;  %v16582_v10 = vpop.permute.xlu1 %4993  ;;  %v6305_v48 = vld [vmem:[#allocation3 + $0x80] sm:$0xff] }
 0x31e   : > { %v6973_v53 = vsel %vm584_vm0, %v6970_v59, %v6972_v30  ;;  %v5488_v46 = vrot.slane %v5164_v40, 2  ;;  %v16576_v12 = vmax.f32 %v6916_v19, %v6968_v29  ;;  %v7130_v58 = vmax.f32 %v7090_v44, %v16564_v11  ;;  %v6304_v19 = vld [vmem:[#allocation3 + $0x78] sm:$0xff]  ;;  %5077 = vst.msk [vmem:[#allocation4 + $0xb1] sm:$0xff] %vm5063_vm8, %v16582_v10 }
 0x31f   : > { %v16578_v23 = vmax.f32 %v6918_v34, %v6973_v53  ;;  %v5489_v3 = vrot.slane %v5165_v4, 2  ;;  %v5310_v27 = vsel %vm4084_vm5, %v5308_v16, %v5309_v35  ;;  %v5668_v17 = vrot.slane %v5164_v40, 3  ;;  %v16591_v34 = vpop.permute.xlu0 %4987 }
 0x320   : > { %v5669_v52 = vrot.slane %v5165_v4, 3  ;;  %v5848_v32 = vrot.slane %v5164_v40, 4  ;;  %v7162_v5 = vmax.f32 %v7130_v58, %v16566_v56  ;;  %v5412_v59 = vmax.f32 %v5164_v40, %v5310_v27  ;;  %5074 = vst.msk [vmem:[#allocation4 + $0x91] sm:$0xff] %vm5063_vm8, %v16591_v34 }
 0x321   : > { %v5490_v13 = vsel %vm4265_vm6, %v5488_v46, %v5489_v3  ;;  %v5849_v41 = vrot.slane %v5165_v4, 4  ;;  %v5984_v55 = vmax.f32 %v16112_v20, %v16164_v21  ;;  %v5311_v63 = vrot.slane %v5166_v24, 1  ;;  %v16602_v27 = vpop.permute.xlu1 %4997 }
 0x322   : > { %v5670_v2 = vsel %vm4446_vm7, %v5668_v17, %v5669_v52  ;;  %v5491_v1 = vrot.slane %v5166_v24, 2  ;;  %v7194_v47 = vmax.f32 %v7162_v5, %v16576_v12  ;;  %v5592_v14 = vmax.f32 %v5412_v59, %v5490_v13  ;;  %v6306_v59 = vld [vmem:[#allocation3 + $0x88] sm:$0xf]  ;;  %5079 = vst.msk [vmem:[#allocation4 + $0xc9] sm:$0xff] %vm5063_vm8, %v16602_v27 }
 0x323   : > { %v5850_v18 = vsel %vm584_vm0, %v5848_v32, %v5849_v41  ;;  %v5671_v31 = vrot.slane %v5166_v24, 3  ;;  %v6016_v40 = vmax.f32 %v5984_v55, %v16220_v15  ;;  %v5312_v43 = vsel %vm4084_vm5, %v5309_v35, %v5311_v63  ;;  %v16610_v55 = vpop.permute.xlu0 %4991 }
 0x324   : > { %v5492_v36 = vsel %vm4265_vm6, %v5489_v3, %v5491_v1  ;;  %v5851_v54 = vrot.slane %v5166_v24, 4  ;;  %v7226_v20 = vmax.f32 %v7194_v47, %v16578_v23  ;;  %v5772_v30 = vmax.f32 %v5592_v14, %v5670_v2  ;;  %5076 = vst.msk [vmem:[#allocation4 + $0xa9] sm:$0xff] %vm5063_vm8, %v16610_v55 }
 0x325   : > { %v5413_v44 = vmax.f32 %v5165_v4, %v5312_v43  ;;  %v5672_v16 = vsel %vm4446_vm7, %v5669_v52, %v5671_v31  ;;  %v6048_v29 = vmax.f32 %v6016_v40, %v16312_v62  ;;  %v5985_v46 = vmax.f32 %v16122_v7, %v16174_v8 }
 0x326   : > { %v5852_v53 = vsel %vm584_vm0, %v5849_v41, %v5851_v54  ;;  %v6434_v58 = vrot.slane %v6304_v19, 1  ;;  %7291 = vrot.lane.b32.xlu1 %v7226_v20, %s13149_s26  ;;  %v16605_v35 = vmax.f32 %v5772_v30, %v5850_v18  ;;  %v6435_v24 = vrot.slane %v6305_v48, 1 }
 0x327   : > { %v5593_v3 = vmax.f32 %v5413_v44, %v5492_v36  ;;  %v6614_v17 = vrot.slane %v6304_v19, 2  ;;  %v6017_v4 = vmax.f32 %v5985_v46, %v16233_v37  ;;  %v6615_v52 = vrot.slane %v6305_v48, 2  ;;  %v16621_v44 = vpop.permute.xlu1 %6128 }
 0x328   : > { %v6794_v32 = vrot.slane %v6304_v19, 3  ;;  %v6795_v5 = vrot.slane %v6305_v48, 3  ;;  %v6080_v13 = vmax.f32 %v6048_v29, %v16605_v35  ;;  %v6436_v7 = vsel %vm4084_vm5, %v6434_v58, %v6435_v24  ;;  %v5168_v58 = vld [vmem:[#allocation3 + $0x140] sm:$0xff]  ;;  %6225 = vst.msk [vmem:[#allocation4 + $0x19] sm:$0xff] %vm6224_vm9, %v16621_v44 }
 0x329   : > { %v5773_v41 = vmax.f32 %v5593_v3, %v5672_v16  ;;  %v6974_v2 = vrot.slane %v6304_v19, 4  ;;  %v6049_v63 = vmax.f32 %v6017_v4, %v16347_v39  ;;  %v6559_v1 = vmax.f32 %v6304_v19, %v6436_v7  ;;  %v5167_v19 = vld [vmem:[#allocation3 + $0x138] sm:$0xff] }
 0x32a   : > { %v6616_v47 = vsel %vm4265_vm6, %v6614_v17, %v6615_v52  ;;  %v6796_v14 = vsel %vm4446_vm7, %v6794_v32, %v6795_v5  ;;  %6273 = vst.msk [vmem:[#allocation3 + $0xf2] sm:$0xff] %vm225_vm1, %v6080_v13  ;;  %6160 = vrot.lane.b32.xlu0 %v6080_v13, %s13148_s25  ;;  %v6975_v31 = vrot.slane %v6305_v48, 4  ;;  %v7131_v40 = vmax.f32 %v16455_v25, %v16465_v45 }
 0x32b   : > { %v16617_v18 = vmax.f32 %v5773_v41, %v5852_v53  ;;  %v6437_v43 = vrot.slane %v6306_v59, 1  ;;  %v6739_v36 = vmax.f32 %v6559_v1, %v6616_v47  ;;  %v6617_v54 = vrot.slane %v6306_v59, 2 }
 0x32c   : > { %v6797_v20 = vrot.slane %v6306_v59, 3  ;;  %v6977_v30 = vrot.slane %v6306_v59, 4  ;;  %v6976_v29 = vsel %vm584_vm0, %v6974_v2, %v6975_v31  ;;  %v7163_v46 = vmax.f32 %v7131_v40, %v16467_v26 }
 0x32d   : > { %v6081_v16 = vmax.f32 %v6049_v63, %v16617_v18  ;;  %v6438_v53 = vsel %vm4084_vm5, %v6435_v24, %v6437_v43  ;;  %v6919_v3 = vmax.f32 %v6739_v36, %v6796_v14  ;;  %v6618_v25 = vsel %vm4265_vm6, %v6615_v52, %v6617_v54  ;;  %v16635_v24 = vpop.permute.xlu0 %4995  ;;  %v5169_v14 = vld [vmem:[#allocation3 + $0x148] sm:$0xf]  ;;  %v16642_v36 = vpop.permute.xlu1 %6130 }
 0x32e   : > { %v6560_v17 = vmax.f32 %v6305_v48, %v6438_v53  ;;  %v6798_v4 = vsel %vm4446_vm7, %v6795_v5, %v6797_v20  ;;  %v7195_v32 = vmax.f32 %v7163_v46, %v16472_v22  ;;  %v6978_v59 = vsel %vm584_vm0, %v6975_v31, %v6977_v30  ;;  %5078 = vst.msk [vmem:[#allocation4 + $0xc1] sm:$0xff] %vm5063_vm8, %v16635_v24 }
 0x32f   : > { %6274 = vst.msk [vmem:[#allocation3 + $0xfa] sm:$0xff] %vm225_vm1, %v6081_v16  ;;  %6162 = vrot.lane.b32.xlu1 %v6081_v16, %s13148_s25  ;;  %v7132_v13 = vmax.f32 %v16564_v11, %v16566_v56  ;;  %v5313_v41 = vrot.slane %v5167_v19, 1  ;;  %v16637_v7 = vmax.f32 %v6919_v3, %v6976_v29  ;;  %v5314_v52 = vrot.slane %v5168_v58, 1 }
 0x330   : > { %v6740_v48 = vmax.f32 %v6560_v17, %v6618_v25  ;;  %v5493_v2 = vrot.slane %v5167_v19, 2  ;;  %v5494_v63 = vrot.slane %v5168_v58, 2  ;;  %v5673_v1 = vrot.slane %v5167_v19, 3  ;;  %6226 = vst.msk [vmem:[#allocation4 + $0x21] sm:$0xff] %vm6224_vm9, %v16642_v36 }
 0x331   : > { %v7164_v5 = vmax.f32 %v7132_v13, %v16576_v12  ;;  %v5674_v47 = vrot.slane %v5168_v58, 3  ;;  %v7227_v40 = vmax.f32 %v7195_v32, %v16637_v7  ;;  %v5315_v43 = vsel %vm4084_vm5, %v5313_v41, %v5314_v52  ;;  %v6307_v13 = vld [vmem:[#allocation3 + $0x90] sm:$0xff]  ;;  %v16652_v41 = vpop.permute.xlu0 %4999 }
 0x332   : > { %v6920_v31 = vmax.f32 %v6740_v48, %v6798_v4  ;;  %v5853_v11 = vrot.slane %v5167_v19, 4  ;;  %v5414_v20 = vmax.f32 %v5167_v19, %v5315_v43  ;;  %v5495_v30 = vsel %vm4265_vm6, %v5493_v2, %v5494_v63  ;;  %5080 = vst.msk [vmem:[#allocation4 + $0xd9] sm:$0xff] %vm5063_vm8, %v16652_v41 }
 0x333   : > { %v7196_v54 = vmax.f32 %v7164_v5, %v16578_v23  ;;  %v5675_v16 = vsel %vm4446_vm7, %v5673_v1, %v5674_v47  ;;  %7293 = vrot.lane.b32.xlu0 %v7227_v40, %s13149_s26  ;;  %v5854_v46 = vrot.slane %v5168_v58, 4  ;;  %v5986_v53 = vmax.f32 %v16164_v21, %v16220_v15  ;;  %v6308_v5 = vld [vmem:[#allocation3 + $0x98] sm:$0xff] }
 0x334   : > { %v16648_v29 = vmax.f32 %v6920_v31, %v6978_v59  ;;  %v5316_v3 = vrot.slane %v5169_v14, 1  ;;  %v5594_v17 = vmax.f32 %v5414_v20, %v5495_v30  ;;  %v5496_v25 = vrot.slane %v5169_v14, 2  ;;  %v16665_v20 = vpop.permute.xlu1 %5001 }
 0x335   : > { %v5676_v4 = vrot.slane %v5169_v14, 3  ;;  %v5856_v32 = vrot.slane %v5169_v14, 4  ;;  %v5855_v48 = vsel %vm584_vm0, %v5853_v11, %v5854_v46  ;;  %v6018_v2 = vmax.f32 %v5986_v53, %v16312_v62  ;;  %5081 = vst.msk [vmem:[#allocation4 + $0xe1] sm:$0xff] %vm5063_vm8, %v16665_v20 }
 0x336   : > { %v7228_v19 = vmax.f32 %v7196_v54, %v16648_v29  ;;  %v5317_v59 = vsel %vm4084_vm5, %v5314_v52, %v5316_v3  ;;  %v5774_v1 = vmax.f32 %v5594_v17, %v5675_v16  ;;  %v5497_v21 = vsel %vm4265_vm6, %v5494_v63, %v5496_v25  ;;  %v6309_v17 = vld [vmem:[#allocation3 + $0xa0] sm:$0xf] }
 0x337   : > { %v5415_v40 = vmax.f32 %v5168_v58, %v5317_v59  ;;  %v5677_v31 = vsel %vm4446_vm7, %v5674_v47, %v5676_v4  ;;  %v6050_v14 = vmax.f32 %v6018_v2, %v16605_v35  ;;  %v5857_v43 = vsel %vm584_vm0, %v5854_v46, %v5856_v32  ;;  %v16672_v32 = vpop.permute.xlu0 %6132 }
 0x338   : > { %7295 = vrot.lane.b32.xlu1 %v7228_v19, %s13149_s26  ;;  %v5987_v11 = vmax.f32 %v16174_v8, %v16233_v37  ;;  %v6439_v54 = vrot.slane %v6307_v13, 1  ;;  %v16667_v52 = vmax.f32 %v5774_v1, %v5855_v48  ;;  %v6440_v58 = vrot.slane %v6308_v5, 1  ;;  %6227 = vst.msk [vmem:[#allocation4 + $0x31] sm:$0xff] %vm6224_vm9, %v16672_v32 }
 0x339   : > { %v5595_v30 = vmax.f32 %v5415_v40, %v5497_v21  ;;  %v6619_v16 = vrot.slane %v6307_v13, 2  ;;  %v6620_v47 = vrot.slane %v6308_v5, 2  ;;  %v6799_v53 = vrot.slane %v6307_v13, 3 }
 0x33a   : > { %v6019_v63 = vmax.f32 %v5987_v11, %v16347_v39  ;;  %v6800_v3 = vrot.slane %v6308_v5, 3  ;;  %v6082_v25 = vmax.f32 %v6050_v14, %v16667_v52  ;;  %v6441_v4 = vsel %vm4084_vm5, %v6439_v54, %v6440_v58 }
 0x33b   : > { %v5775_v46 = vmax.f32 %v5595_v30, %v5677_v31  ;;  %v6979_v8 = vrot.slane %v6307_v13, 4  ;;  %v6561_v48 = vmax.f32 %v6307_v13, %v6441_v4  ;;  %v6621_v2 = vsel %vm4265_vm6, %v6619_v16, %v6620_v47  ;;  %v16683_v13 = vld [vmem:[#allocation3 + $0x150] sm:$0xff]  ;;  %v16685_v16 = vpop.permute.xlu1 %6134 }
 0x33c   : > { %v6051_v19 = vmax.f32 %v6019_v63, %v16617_v18  ;;  %v6801_v59 = vsel %vm4446_vm7, %v6799_v53, %v6800_v3  ;;  %6275 = vst.msk [vmem:[#allocation3 + $0x10a] sm:$0xff] %vm225_vm1, %v6082_v25  ;;  %6164 = vrot.lane.b32.xlu0 %v6082_v25, %s13148_s25  ;;  %v6980_v40 = vrot.slane %v6308_v5, 4  ;;  %v7133_v21 = vmax.f32 %v16465_v45, %v16467_v26 }
 0x33d   : > { %v16679_v1 = vmax.f32 %v5775_v46, %v5857_v43  ;;  %v6442_v31 = vrot.slane %v6309_v17, 1  ;;  %v6741_v14 = vmax.f32 %v6561_v48, %v6621_v2  ;;  %v6622_v11 = vrot.slane %v6309_v17, 2  ;;  %v16691_v46 = vld [vmem:[#allocation3 + $0x158] sm:$0xff]  ;;  %6228 = vst.msk [vmem:[#allocation4 + $0x39] sm:$0xff] %vm6224_vm9, %v16685_v16 }
 0x33e   : > { %v6802_v54 = vrot.slane %v6309_v17, 3  ;;  %v6982_v30 = vrot.slane %v6309_v17, 4  ;;  %v6981_v53 = vsel %vm584_vm0, %v6979_v8, %v6980_v40  ;;  %v7165_v43 = vmax.f32 %v7133_v21, %v16472_v22  ;;  %v5004_v21 = vpop.permute.xlu0 %5003 }
 0x33f   : > { %v6083_v63 = vmax.f32 %v6051_v19, %v16679_v1  ;;  %v6443_v25 = vsel %vm4084_vm5, %v6440_v58, %v6442_v31  ;;  %v6921_v45 = vmax.f32 %v6741_v14, %v6801_v59  ;;  %v6623_v48 = vsel %vm4265_vm6, %v6620_v47, %v6622_v11  ;;  %5082 = vst.msk [vmem:[#allocation4 + $0xf1] sm:$0xff] %vm5063_vm8, %v5004_v21 }
 0x340   : > { %v6562_v4 = vmax.f32 %v6308_v5, %v6443_v25  ;;  %v6803_v17 = vsel %vm4446_vm7, %v6800_v3, %v6802_v54  ;;  %v7197_v19 = vmax.f32 %v7165_v43, %v16637_v7  ;;  %v6983_v8 = vsel %vm584_vm0, %v6980_v40, %v6982_v30  ;;  %v5006_v43 = vpop.permute.xlu1 %5005 }
 0x341   : > { %6276 = vst.msk [vmem:[#allocation3 + $0x112] sm:$0xff] %vm225_vm1, %v6083_v63  ;;  %6166 = vrot.lane.b32.xlu1 %v6083_v63, %s13148_s25  ;;  %v7134_v2 = vmax.f32 %v16566_v56, %v16576_v12  ;;  %v5318_v58 = vrot.slane %v16683_v13, 1  ;;  %v16702_v59 = vmax.f32 %v6921_v45, %v6981_v53  ;;  %v5319_v47 = vrot.slane %v16691_v46, 1  ;;  %v5172_v53 = vld [vmem:[#allocation3 + $0x160] sm:$0xf] }
 0x342   : > { %v6742_v5 = vmax.f32 %v6562_v4, %v6623_v48  ;;  %v5498_v3 = vrot.slane %v16683_v13, 2  ;;  %v5499_v14 = vrot.slane %v16691_v46, 2  ;;  %v5678_v11 = vrot.slane %v16683_v13, 3  ;;  %5083 = vst.msk [vmem:[#allocation4 + $0xf9] sm:$0xff] %vm5063_vm8, %v5006_v43 }
 0x343   : > { %v7166_v31 = vmax.f32 %v7134_v2, %v16578_v23  ;;  %v5679_v40 = vrot.slane %v16691_v46, 3  ;;  %v7229_v56 = vmax.f32 %v7197_v19, %v16702_v59  ;;  %v5320_v30 = vsel %vm4084_vm5, %v5318_v58, %v5319_v47 }
 0x344   : > { %v6922_v54 = vmax.f32 %v6742_v5, %v6803_v17  ;;  %v5858_v63 = vrot.slane %v16683_v13, 4  ;;  %v5416_v45 = vmax.f32 %v16683_v13, %v5320_v30  ;;  %v5500_v4 = vsel %vm4265_vm6, %v5498_v3, %v5499_v14 }
 0x345   : > { %v7198_v25 = vmax.f32 %v7166_v31, %v16648_v29  ;;  %v5680_v48 = vsel %vm4446_vm7, %v5678_v11, %v5679_v40  ;;  %7297 = vrot.lane.b32.xlu0 %v7229_v56, %s13149_s26  ;;  %v5859_v17 = vrot.slane %v16691_v46, 4  ;;  %v5988_v19 = vmax.f32 %v16220_v15, %v16312_v62  ;;  %v16761_v15 = vpop.permute.xlu0 %6136 }
 0x346   : > { %v16718_v2 = vmax.f32 %v6922_v54, %v6983_v8  ;;  %v5596_v58 = vmax.f32 %v5416_v45, %v5500_v4  ;;  %v5321_v5 = vrot.slane %v5172_v53, 1  ;;  %v5501_v13 = vrot.slane %v5172_v53, 2  ;;  %6229 = vst.msk [vmem:[#allocation4 + $0x49] sm:$0xff] %vm6224_vm9, %v16761_v15 }
 0x347   : > { %v5681_v31 = vrot.slane %v5172_v53, 3  ;;  %v5860_v9 = vsel %vm584_vm0, %v5858_v63, %v5859_v17  ;;  %v6020_v28 = vmax.f32 %v5988_v19, %v16605_v35  ;;  %v5861_v0 = vrot.slane %v5172_v53, 4 }
 0x348   : > { %v7230_v50 = vmax.f32 %v7198_v25, %v16718_v2  ;;  %v5776_v6 = vmax.f32 %v5596_v58, %v5680_v48  ;;  %v5322_v38 = vsel %vm4084_vm5, %v5319_v47, %v5321_v5  ;;  %v5502_v42 = vsel %vm4265_vm6, %v5499_v14, %v5501_v13  ;;  %v6312_v14 = vld [vmem:[#allocation3 + $0xb8] sm:$0xf]  ;;  %v16790_v5 = vpop.permute.xlu1 %6138 }
 0x349   : > { %v5682_v61 = vsel %vm4446_vm7, %v5679_v40, %v5681_v31  ;;  %v6052_v57 = vmax.f32 %v6020_v28, %v16667_v52  ;;  %v5417_v10 = vmax.f32 %v16691_v46, %v5322_v38  ;;  %v5862_v34 = vsel %vm584_vm0, %v5859_v17, %v5861_v0  ;;  %v5008_v54 = vpop.permute.xlu0 %5007  ;;  %v5173_v28 = vld [vmem:[#allocation3 + $0x168] sm:$0xff]  ;;  %v5174_v0 = vld [vmem:[#allocation3 + $0x170] sm:$0xff]  ;;  %6230 = vst.msk [vmem:[#allocation4 + $0x51] sm:$0xff] %vm6224_vm9, %v16790_v5 }
 0x34a   : > { %7299 = vrot.lane.b32.xlu1 %v7230_v50, %s13149_s26  ;;  %v5989_v27 = vmax.f32 %v16233_v37, %v16347_v39  ;;  %v16775_v55 = vmax.f32 %v5776_v6, %v5860_v9  ;;  %v6444_v24 = vrot.slane %v6310_v60, 1  ;;  %v6445_v41 = vrot.slane %v6311_v49, 1  ;;  %5084 = vst.msk [vmem:[#allocation4 + $0x109] sm:$0xff] %vm5063_vm8, %v5008_v54 }
 0x34b   : > { %v6624_v20 = vrot.slane %v6310_v60, 2  ;;  %v5597_v8 = vmax.f32 %v5417_v10, %v5502_v42  ;;  %v6625_v47 = vrot.slane %v6311_v49, 2  ;;  %v6804_v3 = vrot.slane %v6310_v60, 3 }
 0x34c   : > { %v6021_v21 = vmax.f32 %v5989_v27, %v16617_v18  ;;  %v6084_v11 = vmax.f32 %v6052_v57, %v16775_v55  ;;  %v6446_v46 = vsel %vm4084_vm5, %v6444_v24, %v6445_v41  ;;  %v6805_v40 = vrot.slane %v6311_v49, 3 }
 0x34d   : > { %v6984_v56 = vrot.slane %v6310_v60, 4  ;;  %v5777_v30 = vmax.f32 %v5597_v8, %v5682_v61  ;;  %v6563_v63 = vmax.f32 %v6310_v60, %v6446_v46  ;;  %v6626_v53 = vsel %vm4265_vm6, %v6624_v20, %v6625_v47  ;;  %v5010_v46 = vpop.permute.xlu1 %5009 }
 0x34e   : > { %v6053_v37 = vmax.f32 %v6021_v21, %v16679_v1  ;;  %6277 = vst.msk [vmem:[#allocation3 + $0x122] sm:$0xff] %vm225_vm1, %v6084_v11  ;;  %6168 = vrot.lane.b32.xlu0 %v6084_v11, %s13148_s25  ;;  %v6806_v43 = vsel %vm4446_vm7, %v6804_v3, %v6805_v40  ;;  %v6985_v25 = vrot.slane %v6311_v49, 4  ;;  %v7135_v45 = vmax.f32 %v16467_v26, %v16472_v22  ;;  %v5175_v11 = vld [vmem:[#allocation3 + $0x178] sm:$0xf] }
 0x34f   : > { %v6447_v4 = vrot.slane %v6312_v14, 1  ;;  %v16788_v48 = vmax.f32 %v5777_v30, %v5862_v34  ;;  %v6743_v17 = vmax.f32 %v6563_v63, %v6626_v53  ;;  %v6627_v19 = vrot.slane %v6312_v14, 2  ;;  %5085 = vst.msk [vmem:[#allocation4 + $0x111] sm:$0xff] %vm5063_vm8, %v5010_v46 }
 0x350   : > { %v6807_v58 = vrot.slane %v6312_v14, 3  ;;  %v6986_v13 = vsel %vm584_vm0, %v6984_v56, %v6985_v25  ;;  %v7167_v31 = vmax.f32 %v7135_v45, %v16637_v7  ;;  %v6987_v9 = vrot.slane %v6312_v14, 4 }
 0x351   : > { %v6448_v50 = vsel %vm4084_vm5, %v6445_v41, %v6447_v4  ;;  %v6085_v60 = vmax.f32 %v6053_v37, %v16788_v48  ;;  %v6923_v26 = vmax.f32 %v6743_v17, %v6806_v43  ;;  %v6628_v38 = vsel %vm4265_vm6, %v6625_v47, %v6627_v19  ;;  %v16818_v19 = vpop.permute.xlu0 %6140 }
 0x352   : > { %v6564_v6 = vmax.f32 %v6311_v49, %v6448_v50  ;;  %v7199_v42 = vmax.f32 %v7167_v31, %v16702_v59  ;;  %v6808_v61 = vsel %vm4446_vm7, %v6805_v40, %v6807_v58  ;;  %v6988_v57 = vsel %vm584_vm0, %v6985_v25, %v6987_v9  ;;  %v6313_v9 = vld [vmem:[#allocation3 + $0xc0] sm:$0xff]  ;;  %6231 = vst.msk [vmem:[#allocation4 + $0x61] sm:$0xff] %vm6224_vm9, %v16818_v19 }
 0x353   : > { %v7136_v10 = vmax.f32 %v16576_v12, %v16578_v23  ;;  %6278 = vst.msk [vmem:[#allocation3 + $0x12a] sm:$0xff] %vm225_vm1, %v6085_v60  ;;  %6170 = vrot.lane.b32.xlu1 %v6085_v60, %s13148_s25  ;;  %v16804_v34 = vmax.f32 %v6923_v26, %v6986_v13  ;;  %v5323_v24 = vrot.slane %v5173_v28, 1  ;;  %v5324_v49 = vrot.slane %v5174_v0, 1 }
 0x354   : > { %v6744_v27 = vmax.f32 %v6564_v6, %v6628_v38  ;;  %v5503_v20 = vrot.slane %v5173_v28, 2  ;;  %v5504_v8 = vrot.slane %v5174_v0, 2  ;;  %v5683_v21 = vrot.slane %v5173_v28, 3 }
 0x355   : > { %v7168_v41 = vmax.f32 %v7136_v10, %v16648_v29  ;;  %v7231_v47 = vmax.f32 %v7199_v42, %v16804_v34  ;;  %v5325_v14 = vsel %vm4084_vm5, %v5323_v24, %v5324_v49  ;;  %v5684_v12 = vrot.slane %v5174_v0, 3 }
 0x356   : > { %v6924_v3 = vmax.f32 %v6744_v27, %v6808_v61  ;;  %v5418_v56 = vmax.f32 %v5173_v28, %v5325_v14  ;;  %v5505_v54 = vsel %vm4265_vm6, %v5503_v20, %v5504_v8  ;;  %v5863_v30 = vrot.slane %v5173_v28, 4  ;;  %v16823_v28 = vld [vmem:[#allocation3 + $0xc8] sm:$0xff] }
 0x357   : > { %v7200_v40 = vmax.f32 %v7168_v41, %v16718_v2  ;;  %7301 = vrot.lane.b32.xlu0 %v7231_v47, %s13149_s26  ;;  %v5685_v63 = vsel %vm4446_vm7, %v5683_v21, %v5684_v12  ;;  %v5864_v53 = vrot.slane %v5174_v0, 4  ;;  %v5990_v43 = vmax.f32 %v16312_v62, %v16605_v35  ;;  %v6315_v47 = vld [vmem:[#allocation3 + $0xd0] sm:$0xf] }
 0x358   : > { %v16813_v37 = vmax.f32 %v6924_v3, %v6988_v57  ;;  %v5598_v25 = vmax.f32 %v5418_v56, %v5505_v54  ;;  %v5326_v45 = vrot.slane %v5175_v11, 1  ;;  %v5506_v4 = vrot.slane %v5175_v11, 2 }
 0x359   : > { %v5686_v17 = vrot.slane %v5175_v11, 3  ;;  %v5865_v13 = vsel %vm584_vm0, %v5863_v30, %v5864_v53  ;;  %v6022_v31 = vmax.f32 %v5990_v43, %v16667_v52  ;;  %v5866_v50 = vrot.slane %v5175_v11, 4  ;;  %v5012_v11 = vpop.permute.xlu0 %5011 }
 0x35a   : > { %v7232_v58 = vmax.f32 %v7200_v40, %v16813_v37  ;;  %v5778_v60 = vmax.f32 %v5598_v25, %v5685_v63  ;;  %v5327_v26 = vsel %vm4084_vm5, %v5324_v49, %v5326_v45  ;;  %v5507_v62 = vsel %vm4265_vm6, %v5504_v8, %v5506_v4  ;;  %5086 = vst.msk [vmem:[#allocation4 + $0x121] sm:$0xff] %vm5063_vm8, %v5012_v11 }
 0x35b   : > { %v5687_v6 = vsel %vm4446_vm7, %v5684_v12, %v5686_v17  ;;  %v6054_v38 = vmax.f32 %v6022_v31, %v16775_v55  ;;  %v5419_v42 = vmax.f32 %v5174_v0, %v5327_v26  ;;  %v5867_v61 = vsel %vm584_vm0, %v5864_v53, %v5866_v50  ;;  %v16841_v12 = vpop.permute.xlu1 %6142 }
 0x35c   : > { %7303 = vrot.lane.b32.xlu1 %v7232_v58, %s13149_s26  ;;  %v5991_v57 = vmax.f32 %v16347_v39, %v16617_v18  ;;  %v16833_v10 = vmax.f32 %v5778_v60, %v5865_v13  ;;  %v6449_v27 = vrot.slane %v6313_v9, 1  ;;  %v6450_v24 = vrot.slane %v16823_v28, 1  ;;  %v16857_v60 = vld [vmem:[#allocation3 + $0x188] sm:$0xff]  ;;  %6232 = vst.msk [vmem:[#allocation4 + $0x69] sm:$0xff] %vm6224_vm9, %v16841_v12 }
 0x35d   : > { %v6629_v49 = vrot.slane %v6313_v9, 2  ;;  %v5599_v41 = vmax.f32 %v5419_v42, %v5507_v62  ;;  %v6630_v8 = vrot.slane %v16823_v28, 2  ;;  %v6809_v21 = vrot.slane %v6313_v9, 3 }
 0x35e   : > { %v6023_v20 = vmax.f32 %v5991_v57, %v16679_v1  ;;  %v6086_v0 = vmax.f32 %v6054_v38, %v16833_v10  ;;  %v6451_v3 = vsel %vm4084_vm5, %v6449_v27, %v6450_v24  ;;  %v6810_v14 = vrot.slane %v16823_v28, 3  ;;  %v7485_v38 = vld [vmem:[%s18936_s3 + $0x18] sm:$0xff] }
 0x35f   : > { %v6989_v39 = vrot.slane %v6313_v9, 4  ;;  %v5779_v46 = vmax.f32 %v5599_v41, %v5687_v6  ;;  %v6565_v56 = vmax.f32 %v6313_v9, %v6451_v3  ;;  %v6631_v54 = vsel %vm4265_vm6, %v6629_v49, %v6630_v8  ;;  %v5176_v9 = vld [vmem:[#allocation3 + $0x180] sm:$0xff]  ;;  %v5014_v42 = vpop.permute.xlu1 %5013  ;;  %12654 = vmatprep.subr.mxu1 %v7485_v38 }
 0x360   : > { %v6055_v40 = vmax.f32 %v6023_v20, %v16788_v48  ;;  %6279 = vst.msk [vmem:[#allocation3 + $0x13a] sm:$0xff] %vm225_vm1, %v6086_v0  ;;  %6172 = vrot.lane.b32.xlu0 %v6086_v0, %s13148_s25  ;;  %v6811_v30 = vsel %vm4446_vm7, %v6809_v21, %v6810_v14  ;;  %v6990_v63 = vrot.slane %v16823_v28, 4  ;;  %v7137_v53 = vmax.f32 %v16472_v22, %v16637_v7 }
 0x361   : > { %v6452_v43 = vrot.slane %v6315_v47, 1  ;;  %v16852_v25 = vmax.f32 %v5779_v46, %v5867_v61  ;;  %v6745_v45 = vmax.f32 %v6565_v56, %v6631_v54  ;;  %v6632_v4 = vrot.slane %v6315_v47, 2  ;;  %v16865_v61 = vpop.permute.xlu0 %6144  ;;  %5087 = vst.msk [vmem:[#allocation4 + $0x129] sm:$0xff] %vm5063_vm8, %v5014_v42  ;;  %12655 = vmatpush3.msra.mxu1 %v7485_v38  ;;  %v5178_v46 = vld [vmem:[#allocation3 + $0x190] sm:$0xf]  ;;  %v16898_v38 = vld [vmem:[#allocation3 + $0x1a0] sm:$0xff] }
 0x362   : > { %v6812_v17 = vrot.slane %v6315_v47, 3  ;;  %v6991_v58 = vsel %vm584_vm0, %v6989_v39, %v6990_v63  ;;  %v7169_v13 = vmax.f32 %v7137_v53, %v16702_v59  ;;  %v6992_v50 = vrot.slane %v6315_v47, 4  ;;  %6233 = vst.msk [vmem:[#allocation4 + $0x79] sm:$0xff] %vm6224_vm9, %v16865_v61  ;;  %v17157_v61 = vld [vmem:[#allocation3 + $0x110] sm:$0xff] }
 0x363   : > { %v6453_v31 = vsel %vm4084_vm5, %v6450_v24, %v6452_v43  ;;  %v6087_v26 = vmax.f32 %v6055_v40, %v16852_v25  ;;  %v6925_v62 = vmax.f32 %v6745_v45, %v6811_v30  ;;  %v6633_v6 = vsel %vm4265_vm6, %v6630_v8, %v6632_v4  ;;  %v16883_v40 = vpop.permute.xlu1 %6146 }
 0x364   : > { %v6566_v22 = vmax.f32 %v16823_v28, %v6453_v31  ;;  %v7201_v57 = vmax.f32 %v7169_v13, %v16804_v34  ;;  %v6813_v27 = vsel %vm4446_vm7, %v6810_v14, %v6812_v17  ;;  %v6993_v24 = vsel %vm584_vm0, %v6990_v63, %v6992_v50  ;;  %6234 = vst.msk [vmem:[#allocation4 + $0x81] sm:$0xff] %vm6224_vm9, %v16883_v40 }
 0x365   : > { %v7138_v49 = vmax.f32 %v16578_v23, %v16648_v29  ;;  %6280 = vst.msk [vmem:[#allocation3 + $0x142] sm:$0xff] %vm225_vm1, %v6087_v26  ;;  %6174 = vrot.lane.b32.xlu1 %v6087_v26, %s13148_s25  ;;  %v16875_v28 = vmax.f32 %v6925_v62, %v6991_v58  ;;  %v5328_v20 = vrot.slane %v5176_v9, 1  ;;  %v5329_v8 = vrot.slane %v16857_v60, 1  ;;  %v5016_v56 = vpop.permute.xlu0 %5015 }
 0x366   : > { %v6746_v41 = vmax.f32 %v6566_v22, %v6633_v6  ;;  %v5508_v47 = vrot.slane %v5176_v9, 2  ;;  %v5509_v0 = vrot.slane %v16857_v60, 2  ;;  %v5688_v23 = vrot.slane %v5176_v9, 3  ;;  %5088 = vst.msk [vmem:[#allocation4 + $0x139] sm:$0xff] %vm5063_vm8, %v5016_v56  ;;  %v5179_v6 = vld [vmem:[#allocation3 + $0x198] sm:$0xff] }
 0x367   : > { %v7170_v21 = vmax.f32 %v7138_v49, %v16718_v2  ;;  %v7233_v3 = vmax.f32 %v7201_v57, %v16875_v28  ;;  %v5330_v39 = vsel %vm4084_vm5, %v5328_v20, %v5329_v8  ;;  %v5689_v11 = vrot.slane %v16857_v60, 3  ;;  %v5018_v42 = vpop.permute.xlu1 %5017  ;;  %v5181_v56 = vld [vmem:[#allocation3 + $0x1a8] sm:$0xf] }
 0x368   : > { %v6926_v14 = vmax.f32 %v6746_v41, %v6813_v27  ;;  %v5420_v30 = vmax.f32 %v5176_v9, %v5330_v39  ;;  %v5510_v63 = vsel %vm4265_vm6, %v5508_v47, %v5509_v0  ;;  %v5868_v53 = vrot.slane %v5176_v9, 4  ;;  %5089 = vst.msk [vmem:[#allocation4 + $0x141] sm:$0xff] %vm5063_vm8, %v5018_v42 }
 0x369   : > { %v7202_v54 = vmax.f32 %v7170_v21, %v16813_v37  ;;  %7305 = vrot.lane.b32.xlu0 %v7233_v3, %s13149_s26  ;;  %v5690_v45 = vsel %vm4446_vm7, %v5688_v23, %v5689_v11  ;;  %v5869_v4 = vrot.slane %v16857_v60, 4  ;;  %v5992_v17 = vmax.f32 %v16605_v35, %v16667_v52  ;;  %v16900_v57 = vpop.permute.xlu0 %6148 }
 0x36a   : > { %v16889_v43 = vmax.f32 %v6926_v14, %v6993_v24  ;;  %v5600_v58 = vmax.f32 %v5420_v30, %v5510_v63  ;;  %v5331_v13 = vrot.slane %v5178_v46, 1  ;;  %v5511_v31 = vrot.slane %v5178_v46, 2  ;;  %6235 = vst.msk [vmem:[#allocation4 + $0x91] sm:$0xff] %vm6224_vm9, %v16900_v57 }
 0x36b   : > { %v5691_v50 = vrot.slane %v5178_v46, 3  ;;  %v5870_v9 = vsel %vm584_vm0, %v5868_v53, %v5869_v4  ;;  %v6024_v62 = vmax.f32 %v5992_v17, %v16775_v55  ;;  %v5871_v22 = vrot.slane %v5178_v46, 4 }
 0x36c   : > { %v7234_v26 = vmax.f32 %v7202_v54, %v16889_v43  ;;  %v5780_v27 = vmax.f32 %v5600_v58, %v5690_v45  ;;  %v5332_v35 = vsel %vm4084_vm5, %v5329_v8, %v5331_v13  ;;  %v5512_v24 = vsel %vm4265_vm6, %v5509_v0, %v5511_v31  ;;  %v16917_v54 = vpop.permute.xlu1 %6150 }
 0x36d   : > { %v5692_v49 = vsel %vm4446_vm7, %v5689_v11, %v5691_v50  ;;  %v6056_v41 = vmax.f32 %v6024_v62, %v16833_v10  ;;  %v5421_v20 = vmax.f32 %v16857_v60, %v5332_v35  ;;  %v5872_v21 = vsel %vm584_vm0, %v5869_v4, %v5871_v22  ;;  %v5020_v60 = vpop.permute.xlu0 %5019  ;;  %v7484_v35 = vld [vmem:[%s18936_s3 + $0x10] sm:$0xff]  ;;  %6236 = vst.msk [vmem:[#allocation4 + $0x99] sm:$0xff] %vm6224_vm9, %v16917_v54 }
 0x36e   : > { %7307 = vrot.lane.b32.xlu1 %v7234_v26, %s13149_s26  ;;  %v5993_v47 = vmax.f32 %v16617_v18, %v16679_v1  ;;  %v16912_v23 = vmax.f32 %v5780_v27, %v5870_v9  ;;  %v5333_v8 = vrot.slane %v5179_v6, 1  ;;  %v5334_v0 = vrot.slane %v16898_v38, 1  ;;  %5090 = vst.msk [vmem:[#allocation4 + $0x151] sm:$0xff] %vm5063_vm8, %v5020_v60  ;;  %12656 = vmatprep.subr.mxu1 %v7484_v35 }
 0x36f   : > { %v5513_v3 = vrot.slane %v5179_v6, 2  ;;  %v5601_v14 = vmax.f32 %v5421_v20, %v5512_v24  ;;  %v5514_v11 = vrot.slane %v16898_v38, 2  ;;  %v5693_v46 = vrot.slane %v5179_v6, 3  ;;  %v7451_v24 = vld [vmem:[%s18936_s3 + $0x8] sm:$0xff]  ;;  %12657 = vmatpush3.msra.mxu1 %v7484_v35 }
 0x370   : > { %v6025_v39 = vmax.f32 %v5993_v47, %v16788_v48  ;;  %v6088_v30 = vmax.f32 %v6056_v41, %v16912_v23  ;;  %v5335_v18 = vsel %vm4084_vm5, %v5333_v8, %v5334_v0  ;;  %v5694_v63 = vrot.slane %v16898_v38, 3  ;;  %v16944_v47 = vld [vmem:[#allocation3 + $0xe0] sm:$0xff]  ;;  %12706 = vmatprep.subr.mxu0 %v7451_v24  ;;  %v7450_v8 = vld [vmem:[%s18936_s3] sm:$0xff] }
 0x371   : > { %v5873_v53 = vrot.slane %v5179_v6, 4  ;;  %v5781_v45 = vmax.f32 %v5601_v14, %v5692_v49  ;;  %v5422_v17 = vmax.f32 %v5179_v6, %v5335_v18  ;;  %v5515_v58 = vsel %vm4265_vm6, %v5513_v3, %v5514_v11  ;;  %v5022_v6 = vpop.permute.xlu1 %5021  ;;  %v16933_v27 = vpop.permute.xlu0 %6152  ;;  %12707 = vmatpush3.msra.mxu0 %v7451_v24 }
 0x372   : > { %v6057_v4 = vmax.f32 %v6025_v39, %v16852_v25  ;;  %6281 = vst.msk [vmem:[#allocation3 + $0x152] sm:$0xff] %vm225_vm1, %v6088_v30  ;;  %6176 = vrot.lane.b32.xlu0 %v6088_v30, %s13148_s25  ;;  %v5695_v13 = vsel %vm4446_vm7, %v5693_v46, %v5694_v63  ;;  %v5874_v31 = vrot.slane %v16898_v38, 4  ;;  %v5994_v50 = vmax.f32 %v16667_v52, %v16775_v55 }
 0x373   : > { %v5336_v26 = vrot.slane %v5181_v56, 1  ;;  %v16931_v9 = vmax.f32 %v5781_v45, %v5872_v21  ;;  %v5602_v62 = vmax.f32 %v5422_v17, %v5515_v58  ;;  %v5516_v22 = vrot.slane %v5181_v56, 2  ;;  %v6316_v21 = vld [vmem:[#allocation3 + $0xd8] sm:$0xff]  ;;  %5091 = vst.msk [vmem:[#allocation4 + $0x159] sm:$0xff] %vm5063_vm8, %v5022_v6  ;;  %12708 = vmatprep.subr.mxu0 %v7450_v8 }
 0x374   : > { %v5696_v42 = vrot.slane %v5181_v56, 3  ;;  %v5875_v49 = vsel %vm584_vm0, %v5873_v53, %v5874_v31  ;;  %v6026_v52 = vmax.f32 %v5994_v50, %v16833_v10  ;;  %v5876_v20 = vrot.slane %v5181_v56, 4  ;;  %12709 = vmatpush3.msra.mxu0 %v7450_v8  ;;  %6237 = vst.msk [vmem:[#allocation4 + $0xa9] sm:$0xff] %vm6224_vm9, %v16933_v27 }
 0x375   : > { %v5337_v41 = vsel %vm4084_vm5, %v5334_v0, %v5336_v26  ;;  %v6089_v3 = vmax.f32 %v6057_v4, %v16931_v9  ;;  %v5782_v14 = vmax.f32 %v5602_v62, %v5695_v13  ;;  %v5517_v46 = vsel %vm4265_vm6, %v5514_v11, %v5516_v22  ;;  %v16963_v45 = vpop.permute.xlu1 %6154  ;;  %v5024_v4 = vpop.permute.xlu0 %5023  ;;  %v6318_v62 = vld [vmem:[#allocation3 + $0xe8] sm:$0xf] }
 0x376   : > { %v5423_v39 = vmax.f32 %v16898_v38, %v5337_v41  ;;  %v6058_v0 = vmax.f32 %v6026_v52, %v16912_v23  ;;  %v5697_v56 = vsel %vm4446_vm7, %v5694_v63, %v5696_v42  ;;  %v5877_v60 = vsel %vm584_vm0, %v5874_v31, %v5876_v20  ;;  %5092 = vst.msk [vmem:[#allocation4 + $0x169] sm:$0xff] %vm5063_vm8, %v5024_v4 }
 0x377   : > { %v5995_v30 = vmax.f32 %v16679_v1, %v16788_v48  ;;  %6282 = vst.msk [vmem:[#allocation3 + $0x15a] sm:$0xff] %vm225_vm1, %v6089_v3  ;;  %6178 = vrot.lane.b32.xlu1 %v6089_v3, %s13148_s25  ;;  %v16960_v18 = vmax.f32 %v5782_v14, %v5875_v49  ;;  %v6454_v53 = vrot.slane %v6316_v21, 1  ;;  %v6455_v11 = vrot.slane %v16944_v47, 1 }
 0x378   : > { %v5603_v38 = vmax.f32 %v5423_v39, %v5517_v46  ;;  %v6634_v17 = vrot.slane %v6316_v21, 2  ;;  %v6635_v1 = vrot.slane %v16944_v47, 2  ;;  %v6814_v58 = vrot.slane %v6316_v21, 3  ;;  %6238 = vst.msk [vmem:[#allocation4 + $0xb1] sm:$0xff] %vm6224_vm9, %v16963_v45 }
 0x379   : > { %v6027_v63 = vmax.f32 %v5995_v30, %v16852_v25  ;;  %v6090_v13 = vmax.f32 %v6058_v0, %v16960_v18  ;;  %v6456_v50 = vsel %vm4084_vm5, %v6454_v53, %v6455_v11  ;;  %v6815_v26 = vrot.slane %v16944_v47, 3  ;;  %v5026_v20 = vpop.permute.xlu1 %5025  ;;  %v5182_v30 = vld [vmem:[#allocation3 + $0x1b0] sm:$0xff] }
 0x37a   : > { %v5783_v31 = vmax.f32 %v5603_v38, %v5697_v56  ;;  %v6567_v42 = vmax.f32 %v6316_v21, %v6456_v50  ;;  %v6636_v6 = vsel %vm4265_vm6, %v6634_v17, %v6635_v1  ;;  %v6994_v35 = vrot.slane %v6316_v21, 4  ;;  %5093 = vst.msk [vmem:[#allocation4 + $0x171] sm:$0xff] %vm5063_vm8, %v5026_v20  ;;  %v8161_v21 = vld [vmem:[%s18936_s3 + $0x28] sm:$0xff]  ;;  %v5185_v38 = vld [vmem:[#allocation3 + $0x1c8] sm:$0xff] }
 0x37b   : > { %v6059_v22 = vmax.f32 %v6027_v63, %v16931_v9  ;;  %6283 = vst.msk [vmem:[#allocation3 + $0x16a] sm:$0xff] %vm225_vm1, %v6090_v13  ;;  %6180 = vrot.lane.b32.xlu0 %v6090_v13, %s13148_s25  ;;  %v6816_v49 = vsel %vm4446_vm7, %v6814_v58, %v6815_v26  ;;  %v6995_v52 = vrot.slane %v16944_v47, 4  ;;  %v7139_v41 = vmax.f32 %v16637_v7, %v16702_v59  ;;  %v16988_v7 = vld [vmem:[#allocation3 + $0x1b8] sm:$0xff]  ;;  %v16993_v58 = vld [vmem:[#allocation3 + $0x1d0] sm:$0xff] }
 0x37c   : > { %v16975_v24 = vmax.f32 %v5783_v31, %v5877_v60  ;;  %v6747_v8 = vmax.f32 %v6567_v42, %v6636_v6  ;;  %v6457_v3 = vrot.slane %v6318_v62, 1  ;;  %v6637_v14 = vrot.slane %v6318_v62, 2  ;;  %12758 = vmatprep.subr.mxu1 %v8161_v21 }
 0x37d   : > { %v6817_v39 = vrot.slane %v6318_v62, 3  ;;  %v6996_v0 = vsel %vm584_vm0, %v6994_v35, %v6995_v52  ;;  %v7171_v56 = vmax.f32 %v7139_v41, %v16804_v34  ;;  %v6997_v60 = vrot.slane %v6318_v62, 4 }
 0x37e   : > { %v6091_v46 = vmax.f32 %v6059_v22, %v16975_v24  ;;  %v6927_v53 = vmax.f32 %v6747_v8, %v6816_v49  ;;  %v6458_v4 = vsel %vm4084_vm5, %v6455_v11, %v6457_v3  ;;  %v6638_v63 = vsel %vm4265_vm6, %v6635_v1, %v6637_v14 }
 0x37f   : > { %v6818_v17 = vsel %vm4446_vm7, %v6815_v26, %v6817_v39  ;;  %v7203_v13 = vmax.f32 %v7171_v56, %v16875_v28  ;;  %v6568_v31 = vmax.f32 %v16944_v47, %v6458_v4  ;;  %v6998_v50 = vsel %vm584_vm0, %v6995_v52, %v6997_v60 }
 0x380   : > { %6284 = vst.msk [vmem:[#allocation3 + $0x172] sm:$0xff] %vm225_vm1, %v6091_v46  ;;  %6182 = vrot.lane.b32.xlu1 %v6091_v46, %s13148_s25  ;;  %v7140_v62 = vmax.f32 %v16648_v29, %v16718_v2  ;;  %v17002_v11 = vmax.f32 %v6927_v53, %v6996_v0  ;;  %v5338_v1 = vrot.slane %v5182_v30, 1  ;;  %v17005_v26 = vrot.slane %v16988_v7, 1 }
 0x381   : > { %v5343_v22 = vrot.slane %v5185_v38, 1  ;;  %v6748_v42 = vmax.f32 %v6568_v31, %v6638_v63  ;;  %v17009_v35 = vrot.slane %v16993_v58, 1  ;;  %v5518_v49 = vrot.slane %v5182_v30, 2 }
 0x382   : > { %v7172_v6 = vmax.f32 %v7140_v62, %v16813_v37  ;;  %v7235_v47 = vmax.f32 %v7203_v13, %v17002_v11  ;;  %v5340_v52 = vsel %vm4084_vm5, %v5338_v1, %v17005_v26  ;;  %v17015_v29 = vrot.slane %v16988_v7, 2  ;;  %v5184_v62 = vld [vmem:[#allocation3 + $0x1c0] sm:$0xf] }
 0x383   : > { %v5523_v41 = vrot.slane %v5185_v38, 2  ;;  %v6928_v20 = vmax.f32 %v6748_v42, %v6818_v17  ;;  %v5345_v3 = vsel %vm4084_vm5, %v5343_v22, %v17009_v35  ;;  %v5424_v14 = vmax.f32 %v5182_v30, %v5340_v52 }
 0x384   : > { %v7204_v8 = vmax.f32 %v7172_v6, %v16889_v43  ;;  %7309 = vrot.lane.b32.xlu0 %v7235_v47, %s13149_s26  ;;  %v5426_v39 = vmax.f32 %v5185_v38, %v5345_v3  ;;  %v5520_v21 = vsel %vm4265_vm6, %v5518_v49, %v17015_v29  ;;  %v17024_v46 = vrot.slane %v16993_v58, 2  ;;  %v5187_v6 = vld [vmem:[#allocation3 + $0x1d8] sm:$0xf] }
 0x385   : > { %v5698_v0 = vrot.slane %v5182_v30, 3  ;;  %v17026_v56 = vmax.f32 %v6928_v20, %v6998_v50  ;;  %v5604_v60 = vmax.f32 %v5424_v14, %v5520_v21  ;;  %v17029_v53 = vrot.slane %v16988_v7, 3 }
 0x386   : > { %v5703_v4 = vrot.slane %v5185_v38, 3  ;;  %v5525_v63 = vsel %vm4265_vm6, %v5523_v41, %v17024_v46  ;;  %v17034_v17 = vrot.slane %v16993_v58, 3  ;;  %v5878_v13 = vrot.slane %v5182_v30, 4 }
 0x387   : > { %v17037_v31 = vrot.slane %v16988_v7, 4  ;;  %v7236_v1 = vmax.f32 %v7204_v8, %v17026_v56  ;;  %v5606_v50 = vmax.f32 %v5426_v39, %v5525_v63  ;;  %v5700_v22 = vsel %vm4446_vm7, %v5698_v0, %v17029_v53 }
 0x388   : > { %v5883_v42 = vrot.slane %v5185_v38, 4  ;;  %v5705_v49 = vsel %vm4446_vm7, %v5703_v4, %v17034_v17  ;;  %v5784_v47 = vmax.f32 %v5604_v60, %v5700_v22  ;;  %v17047_v30 = vrot.slane %v16993_v58, 4 }
 0x389   : > { %v5880_v52 = vsel %vm584_vm0, %v5878_v13, %v17037_v31  ;;  %7311 = vrot.lane.b32.xlu1 %v7236_v1, %s13149_s26  ;;  %v5786_v41 = vmax.f32 %v5606_v50, %v5705_v49  ;;  %v5996_v20 = vmax.f32 %v16775_v55, %v16833_v10  ;;  %v5998_v38 = vmax.f32 %v16833_v10, %v16912_v23 }
 0x38a   : > { %v5341_v8 = vrot.slane %v5184_v62, 1  ;;  %v5885_v3 = vsel %vm584_vm0, %v5883_v42, %v17047_v30  ;;  %v17056_v14 = vmax.f32 %v5784_v47, %v5880_v52  ;;  %v5346_v39 = vrot.slane %v5187_v6, 1 }
 0x38b   : > { %v5521_v21 = vrot.slane %v5184_v62, 2  ;;  %v17058_v0 = vmax.f32 %v5786_v41, %v5885_v3  ;;  %v6028_v60 = vmax.f32 %v5996_v20, %v16912_v23  ;;  %v6030_v4 = vmax.f32 %v5998_v38, %v16960_v18  ;;  %v17074_v20 = vld [vmem:[#allocation3 + $0xf0] sm:$0xff] }
 0x38c   : > { %v5342_v55 = vsel %vm4084_vm5, %v17005_v26, %v5341_v8  ;;  %v5347_v10 = vsel %vm4084_vm5, %v17009_v35, %v5346_v39  ;;  %v5526_v1 = vrot.slane %v5187_v6, 2  ;;  %v5701_v42 = vrot.slane %v5184_v62, 3  ;;  %v17082_v39 = vld [vmem:[#allocation3 + $0xf8] sm:$0xff] }
 0x38d   : > { %v5425_v63 = vmax.f32 %v16988_v7, %v5342_v55  ;;  %v5522_v13 = vsel %vm4265_vm6, %v17015_v29, %v5521_v21  ;;  %v6060_v50 = vmax.f32 %v6028_v60, %v16960_v18  ;;  %v6062_v22 = vmax.f32 %v6030_v4, %v17056_v14  ;;  %v6157_v55 = vpop.permute.xlu0 %6156 }
 0x38e   : > { %v5427_v23 = vmax.f32 %v16993_v58, %v5347_v10  ;;  %v5527_v49 = vsel %vm4265_vm6, %v17024_v46, %v5526_v1  ;;  %v5706_v52 = vrot.slane %v5187_v6, 3  ;;  %v5881_v41 = vrot.slane %v5184_v62, 4  ;;  %6239 = vst.msk [vmem:[#allocation4 + $0xc1] sm:$0xff] %vm6224_vm9, %v6157_v55 }
 0x38f   : > { %v5605_v47 = vmax.f32 %v5425_v63, %v5522_v13  ;;  %v6092_v38 = vmax.f32 %v6060_v50, %v17056_v14  ;;  %v17078_v8 = vmax.f32 %v6062_v22, %v17058_v0  ;;  %v5702_v18 = vsel %vm4446_vm7, %v17029_v53, %v5701_v42 }
 0x390   : > { %v5607_v3 = vmax.f32 %v5427_v23, %v5527_v49  ;;  %v5707_v21 = vsel %vm4446_vm7, %v17034_v17, %v5706_v52  ;;  %v5882_v62 = vsel %vm584_vm0, %v17037_v31, %v5881_v41  ;;  %v5886_v4 = vrot.slane %v5187_v6, 4 }
 0x391   : > { %v5785_v60 = vmax.f32 %v5605_v47, %v5702_v18  ;;  %6285 = vst.msk [vmem:[#allocation3 + $0x182] sm:$0xff] %vm225_vm1, %v6092_v38  ;;  %6287 = vst.msk [vmem:[#allocation3 + $0x19a] sm:$0xff] %vm225_vm1, %v17078_v8  ;;  %6184 = vrot.lane.b32.xlu0 %v6092_v38, %s13148_s25  ;;  %v5997_v63 = vmax.f32 %v16788_v48, %v16852_v25  ;;  %v5999_v13 = vmax.f32 %v16852_v25, %v16931_v9  ;;  %v6321_v38 = vld [vmem:[#allocation3 + $0x100] sm:$0xf] }
 0x392   : > { %v5787_v10 = vmax.f32 %v5607_v3, %v5707_v21  ;;  %v6459_v1 = vrot.slane %v17074_v20, 1  ;;  %v5887_v6 = vsel %vm584_vm0, %v17047_v30, %v5886_v4  ;;  %v6460_v22 = vrot.slane %v17082_v39, 1  ;;  %v6159_v3 = vpop.permute.xlu1 %6158 }
 0x393   : > { %v5965_v50 = vmax.f32 %v5785_v60, %v5882_v62  ;;  %v6639_v23 = vrot.slane %v17074_v20, 2  ;;  %v6029_v49 = vmax.f32 %v5997_v63, %v16931_v9  ;;  %v6031_v47 = vmax.f32 %v5999_v13, %v16975_v24  ;;  %v17114_v63 = vpop.permute.xlu0 %7289  ;;  %6240 = vst.msk [vmem:[#allocation4 + $0xc9] sm:$0xff] %vm6224_vm9, %v6159_v3 }
 0x394   : > { %v5967_v42 = vmax.f32 %v5787_v10, %v5887_v6  ;;  %v6640_v48 = vrot.slane %v17082_v39, 2  ;;  %v6461_v52 = vsel %vm4084_vm5, %v6459_v1, %v6460_v22  ;;  %v6819_v25 = vrot.slane %v17074_v20, 3  ;;  %7386 = vst.msk [vmem:[#allocation4 + $0x19] sm:$0xff] %vm7385_vm10, %v17114_v63 }
 0x395   : > { %v6820_v41 = vrot.slane %v17082_v39, 3  ;;  %v6061_v18 = vmax.f32 %v6029_v49, %v16975_v24  ;;  %v6063_v21 = vmax.f32 %v6031_v47, %v5965_v50  ;;  %v6569_v60 = vmax.f32 %v17074_v20, %v6461_v52 }
 0x396   : > { %v6999_v62 = vrot.slane %v17074_v20, 4  ;;  %v6641_v9 = vsel %vm4265_vm6, %v6639_v23, %v6640_v48  ;;  %v7000_v4 = vrot.slane %v17082_v39, 4  ;;  %v7141_v10 = vmax.f32 %v16702_v59, %v16804_v34  ;;  %v6322_v59 = vld [vmem:[#allocation3 + $0x108] sm:$0xff] }
 0x397   : > { %v6093_v13 = vmax.f32 %v6061_v18, %v5965_v50  ;;  %v17116_v1 = vmax.f32 %v6063_v21, %v5967_v42  ;;  %v6749_v6 = vmax.f32 %v6569_v60, %v6641_v9  ;;  %v6462_v24 = vrot.slane %v6321_v38, 1 }
 0x398   : > { %v6821_v44 = vsel %vm4446_vm7, %v6819_v25, %v6820_v41  ;;  %v7173_v36 = vmax.f32 %v7141_v10, %v16875_v28  ;;  %v6642_v32 = vrot.slane %v6321_v38, 2  ;;  %v6822_v16 = vrot.slane %v6321_v38, 3  ;;  %v17163_v45 = vpop.permute.xlu1 %7291 }
 0x399   : > { %6286 = vst.msk [vmem:[#allocation3 + $0x18a] sm:$0xff] %vm225_vm1, %v6093_v13  ;;  %6288 = vst.msk [vmem:[#allocation3 + $0x1a2] sm:$0xff] %vm225_vm1, %v17116_v1  ;;  %6186 = vrot.lane.b32.xlu1 %v6093_v13, %s13148_s25  ;;  %v6929_v15 = vmax.f32 %v6749_v6, %v6821_v44  ;;  %v6463_v5 = vsel %vm4084_vm5, %v6460_v22, %v6462_v24  ;;  %v7002_v19 = vrot.slane %v6321_v38, 4  ;;  %v6464_v22 = vrot.slane %v6322_v59, 1  ;;  %v6324_v38 = vld [vmem:[#allocation3 + $0x118] sm:$0xf] }
 0x39a   : > { %v7142_v12 = vmax.f32 %v16718_v2, %v16813_v37  ;;  %v7001_v40 = vsel %vm584_vm0, %v6999_v62, %v7000_v4  ;;  %v7205_v57 = vmax.f32 %v7173_v36, %v17002_v11  ;;  %v6570_v54 = vmax.f32 %v17082_v39, %v6463_v5  ;;  %v17187_v5 = vld [vmem:[#allocation3 + $0x128] sm:$0xff]  ;;  %7387 = vst.msk [vmem:[#allocation4 + $0x21] sm:$0xff] %vm7385_vm10, %v17163_v45 }
 0x39b   : > { %v6643_v27 = vsel %vm4265_vm6, %v6640_v48, %v6642_v32  ;;  %v17165_v20 = vmax.f32 %v6929_v15, %v7001_v40  ;;  %v6823_v55 = vsel %vm4446_vm7, %v6820_v41, %v6822_v16  ;;  %v6465_v23 = vrot.slane %v17157_v61, 1  ;;  %v6325_v15 = vld [vmem:[#allocation3 + $0x120] sm:$0xff] }
 0x39c   : > { %v7174_v50 = vmax.f32 %v7142_v12, %v16889_v43  ;;  %v6750_v2 = vmax.f32 %v6570_v54, %v6643_v27  ;;  %v6644_v42 = vrot.slane %v6322_v59, 2  ;;  %v6645_v49 = vrot.slane %v17157_v61, 2  ;;  %v6161_v47 = vpop.permute.xlu0 %6160 }
 0x39d   : > { %v7237_v39 = vmax.f32 %v7205_v57, %v17165_v20  ;;  %v7003_v48 = vsel %vm584_vm0, %v7000_v4, %v7002_v19  ;;  %v6824_v52 = vrot.slane %v6322_v59, 3  ;;  %v6825_v25 = vrot.slane %v17157_v61, 3  ;;  %6241 = vst.msk [vmem:[#allocation4 + $0xd9] sm:$0xff] %vm6224_vm9, %v6161_v47 }
 0x39e   : > { %v6930_v41 = vmax.f32 %v6750_v2, %v6823_v55  ;;  %v7206_v3 = vmax.f32 %v7174_v50, %v17026_v56  ;;  %v6466_v18 = vsel %vm4084_vm5, %v6464_v22, %v6465_v23  ;;  %v7004_v21 = vrot.slane %v6322_v59, 4 }
 0x39f   : > { %7313 = vrot.lane.b32.xlu0 %v7237_v39, %s13149_s26  ;;  %v6571_v60 = vmax.f32 %v6322_v59, %v6466_v18  ;;  %v6646_v62 = vsel %vm4265_vm6, %v6644_v42, %v6645_v49  ;;  %v7005_v9 = vrot.slane %v17157_v61, 4  ;;  %v7143_v4 = vmax.f32 %v16804_v34, %v16875_v28 }
 0x3a0   : > { %v17182_v10 = vmax.f32 %v6930_v41, %v7003_v48  ;;  %v6467_v13 = vrot.slane %v6324_v38, 1  ;;  %v6647_v6 = vrot.slane %v6324_v38, 2  ;;  %v6827_v24 = vrot.slane %v6324_v38, 3 }
 0x3a1   : > { %v6163_v44 = vpop.permute.xlu1 %6162  ;;  %v6751_v36 = vmax.f32 %v6571_v60, %v6646_v62  ;;  %v6826_v32 = vsel %vm4446_vm7, %v6824_v52, %v6825_v25  ;;  %v7006_v16 = vsel %vm584_vm0, %v7004_v21, %v7005_v9  ;;  %v7175_v59 = vmax.f32 %v7143_v4, %v17002_v11 }
 0x3a2   : > { %6242 = vst.msk [vmem:[#allocation4 + $0xe1] sm:$0xff] %vm6224_vm9, %v6163_v44  ;;  %v7238_v34 = vmax.f32 %v7206_v3, %v17182_v10  ;;  %v6468_v19 = vsel %vm4084_vm5, %v6465_v23, %v6467_v13  ;;  %v6648_v12 = vsel %vm4265_vm6, %v6645_v49, %v6647_v6  ;;  %v7007_v40 = vrot.slane %v6324_v38, 4  ;;  %v6327_v38 = vld [vmem:[#allocation3 + $0x130] sm:$0xf] }
 0x3a3   : > { %v6931_v57 = vmax.f32 %v6751_v36, %v6826_v32  ;;  %v7207_v54 = vmax.f32 %v7175_v59, %v17165_v20  ;;  %v6572_v27 = vmax.f32 %v17157_v61, %v6468_v19  ;;  %v6828_v55 = vsel %vm4446_vm7, %v6825_v25, %v6827_v24 }
 0x3a4   : > { %7315 = vrot.lane.b32.xlu1 %v7238_v34, %s13149_s26  ;;  %v7144_v50 = vmax.f32 %v16813_v37, %v16889_v43  ;;  %v6469_v22 = vrot.slane %v6325_v15, 1  ;;  %v6470_v2 = vrot.slane %v17187_v5, 1  ;;  %v6649_v42 = vrot.slane %v6325_v15, 2  ;;  %v17221_v34 = vld [vmem:[#allocation3 + $0x140] sm:$0xff] }
 0x3a5   : > { %v17200_v23 = vmax.f32 %v6931_v57, %v7006_v16  ;;  %v6752_v49 = vmax.f32 %v6572_v27, %v6648_v12  ;;  %v6650_v47 = vrot.slane %v17187_v5, 2  ;;  %v6829_v39 = vrot.slane %v6325_v15, 3  ;;  %v17213_v13 = vpop.permute.xlu0 %7293 }
 0x3a6   : > { %v7176_v48 = vmax.f32 %v7144_v50, %v17026_v56  ;;  %v6471_v61 = vsel %vm4084_vm5, %v6469_v22, %v6470_v2  ;;  %v6830_v52 = vrot.slane %v17187_v5, 3  ;;  %v7009_v25 = vrot.slane %v6325_v15, 4  ;;  %7388 = vst.msk [vmem:[#allocation4 + $0x31] sm:$0xff] %vm7385_vm10, %v17213_v13 }
 0x3a7   : > { %v7239_v37 = vmax.f32 %v7207_v54, %v17200_v23  ;;  %v6932_v41 = vmax.f32 %v6752_v49, %v6828_v55  ;;  %v7008_v3 = vsel %vm584_vm0, %v7005_v9, %v7007_v40  ;;  %v6573_v18 = vmax.f32 %v6325_v15, %v6471_v61  ;;  %v6328_v15 = vld [vmem:[#allocation3 + $0x138] sm:$0xff] }
 0x3a8   : > { %v7208_v21 = vmax.f32 %v7176_v48, %v17182_v10  ;;  %v6651_v60 = vsel %vm4265_vm6, %v6649_v42, %v6650_v47  ;;  %v7010_v62 = vrot.slane %v17187_v5, 4  ;;  %v7145_v4 = vmax.f32 %v16875_v28, %v17002_v11 }
 0x3a9   : > { %7317 = vrot.lane.b32.xlu0 %v7239_v37, %s13149_s26  ;;  %v17216_v6 = vmax.f32 %v6932_v41, %v7008_v3  ;;  %v6753_v24 = vmax.f32 %v6573_v18, %v6651_v60  ;;  %v6472_v44 = vrot.slane %v6327_v38, 1  ;;  %v6652_v36 = vrot.slane %v6327_v38, 2  ;;  %v6330_v41 = vld [vmem:[#allocation3 + $0x148] sm:$0xf] }
 0x3aa   : > { %v6831_v9 = vsel %vm4446_vm7, %v6829_v39, %v6830_v52  ;;  %v7011_v32 = vsel %vm584_vm0, %v7009_v25, %v7010_v62  ;;  %v7177_v16 = vmax.f32 %v7145_v4, %v17165_v20  ;;  %v6832_v59 = vrot.slane %v6327_v38, 3  ;;  %v17229_v50 = vpop.permute.xlu1 %7295 }
 0x3ab   : > { %v7240_v28 = vmax.f32 %v7208_v21, %v17216_v6  ;;  %v6933_v19 = vmax.f32 %v6753_v24, %v6831_v9  ;;  %v6473_v12 = vsel %vm4084_vm5, %v6470_v2, %v6472_v44  ;;  %v7012_v40 = vrot.slane %v6327_v38, 4  ;;  %7389 = vst.msk [vmem:[#allocation4 + $0x39] sm:$0xff] %vm7385_vm10, %v17229_v50 }
 0x3ac   : > { %v7209_v57 = vmax.f32 %v7177_v16, %v17200_v23  ;;  %v6574_v54 = vmax.f32 %v17187_v5, %v6473_v12  ;;  %v6653_v27 = vsel %vm4265_vm6, %v6650_v47, %v6652_v36  ;;  %v6833_v55 = vsel %vm4446_vm7, %v6830_v52, %v6832_v59  ;;  %v6331_v12 = vld [vmem:[#allocation3 + $0x150] sm:$0xff] }
 0x3ad   : > { %7319 = vrot.lane.b32.xlu1 %v7240_v28, %s13149_s26  ;;  %v17232_v22 = vmax.f32 %v6933_v19, %v7011_v32  ;;  %v7146_v42 = vmax.f32 %v16889_v43, %v17026_v56  ;;  %v6474_v49 = vrot.slane %v6328_v15, 1  ;;  %v6475_v2 = vrot.slane %v17221_v34, 1 }
 0x3ae   : > { %v6754_v39 = vmax.f32 %v6574_v54, %v6653_v27  ;;  %v6654_v48 = vrot.slane %v6328_v15, 2  ;;  %v6655_v5 = vrot.slane %v17221_v34, 2  ;;  %v6834_v61 = vrot.slane %v6328_v15, 3  ;;  %v6165_v47 = vpop.permute.xlu0 %6164 }
 0x3af   : > { %v7241_v52 = vmax.f32 %v7209_v57, %v17232_v22  ;;  %v7178_v25 = vmax.f32 %v7146_v42, %v17182_v10  ;;  %v6476_v38 = vsel %vm4084_vm5, %v6474_v49, %v6475_v2  ;;  %v6835_v37 = vrot.slane %v17221_v34, 3  ;;  %6243 = vst.msk [vmem:[#allocation4 + $0xf1] sm:$0xff] %vm6224_vm9, %v6165_v47 }
 0x3b0   : > { %v6934_v43 = vmax.f32 %v6754_v39, %v6833_v55  ;;  %v7013_v3 = vsel %vm584_vm0, %v7010_v62, %v7012_v40  ;;  %v6575_v18 = vmax.f32 %v6328_v15, %v6476_v38  ;;  %v7014_v21 = vrot.slane %v6328_v15, 4  ;;  %v17255_v40 = vld [vmem:[#allocation3 + $0x158] sm:$0xff] }
 0x3b1   : > { %7321 = vrot.lane.b32.xlu0 %v7241_v52, %s13149_s26  ;;  %v7210_v60 = vmax.f32 %v7178_v25, %v17216_v6  ;;  %v6656_v4 = vsel %vm4265_vm6, %v6654_v48, %v6655_v5  ;;  %v7015_v24 = vrot.slane %v17221_v34, 4  ;;  %v7147_v44 = vmax.f32 %v17002_v11, %v17165_v20 }
 0x3b2   : > { %v17250_v36 = vmax.f32 %v6934_v43, %v7013_v3  ;;  %v6755_v9 = vmax.f32 %v6575_v18, %v6656_v4  ;;  %v6477_v32 = vrot.slane %v6330_v41, 1  ;;  %v6657_v16 = vrot.slane %v6330_v41, 2  ;;  %v6333_v3 = vld [vmem:[#allocation3 + $0x160] sm:$0xf] }
 0x3b3   : > { %v6167_v59 = vpop.permute.xlu1 %6166  ;;  %v6836_v62 = vsel %vm4446_vm7, %v6834_v61, %v6835_v37  ;;  %v7016_v15 = vsel %vm584_vm0, %v7014_v21, %v7015_v24  ;;  %v7179_v28 = vmax.f32 %v7147_v44, %v17200_v23  ;;  %v6837_v19 = vrot.slane %v6330_v41, 3 }
 0x3b4   : > { %6244 = vst.msk [vmem:[#allocation4 + $0xf9] sm:$0xff] %vm6224_vm9, %v6167_v59  ;;  %v7242_v11 = vmax.f32 %v7210_v60, %v17250_v36  ;;  %v6935_v57 = vmax.f32 %v6755_v9, %v6836_v62  ;;  %v6478_v54 = vsel %vm4084_vm5, %v6475_v2, %v6477_v32  ;;  %v7017_v27 = vrot.slane %v6330_v41, 4 }
 0x3b5   : > { %v7211_v55 = vmax.f32 %v7179_v28, %v17232_v22  ;;  %v6576_v42 = vmax.f32 %v17221_v34, %v6478_v54  ;;  %v6658_v49 = vsel %vm4265_vm6, %v6655_v5, %v6657_v16  ;;  %v6838_v39 = vsel %vm4446_vm7, %v6835_v37, %v6837_v19  ;;  %v17289_v54 = vld [vmem:[#allocation3 + $0x170] sm:$0xff] }
 0x3b6   : > { %7323 = vrot.lane.b32.xlu1 %v7242_v11, %s13149_s26  ;;  %v17265_v48 = vmax.f32 %v6935_v57, %v7016_v15  ;;  %v7148_v61 = vmax.f32 %v17026_v56, %v17182_v10  ;;  %v6479_v47 = vrot.slane %v6331_v12, 1  ;;  %v6480_v52 = vrot.slane %v17255_v40, 1  ;;  %v6334_v57 = vld [vmem:[#allocation3 + $0x168] sm:$0xff] }
 0x3b7   : > { %v6756_v2 = vmax.f32 %v6576_v42, %v6658_v49  ;;  %v6659_v25 = vrot.slane %v6331_v12, 2  ;;  %v6660_v38 = vrot.slane %v17255_v40, 2  ;;  %v6839_v41 = vrot.slane %v6331_v12, 3  ;;  %v17282_v16 = vpop.permute.xlu0 %7297 }
 0x3b8   : > { %v7243_v34 = vmax.f32 %v7211_v55, %v17265_v48  ;;  %v7180_v5 = vmax.f32 %v7148_v61, %v17216_v6  ;;  %v6481_v37 = vsel %vm4084_vm5, %v6479_v47, %v6480_v52  ;;  %v6840_v43 = vrot.slane %v17255_v40, 3  ;;  %7390 = vst.msk [vmem:[#allocation4 + $0x49] sm:$0xff] %vm7385_vm10, %v17282_v16 }
 0x3b9   : > { %v6936_v18 = vmax.f32 %v6756_v2, %v6838_v39  ;;  %v7018_v56 = vsel %vm584_vm0, %v7015_v24, %v7017_v27  ;;  %v6577_v21 = vmax.f32 %v6331_v12, %v6481_v37  ;;  %v7019_v60 = vrot.slane %v6331_v12, 4 }
 0x3ba   : > { %7325 = vrot.lane.b32.xlu0 %v7243_v34, %s13149_s26  ;;  %v7212_v4 = vmax.f32 %v7180_v5, %v17250_v36  ;;  %v6661_v44 = vsel %vm4265_vm6, %v6659_v25, %v6660_v38  ;;  %v7020_v9 = vrot.slane %v17255_v40, 4  ;;  %v7149_v32 = vmax.f32 %v17165_v20, %v17200_v23 }
 0x3bb   : > { %v17284_v59 = vmax.f32 %v6936_v18, %v7018_v56  ;;  %v6757_v62 = vmax.f32 %v6577_v21, %v6661_v44  ;;  %v6482_v15 = vrot.slane %v6333_v3, 1  ;;  %v6662_v24 = vrot.slane %v6333_v3, 2 }
 0x3bc   : > { %v6841_v28 = vsel %vm4446_vm7, %v6839_v41, %v6840_v43  ;;  %v7021_v19 = vsel %vm584_vm0, %v7019_v60, %v7020_v9  ;;  %v7181_v12 = vmax.f32 %v7149_v32, %v17232_v22  ;;  %v6842_v11 = vrot.slane %v6333_v3, 3 }
 0x3bd   : > { %v7244_v27 = vmax.f32 %v7212_v4, %v17284_v59  ;;  %v6937_v20 = vmax.f32 %v6757_v62, %v6841_v28  ;;  %v6483_v55 = vsel %vm4084_vm5, %v6480_v52, %v6482_v15  ;;  %v7022_v42 = vrot.slane %v6333_v3, 4  ;;  %v17303_v52 = vpop.permute.xlu1 %7299 }
 0x3be   : > { %v7213_v49 = vmax.f32 %v7181_v12, %v17265_v48  ;;  %v6578_v39 = vmax.f32 %v17255_v40, %v6483_v55  ;;  %v6663_v61 = vsel %vm4265_vm6, %v6660_v38, %v6662_v24  ;;  %v6843_v47 = vsel %vm4446_vm7, %v6840_v43, %v6842_v11  ;;  %7391 = vst.msk [vmem:[#allocation4 + $0x51] sm:$0xff] %vm7385_vm10, %v17303_v52 }
 0x3bf   : > { %7327 = vrot.lane.b32.xlu1 %v7244_v27, %s13149_s26  ;;  %v17298_v2 = vmax.f32 %v6937_v20, %v7021_v19  ;;  %v7150_v25 = vmax.f32 %v17182_v10, %v17216_v6  ;;  %v6484_v41 = vrot.slane %v6334_v57, 1  ;;  %v6485_v34 = vrot.slane %v17289_v54, 1  ;;  %v6336_v10 = vld [vmem:[#allocation3 + $0x178] sm:$0xf] }
 0x3c0   : > { %v6758_v5 = vmax.f32 %v6578_v39, %v6663_v61  ;;  %v6664_v37 = vrot.slane %v6334_v57, 2  ;;  %v6665_v40 = vrot.slane %v17289_v54, 2  ;;  %v6844_v3 = vrot.slane %v6334_v57, 3  ;;  %v6169_v38 = vpop.permute.xlu0 %6168 }
 0x3c1   : > { %v7245_v43 = vmax.f32 %v7213_v49, %v17298_v2  ;;  %v7182_v18 = vmax.f32 %v7150_v25, %v17250_v36  ;;  %v6486_v56 = vsel %vm4084_vm5, %v6484_v41, %v6485_v34  ;;  %v6845_v21 = vrot.slane %v17289_v54, 3  ;;  %6245 = vst.msk [vmem:[#allocation4 + $0x109] sm:$0xff] %vm6224_vm9, %v6169_v38  ;;  %v17323_v49 = vld [vmem:[#allocation3 + $0x188] sm:$0xff] }
 0x3c2   : > { %v6938_v60 = vmax.f32 %v6758_v5, %v6843_v47  ;;  %v7023_v4 = vsel %vm584_vm0, %v7020_v9, %v7022_v42  ;;  %v6579_v44 = vmax.f32 %v6334_v57, %v6486_v56  ;;  %v7024_v32 = vrot.slane %v6334_v57, 4  ;;  %v6337_v42 = vld [vmem:[#allocation3 + $0x180] sm:$0xff] }
 0x3c3   : > { %7329 = vrot.lane.b32.xlu0 %v7245_v43, %s13149_s26  ;;  %v7214_v62 = vmax.f32 %v7182_v18, %v17284_v59  ;;  %v6666_v15 = vsel %vm4265_vm6, %v6664_v37, %v6665_v40  ;;  %v7025_v24 = vrot.slane %v17289_v54, 4  ;;  %v7151_v28 = vmax.f32 %v17200_v23, %v17232_v22 }
 0x3c4   : > { %v17318_v19 = vmax.f32 %v6938_v60, %v7023_v4  ;;  %v6759_v12 = vmax.f32 %v6579_v44, %v6666_v15  ;;  %v6487_v11 = vrot.slane %v6336_v10, 1  ;;  %v6667_v27 = vrot.slane %v6336_v10, 2 }
 0x3c5   : > { %v6846_v9 = vsel %vm4446_vm7, %v6844_v3, %v6845_v21  ;;  %v7026_v57 = vsel %vm584_vm0, %v7024_v32, %v7025_v24  ;;  %v7183_v20 = vmax.f32 %v7151_v28, %v17265_v48  ;;  %v6847_v55 = vrot.slane %v6336_v10, 3  ;;  %v6171_v39 = vpop.permute.xlu1 %6170  ;;  %v6339_v32 = vld [vmem:[#allocation3 + $0x190] sm:$0xf] }
 0x3c6   : > { %v7246_v61 = vmax.f32 %v7214_v62, %v17318_v19  ;;  %v6939_v47 = vmax.f32 %v6759_v12, %v6846_v9  ;;  %v6488_v23 = vsel %vm4084_vm5, %v6485_v34, %v6487_v11  ;;  %v7027_v25 = vrot.slane %v6336_v10, 4  ;;  %6246 = vst.msk [vmem:[#allocation4 + $0x111] sm:$0xff] %vm6224_vm9, %v6171_v39 }
 0x3c7   : > { %v7215_v41 = vmax.f32 %v7183_v20, %v17298_v2  ;;  %v6580_v5 = vmax.f32 %v17289_v54, %v6488_v23  ;;  %v6668_v37 = vsel %vm4265_vm6, %v6665_v40, %v6667_v27  ;;  %v6848_v3 = vsel %vm4446_vm7, %v6845_v21, %v6847_v55 }
 0x3c8   : > { %7331 = vrot.lane.b32.xlu1 %v7246_v61, %s13149_s26  ;;  %v17333_v38 = vmax.f32 %v6939_v47, %v7026_v57  ;;  %v7152_v43 = vmax.f32 %v17216_v6, %v17250_v36  ;;  %v6489_v18 = vrot.slane %v6337_v42, 1  ;;  %v6490_v34 = vrot.slane %v17323_v49, 1 }
 0x3c9   : > { %v6760_v56 = vmax.f32 %v6580_v5, %v6668_v37  ;;  %v6669_v10 = vrot.slane %v6337_v42, 2  ;;  %v6670_v60 = vrot.slane %v17323_v49, 2  ;;  %v6849_v4 = vrot.slane %v6337_v42, 3  ;;  %v17350_v57 = vpop.permute.xlu0 %7301 }
 0x3ca   : > { %v7247_v54 = vmax.f32 %v7215_v41, %v17333_v38  ;;  %v7184_v40 = vmax.f32 %v7152_v43, %v17284_v59  ;;  %v6491_v21 = vsel %vm4084_vm5, %v6489_v18, %v6490_v34  ;;  %v6850_v44 = vrot.slane %v17323_v49, 3  ;;  %v17357_v41 = vld [vmem:[#allocation3 + $0x1a0] sm:$0xff]  ;;  %7392 = vst.msk [vmem:[#allocation4 + $0x61] sm:$0xff] %vm7385_vm10, %v17350_v57 }
 0x3cb   : > { %v6940_v62 = vmax.f32 %v6760_v56, %v6848_v3  ;;  %v7028_v6 = vsel %vm584_vm0, %v7025_v24, %v7027_v25  ;;  %v6581_v15 = vmax.f32 %v6337_v42, %v6491_v21  ;;  %v7029_v28 = vrot.slane %v6337_v42, 4  ;;  %v6340_v25 = vld [vmem:[#allocation3 + $0x198] sm:$0xff] }
 0x3cc   : > { %7333 = vrot.lane.b32.xlu0 %v7247_v54, %s13149_s26  ;;  %v7216_v12 = vmax.f32 %v7184_v40, %v17318_v19  ;;  %v6671_v11 = vsel %vm4265_vm6, %v6669_v10, %v6670_v60  ;;  %v7030_v27 = vrot.slane %v17323_v49, 4  ;;  %v7153_v9 = vmax.f32 %v17232_v22, %v17265_v48 }
 0x3cd   : > { %v17352_v20 = vmax.f32 %v6940_v62, %v7028_v6  ;;  %v6761_v55 = vmax.f32 %v6581_v15, %v6671_v11  ;;  %v6492_v39 = vrot.slane %v6339_v32, 1  ;;  %v6672_v24 = vrot.slane %v6339_v32, 2 }
 0x3ce   : > { %v6851_v42 = vsel %vm4446_vm7, %v6849_v4, %v6850_v44  ;;  %v7031_v61 = vsel %vm584_vm0, %v7029_v28, %v7030_v27  ;;  %v7185_v47 = vmax.f32 %v7153_v9, %v17298_v2  ;;  %v6852_v23 = vrot.slane %v6339_v32, 3 }
 0x3cf   : > { %v7248_v5 = vmax.f32 %v7216_v12, %v17352_v20  ;;  %v6941_v22 = vmax.f32 %v6761_v55, %v6851_v42  ;;  %v6493_v37 = vsel %vm4084_vm5, %v6490_v34, %v6492_v39  ;;  %v7032_v3 = vrot.slane %v6339_v32, 4  ;;  %v17371_v34 = vpop.permute.xlu1 %7303 }
 0x3d0   : > { %v7217_v43 = vmax.f32 %v7185_v47, %v17333_v38  ;;  %v6582_v18 = vmax.f32 %v17323_v49, %v6493_v37  ;;  %v6673_v56 = vsel %vm4265_vm6, %v6670_v60, %v6672_v24  ;;  %v6853_v10 = vsel %vm4446_vm7, %v6850_v44, %v6852_v23  ;;  %7393 = vst.msk [vmem:[#allocation4 + $0x69] sm:$0xff] %vm7385_vm10, %v17371_v34 }
 0x3d1   : > { %7335 = vrot.lane.b32.xlu1 %v7248_v5, %s13149_s26  ;;  %v17366_v4 = vmax.f32 %v6941_v22, %v7031_v61  ;;  %v7154_v54 = vmax.f32 %v17250_v36, %v17284_v59  ;;  %v6494_v40 = vrot.slane %v6340_v25, 1  ;;  %v6495_v21 = vrot.slane %v17357_v41, 1  ;;  %v6342_v36 = vld [vmem:[#allocation3 + $0x1a8] sm:$0xf] }
 0x3d2   : > { %v6762_v32 = vmax.f32 %v6582_v18, %v6673_v56  ;;  %v6674_v62 = vrot.slane %v6340_v25, 2  ;;  %v6675_v49 = vrot.slane %v17357_v41, 2  ;;  %v6854_v6 = vrot.slane %v6340_v25, 3  ;;  %v6173_v60 = vpop.permute.xlu0 %6172  ;;  %v6345_v18 = vld [vmem:[#allocation3 + $0x1c0] sm:$0xf] }
 0x3d3   : > { %v7249_v44 = vmax.f32 %v7217_v43, %v17366_v4  ;;  %v7186_v15 = vmax.f32 %v7154_v54, %v17318_v19  ;;  %v6496_v28 = vsel %vm4084_vm5, %v6494_v40, %v6495_v21  ;;  %v6855_v12 = vrot.slane %v17357_v41, 3  ;;  %6247 = vst.msk [vmem:[#allocation4 + $0x121] sm:$0xff] %vm6224_vm9, %v6173_v60 }
 0x3d4   : > { %v6942_v11 = vmax.f32 %v6762_v32, %v6853_v10  ;;  %v7033_v9 = vsel %vm584_vm0, %v7030_v27, %v7032_v3  ;;  %v6583_v55 = vmax.f32 %v6340_v25, %v6496_v28  ;;  %v7034_v39 = vrot.slane %v6340_v25, 4 }
 0x3d5   : > { %7337 = vrot.lane.b32.xlu0 %v7249_v44, %s13149_s26  ;;  %v7218_v24 = vmax.f32 %v7186_v15, %v17352_v20  ;;  %v6676_v42 = vsel %vm4265_vm6, %v6674_v62, %v6675_v49  ;;  %v7035_v61 = vrot.slane %v17357_v41, 4  ;;  %v7155_v47 = vmax.f32 %v17265_v48, %v17298_v2 }
 0x3d6   : > { %v17386_v23 = vmax.f32 %v6942_v11, %v7033_v9  ;;  %v6763_v5 = vmax.f32 %v6583_v55, %v6676_v42  ;;  %v6497_v22 = vrot.slane %v6342_v36, 1  ;;  %v6677_v37 = vrot.slane %v6342_v36, 2 }
 0x3d7   : > { %v6856_v27 = vsel %vm4446_vm7, %v6854_v6, %v6855_v12  ;;  %v7036_v25 = vsel %vm584_vm0, %v7034_v39, %v7035_v61  ;;  %v7187_v3 = vmax.f32 %v7155_v47, %v17333_v38  ;;  %v6857_v43 = vrot.slane %v6342_v36, 3  ;;  %v6175_v56 = vpop.permute.xlu1 %6174 }
 0x3d8   : > { %v7250_v10 = vmax.f32 %v7218_v24, %v17386_v23  ;;  %v6943_v54 = vmax.f32 %v6763_v5, %v6856_v27  ;;  %v6498_v40 = vsel %vm4084_vm5, %v6495_v21, %v6497_v22  ;;  %v7037_v48 = vrot.slane %v6342_v36, 4  ;;  %6248 = vst.msk [vmem:[#allocation4 + $0x129] sm:$0xff] %vm6224_vm9, %v6175_v56  ;;  %v17407_v24 = vld [vmem:[#allocation3 + $0x1d8] sm:$0xf] }
 0x3d9   : > { %v7219_v32 = vmax.f32 %v7187_v3, %v17366_v4  ;;  %v6584_v62 = vmax.f32 %v17357_v41, %v6498_v40  ;;  %v6678_v6 = vsel %vm4265_vm6, %v6675_v49, %v6677_v37  ;;  %v6858_v60 = vsel %vm4446_vm7, %v6855_v12, %v6857_v43 }
 0x3da   : > { %7339 = vrot.lane.b32.xlu1 %v7250_v10, %s13149_s26  ;;  %v7123_v44 = vmax.f32 %v6943_v54, %v7036_v25  ;;  %v7156_v15 = vmax.f32 %v17284_v59, %v17318_v19  ;;  %v7157_v21 = vmax.f32 %v17298_v2, %v17333_v38  ;;  %v6502_v28 = vrot.slane %v6345_v18, 1 }
 0x3db   : > { %v6764_v36 = vmax.f32 %v6584_v62, %v6678_v6  ;;  %v6682_v11 = vrot.slane %v6345_v18, 2  ;;  %v6862_v9 = vrot.slane %v6345_v18, 3  ;;  %v7042_v55 = vrot.slane %v6345_v18, 4  ;;  %v7306_v27 = vpop.permute.xlu0 %7305 }
 0x3dc   : > { %v7251_v39 = vmax.f32 %v7219_v32, %v7123_v44  ;;  %v7188_v41 = vmax.f32 %v7156_v15, %v17352_v20  ;;  %v7189_v49 = vmax.f32 %v7157_v21, %v17366_v4  ;;  %v6503_v12 = vsel %vm4084_vm5, %v17005_v26, %v6502_v28  ;;  %7394 = vst.msk [vmem:[#allocation4 + $0x79] sm:$0xff] %vm7385_vm10, %v7306_v27  ;;  %v8160_v15 = vld [vmem:[%s18936_s3 + $0x20] sm:$0xff]  ;;  %v17587_v21 = vld [vmem:[#allocation4 + $0x20] sm:$0xff] }
 0x3dd   : > { %v6944_v42 = vmax.f32 %v6764_v36, %v6858_v60  ;;  %v7038_v59 = vsel %vm584_vm0, %v7035_v61, %v7037_v48  ;;  %v6586_v2 = vmax.f32 %v16988_v7, %v6503_v12  ;;  %v6683_v47 = vsel %vm4265_vm6, %v17015_v29, %v6682_v11  ;;  %v17589_v36 = vld [vmem:[#allocation4 + $0x31] sm:$0xff] }
 0x3de   : > { %7341 = vrot.lane.b32.xlu0 %v7251_v39, %s13149_s26  ;;  %v7220_v5 = vmax.f32 %v7188_v41, %v17386_v23  ;;  %v7221_v22 = vmax.f32 %v7189_v49, %v7123_v44  ;;  %v6863_v37 = vsel %vm4446_vm7, %v17029_v53, %v6862_v9  ;;  %v7158_v26 = vmax.f32 %v17318_v19, %v17352_v20  ;;  %v13136_v11 = vld [vmem:[%s18936_s3 + $0x28] sm:$0xff]  ;;  %v17614_v49 = vld [vmem:[#allocation4 + $0x49] sm:$0xff] }
 0x3df   : > { %v17419_v25 = vmax.f32 %v6944_v42, %v7038_v59  ;;  %v6766_v61 = vmax.f32 %v6586_v2, %v6683_v47  ;;  %v7043_v7 = vsel %vm584_vm0, %v17037_v31, %v7042_v55  ;;  %v6507_v29 = vrot.slane %v17407_v24, 1  ;;  %v8547_v55 = vld [vmem:[%s18936_s3 + $0x30] sm:$0xff]  ;;  %v17612_v41 = vld [vmem:[#allocation4 + $0x38] sm:$0xff]  ;;  %v17634_v2 = vld [vmem:[#allocation4 + $0x50] sm:$0xff] }
 0x3e0   : > { %v7253_v3 = vmax.f32 %v7221_v22, %v17056_v14  ;;  %v7190_v43 = vmax.f32 %v7158_v26, %v17386_v23  ;;  %v7159_v18 = vmax.f32 %v17333_v38, %v17366_v4  ;;  %v6687_v53 = vrot.slane %v17407_v24, 2  ;;  %v7308_v38 = vpop.permute.xlu1 %7307  ;;  %v17441_v4 = vld [vmem:[%s18936_s3 + $0x38] sm:$0xff]  ;;  %v17606_v39 = vld [vmem:[#allocation4 + $0x39] sm:$0xff]  ;;  %v17629_v59 = vld [vmem:[#allocation4 + $0x51] sm:$0xff]  ;;  %19280 = vst [vmem:[#allocation36_spill] sm:$0xff] %v17634_v2 }
 0x3e1   : > { %v7252_v19 = vmax.f32 %v7220_v5, %v17419_v25  ;;  %v6946_v56 = vmax.f32 %v6766_v61, %v6863_v37  ;;  %v6508_v10 = vsel %vm4084_vm5, %v17009_v35, %v6507_v29  ;;  %v6867_v48 = vrot.slane %v17407_v24, 3  ;;  %12810 = vmatprep.subr.mxu0 %v17441_v4  ;;  %7395 = vst.msk [vmem:[#allocation4 + $0x81] sm:$0xff] %vm7385_vm10, %v7308_v38  ;;  %v17636_v47 = vld [vmem:[#allocation4 + $0x61] sm:$0xff]  ;;  %v17647_v22 = vld [vmem:[#allocation4 + $0x69] sm:$0xff] }
 0x3e2   : > { %7345 = vrot.lane.b32.xlu0 %v7253_v3, %s13149_s26  ;;  %v7222_v31 = vmax.f32 %v7190_v43, %v17419_v25  ;;  %v6588_v54 = vmax.f32 %v16993_v58, %v6508_v10  ;;  %v6688_v40 = vsel %vm4265_vm6, %v17024_v46, %v6687_v53  ;;  %v17447_v32 = vmax.f32 %v7159_v18, %v7123_v44  ;;  %v17568_v44 = vld [vmem:[#allocation4 + $0x19] sm:$0xff]  ;;  %v17651_v26 = vld [vmem:[#allocation4 + $0x68] sm:$0xff] }
 0x3e3   : > { %7343 = vrot.lane.b32.xlu1 %v7252_v19, %s13149_s26  ;;  %v17444_v35 = vmax.f32 %v6946_v56, %v7043_v7  ;;  %v7160_v6 = vmax.f32 %v17352_v20, %v17386_v23  ;;  %v19278_v60 = vmov 0.0   ;;  %v6868_v63 = vsel %vm4446_vm7, %v17034_v17, %v6867_v48  ;;  %19282 = vst [vmem:[#allocation37_spill] sm:$0xff] %v17651_v26  ;;  %v17653_v27 = vld [vmem:[#allocation4 + $0x79] sm:$0xff] }
 0x3e4   : > { %v6177_v58 = vpop.permute.xlu0 %6176  ;;  %v17450_v62 = vmax.f32 %v6588_v54, %v6688_v40  ;;  %316 = vst.msk [vmem:[#allocation4] sm:$0xff] %vm315_vm11, %v19278_v60  ;;  %317 = vst.msk [vmem:[#allocation4 + $0x8] sm:$0xff] %vm315_vm11, %v19278_v60  ;;  %v7047_v45 = vrot.slane %v17407_v24, 4  ;;  %v17621_v24 = vld [vmem:[%s18936_s3 + $0x48] sm:$0xff] }
 0x3e5   : > { %v7254_v46 = vmax.f32 %v7222_v31, %v17444_v35  ;;  %321 = vst.msk [vmem:[#allocation4 + $0x198] sm:$0xff] %vm315_vm11, %v19278_v60  ;;  %322 = vst.msk [vmem:[#allocation4 + $0x1a0] sm:$0xff] %vm315_vm11, %v19278_v60  ;;  %v7192_v13 = vmax.f32 %v7160_v6, %v17419_v25 }
 0x3e6   : > { %319 = vst.msk [vmem:[#allocation4 + $0x10] sm:$0x3] %vm318_vm12, %v19278_v60  ;;  %323 = vst.msk [vmem:[#allocation4 + $0x1a8] sm:$0x3] %vm318_vm12, %v19278_v60  ;;  %5027 = vrot.lane.b32.xlu0 %v16262_v51, %s13147_s22  ;;  %v7223_v51 = vmax.f32 %v17447_v32, %v17056_v14  ;;  %v6948_v17 = vmax.f32 %v17450_v62, %v6868_v63  ;;  %v7048_v16 = vsel %vm584_vm0, %v17047_v30, %v7047_v45 }
 0x3e7   : > { %6249 = vst.msk [vmem:[#allocation4 + $0x139] sm:$0xff] %vm6224_vm9, %v6177_v58  ;;  %7347 = vrot.lane.b32.xlu1 %v7254_v46, %s13149_s26  ;;  %v7224_v23 = vmax.f32 %v7192_v13, %v17444_v35  ;;  %v17715_v35 = vld [vmem:[%s18936_s3 + $0x58] sm:$0xff] }
 0x3e8   : > { %326 = vst.msk [vmem:[#allocation4 + $0x18] sm:$0x1] %vm325_vm13, %v19278_v60  ;;  %327 = vst.msk [vmem:[#allocation4 + $0x30] sm:$0x1] %vm325_vm13, %v19278_v60  ;;  %v7255_v52 = vmax.f32 %v7223_v51, %v17058_v0  ;;  %v7128_v34 = vmax.f32 %v6948_v17, %v7048_v16  ;;  %v17578_v0 = vld [vmem:[#allocation4 + $0x21] sm:$0xff] }
 0x3e9   : > { %328 = vst.msk [vmem:[#allocation4 + $0x48] sm:$0x1] %vm325_vm13, %v19278_v60  ;;  %329 = vst.msk [vmem:[#allocation4 + $0x60] sm:$0x1] %vm325_vm13, %v19278_v60  ;;  %v6179_v50 = vpop.permute.xlu1 %6178  ;;  %v17664_v61 = vld [vmem:[#allocation4 + $0x81] sm:$0xff] }
 0x3ea   : > { %330 = vst.msk [vmem:[#allocation4 + $0x78] sm:$0x1] %vm325_vm13, %v19278_v60  ;;  %331 = vst.msk [vmem:[#allocation4 + $0x90] sm:$0x1] %vm325_vm13, %v19278_v60  ;;  %6188 = vrot.lane.b32.xlu0 %v17078_v8, %s13148_s25  ;;  %v7256_v28 = vmax.f32 %v7224_v23, %v7128_v34  ;;  %v17668_v7 = vld [vmem:[#allocation4 + $0x80] sm:$0xff] }
 0x3eb   : > { %332 = vst.msk [vmem:[#allocation4 + $0xa8] sm:$0x1] %vm325_vm13, %v19278_v60  ;;  %333 = vst.msk [vmem:[#allocation4 + $0xc0] sm:$0x1] %vm325_vm13, %v19278_v60  ;;  %5029 = vrot.lane.b32.xlu1 %v16289_v33, %s13147_s22  ;;  %v7452_v57 = vld [vmem:[#allocation4 + $0x1] sm:$0xff] }
 0x3ec   : > { %334 = vst.msk [vmem:[#allocation4 + $0xd8] sm:$0x1] %vm325_vm13, %v19278_v60  ;;  %335 = vst.msk [vmem:[#allocation4 + $0xf0] sm:$0x1] %vm325_vm13, %v19278_v60  ;;  %v7418_v14 = vld [vmem:[#allocation4] sm:$0xff]  ;;  %12658 = vmatprep.mubr.msk.f32.mxu1 %vm315_vm11, %v7452_v57  ;;  %v7419_v8 = vld [vmem:[#allocation4 + $0x8] sm:$0xff] }
 0x3ed   : > { %336 = vst.msk [vmem:[#allocation4 + $0x108] sm:$0x1] %vm325_vm13, %v19278_v60  ;;  %337 = vst.msk [vmem:[#allocation4 + $0x120] sm:$0x1] %vm325_vm13, %v19278_v60  ;;  %v7453_v20 = vld [vmem:[#allocation4 + $0x9] sm:$0xff]  ;;  %12710 = vmatprep.mubr.msk.f32.mxu0 %vm315_vm11, %v7418_v14  ;;  %v6181_v30 = vpop.permute.xlu0 %6180 }
 0x3ee   : > { %338 = vst.msk [vmem:[#allocation4 + $0x138] sm:$0x1] %vm325_vm13, %v19278_v60  ;;  %339 = vst.msk [vmem:[#allocation4 + $0x150] sm:$0x1] %vm325_vm13, %v19278_v60  ;;  %7349 = vrot.lane.b32.xlu0 %v7255_v52, %s13149_s26  ;;  %12659 = vmatmul.mubr.msk.f32.vlgmr.msra.gmra.mxu1 %vm315_vm11, %v7453_v20 }
 0x3ef   : > { %340 = vst.msk [vmem:[#allocation4 + $0x168] sm:$0x1] %vm325_vm13, %v19278_v60  ;;  %341 = vst.msk [vmem:[#allocation4 + $0x180] sm:$0x1] %vm325_vm13, %v19278_v60  ;;  %v17572_v33 = vld [vmem:[#allocation4 + $0x18] sm:$0xff]  ;;  %6190 = vrot.lane.b32.xlu1 %v17116_v1, %s13148_s25  ;;  %12711 = vmatmul.mubr.msk.f32.vlgmr.msra.gmra.mxu0 %vm315_vm11, %v7419_v8  ;;  %v17591_v1 = vld [vmem:[#allocation4 + $0x30] sm:$0xff] }
 0x3f0   : > { %342 = vst.msk [vmem:[#allocation4 + $0x29] sm:$0x1] %vm325_vm13, %v19278_v60  ;;  %343 = vst.msk [vmem:[#allocation4 + $0x41] sm:$0x1] %vm325_vm13, %v19278_v60  ;;  %12661 = vmatprep.mubr.msk.f32.mxu1 %vm315_vm11, %v17568_v44  ;;  %12713 = vmatprep.mubr.msk.f32.mxu0 %vm315_vm11, %v17572_v33  ;;  %v17616_v12 = vld [vmem:[#allocation4 + $0x48] sm:$0xff]  ;;  %v17639_v5 = vld [vmem:[#allocation4 + $0x60] sm:$0xff] }
 0x3f1   : > { %344 = vst.msk [vmem:[#allocation4 + $0x59] sm:$0x1] %vm325_vm13, %v19278_v60  ;;  %345 = vst.msk [vmem:[#allocation4 + $0x71] sm:$0x1] %vm325_vm13, %v19278_v60  ;;  %12759 = vmatpush3.msra.mxu1 %v13136_v11  ;;  %12811 = vmatpush3.msra.mxu0 %v17441_v4  ;;  %v17656_v25 = vld [vmem:[#allocation4 + $0x78] sm:$0xff] }
 0x3f2   : > { %346 = vst.msk [vmem:[#allocation4 + $0x89] sm:$0x1] %vm325_vm13, %v19278_v60  ;;  %347 = vst.msk [vmem:[#allocation4 + $0xa1] sm:$0x1] %vm325_vm13, %v19278_v60  ;;  %v6183_v9 = vpop.permute.xlu1 %6182  ;;  %12662 = vmatmul.mubr.msk.f32.gmra.mxu1 %vm315_vm11, %v17578_v0  ;;  %12760 = vmatprep.subr.mxu1 %v8160_v15 }
 0x3f3   : > { %348 = vst.msk [vmem:[#allocation4 + $0xb9] sm:$0x1] %vm325_vm13, %v19278_v60  ;;  %349 = vst.msk [vmem:[#allocation4 + $0xd1] sm:$0x1] %vm325_vm13, %v19278_v60  ;;  %7351 = vrot.lane.b32.xlu1 %v7256_v28, %s13149_s26  ;;  %12714 = vmatmul.mubr.msk.f32.gmra.mxu0 %vm315_vm11, %v17587_v21 }
 0x3f4   : > { %350 = vst.msk [vmem:[#allocation4 + $0xe9] sm:$0x1] %vm325_vm13, %v19278_v60  ;;  %351 = vst.msk [vmem:[#allocation4 + $0x101] sm:$0x1] %vm325_vm13, %v19278_v60  ;;  %12664 = vmatprep.mubr.msk.f32.mxu1 %vm315_vm11, %v17589_v36  ;;  %12716 = vmatprep.mubr.msk.f32.mxu0 %vm315_vm11, %v17591_v1 }
 0x3f5   : > { %352 = vst.msk [vmem:[#allocation4 + $0x119] sm:$0x1] %vm325_vm13, %v19278_v60  ;;  %353 = vst.msk [vmem:[#allocation4 + $0x131] sm:$0x1] %vm325_vm13, %v19278_v60  ;;  %12761 = vmatpush3.msra.mxu1 %v8160_v15  ;;  %12812 = vmatprep.subr.mxu0 %v8547_v55 }
 0x3f6   : > { %354 = vst.msk [vmem:[#allocation4 + $0x149] sm:$0x1] %vm325_vm13, %v19278_v60  ;;  %355 = vst.msk [vmem:[#allocation4 + $0x161] sm:$0x1] %vm325_vm13, %v19278_v60  ;;  %12665 = vmatmul.mubr.msk.f32.gmra.mxu1 %vm315_vm11, %v17606_v39  ;;  %v7310_v42 = vpop.permute.xlu0 %7309  ;;  %12813 = vmatpush3.msra.mxu0 %v8547_v55 }
 0x3f7   : > { %356 = vst.msk [vmem:[#allocation4 + $0x179] sm:$0x1] %vm325_vm13, %v19278_v60  ;;  %357 = vst.msk [vmem:[#allocation4 + $0x191] sm:$0x1] %vm325_vm13, %v19278_v60  ;;  %12717 = vmatmul.mubr.msk.f32.gmra.mxu0 %vm315_vm11, %v17612_v41  ;;  %12667 = vmatprep.mubr.msk.f32.mxu1 %vm315_vm11, %v17614_v49 }
 0x3f8   : > { %6250 = vst.msk [vmem:[#allocation4 + $0x141] sm:$0xff] %vm6224_vm9, %v6179_v50  ;;  %6251 = vst.msk [vmem:[#allocation4 + $0x151] sm:$0xff] %vm6224_vm9, %v6181_v30  ;;  %12719 = vmatprep.mubr.msk.f32.mxu0 %vm315_vm11, %v17616_v12  ;;  %12862 = vmatprep.subr.mxu1 %v17621_v24 }
 0x3f9   : > { %6252 = vst.msk [vmem:[#allocation4 + $0x159] sm:$0xff] %vm6224_vm9, %v6183_v9  ;;  %19279 = vst [vmem:[#allocation34_spill] sm:$0xff] %v17616_v12  ;;  %12914 = vmatprep.subr.mxu0 %v17715_v35 }
 0x3fa   : > { %7396 = vst.msk [vmem:[#allocation4 + $0x91] sm:$0xff] %vm7385_vm10, %v7310_v42  ;;  %19281 = vst [vmem:[#allocation35_spill] sm:$0xff] %v17639_v5  ;;  %12668 = vmatmul.mubr.msk.f32.gmra.mxu1 %vm315_vm11, %v17629_v59 }
 0x3fb   : > { %12720 = vmatmul.mubr.msk.f32.gmra.mxu0 %vm315_vm11, %v17634_v2  ;;  %12670 = vmatprep.mubr.msk.f32.mxu1 %vm315_vm11, %v17636_v47  ;;  %v7312_v37 = vpop.permute.xlu1 %7311  ;;  %19283 = vst [vmem:[#allocation39_spill] sm:$0xff] %v17656_v25  ;;  %19284 = vst [vmem:[#allocation38_spill] sm:$0xff] %v17668_v7 }
 0x3fc   : > { %12722 = vmatprep.mubr.msk.f32.mxu0 %vm315_vm11, %v17639_v5  ;;  %7397 = vst.msk [vmem:[#allocation4 + $0x99] sm:$0xff] %vm7385_vm10, %v7312_v37 }
 0x3fe   : > { %12671 = vmatmul.mubr.msk.f32.gmra.mxu1 %vm315_vm11, %v17647_v22 }
 0x3ff   : > { %12723 = vmatmul.mubr.msk.f32.gmra.mxu0 %vm315_vm11, %v17651_v26  ;;  %12673 = vmatprep.mubr.msk.f32.mxu1 %vm315_vm11, %v17653_v27 }
 0x400   : > { %12725 = vmatprep.mubr.msk.f32.mxu0 %vm315_vm11, %v17656_v25 }
 0x401   : > { %v17670_v29 = vld [vmem:[#allocation4 + $0x91] sm:$0xff] }
 0x402   : > { %v17672_v3 = vld [vmem:[#allocation4 + $0x90] sm:$0xff]  ;;  %12674 = vmatmul.mubr.msk.f32.gmra.mxu1 %vm315_vm11, %v17664_v61 }
 0x403   : > { %19285 = vst [vmem:[#allocation49_spill] sm:$0xff] %v17672_v3  ;;  %12726 = vmatmul.mubr.msk.f32.gmra.mxu0 %vm315_vm11, %v17668_v7  ;;  %v6185_v43 = vpop.permute.xlu0 %6184  ;;  %12676 = vmatprep.mubr.msk.f32.mxu1 %vm315_vm11, %v17670_v29  ;;  %v17680_v18 = vld [vmem:[#allocation4 + $0x99] sm:$0xff] }
 0x404   : > { %6253 = vst.msk [vmem:[#allocation4 + $0x169] sm:$0xff] %vm6224_vm9, %v6185_v43  ;;  %12728 = vmatprep.mubr.msk.f32.mxu0 %vm315_vm11, %v17672_v3  ;;  %v17685_v53 = vld [vmem:[#allocation4 + $0x98] sm:$0xff] }
 0x405   : > { %19286 = vst [vmem:[#allocation53_spill] sm:$0xff] %v17685_v53 }
 0x406   : > { %12677 = vmatmul.mubr.msk.f32.gmra.mxu1 %vm315_vm11, %v17680_v18 }
 0x407   : > { %12729 = vmatmul.mubr.msk.f32.gmra.mxu0 %vm315_vm11, %v17685_v53 }
 0x40b   : > { %v6187_v19 = vpop.permute.xlu1 %6186 }
 0x40c   : > { %6254 = vst.msk [vmem:[#allocation4 + $0x171] sm:$0xff] %vm6224_vm9, %v6187_v19 }
 0x411   : > { %v7314_v56 = vpop.permute.xlu0 %7313 }
 0x412   : > { %7398 = vst.msk [vmem:[#allocation4 + $0xa9] sm:$0xff] %vm7385_vm10, %v7314_v56 }
 0x416   : > { %v7316_v10 = vpop.permute.xlu1 %7315 }
 0x417   : > { %7399 = vst.msk [vmem:[#allocation4 + $0xb1] sm:$0xff] %vm7385_vm10, %v7316_v10 }
 0x419   : > { %v17694_v31 = vld [vmem:[#allocation4 + $0xa9] sm:$0xff] }
 0x41a   : > { %v17696_v54 = vld [vmem:[#allocation4 + $0xa8] sm:$0xff]  ;;  %12679 = vmatprep.mubr.msk.f32.mxu1 %vm315_vm11, %v17694_v31 }
 0x41b   : > { %19287 = vst [vmem:[#allocation40_spill] sm:$0xff] %v17696_v54  ;;  %12731 = vmatprep.mubr.msk.f32.mxu0 %vm315_vm11, %v17696_v54  ;;  %v7318_v40 = vpop.permute.xlu0 %7317 }
 0x41c   : > { %7400 = vst.msk [vmem:[#allocation4 + $0xc1] sm:$0xff] %vm7385_vm10, %v7318_v40 }
 0x41e   : > { %v17703_v48 = vld [vmem:[#allocation4 + $0xb1] sm:$0xff] }
 0x41f   : > { %v17705_v38 = vld [vmem:[#allocation4 + $0xb0] sm:$0xff]  ;;  %v7320_v4 = vpop.permute.xlu1 %7319  ;;  %12680 = vmatmul.mubr.msk.f32.gmra.mxu1 %vm315_vm11, %v17703_v48 }
 0x420   : > { %19288 = vst [vmem:[#allocation42_spill] sm:$0xff] %v17705_v38  ;;  %12732 = vmatmul.mubr.msk.f32.gmra.mxu0 %vm315_vm11, %v17705_v38  ;;  %7401 = vst.msk [vmem:[#allocation4 + $0xc9] sm:$0xff] %vm7385_vm10, %v7320_v4 }
 0x423   : > { %v7322_v32 = vpop.permute.xlu0 %7321  ;;  %v17717_v58 = vld [vmem:[#allocation4 + $0xc1] sm:$0xff] }
 0x424   : > { %v17719_v46 = vld [vmem:[#allocation4 + $0xc0] sm:$0xff]  ;;  %7402 = vst.msk [vmem:[#allocation4 + $0xd9] sm:$0xff] %vm7385_vm10, %v7322_v32  ;;  %12682 = vmatprep.mubr.msk.f32.mxu1 %vm315_vm11, %v17717_v58 }
 0x425   : > { %19289 = vst [vmem:[#allocation41_spill] sm:$0xff] %v17719_v46  ;;  %12734 = vmatprep.mubr.msk.f32.mxu0 %vm315_vm11, %v17719_v46 }
 0x427   : > { %v17727_v62 = vld [vmem:[#allocation4 + $0xc9] sm:$0xff] }
 0x428   : > { %v17729_v6 = vld [vmem:[#allocation4 + $0xc8] sm:$0xff]  ;;  %v7324_v60 = vpop.permute.xlu1 %7323  ;;  %12683 = vmatmul.mubr.msk.f32.gmra.mxu1 %vm315_vm11, %v17727_v62 }
 0x429   : > { %19290 = vst [vmem:[#allocation43_spill] sm:$0xff] %v17729_v6  ;;  %12735 = vmatmul.mubr.msk.f32.gmra.mxu0 %vm315_vm11, %v17729_v6  ;;  %7403 = vst.msk [vmem:[#allocation4 + $0xe1] sm:$0xff] %vm7385_vm10, %v7324_v60 }
 0x42b   : > { %v17736_v63 = vld [vmem:[#allocation4 + $0xd9] sm:$0xff] }
 0x42c   : > { %v17738_v45 = vld [vmem:[#allocation4 + $0xd8] sm:$0xff]  ;;  %v7326_v51 = vpop.permute.xlu0 %7325  ;;  %12685 = vmatprep.mubr.msk.f32.mxu1 %vm315_vm11, %v17736_v63 }
 0x42d   : > { %19291 = vst [vmem:[#allocation45_spill] sm:$0xff] %v17738_v45  ;;  %12737 = vmatprep.mubr.msk.f32.mxu0 %vm315_vm11, %v17738_v45  ;;  %7404 = vst.msk [vmem:[#allocation4 + $0xf1] sm:$0xff] %vm7385_vm10, %v7326_v51 }
 0x430   : > { %v17745_v17 = vld [vmem:[#allocation4 + $0xe1] sm:$0xff] }
 0x431   : > { %v17747_v13 = vld [vmem:[#allocation4 + $0xe0] sm:$0xff]  ;;  %v7328_v50 = vpop.permute.xlu1 %7327  ;;  %12686 = vmatmul.mubr.msk.f32.gmra.mxu1 %vm315_vm11, %v17745_v17 }
 0x432   : > { %19292 = vst [vmem:[#allocation44_spill] sm:$0xff] %v17747_v13  ;;  %12738 = vmatmul.mubr.msk.f32.gmra.mxu0 %vm315_vm11, %v17747_v13  ;;  %7405 = vst.msk [vmem:[#allocation4 + $0xf9] sm:$0xff] %vm7385_vm10, %v7328_v50 }
 0x434   : > { %v17754_v16 = vld [vmem:[#allocation4 + $0xf1] sm:$0xff] }
 0x435   : > { %v17756_v52 = vld [vmem:[#allocation4 + $0xf0] sm:$0xff]  ;;  %v7330_v57 = vpop.permute.xlu0 %7329  ;;  %12688 = vmatprep.mubr.msk.f32.mxu1 %vm315_vm11, %v17754_v16 }
 0x436   : > { %19293 = vst [vmem:[#allocation55_spill] sm:$0xff] %v17756_v52  ;;  %12740 = vmatprep.mubr.msk.f32.mxu0 %vm315_vm11, %v17756_v52  ;;  %7406 = vst.msk [vmem:[#allocation4 + $0x109] sm:$0xff] %vm7385_vm10, %v7330_v57 }
 0x439   : > { %v17763_v14 = vld [vmem:[#allocation4 + $0xf9] sm:$0xff] }
 0x43a   : > { %v17765_v20 = vld [vmem:[#allocation4 + $0xf8] sm:$0xff]  ;;  %v7332_v34 = vpop.permute.xlu1 %7331  ;;  %12689 = vmatmul.mubr.msk.f32.gmra.mxu1 %vm315_vm11, %v17763_v14 }
 0x43b   : > { %19294 = vst [vmem:[#allocation46_spill] sm:$0xff] %v17765_v20  ;;  %12741 = vmatmul.mubr.msk.f32.gmra.mxu0 %vm315_vm11, %v17765_v20  ;;  %7407 = vst.msk [vmem:[#allocation4 + $0x111] sm:$0xff] %vm7385_vm10, %v7332_v34 }
 0x43d   : > { %v17772_v23 = vld [vmem:[#allocation4 + $0x109] sm:$0xff] }
 0x43e   : > { %v17774_v8 = vld [vmem:[#allocation4 + $0x108] sm:$0xff]  ;;  %v7334_v30 = vpop.permute.xlu0 %7333  ;;  %12691 = vmatprep.mubr.msk.f32.mxu1 %vm315_vm11, %v17772_v23 }
 0x43f   : > { %19295 = vst [vmem:[#allocation48_spill] sm:$0xff] %v17774_v8  ;;  %12743 = vmatprep.mubr.msk.f32.mxu0 %vm315_vm11, %v17774_v8  ;;  %7408 = vst.msk [vmem:[#allocation4 + $0x121] sm:$0xff] %vm7385_vm10, %v7334_v30 }
 0x442   : > { %v17781_v15 = vld [vmem:[#allocation4 + $0x111] sm:$0xff] }
 0x443   : > { %v17783_v28 = vld [vmem:[#allocation4 + $0x110] sm:$0xff]  ;;  %v7336_v11 = vpop.permute.xlu1 %7335  ;;  %12692 = vmatmul.mubr.msk.f32.gmra.mxu1 %vm315_vm11, %v17781_v15 }
 0x444   : > { %19296 = vst [vmem:[#allocation47_spill] sm:$0xff] %v17783_v28  ;;  %12744 = vmatmul.mubr.msk.f32.gmra.mxu0 %vm315_vm11, %v17783_v28  ;;  %7409 = vst.msk [vmem:[#allocation4 + $0x129] sm:$0xff] %vm7385_vm10, %v7336_v11 }
 0x446   : > { %v17790_v9 = vld [vmem:[#allocation4 + $0x121] sm:$0xff] }
 0x447   : > { %v17792_v55 = vld [vmem:[#allocation4 + $0x120] sm:$0xff]  ;;  %v7338_v42 = vpop.permute.xlu0 %7337  ;;  %12694 = vmatprep.mubr.msk.f32.mxu1 %vm315_vm11, %v17790_v9 }
 0x448   : > { %19297 = vst [vmem:[#allocation50_spill] sm:$0xff] %v17792_v55  ;;  %12746 = vmatprep.mubr.msk.f32.mxu0 %vm315_vm11, %v17792_v55  ;;  %7410 = vst.msk [vmem:[#allocation4 + $0x139] sm:$0xff] %vm7385_vm10, %v7338_v42 }
 0x44b   : > { %v17799_v37 = vld [vmem:[#allocation4 + $0x129] sm:$0xff] }
 0x44c   : > { %v17801_v43 = vld [vmem:[#allocation4 + $0x128] sm:$0xff]  ;;  %v7340_v19 = vpop.permute.xlu1 %7339  ;;  %12695 = vmatmul.mubr.msk.f32.gmra.mxu1 %vm315_vm11, %v17799_v37 }
 0x44d   : > { %19298 = vst [vmem:[#allocation52_spill] sm:$0xff] %v17801_v43  ;;  %12747 = vmatmul.mubr.msk.f32.gmra.mxu0 %vm315_vm11, %v17801_v43  ;;  %7411 = vst.msk [vmem:[#allocation4 + $0x141] sm:$0xff] %vm7385_vm10, %v7340_v19 }
 0x44f   : > { %v17808_v56 = vld [vmem:[#allocation4 + $0x139] sm:$0xff] }
 0x450   : > { %v17810_v10 = vld [vmem:[#allocation4 + $0x138] sm:$0xff]  ;;  %v7342_v40 = vpop.permute.xlu0 %7341  ;;  %12697 = vmatprep.mubr.msk.f32.mxu1 %vm315_vm11, %v17808_v56 }
 0x451   : > { %19299 = vst [vmem:[#allocation51_spill] sm:$0xff] %v17810_v10  ;;  %12749 = vmatprep.mubr.msk.f32.mxu0 %vm315_vm11, %v17810_v10  ;;  %7412 = vst.msk [vmem:[#allocation4 + $0x151] sm:$0xff] %vm7385_vm10, %v7342_v40 }
 0x454   : > { %v7346_v4 = vpop.permute.xlu0 %7345  ;;  %v17817_v32 = vld [vmem:[#allocation4 + $0x141] sm:$0xff] }
 0x455   : > { %v17819_v60 = vld [vmem:[#allocation4 + $0x140] sm:$0xff]  ;;  %v7344_v51 = vpop.permute.xlu1 %7343  ;;  %7414 = vst.msk [vmem:[#allocation4 + $0x169] sm:$0xff] %vm7385_vm10, %v7346_v4  ;;  %12698 = vmatmul.mubr.msk.f32.gmra.mxu1 %vm315_vm11, %v17817_v32 }
 0x456   : > { %19300 = vst [vmem:[#allocation54_spill] sm:$0xff] %v17819_v60  ;;  %12750 = vmatmul.mubr.msk.f32.gmra.mxu0 %vm315_vm11, %v17819_v60  ;;  %7413 = vst.msk [vmem:[#allocation4 + $0x159] sm:$0xff] %vm7385_vm10, %v7344_v51 }
 0x458   : > { %v5028_v50 = vpop.permute.xlu0 %5027  ;;  %v17827_v57 = vld [vmem:[#allocation4 + $0x151] sm:$0xff] }
 0x459   : > { %19301 = vst [vmem:[#allocation56_spill] sm:$0xff] %v17827_v57  ;;  %v17829_v34 = vld [vmem:[#allocation4 + $0x150] sm:$0xff]  ;;  %v7348_v30 = vpop.permute.xlu1 %7347  ;;  %5094 = vst.msk [vmem:[#allocation4 + $0x181] sm:$0xff] %vm5063_vm8, %v5028_v50  ;;  %12700 = vmatprep.mubr.msk.f32.mxu1 %vm315_vm11, %v17827_v57 }
 0x45a   : > { %19302 = vst [vmem:[#allocation69_spill] sm:$0xff] %v17829_v34  ;;  %12752 = vmatprep.mubr.msk.f32.mxu0 %vm315_vm11, %v17829_v34  ;;  %7415 = vst.msk [vmem:[#allocation4 + $0x171] sm:$0xff] %vm7385_vm10, %v7348_v30  ;;  %v8128_v30 = vld [vmem:[#allocation4 + $0x2] sm:$0xff] }
 0x45c   : > { %v6189_v11 = vpop.permute.xlu0 %6188  ;;  %v17837_v42 = vld [vmem:[#allocation4 + $0x169] sm:$0xff] }
 0x45d   : > { %19303 = vst [vmem:[#allocation58_spill] sm:$0xff] %v17837_v42  ;;  %v17839_v19 = vld [vmem:[#allocation4 + $0x168] sm:$0xff]  ;;  %v5030_v40 = vpop.permute.xlu1 %5029  ;;  %6255 = vst.msk [vmem:[#allocation4 + $0x181] sm:$0xff] %vm6224_vm9, %v6189_v11  ;;  %v17842_v4 = vld [vmem:[#allocation4 + $0x159] sm:$0xff] }
 0x45e   : > { %19304 = vst [vmem:[#allocation60_spill] sm:$0xff] %v17839_v19  ;;  %19305 = vst [vmem:[#allocation31_spill] sm:$0xff] %v17842_v4  ;;  %v17844_v51 = vld [vmem:[#allocation4 + $0x158] sm:$0xff]  ;;  %12701 = vmatmul.mubr.msk.f32.gmra.mxu1 %vm315_vm11, %v17842_v4 }
 0x45f   : > { %19306 = vst [vmem:[#allocation5_spill] sm:$0xff] %v17844_v51  ;;  %5095 = vst.msk [vmem:[#allocation4 + $0x189] sm:$0xff] %vm5063_vm8, %v5030_v40  ;;  %12753 = vmatmul.mubr.msk.f32.gmra.mxu0 %vm315_vm11, %v17844_v51  ;;  %12703 = vmatprep.mubr.msk.f32.mxu1 %vm315_vm11, %v17837_v42  ;;  %v8129_v42 = vld [vmem:[#allocation4 + $0xa] sm:$0xff] }
 0x460   : > { %12755 = vmatprep.mubr.msk.f32.mxu0 %vm315_vm11, %v17839_v19  ;;  %v7350_v50 = vpop.permute.xlu0 %7349 }
 0x461   : > { %v6191_v11 = vpop.permute.xlu1 %6190  ;;  %7416 = vst.msk [vmem:[#allocation4 + $0x181] sm:$0xff] %vm7385_vm10, %v7350_v50  ;;  %v17856_v57 = vld [vmem:[#allocation4 + $0x171] sm:$0xff] }
 0x462   : > { %v17858_v40 = vld [vmem:[#allocation4 + $0x170] sm:$0xff]  ;;  %6256 = vst.msk [vmem:[#allocation4 + $0x189] sm:$0xff] %vm6224_vm9, %v6191_v11  ;;  %12704 = vmatmul.mubr.msk.f32.gmra.mxu1 %vm315_vm11, %v17856_v57  ;;  %v17875_v11 = vld [vmem:[#allocation4 + $0x1a] sm:$0xff] }
 0x463   : > { %12756 = vmatmul.mubr.msk.f32.gmra.mxu0 %vm315_vm11, %v17858_v40  ;;  %12762 = vmatprep.mubr.msk.f32.mxu1 %vm315_vm11, %v8128_v30  ;;  %v8934_v50 = vld [vmem:[%s18936_s3 + $0x40] sm:$0xff] }
 0x464   : > { %12814 = vmatprep.mubr.msk.f32.mxu0 %vm315_vm11, %v17572_v33  ;;  %v17882_v33 = vld [vmem:[#allocation4 + $0x22] sm:$0xff]  ;;  %v17915_v30 = vld [vmem:[#allocation4 + $0x4a] sm:$0xff] }
 0x465   : > { %v7352_v4 = vpop.permute.xlu1 %7351 }
 0x466   : > { %7417 = vst.msk [vmem:[#allocation4 + $0x189] sm:$0xff] %vm7385_vm10, %v7352_v4  ;;  %12763 = vmatmul.mubr.msk.f32.vlgmr.msra.gmra.mxu1 %vm315_vm11, %v8129_v42  ;;  %v17897_v42 = vld [vmem:[#allocation4 + $0x32] sm:$0xff]  ;;  %v17909_v4 = vld [vmem:[%s18936_s3 + $0x78] sm:$0xff] }
 0x467   : > { %12815 = vmatmul.mubr.msk.f32.vlgmr.msra.gmra.mxu0 %vm315_vm11, %v17587_v21  ;;  %12863 = vmatpush3.msra.mxu1 %v17621_v24  ;;  %v9321_v21 = vld [vmem:[%s18936_s3 + $0x50] sm:$0xff]  ;;  %v17891_v24 = vld [vmem:[%s18936_s3 + $0x68] sm:$0xff] }
 0x468   : > { %12765 = vmatprep.mubr.msk.f32.mxu1 %vm315_vm11, %v17875_v11  ;;  %12817 = vmatprep.mubr.msk.f32.mxu0 %vm315_vm11, %v17591_v1 }
 0x469   : > { %12864 = vmatprep.subr.mxu1 %v8934_v50  ;;  %12915 = vmatpush3.msra.mxu0 %v17715_v35  ;;  %v17904_v35 = vld [vmem:[#allocation4 + $0x3a] sm:$0xff] }
 0x46a   : > { %12865 = vmatpush3.msra.mxu1 %v8934_v50  ;;  %12916 = vmatprep.subr.mxu0 %v9321_v21  ;;  %v17922_v50 = vld [vmem:[#allocation4 + $0x52] sm:$0xff] }
 0x46b   : > { %12766 = vmatmul.mubr.msk.f32.gmra.mxu1 %vm315_vm11, %v17882_v33  ;;  %12818 = vmatmul.mubr.msk.f32.gmra.mxu0 %vm315_vm11, %v17612_v41 }
 0x46c   : > { %12768 = vmatprep.mubr.msk.f32.mxu1 %vm315_vm11, %v17897_v42  ;;  %12820 = vmatprep.mubr.msk.f32.mxu0 %vm315_vm11, %v17616_v12  ;;  %v18062_v12 = vld [vmem:[#allocation4 + $0x180] sm:$0xff] }
 0x46d   : > { %12966 = vmatprep.subr.mxu1 %v17891_v24  ;;  %12917 = vmatpush3.msra.mxu0 %v9321_v21  ;;  %v17928_v21 = vld [vmem:[#allocation4 + $0x62] sm:$0xff]  ;;  %19316 = vst [vmem:[#allocation70_spill] sm:$0xff] %v18062_v12 }
 0x46e   : > { %13018 = vmatprep.subr.mxu0 %v17909_v4  ;;  %19307 = vst [vmem:[#allocation62_spill] sm:$0xff] %v17928_v21 }
 0x46f   : > { %12769 = vmatmul.mubr.msk.f32.gmra.mxu1 %vm315_vm11, %v17904_v35  ;;  %12821 = vmatmul.mubr.msk.f32.gmra.mxu0 %vm315_vm11, %v17634_v2  ;;  %v17934_v2 = vld [vmem:[#allocation4 + $0x6a] sm:$0xff] }
 0x470   : > { %12771 = vmatprep.mubr.msk.f32.mxu1 %vm315_vm11, %v17915_v30  ;;  %12823 = vmatprep.mubr.msk.f32.mxu0 %vm315_vm11, %v17639_v5  ;;  %19308 = vst [vmem:[#allocation6_spill] sm:$0xff] %v17934_v2  ;;  %v17940_v5 = vld [vmem:[#allocation4 + $0x7a] sm:$0xff] }
 0x471   : > { %19309 = vst [vmem:[#allocation7_spill] sm:$0xff] %v17940_v5 }
 0x473   : > { %12772 = vmatmul.mubr.msk.f32.gmra.mxu1 %vm315_vm11, %v17922_v50  ;;  %12824 = vmatmul.mubr.msk.f32.gmra.mxu0 %vm315_vm11, %v17651_v26  ;;  %v17946_v26 = vld [vmem:[#allocation4 + $0x82] sm:$0xff] }
 0x474   : > { %12774 = vmatprep.mubr.msk.f32.mxu1 %vm315_vm11, %v17928_v21  ;;  %12826 = vmatprep.mubr.msk.f32.mxu0 %vm315_vm11, %v17656_v25  ;;  %19310 = vst [vmem:[#allocation12_spill] sm:$0xff] %v17946_v26  ;;  %v17952_v25 = vld [vmem:[#allocation4 + $0x92] sm:$0xff] }
 0x475   : > { %19311 = vst [vmem:[#allocation64_spill] sm:$0xff] %v17952_v25 }
 0x477   : > { %12775 = vmatmul.mubr.msk.f32.gmra.mxu1 %vm315_vm11, %v17934_v2  ;;  %12827 = vmatmul.mubr.msk.f32.gmra.mxu0 %vm315_vm11, %v17668_v7  ;;  %v17958_v7 = vld [vmem:[#allocation4 + $0x9a] sm:$0xff] }
 0x478   : > { %12777 = vmatprep.mubr.msk.f32.mxu1 %vm315_vm11, %v17940_v5  ;;  %12829 = vmatprep.mubr.msk.f32.mxu0 %vm315_vm11, %v17672_v3  ;;  %19312 = vst [vmem:[#allocation65_spill] sm:$0xff] %v17958_v7  ;;  %v17964_v3 = vld [vmem:[#allocation4 + $0xaa] sm:$0xff] }
 0x479   : > { %19313 = vst [vmem:[#allocation66_spill] sm:$0xff] %v17964_v3 }
 0x47b   : > { %12778 = vmatmul.mubr.msk.f32.gmra.mxu1 %vm315_vm11, %v17946_v26  ;;  %12830 = vmatmul.mubr.msk.f32.gmra.mxu0 %vm315_vm11, %v17685_v53  ;;  %v17970_v53 = vld [vmem:[#allocation4 + $0xb2] sm:$0xff] }
 0x47c   : > { %12780 = vmatprep.mubr.msk.f32.mxu1 %vm315_vm11, %v17952_v25  ;;  %12832 = vmatprep.mubr.msk.f32.mxu0 %vm315_vm11, %v17696_v54  ;;  %v17976_v54 = vld [vmem:[#allocation4 + $0xc2] sm:$0xff] }
 0x47d   : > { %19314 = vst [vmem:[#allocation67_spill] sm:$0xff] %v17976_v54 }
 0x47f   : > { %12781 = vmatmul.mubr.msk.f32.gmra.mxu1 %vm315_vm11, %v17958_v7  ;;  %12833 = vmatmul.mubr.msk.f32.gmra.mxu0 %vm315_vm11, %v17705_v38  ;;  %v17982_v38 = vld [vmem:[#allocation4 + $0xca] sm:$0xff] }
 0x480   : > { %12783 = vmatprep.mubr.msk.f32.mxu1 %vm315_vm11, %v17964_v3  ;;  %12835 = vmatprep.mubr.msk.f32.mxu0 %vm315_vm11, %v17719_v46  ;;  %v17988_v46 = vld [vmem:[#allocation4 + $0xda] sm:$0xff] }
 0x481   : > { %19315 = vst [vmem:[#allocation68_spill] sm:$0xff] %v17988_v46 }
 0x483   : > { %12784 = vmatmul.mubr.msk.f32.gmra.mxu1 %vm315_vm11, %v17970_v53  ;;  %12836 = vmatmul.mubr.msk.f32.gmra.mxu0 %vm315_vm11, %v17729_v6  ;;  %v17994_v6 = vld [vmem:[#allocation4 + $0xe2] sm:$0xff] }
 0x484   : > { %12786 = vmatprep.mubr.msk.f32.mxu1 %vm315_vm11, %v17976_v54  ;;  %12838 = vmatprep.mubr.msk.f32.mxu0 %vm315_vm11, %v17738_v45  ;;  %v18000_v45 = vld [vmem:[#allocation4 + $0xf2] sm:$0xff] }
 0x487   : > { %12787 = vmatmul.mubr.msk.f32.gmra.mxu1 %vm315_vm11, %v17982_v38  ;;  %12839 = vmatmul.mubr.msk.f32.gmra.mxu0 %vm315_vm11, %v17747_v13  ;;  %v18006_v13 = vld [vmem:[#allocation4 + $0xfa] sm:$0xff] }
 0x488   : > { %12789 = vmatprep.mubr.msk.f32.mxu1 %vm315_vm11, %v17988_v46  ;;  %12841 = vmatprep.mubr.msk.f32.mxu0 %vm315_vm11, %v17756_v52  ;;  %v18012_v52 = vld [vmem:[#allocation4 + $0x10a] sm:$0xff] }
 0x48b   : > { %12790 = vmatmul.mubr.msk.f32.gmra.mxu1 %vm315_vm11, %v17994_v6  ;;  %12842 = vmatmul.mubr.msk.f32.gmra.mxu0 %vm315_vm11, %v17765_v20  ;;  %v18018_v20 = vld [vmem:[#allocation4 + $0x112] sm:$0xff] }
 0x48c   : > { %12792 = vmatprep.mubr.msk.f32.mxu1 %vm315_vm11, %v18000_v45  ;;  %12844 = vmatprep.mubr.msk.f32.mxu0 %vm315_vm11, %v17774_v8  ;;  %v18024_v8 = vld [vmem:[#allocation4 + $0x122] sm:$0xff] }
 0x48f   : > { %12793 = vmatmul.mubr.msk.f32.gmra.mxu1 %vm315_vm11, %v18006_v13  ;;  %12845 = vmatmul.mubr.msk.f32.gmra.mxu0 %vm315_vm11, %v17783_v28  ;;  %v18030_v28 = vld [vmem:[#allocation4 + $0x12a] sm:$0xff] }
 0x490   : > { %12795 = vmatprep.mubr.msk.f32.mxu1 %vm315_vm11, %v18012_v52  ;;  %12847 = vmatprep.mubr.msk.f32.mxu0 %vm315_vm11, %v17792_v55  ;;  %v18036_v55 = vld [vmem:[#allocation4 + $0x13a] sm:$0xff] }
 0x493   : > { %12796 = vmatmul.mubr.msk.f32.gmra.mxu1 %vm315_vm11, %v18018_v20  ;;  %12848 = vmatmul.mubr.msk.f32.gmra.mxu0 %vm315_vm11, %v17801_v43  ;;  %v18042_v43 = vld [vmem:[#allocation4 + $0x142] sm:$0xff] }
 0x494   : > { %12798 = vmatprep.mubr.msk.f32.mxu1 %vm315_vm11, %v18024_v8  ;;  %12850 = vmatprep.mubr.msk.f32.mxu0 %vm315_vm11, %v17810_v10  ;;  %v18048_v10 = vld [vmem:[#allocation4 + $0x152] sm:$0xff] }
 0x497   : > { %12799 = vmatmul.mubr.msk.f32.gmra.mxu1 %vm315_vm11, %v18030_v28  ;;  %12851 = vmatmul.mubr.msk.f32.gmra.mxu0 %vm315_vm11, %v17819_v60  ;;  %v18054_v60 = vld [vmem:[#allocation4 + $0x15a] sm:$0xff] }
 0x498   : > { %12801 = vmatprep.mubr.msk.f32.mxu1 %vm315_vm11, %v18036_v55  ;;  %12853 = vmatprep.mubr.msk.f32.mxu0 %vm315_vm11, %v17829_v34  ;;  %v18060_v34 = vld [vmem:[#allocation4 + $0x16a] sm:$0xff] }
 0x49b   : > { %12802 = vmatmul.mubr.msk.f32.gmra.mxu1 %vm315_vm11, %v18042_v43  ;;  %12854 = vmatmul.mubr.msk.f32.gmra.mxu0 %vm315_vm11, %v17844_v51  ;;  %v18068_v51 = vld [vmem:[#allocation4 + $0x172] sm:$0xff] }
 0x49c   : > { %12804 = vmatprep.mubr.msk.f32.mxu1 %vm315_vm11, %v18048_v10  ;;  %12856 = vmatprep.mubr.msk.f32.mxu0 %vm315_vm11, %v17839_v19  ;;  %v18070_v19 = vld [vmem:[#allocation4 + $0x188] sm:$0xff] }
 0x49f   : > { %12805 = vmatmul.mubr.msk.f32.gmra.mxu1 %vm315_vm11, %v18054_v60  ;;  %12857 = vmatmul.mubr.msk.f32.gmra.mxu0 %vm315_vm11, %v17858_v40 }
 0x4a0   : > { %12807 = vmatprep.mubr.msk.f32.mxu1 %vm315_vm11, %v18060_v34  ;;  %12859 = vmatprep.mubr.msk.f32.mxu0 %vm315_vm11, %v18062_v12  ;;  %v9709_v12 = vld [vmem:[%s18936_s3 + $0x60] sm:$0xff] }
 0x4a3   : > { %12808 = vmatmul.mubr.msk.f32.gmra.mxu1 %vm315_vm11, %v18068_v51  ;;  %12860 = vmatmul.mubr.msk.f32.gmra.mxu0 %vm315_vm11, %v18070_v19 }
 0x4a4   : > { %12866 = vmatprep.mubr.msk.f32.mxu1 %vm315_vm11, %v17568_v44  ;;  %12918 = vmatprep.mubr.msk.f32.mxu0 %vm315_vm11, %v17875_v11  ;;  %v10096_v44 = vld [vmem:[%s18936_s3 + $0x70] sm:$0xff] }
 0x4a7   : > { %12867 = vmatmul.mubr.msk.f32.vlgmr.msra.gmra.mxu1 %vm315_vm11, %v17578_v0  ;;  %12919 = vmatmul.mubr.msk.f32.vlgmr.msra.gmra.mxu0 %vm315_vm11, %v17882_v33  ;;  %v18099_v0 = vld [vmem:[%s18936_s3 + $0x88] sm:$0xff] }
 0x4a8   : > { %12967 = vmatpush3.msra.mxu1 %v17891_v24  ;;  %12869 = vmatprep.mubr.msk.f32.mxu1 %vm315_vm11, %v17589_v36 }
 0x4a9   : > { %12921 = vmatprep.mubr.msk.f32.mxu0 %vm315_vm11, %v17897_v42  ;;  %12968 = vmatprep.subr.mxu1 %v9709_v12 }
 0x4aa   : > { %12969 = vmatpush3.msra.mxu1 %v9709_v12  ;;  %13019 = vmatpush3.msra.mxu0 %v17909_v4 }
 0x4ab   : > { %12870 = vmatmul.mubr.msk.f32.gmra.mxu1 %vm315_vm11, %v17606_v39  ;;  %12922 = vmatmul.mubr.msk.f32.gmra.mxu0 %vm315_vm11, %v17904_v35 }
 0x4ac   : > { %12872 = vmatprep.mubr.msk.f32.mxu1 %vm315_vm11, %v17614_v49  ;;  %12924 = vmatprep.mubr.msk.f32.mxu0 %vm315_vm11, %v17915_v30 }
 0x4ad   : > { %13020 = vmatprep.subr.mxu0 %v10096_v44  ;;  %13070 = vmatprep.subr.mxu1 %v18099_v0 }
 0x4ae   : > { %13021 = vmatpush3.msra.mxu0 %v10096_v44  ;;  %v12660_v39 = vpop.f32.mrf.mxu1 }
 0x4af   : > { %12873 = vmatmul.mubr.msk.f32.gmra.mxu1 %vm315_vm11, %v17629_v59  ;;  %12925 = vmatmul.mubr.msk.f32.gmra.mxu0 %vm315_vm11, %v17922_v50  ;;  %v12712_v12 = vpop.f32.mrf.mxu0 }
 0x4b0   : > { %12875 = vmatprep.mubr.msk.f32.mxu1 %vm315_vm11, %v17636_v47  ;;  %12927 = vmatprep.mubr.msk.f32.mxu0 %vm315_vm11, %v17928_v21  ;;  %v18118_v11 = vadd.f32 %v12712_v12, %v12660_v39  ;;  %v18120_v33 = vpop.f32.mrf.mxu1 }
 0x4b1   : > { %v18122_v24 = vpop.f32.mrf.mxu0 }
 0x4b2   : > { %v12663_v4 = vpop.f32.mrf.mxu1 }
 0x4b3   : > { %12876 = vmatmul.mubr.msk.f32.gmra.mxu1 %vm315_vm11, %v17647_v22  ;;  %12928 = vmatmul.mubr.msk.f32.gmra.mxu0 %vm315_vm11, %v17934_v2  ;;  %v12715_v44 = vpop.f32.mrf.mxu0 }
 0x4b4   : > { %12878 = vmatprep.mubr.msk.f32.mxu1 %vm315_vm11, %v17653_v27  ;;  %12930 = vmatprep.mubr.msk.f32.mxu0 %vm315_vm11, %v17940_v5  ;;  %v18132_v39 = vadd.f32 %v12715_v44, %v12663_v4  ;;  %v18134_v12 = vpop.f32.mrf.mxu1 }
 0x4b5   : > { %v18136_v21 = vpop.f32.mrf.mxu0 }
 0x4b6   : > { %19317 = vst [vmem:[#allocation10_spill] sm:$0xff] %v18132_v39  ;;  %v12666_v2 = vpop.f32.mrf.mxu1 }
 0x4b7   : > { %12879 = vmatmul.mubr.msk.f32.gmra.mxu1 %vm315_vm11, %v17664_v61  ;;  %12931 = vmatmul.mubr.msk.f32.gmra.mxu0 %vm315_vm11, %v17946_v26  ;;  %v12718_v5 = vpop.f32.mrf.mxu0 }
 0x4b8   : > { %12881 = vmatprep.mubr.msk.f32.mxu1 %vm315_vm11, %v17670_v29  ;;  %12933 = vmatprep.mubr.msk.f32.mxu0 %vm315_vm11, %v17952_v25  ;;  %v18146_v4 = vadd.f32 %v12718_v5, %v12666_v2  ;;  %v18148_v44 = vpop.f32.mrf.mxu1 }
 0x4b9   : > { %v18150_v39 = vpop.f32.mrf.mxu0 }
 0x4ba   : > { %19318 = vst [vmem:[#allocation13_spill] sm:$0xff] %v18146_v4  ;;  %v12669_v26 = vpop.f32.mrf.mxu1 }
 0x4bb   : > { %12882 = vmatmul.mubr.msk.f32.gmra.mxu1 %vm315_vm11, %v17680_v18  ;;  %12934 = vmatmul.mubr.msk.f32.gmra.mxu0 %vm315_vm11, %v17958_v7  ;;  %v12721_v25 = vpop.f32.mrf.mxu0 }
 0x4bc   : > { %12884 = vmatprep.mubr.msk.f32.mxu1 %vm315_vm11, %v17694_v31  ;;  %12936 = vmatprep.mubr.msk.f32.mxu0 %vm315_vm11, %v17964_v3  ;;  %v18160_v2 = vadd.f32 %v12721_v25, %v12669_v26  ;;  %v18162_v5 = vpop.f32.mrf.mxu1 }
 0x4bd   : > { %v18164_v4 = vpop.f32.mrf.mxu0 }
 0x4be   : > { %19319 = vst [vmem:[#allocation32_spill] sm:$0xff] %v18160_v2  ;;  %v12672_v7 = vpop.f32.mrf.mxu1 }
 0x4bf   : > { %12885 = vmatmul.mubr.msk.f32.gmra.mxu1 %vm315_vm11, %v17703_v48  ;;  %12937 = vmatmul.mubr.msk.f32.gmra.mxu0 %vm315_vm11, %v17970_v53  ;;  %v12724_v3 = vpop.f32.mrf.mxu0 }
 0x4c0   : > { %12887 = vmatprep.mubr.msk.f32.mxu1 %vm315_vm11, %v17717_v58  ;;  %12939 = vmatprep.mubr.msk.f32.mxu0 %vm315_vm11, %v17976_v54  ;;  %v18174_v26 = vadd.f32 %v12724_v3, %v12672_v7  ;;  %v18176_v25 = vpop.f32.mrf.mxu1 }
 0x4c1   : > { %v18178_v2 = vpop.f32.mrf.mxu0 }
 0x4c2   : > { %19320 = vst [vmem:[#allocation71_spill] sm:$0xff] %v18174_v26  ;;  %v12675_v53 = vpop.f32.mrf.mxu1 }
 0x4c3   : > { %12888 = vmatmul.mubr.msk.f32.gmra.mxu1 %vm315_vm11, %v17727_v62  ;;  %12940 = vmatmul.mubr.msk.f32.gmra.mxu0 %vm315_vm11, %v17982_v38  ;;  %v12727_v54 = vpop.f32.mrf.mxu0 }
 0x4c4   : > { %12890 = vmatprep.mubr.msk.f32.mxu1 %vm315_vm11, %v17736_v63  ;;  %12942 = vmatprep.mubr.msk.f32.mxu0 %vm315_vm11, %v17988_v46  ;;  %v18188_v7 = vadd.f32 %v12727_v54, %v12675_v53  ;;  %v18190_v3 = vpop.f32.mrf.mxu1 }
 0x4c5   : > { %v18192_v26 = vpop.f32.mrf.mxu0 }
 0x4c6   : > { %v12678_v38 = vpop.f32.mrf.mxu1 }
 0x4c7   : > { %12891 = vmatmul.mubr.msk.f32.gmra.mxu1 %vm315_vm11, %v17745_v17  ;;  %12943 = vmatmul.mubr.msk.f32.gmra.mxu0 %vm315_vm11, %v17994_v6  ;;  %v12730_v46 = vpop.f32.mrf.mxu0  ;;  %v19322_v6 = vld [vmem:[#allocation31_spill] sm:$0xff] }
 0x4c8   : > { %12893 = vmatprep.mubr.msk.f32.mxu1 %vm315_vm11, %v17754_v16  ;;  %12945 = vmatprep.mubr.msk.f32.mxu0 %vm315_vm11, %v18000_v45  ;;  %v18202_v54 = vadd.f32 %v12730_v46, %v12678_v38  ;;  %v19321_v46 = vld [vmem:[#allocation56_spill] sm:$0xff]  ;;  %v19323_v45 = vld [vmem:[#allocation58_spill] sm:$0xff] }
 0x4c9   : > { %v10065_v38 = vld [vmem:[#allocation4 + $0x39] sm:$0xff] }
 0x4cb   : > { %12894 = vmatmul.mubr.msk.f32.gmra.mxu1 %vm315_vm11, %v17763_v14  ;;  %12946 = vmatmul.mubr.msk.f32.gmra.mxu0 %vm315_vm11, %v18006_v13  ;;  %v18244_v13 = vpop.f32.mrf.mxu1 }
 0x4cc   : > { %12896 = vmatprep.mubr.msk.f32.mxu1 %vm315_vm11, %v17772_v23  ;;  %12948 = vmatprep.mubr.msk.f32.mxu0 %vm315_vm11, %v18012_v52  ;;  %v18246_v52 = vpop.f32.mrf.mxu0 }
 0x4cf   : > { %12897 = vmatmul.mubr.msk.f32.gmra.mxu1 %vm315_vm11, %v17781_v15  ;;  %12949 = vmatmul.mubr.msk.f32.gmra.mxu0 %vm315_vm11, %v18018_v20  ;;  %v18252_v20 = vld [vmem:[#allocation4 + $0x181] sm:$0xff] }
 0x4d0   : > { %12899 = vmatprep.mubr.msk.f32.mxu1 %vm315_vm11, %v17790_v9  ;;  %12951 = vmatprep.mubr.msk.f32.mxu0 %vm315_vm11, %v18024_v8  ;;  %v18254_v8 = vld [vmem:[#allocation4 + $0x182] sm:$0xff] }
 0x4d3   : > { %12900 = vmatmul.mubr.msk.f32.gmra.mxu1 %vm315_vm11, %v17799_v37  ;;  %12952 = vmatmul.mubr.msk.f32.gmra.mxu0 %vm315_vm11, %v18030_v28 }
 0x4d4   : > { %12902 = vmatprep.mubr.msk.f32.mxu1 %vm315_vm11, %v17808_v56  ;;  %12954 = vmatprep.mubr.msk.f32.mxu0 %vm315_vm11, %v18036_v55 }
 0x4d7   : > { %12903 = vmatmul.mubr.msk.f32.gmra.mxu1 %vm315_vm11, %v17817_v32  ;;  %12955 = vmatmul.mubr.msk.f32.gmra.mxu0 %vm315_vm11, %v18042_v43 }
 0x4d8   : > { %12905 = vmatprep.mubr.msk.f32.mxu1 %vm315_vm11, %v19321_v46  ;;  %12957 = vmatprep.mubr.msk.f32.mxu0 %vm315_vm11, %v18048_v10  ;;  %v18262_v10 = vld [vmem:[#allocation4 + $0x189] sm:$0xff] }
 0x4db   : > { %12906 = vmatmul.mubr.msk.f32.gmra.mxu1 %vm315_vm11, %v19322_v6  ;;  %12958 = vmatmul.mubr.msk.f32.gmra.mxu0 %vm315_vm11, %v18054_v60  ;;  %v18264_v60 = vld [vmem:[#allocation4 + $0x18a] sm:$0xff] }
 0x4dc   : > { %12908 = vmatprep.mubr.msk.f32.mxu1 %vm315_vm11, %v19323_v45  ;;  %12960 = vmatprep.mubr.msk.f32.mxu0 %vm315_vm11, %v18060_v34 }
 0x4df   : > { %12909 = vmatmul.mubr.msk.f32.gmra.mxu1 %vm315_vm11, %v17856_v57  ;;  %12961 = vmatmul.mubr.msk.f32.gmra.mxu0 %vm315_vm11, %v18068_v51  ;;  %v12681_v28 = vpop.f32.mrf.mxu1 }
 0x4e0   : > { %12911 = vmatprep.mubr.msk.f32.mxu1 %vm315_vm11, %v18252_v20  ;;  %12963 = vmatprep.mubr.msk.f32.mxu0 %vm315_vm11, %v18254_v8  ;;  %v12733_v55 = vpop.f32.mrf.mxu0 }
 0x4e1   : > { %v18260_v43 = vadd.f32 %v12733_v55, %v12681_v28  ;;  %v7718_v34 = vpop.f32.mrf.mxu1  ;;  %v10483_v28 = vld [vmem:[%s18936_s3 + $0x80] sm:$0xff]  ;;  %v19324_v55 = vld [vmem:[#allocation34_spill] sm:$0xff] }
 0x4e2   : > { %v8039_v51 = vpop.f32.mrf.mxu0 }
 0x4e3   : > { %12912 = vmatmul.mubr.msk.f32.gmra.mxu1 %vm315_vm11, %v18262_v10  ;;  %12964 = vmatmul.mubr.msk.f32.gmra.mxu0 %vm315_vm11, %v18264_v60  ;;  %v18270_v53 = vadd.f32 %v8039_v51, %v7718_v34  ;;  %v19325_v51 = vld [vmem:[#allocation36_spill] sm:$0xff] }
 0x4e4   : > { %12970 = vmatprep.mubr.msk.f32.mxu1 %vm315_vm11, %v17591_v1  ;;  %13022 = vmatprep.mubr.msk.f32.mxu0 %vm315_vm11, %v17589_v36 }
 0x4e7   : > { %12971 = vmatmul.mubr.msk.f32.vlgmr.msra.gmra.mxu1 %vm315_vm11, %v17612_v41  ;;  %13023 = vmatmul.mubr.msk.f32.vlgmr.msra.gmra.mxu0 %vm315_vm11, %v10065_v38  ;;  %v19326_v38 = vld [vmem:[#allocation35_spill] sm:$0xff] }
 0x4e8   : > { %13071 = vmatpush3.msra.mxu1 %v18099_v0  ;;  %12973 = vmatprep.mubr.msk.f32.mxu1 %vm315_vm11, %v19324_v55  ;;  %v12684_v36 = vpop.f32.mrf.mxu1  ;;  %v19327_v55 = vld [vmem:[#allocation37_spill] sm:$0xff] }
 0x4e9   : > { %13025 = vmatprep.mubr.msk.f32.mxu0 %vm315_vm11, %v17614_v49  ;;  %13072 = vmatprep.subr.mxu1 %v10483_v28  ;;  %v12736_v1 = vpop.f32.mrf.mxu0 }
 0x4ea   : > { %v18287_v34 = vadd.f32 %v12736_v1, %v12684_v36  ;;  %13073 = vmatpush3.msra.mxu1 %v10483_v28  ;;  %v7728_v41 = vpop.f32.mrf.mxu1  ;;  %v19328_v28 = vld [vmem:[#allocation39_spill] sm:$0xff]  ;;  %v19329_v1 = vld [vmem:[#allocation38_spill] sm:$0xff] }
 0x4eb   : > { %12974 = vmatmul.mubr.msk.f32.gmra.mxu1 %vm315_vm11, %v19325_v51  ;;  %13026 = vmatmul.mubr.msk.f32.gmra.mxu0 %vm315_vm11, %v17629_v59  ;;  %v8049_v0 = vpop.f32.mrf.mxu0  ;;  %v19330_v51 = vld [vmem:[#allocation49_spill] sm:$0xff] }
 0x4ec   : > { %12976 = vmatprep.mubr.msk.f32.mxu1 %vm315_vm11, %v19326_v38  ;;  %13028 = vmatprep.mubr.msk.f32.mxu0 %vm315_vm11, %v17636_v47  ;;  %v18297_v49 = vadd.f32 %v8049_v0, %v7728_v41  ;;  %v19332_v38 = vld [vmem:[#allocation40_spill] sm:$0xff] }
 0x4ef   : > { %12977 = vmatmul.mubr.msk.f32.gmra.mxu1 %vm315_vm11, %v19327_v55  ;;  %13029 = vmatmul.mubr.msk.f32.gmra.mxu0 %vm315_vm11, %v17647_v22 }
 0x4f0   : > { %12979 = vmatprep.mubr.msk.f32.mxu1 %vm315_vm11, %v19328_v28  ;;  %13031 = vmatprep.mubr.msk.f32.mxu0 %vm315_vm11, %v17653_v27  ;;  %v19331_v27 = vld [vmem:[#allocation53_spill] sm:$0xff] }
 0x4f1   : > { %v12687_v59 = vpop.f32.mrf.mxu1  ;;  %v19334_v28 = vld [vmem:[#allocation41_spill] sm:$0xff] }
 0x4f2   : > { %v12739_v36 = vpop.f32.mrf.mxu0 }
 0x4f3   : > { %12980 = vmatmul.mubr.msk.f32.gmra.mxu1 %vm315_vm11, %v19329_v1  ;;  %13032 = vmatmul.mubr.msk.f32.gmra.mxu0 %vm315_vm11, %v17664_v61  ;;  %v18311_v47 = vadd.f32 %v12739_v36, %v12687_v59  ;;  %v7738_v22 = vpop.f32.mrf.mxu1  ;;  %v19333_v61 = vld [vmem:[#allocation42_spill] sm:$0xff] }
 0x4f4   : > { %12982 = vmatprep.mubr.msk.f32.mxu1 %vm315_vm11, %v19330_v51  ;;  %13034 = vmatprep.mubr.msk.f32.mxu0 %vm315_vm11, %v17670_v29  ;;  %v8059_v41 = vpop.f32.mrf.mxu0  ;;  %v19337_v51 = vld [vmem:[#allocation44_spill] sm:$0xff] }
 0x4f5   : > { %v18317_v0 = vadd.f32 %v8059_v41, %v7738_v22 }
 0x4f7   : > { %12983 = vmatmul.mubr.msk.f32.gmra.mxu1 %vm315_vm11, %v19331_v27  ;;  %13035 = vmatmul.mubr.msk.f32.gmra.mxu0 %vm315_vm11, %v17680_v18 }
 0x4f8   : > { %12985 = vmatprep.mubr.msk.f32.mxu1 %vm315_vm11, %v19332_v38  ;;  %13037 = vmatprep.mubr.msk.f32.mxu0 %vm315_vm11, %v17694_v31  ;;  %v19335_v31 = vld [vmem:[#allocation43_spill] sm:$0xff] }
 0x4fa   : > { %v12690_v29 = vpop.f32.mrf.mxu1 }
 0x4fb   : > { %12986 = vmatmul.mubr.msk.f32.gmra.mxu1 %vm315_vm11, %v19333_v61  ;;  %13038 = vmatmul.mubr.msk.f32.gmra.mxu0 %vm315_vm11, %v17703_v48  ;;  %v12742_v55 = vpop.f32.mrf.mxu0  ;;  %v19336_v48 = vld [vmem:[#allocation45_spill] sm:$0xff]  ;;  %v19339_v61 = vld [vmem:[#allocation46_spill] sm:$0xff] }
 0x4fc   : > { %12988 = vmatprep.mubr.msk.f32.mxu1 %vm315_vm11, %v19334_v28  ;;  %13040 = vmatprep.mubr.msk.f32.mxu0 %vm315_vm11, %v17717_v58  ;;  %v18335_v18 = vadd.f32 %v12742_v55, %v12690_v29  ;;  %v7748_v59 = vpop.f32.mrf.mxu1  ;;  %v19338_v58 = vld [vmem:[#allocation55_spill] sm:$0xff]  ;;  %v19342_v29 = vld [vmem:[#allocation50_spill] sm:$0xff] }
 0x4fd   : > { %v8069_v36 = vpop.f32.mrf.mxu0 }
 0x4fe   : > { %v18337_v1 = vadd.f32 %v8069_v36, %v7748_v59  ;;  %v19343_v59 = vld [vmem:[#allocation52_spill] sm:$0xff] }
 0x4ff   : > { %12989 = vmatmul.mubr.msk.f32.gmra.mxu1 %vm315_vm11, %v19335_v31  ;;  %13041 = vmatmul.mubr.msk.f32.gmra.mxu0 %vm315_vm11, %v17727_v62  ;;  %v19344_v31 = vld [vmem:[#allocation51_spill] sm:$0xff] }
 0x500   : > { %12991 = vmatprep.mubr.msk.f32.mxu1 %vm315_vm11, %v19336_v48  ;;  %13043 = vmatprep.mubr.msk.f32.mxu0 %vm315_vm11, %v17736_v63  ;;  %v19346_v48 = vld [vmem:[#allocation69_spill] sm:$0xff] }
 0x503   : > { %12992 = vmatmul.mubr.msk.f32.gmra.mxu1 %vm315_vm11, %v19337_v51  ;;  %13044 = vmatmul.mubr.msk.f32.gmra.mxu0 %vm315_vm11, %v17745_v17  ;;  %v12693_v22 = vpop.f32.mrf.mxu1  ;;  %v19340_v17 = vld [vmem:[#allocation48_spill] sm:$0xff] }
 0x504   : > { %12994 = vmatprep.mubr.msk.f32.mxu1 %vm315_vm11, %v19338_v58  ;;  %13046 = vmatprep.mubr.msk.f32.mxu0 %vm315_vm11, %v17754_v16  ;;  %v12745_v62 = vpop.f32.mrf.mxu0  ;;  %v19341_v16 = vld [vmem:[#allocation47_spill] sm:$0xff]  ;;  %v19347_v58 = vld [vmem:[#allocation5_spill] sm:$0xff] }
 0x505   : > { %v18355_v41 = vadd.f32 %v12745_v62, %v12693_v22  ;;  %v7758_v27 = vpop.f32.mrf.mxu1  ;;  %v19348_v22 = vld [vmem:[#allocation60_spill] sm:$0xff] }
 0x506   : > { %v8079_v38 = vpop.f32.mrf.mxu0 }
 0x507   : > { %12995 = vmatmul.mubr.msk.f32.gmra.mxu1 %vm315_vm11, %v19339_v61  ;;  %13047 = vmatmul.mubr.msk.f32.gmra.mxu0 %vm315_vm11, %v17763_v14  ;;  %v18361_v63 = vadd.f32 %v8079_v38, %v7758_v27  ;;  %v10094_v38 = vld [vmem:[#allocation4 + $0x199] sm:$0xff] }
 0x508   : > { %12997 = vmatprep.mubr.msk.f32.mxu1 %vm315_vm11, %v19340_v17  ;;  %13049 = vmatprep.mubr.msk.f32.mxu0 %vm315_vm11, %v17772_v23  ;;  %v10095_v17 = vld [vmem:[#allocation4 + $0x1a1] sm:$0xff] }
 0x50b   : > { %12998 = vmatmul.mubr.msk.f32.gmra.mxu1 %vm315_vm11, %v19341_v16  ;;  %13050 = vmatmul.mubr.msk.f32.gmra.mxu0 %vm315_vm11, %v17781_v15 }
 0x50c   : > { %13000 = vmatprep.mubr.msk.f32.mxu1 %vm315_vm11, %v19342_v29  ;;  %13052 = vmatprep.mubr.msk.f32.mxu0 %vm315_vm11, %v17790_v9  ;;  %v12696_v14 = vpop.f32.mrf.mxu1  ;;  %v19345_v9 = vld [vmem:[#allocation54_spill] sm:$0xff] }
 0x50d   : > { %v12748_v55 = vpop.f32.mrf.mxu0 }
 0x50e   : > { %v18375_v28 = vadd.f32 %v12748_v55, %v12696_v14  ;;  %v7768_v23 = vpop.f32.mrf.mxu1 }
 0x50f   : > { %13001 = vmatmul.mubr.msk.f32.gmra.mxu1 %vm315_vm11, %v19343_v59  ;;  %13053 = vmatmul.mubr.msk.f32.gmra.mxu0 %vm315_vm11, %v17799_v37  ;;  %v8089_v36 = vpop.f32.mrf.mxu0 }
 0x510   : > { %13003 = vmatprep.mubr.msk.f32.mxu1 %vm315_vm11, %v19344_v31  ;;  %13055 = vmatprep.mubr.msk.f32.mxu0 %vm315_vm11, %v17808_v56  ;;  %v18385_v15 = vadd.f32 %v8089_v36, %v7768_v23 }
 0x513   : > { %13004 = vmatmul.mubr.msk.f32.gmra.mxu1 %vm315_vm11, %v19345_v9  ;;  %13056 = vmatmul.mubr.msk.f32.gmra.mxu0 %vm315_vm11, %v17817_v32  ;;  %v7970_v9 = vadd.f32 %v18122_v24, %v18120_v33  ;;  %v19350_v33 = vld [vmem:[#allocation10_spill] sm:$0xff] }
 0x514   : > { %13006 = vmatprep.mubr.msk.f32.mxu1 %vm315_vm11, %v19346_v48  ;;  %13058 = vmatprep.mubr.msk.f32.mxu0 %vm315_vm11, %v19321_v46  ;;  %v19349_v46 = vld [vmem:[#allocation70_spill] sm:$0xff] }
 0x515   : > { %v12699_v37 = vpop.f32.mrf.mxu1  ;;  %v19351_v24 = vld [vmem:[#allocation62_spill] sm:$0xff] }
 0x516   : > { %v12751_v51 = vpop.f32.mrf.mxu0 }
 0x517   : > { %13007 = vmatmul.mubr.msk.f32.gmra.mxu1 %vm315_vm11, %v19347_v58  ;;  %13059 = vmatmul.mubr.msk.f32.gmra.mxu0 %vm315_vm11, %v19322_v6  ;;  %v18399_v56 = vadd.f32 %v12751_v51, %v12699_v37  ;;  %v7778_v32 = vpop.f32.mrf.mxu1  ;;  %v9707_v6 = vld [vmem:[#allocation4 + $0x198] sm:$0xff] }
 0x518   : > { %13009 = vmatprep.mubr.msk.f32.mxu1 %vm315_vm11, %v19348_v22  ;;  %13061 = vmatprep.mubr.msk.f32.mxu0 %vm315_vm11, %v19323_v45  ;;  %v8099_v62 = vpop.f32.mrf.mxu0 }
 0x519   : > { %v18405_v27 = vadd.f32 %v8099_v62, %v7778_v32 }
 0x51b   : > { %13010 = vmatmul.mubr.msk.f32.gmra.mxu1 %vm315_vm11, %v17858_v40  ;;  %13062 = vmatmul.mubr.msk.f32.gmra.mxu0 %vm315_vm11, %v17856_v57  ;;  %v9708_v57 = vld [vmem:[#allocation4 + $0x1a0] sm:$0xff] }
 0x51c   : > { %13012 = vmatprep.mubr.msk.f32.mxu1 %vm315_vm11, %v19349_v46  ;;  %13064 = vmatprep.mubr.msk.f32.mxu0 %vm315_vm11, %v18252_v20 }
 0x51e   : > { %v12702_v61 = vpop.f32.mrf.mxu1 }
 0x51f   : > { %v12754_v45 = vpop.f32.mrf.mxu0  ;;  %13013 = vmatmul.mubr.msk.f32.gmra.mxu1 %vm315_vm11, %v18070_v19  ;;  %13065 = vmatmul.mubr.msk.f32.gmra.mxu0 %vm315_vm11, %v18262_v10 }
 0x520   : > { %v18419_v40 = vadd.f32 %v12754_v45, %v12702_v61  ;;  %13015 = vmatprep.mubr.msk.f32.mxu1 %vm315_vm11, %v9707_v6  ;;  %13067 = vmatprep.mubr.msk.f32.mxu0 %vm315_vm11, %v10094_v38  ;;  %v7788_v16 = vpop.f32.mrf.mxu1 }
 0x521   : > { %v8109_v20 = vpop.f32.mrf.mxu0 }
 0x522   : > { %v18423_v29 = vadd.f32 %v8109_v20, %v7788_v16  ;;  %v12705_v14 = vpop.f32.mrf.mxu1  ;;  %v19354_v16 = vld [vmem:[#allocation7_spill] sm:$0xff] }
 0x523   : > { %v12757_v55 = vpop.f32.mrf.mxu0  ;;  %13016 = vmatmul.mubr.msk.f32.gmra.mxu1 %vm315_vm11, %v9708_v57  ;;  %13068 = vmatmul.mubr.msk.f32.gmra.mxu0 %vm315_vm11, %v10095_v17  ;;  %v19352_v57 = vld [vmem:[#allocation6_spill] sm:$0xff] }
 0x524   : > { %v18427_v19 = vadd.f32 %v12757_v55, %v12705_v14  ;;  %13074 = vmatprep.mubr.msk.f32.mxu1 %vm315_vm11, %v17897_v42  ;;  %v7798_v10 = vpop.f32.mrf.mxu1 }
 0x525   : > { %v8119_v59 = vpop.f32.mrf.mxu0 }
 0x526   : > { %v18431_v23 = vadd.f32 %v8119_v59, %v7798_v10  ;;  %v12764_v36 = vpop.f32.mrf.mxu1 }
 0x527   : > { %v12816_v31 = vpop.f32.mrf.mxu0  ;;  %13075 = vmatmul.mubr.msk.f32.vlgmr.msra.gmra.mxu1 %vm315_vm11, %v17904_v35  ;;  %v8484_v48 = vadd.f32 %v12764_v36, %v18118_v11  ;;  %v7980_v35 = vadd.f32 %v18136_v21, %v18134_v12  ;;  %v19353_v12 = vld [vmem:[#allocation13_spill] sm:$0xff] }
 0x528   : > { %13077 = vmatprep.mubr.msk.f32.mxu1 %vm315_vm11, %v17915_v30  ;;  %v8324_v37 = vpop.f32.mrf.mxu1 }
 0x529   : > { %v8711_v51 = vpop.f32.mrf.mxu0  ;;  %v18440_v42 = vadd.f32 %v12816_v31, %v8484_v48  ;;  %v8483_v58 = vadd.f32 %v8324_v37, %v7970_v9  ;;  %v19355_v31 = vld [vmem:[#allocation12_spill] sm:$0xff] }
 0x52a   : > { %v19356_v9 = vld [vmem:[#allocation32_spill] sm:$0xff] }
 0x52b   : > { %v12767_v22 = vpop.f32.mrf.mxu1  ;;  %v12819_v32 = vpop.f32.mrf.mxu0  ;;  %13078 = vmatmul.mubr.msk.f32.gmra.mxu1 %vm315_vm11, %v17922_v50  ;;  %v18446_v62 = vadd.f32 %v8711_v51, %v8483_v58  ;;  %v7990_v50 = vadd.f32 %v18150_v39, %v18148_v44  ;;  %v8000_v39 = vadd.f32 %v18164_v4, %v18162_v5  ;;  %v19357_v37 = vld [vmem:[#allocation64_spill] sm:$0xff]  ;;  %v8010_v4 = vadd.f32 %v18178_v2, %v18176_v25 }
 0x52c   : > { %v8486_v11 = vadd.f32 %v12767_v22, %v19350_v33  ;;  %13080 = vmatprep.mubr.msk.f32.mxu1 %vm315_vm11, %v19351_v24  ;;  %v19359_v24 = vld [vmem:[#allocation71_spill] sm:$0xff]  ;;  %v8020_v2 = vadd.f32 %v18192_v26, %v18190_v3  ;;  %v8030_v26 = vadd.f32 %v18246_v52, %v18244_v13 }
 0x52d   : > { %v8334_v30 = vpop.f32.mrf.mxu1  ;;  %v8721_v46 = vpop.f32.mrf.mxu0 }
 0x52e   : > { %v18451_v6 = vadd.f32 %v12819_v32, %v8486_v11  ;;  %v8485_v38 = vadd.f32 %v8334_v30, %v7980_v35  ;;  %v19358_v11 = vld [vmem:[#allocation65_spill] sm:$0xff] }
 0x52f   : > { %v12770_v61 = vpop.f32.mrf.mxu1  ;;  %v12822_v45 = vpop.f32.mrf.mxu0  ;;  %13081 = vmatmul.mubr.msk.f32.gmra.mxu1 %vm315_vm11, %v19352_v57 }
 0x530   : > { %v18457_v21 = vadd.f32 %v8721_v46, %v8485_v38  ;;  %v8488_v17 = vadd.f32 %v12770_v61, %v19353_v12  ;;  %13083 = vmatprep.mubr.msk.f32.mxu1 %vm315_vm11, %v19354_v16  ;;  %v19360_v46 = vld [vmem:[#allocation66_spill] sm:$0xff] }
 0x531   : > { %v8344_v20 = vpop.f32.mrf.mxu1  ;;  %v8731_v14 = vpop.f32.mrf.mxu0 }
 0x532   : > { %v18462_v55 = vadd.f32 %v12822_v45, %v8488_v17  ;;  %v8487_v10 = vadd.f32 %v8344_v20, %v7990_v50  ;;  %v10462_v50 = vld [vmem:[#allocation4 + $0xb2] sm:$0xff]  ;;  %v19361_v20 = vld [vmem:[#allocation67_spill] sm:$0xff] }
 0x533   : > { %v12773_v59 = vpop.f32.mrf.mxu1  ;;  %v12825_v36 = vpop.f32.mrf.mxu0  ;;  %13084 = vmatmul.mubr.msk.f32.gmra.mxu1 %vm315_vm11, %v19355_v31  ;;  %v10464_v31 = vld [vmem:[#allocation4 + $0xca] sm:$0xff] }
 0x534   : > { %v18468_v44 = vadd.f32 %v8731_v14, %v8487_v10  ;;  %v8490_v48 = vadd.f32 %v12773_v59, %v19356_v9  ;;  %13086 = vmatprep.mubr.msk.f32.mxu1 %vm315_vm11, %v19357_v37 }
 0x535   : > { %v8354_v51 = vpop.f32.mrf.mxu1  ;;  %v8741_v58 = vpop.f32.mrf.mxu0 }
 0x536   : > { %v18473_v22 = vadd.f32 %v12825_v36, %v8490_v48  ;;  %v8489_v32 = vadd.f32 %v8354_v51, %v8000_v39  ;;  %v19362_v48 = vld [vmem:[#allocation68_spill] sm:$0xff] }
 0x537   : > { %v12776_v35 = vpop.f32.mrf.mxu1  ;;  %v12828_v33 = vpop.f32.mrf.mxu0  ;;  %13087 = vmatmul.mubr.msk.f32.gmra.mxu1 %vm315_vm11, %v19358_v11 }
 0x538   : > { %v18479_v5 = vadd.f32 %v8741_v58, %v8489_v32  ;;  %v8492_v30 = vadd.f32 %v12776_v35, %v19359_v24  ;;  %13089 = vmatprep.mubr.msk.f32.mxu1 %vm315_vm11, %v19360_v46  ;;  %v10466_v35 = vld [vmem:[#allocation4 + $0xe2] sm:$0xff] }
 0x539   : > { %v8364_v38 = vpop.f32.mrf.mxu1  ;;  %v8751_v61 = vpop.f32.mrf.mxu0 }
 0x53a   : > { %v18484_v45 = vadd.f32 %v12828_v33, %v8492_v30  ;;  %v8491_v57 = vadd.f32 %v8364_v38, %v8010_v4  ;;  %v10467_v4 = vld [vmem:[#allocation4 + $0xf2] sm:$0xff]  ;;  %v10468_v38 = vld [vmem:[#allocation4 + $0xfa] sm:$0xff] }
 0x53b   : > { %v12779_v12 = vpop.f32.mrf.mxu1  ;;  %v12831_v17 = vpop.f32.mrf.mxu0  ;;  %13090 = vmatmul.mubr.msk.f32.gmra.mxu1 %vm315_vm11, %v10462_v50  ;;  %v10469_v50 = vld [vmem:[#allocation4 + $0x10a] sm:$0xff] }
 0x53c   : > { %v18489_v25 = vadd.f32 %v8751_v61, %v8491_v57  ;;  %v8494_v16 = vadd.f32 %v12779_v12, %v18188_v7  ;;  %13092 = vmatprep.mubr.msk.f32.mxu1 %vm315_vm11, %v19361_v20 }
 0x53d   : > { %v8374_v14 = vpop.f32.mrf.mxu1  ;;  %v8761_v10 = vpop.f32.mrf.mxu0 }
 0x53e   : > { %v18494_v59 = vadd.f32 %v12831_v17, %v8494_v16  ;;  %v8493_v36 = vadd.f32 %v8374_v14, %v8020_v2  ;;  %v10470_v14 = vld [vmem:[#allocation4 + $0x112] sm:$0xff] }
 0x53f   : > { %v12782_v39 = vpop.f32.mrf.mxu1  ;;  %v12834_v9 = vpop.f32.mrf.mxu0  ;;  %13093 = vmatmul.mubr.msk.f32.gmra.mxu1 %vm315_vm11, %v10464_v31 }
 0x540   : > { %v18499_v3 = vadd.f32 %v8761_v10, %v8493_v36  ;;  %v8496_v7 = vadd.f32 %v12782_v39, %v18202_v54  ;;  %13095 = vmatprep.mubr.msk.f32.mxu1 %vm315_vm11, %v19362_v48  ;;  %v10471_v36 = vld [vmem:[#allocation4 + $0x122] sm:$0xff]  ;;  %v10472_v48 = vld [vmem:[#allocation4 + $0x12a] sm:$0xff] }
 0x541   : > { %v8384_v37 = vpop.f32.mrf.mxu1  ;;  %v8771_v51 = vpop.f32.mrf.mxu0 }
 0x542   : > { %v18504_v58 = vadd.f32 %v12834_v9, %v8496_v7  ;;  %v8495_v32 = vadd.f32 %v8384_v37, %v8030_v26 }
 0x543   : > { %v12785_v33 = vpop.f32.mrf.mxu1  ;;  %v12837_v11 = vpop.f32.mrf.mxu0  ;;  %13096 = vmatmul.mubr.msk.f32.gmra.mxu1 %vm315_vm11, %v10466_v35 }
 0x544   : > { %v18507_v24 = vadd.f32 %v8771_v51, %v8495_v32  ;;  %v8498_v13 = vadd.f32 %v12785_v33, %v18260_v43  ;;  %13098 = vmatprep.mubr.msk.f32.mxu1 %vm315_vm11, %v10467_v4  ;;  %v10473_v51 = vld [vmem:[#allocation4 + $0x13a] sm:$0xff] }
 0x545   : > { %v8394_v54 = vpop.f32.mrf.mxu1  ;;  %v8781_v52 = vpop.f32.mrf.mxu0 }
 0x546   : > { %v18511_v30 = vadd.f32 %v12837_v11, %v8498_v13  ;;  %v8497_v46 = vadd.f32 %v8394_v54, %v18270_v53  ;;  %v10474_v13 = vld [vmem:[#allocation4 + $0x142] sm:$0xff] }
 0x547   : > { %v12788_v61 = vpop.f32.mrf.mxu1  ;;  %v12840_v57 = vpop.f32.mrf.mxu0  ;;  %13099 = vmatmul.mubr.msk.f32.gmra.mxu1 %vm315_vm11, %v10468_v38 }
 0x548   : > { %v18515_v12 = vadd.f32 %v8781_v52, %v8497_v46  ;;  %v8500_v17 = vadd.f32 %v12788_v61, %v18287_v34  ;;  %13101 = vmatprep.mubr.msk.f32.mxu1 %vm315_vm11, %v10469_v50  ;;  %v10475_v52 = vld [vmem:[#allocation4 + $0x152] sm:$0xff] }
 0x549   : > { %v8404_v43 = vpop.f32.mrf.mxu1  ;;  %v8791_v2 = vpop.f32.mrf.mxu0 }
 0x54a   : > { %v18519_v16 = vadd.f32 %v12840_v57, %v8500_v17  ;;  %v8499_v20 = vadd.f32 %v8404_v43, %v18297_v49  ;;  %v10476_v17 = vld [vmem:[#allocation4 + $0x15a] sm:$0xff] }
 0x54b   : > { %v12791_v53 = vpop.f32.mrf.mxu1  ;;  %v12843_v10 = vpop.f32.mrf.mxu0  ;;  %13102 = vmatmul.mubr.msk.f32.gmra.mxu1 %vm315_vm11, %v10470_v14 }
 0x54c   : > { %v18523_v31 = vadd.f32 %v8791_v2, %v8499_v20  ;;  %v8502_v39 = vadd.f32 %v12791_v53, %v18311_v47  ;;  %13104 = vmatprep.mubr.msk.f32.mxu1 %vm315_vm11, %v10471_v36  ;;  %v10477_v2 = vld [vmem:[#allocation4 + $0x16a] sm:$0xff] }
 0x54d   : > { %v8414_v34 = vpop.f32.mrf.mxu1  ;;  %v8801_v9 = vpop.f32.mrf.mxu0 }
 0x54e   : > { %v18527_v26 = vadd.f32 %v12843_v10, %v8502_v39  ;;  %v8501_v7 = vadd.f32 %v8414_v34, %v18317_v0  ;;  %v10478_v39 = vld [vmem:[#allocation4 + $0x172] sm:$0xff] }
 0x54f   : > { %v12794_v49 = vpop.f32.mrf.mxu1  ;;  %v12846_v37 = vpop.f32.mrf.mxu0  ;;  %13105 = vmatmul.mubr.msk.f32.gmra.mxu1 %vm315_vm11, %v10472_v48 }
 0x550   : > { %v18531_v32 = vadd.f32 %v8801_v9, %v8501_v7  ;;  %v8504_v35 = vadd.f32 %v12794_v49, %v18335_v18  ;;  %13107 = vmatprep.mubr.msk.f32.mxu1 %vm315_vm11, %v10473_v51  ;;  %v10481_v49 = vld [vmem:[#allocation4 + $0x19a] sm:$0xff] }
 0x551   : > { %v8424_v47 = vpop.f32.mrf.mxu1  ;;  %v8811_v33 = vpop.f32.mrf.mxu0 }
 0x552   : > { %v18535_v11 = vadd.f32 %v12846_v37, %v8504_v35  ;;  %v8503_v4 = vadd.f32 %v8424_v47, %v18337_v1 }
 0x553   : > { %v12797_v0 = vpop.f32.mrf.mxu1  ;;  %v12849_v54 = vpop.f32.mrf.mxu0  ;;  %13108 = vmatmul.mubr.msk.f32.gmra.mxu1 %vm315_vm11, %v10474_v13 }
 0x554   : > { %v18539_v46 = vadd.f32 %v8811_v33, %v8503_v4  ;;  %v8506_v38 = vadd.f32 %v12797_v0, %v18355_v41  ;;  %13110 = vmatprep.mubr.msk.f32.mxu1 %vm315_vm11, %v10475_v52 }
 0x555   : > { %v8434_v18 = vpop.f32.mrf.mxu1  ;;  %v8821_v61 = vpop.f32.mrf.mxu0 }
 0x556   : > { %v18543_v57 = vadd.f32 %v12849_v54, %v8506_v38  ;;  %v8505_v50 = vadd.f32 %v8434_v18, %v18361_v63 }
 0x557   : > { %v12800_v1 = vpop.f32.mrf.mxu1  ;;  %v12852_v43 = vpop.f32.mrf.mxu0  ;;  %13111 = vmatmul.mubr.msk.f32.gmra.mxu1 %vm315_vm11, %v10476_v17 }
 0x558   : > { %v18547_v20 = vadd.f32 %v8821_v61, %v8505_v50  ;;  %v8508_v14 = vadd.f32 %v12800_v1, %v18375_v28  ;;  %13113 = vmatprep.mubr.msk.f32.mxu1 %vm315_vm11, %v10477_v2 }
 0x559   : > { %v8444_v41 = vpop.f32.mrf.mxu1  ;;  %v8831_v53 = vpop.f32.mrf.mxu0 }
 0x55a   : > { %v18551_v10 = vadd.f32 %v12852_v43, %v8508_v14  ;;  %v8507_v36 = vadd.f32 %v8444_v41, %v18385_v15 }
 0x55b   : > { %v12803_v63 = vpop.f32.mrf.mxu1  ;;  %v12855_v34 = vpop.f32.mrf.mxu0  ;;  %13114 = vmatmul.mubr.msk.f32.gmra.mxu1 %vm315_vm11, %v10478_v39 }
 0x55c   : > { %v18555_v9 = vadd.f32 %v8831_v53, %v8507_v36  ;;  %v8510_v7 = vadd.f32 %v12803_v63, %v18399_v56  ;;  %13116 = vmatprep.mubr.msk.f32.mxu1 %vm315_vm11, %v18254_v8  ;;  %v10482_v56 = vld [vmem:[#allocation4 + $0x1a2] sm:$0xff] }
 0x55d   : > { %v8454_v28 = vpop.f32.mrf.mxu1  ;;  %v8841_v48 = vpop.f32.mrf.mxu0 }
 0x55e   : > { %v18560_v37 = vadd.f32 %v12855_v34, %v8510_v7  ;;  %v8509_v51 = vadd.f32 %v8454_v28, %v18405_v27 }
 0x55f   : > { %v12806_v15 = vpop.f32.mrf.mxu1  ;;  %v12858_v35 = vpop.f32.mrf.mxu0  ;;  %13117 = vmatmul.mubr.msk.f32.gmra.mxu1 %vm315_vm11, %v18264_v60 }
 0x560   : > { %v18565_v47 = vadd.f32 %v8841_v48, %v8509_v51  ;;  %v8512_v33 = vadd.f32 %v12806_v15, %v18419_v40  ;;  %13119 = vmatprep.mubr.msk.f32.mxu1 %vm315_vm11, %v10481_v49 }
 0x561   : > { %v8464_v8 = vpop.f32.mrf.mxu1  ;;  %v8851_v4 = vpop.f32.mrf.mxu0 }
 0x562   : > { %v18569_v13 = vadd.f32 %v12858_v35, %v8512_v33  ;;  %v8511_v0 = vadd.f32 %v8464_v8, %v18423_v29 }
 0x563   : > { %v12809_v54 = vpop.f32.mrf.mxu1  ;;  %v12861_v27 = vpop.f32.mrf.mxu0  ;;  %13120 = vmatmul.mubr.msk.f32.gmra.mxu1 %vm315_vm11, %v10482_v56 }
 0x564   : > { %v18573_v52 = vadd.f32 %v8851_v4, %v8511_v0  ;;  %v8514_v60 = vadd.f32 %v12809_v54, %v18427_v19 }
 0x565   : > { %v8474_v38 = vpop.f32.mrf.mxu1  ;;  %v8861_v18 = vpop.f32.mrf.mxu0 }
 0x566   : > { %v18576_v40 = vadd.f32 %v12861_v27, %v8514_v60  ;;  %v8513_v61 = vadd.f32 %v8474_v38, %v18431_v23 }
 0x567   : > { %v12868_v50 = vpop.f32.mrf.mxu1  ;;  %v12920_v17 = vpop.f32.mrf.mxu0 }
 0x568   : > { %v18579_v1 = vadd.f32 %v8861_v18, %v8513_v61  ;;  %v9258_v29 = vadd.f32 %v12868_v50, %v18440_v42 }
 0x569   : > { %v9098_v43 = vpop.f32.mrf.mxu1  ;;  %v18582_v2 = vpop.f32.mrf.mxu0 }
 0x56a   : > { %v18584_v14 = vadd.f32 %v12920_v17, %v9258_v29  ;;  %v18587_v41 = vadd.f32 %v9098_v43, %v18446_v62 }
 0x56b   : > { %v12871_v19 = vpop.f32.mrf.mxu1  ;;  %v12923_v53 = vpop.f32.mrf.mxu0 }
 0x56c   : > { %v9260_v36 = vadd.f32 %v12871_v19, %v18451_v6 }
 0x56d   : > { %v9108_v39 = vpop.f32.mrf.mxu1  ;;  %v9495_v23 = vpop.f32.mrf.mxu0 }
 0x56e   : > { %v18590_v63 = vadd.f32 %v12923_v53, %v9260_v36  ;;  %v9259_v34 = vadd.f32 %v9108_v39, %v18457_v21 }
 0x56f   : > { %v12874_v7 = vpop.f32.mrf.mxu1  ;;  %v12926_v42 = vpop.f32.mrf.mxu0 }
 0x570   : > { %v18593_v28 = vadd.f32 %v9495_v23, %v9259_v34  ;;  %v9262_v48 = vadd.f32 %v12874_v7, %v18462_v55 }
 0x571   : > { %v9118_v49 = vpop.f32.mrf.mxu1  ;;  %v9505_v51 = vpop.f32.mrf.mxu0 }
 0x572   : > { %v18596_v62 = vadd.f32 %v12926_v42, %v9262_v48  ;;  %v9261_v15 = vadd.f32 %v9118_v49, %v18468_v44 }
 0x573   : > { %v12877_v35 = vpop.f32.mrf.mxu1  ;;  %v12929_v6 = vpop.f32.mrf.mxu0 }
 0x574   : > { %v18599_v33 = vadd.f32 %v9505_v51, %v9261_v15  ;;  %v9264_v56 = vadd.f32 %v12877_v35, %v18473_v22 }
 0x575   : > { %v9128_v8 = vpop.f32.mrf.mxu1  ;;  %v9515_v21 = vpop.f32.mrf.mxu0 }
 0x576   : > { %v18602_v4 = vadd.f32 %v12929_v6, %v9264_v56  ;;  %v9263_v0 = vadd.f32 %v9128_v8, %v18479_v5 }
 0x577   : > { %v12880_v54 = vpop.f32.mrf.mxu1  ;;  %v12932_v55 = vpop.f32.mrf.mxu0 }
 0x578   : > { %v18605_v27 = vadd.f32 %v9515_v21, %v9263_v0  ;;  %v9266_v60 = vadd.f32 %v12880_v54, %v18484_v45 }
 0x579   : > { %v9138_v38 = vpop.f32.mrf.mxu1  ;;  %v9525_v44 = vpop.f32.mrf.mxu0 }
 0x57a   : > { %v18608_v18 = vadd.f32 %v12932_v55, %v9266_v60  ;;  %v9265_v61 = vadd.f32 %v9138_v38, %v18489_v25 }
 0x57b   : > { %v12883_v50 = vpop.f32.mrf.mxu1  ;;  %v12935_v22 = vpop.f32.mrf.mxu0 }
 0x57c   : > { %v18611_v17 = vadd.f32 %v9525_v44, %v9265_v61  ;;  %v9268_v29 = vadd.f32 %v12883_v50, %v18494_v59 }
 0x57d   : > { %v9148_v43 = vpop.f32.mrf.mxu1  ;;  %v9535_v5 = vpop.f32.mrf.mxu0 }
 0x57e   : > { %v18614_v19 = vadd.f32 %v12935_v22, %v9268_v29  ;;  %v9267_v53 = vadd.f32 %v9148_v43, %v18499_v3 }
 0x57f   : > { %v12886_v36 = vpop.f32.mrf.mxu1  ;;  %v12938_v45 = vpop.f32.mrf.mxu0 }
 0x580   : > { %v18617_v39 = vadd.f32 %v9535_v5, %v9267_v53  ;;  %v9270_v23 = vadd.f32 %v12886_v36, %v18504_v58 }
 0x581   : > { %v9158_v34 = vpop.f32.mrf.mxu1  ;;  %v9545_v25 = vpop.f32.mrf.mxu0 }
 0x582   : > { %v18620_v7 = vadd.f32 %v12938_v45, %v9270_v23  ;;  %v9269_v42 = vadd.f32 %v9158_v34, %v18507_v24 }
 0x583   : > { %v12889_v48 = vpop.f32.mrf.mxu1  ;;  %v12941_v59 = vpop.f32.mrf.mxu0 }
 0x584   : > { %v18623_v49 = vadd.f32 %v9545_v25, %v9269_v42  ;;  %v9272_v51 = vadd.f32 %v12889_v48, %v18511_v30 }
 0x585   : > { %v9168_v15 = vpop.f32.mrf.mxu1  ;;  %v9555_v3 = vpop.f32.mrf.mxu0 }
 0x586   : > { %v18626_v35 = vadd.f32 %v12941_v59, %v9272_v51  ;;  %v9271_v6 = vadd.f32 %v9168_v15, %v18515_v12 }
 0x587   : > { %v12892_v56 = vpop.f32.mrf.mxu1  ;;  %v12944_v58 = vpop.f32.mrf.mxu0 }
 0x588   : > { %v18629_v8 = vadd.f32 %v9555_v3, %v9271_v6  ;;  %v9274_v21 = vadd.f32 %v12892_v56, %v18519_v16 }
 0x589   : > { %v9178_v0 = vpop.f32.mrf.mxu1  ;;  %v18632_v24 = vpop.f32.mrf.mxu0 }
 0x58a   : > { %v18634_v54 = vadd.f32 %v12944_v58, %v9274_v21  ;;  %v18637_v55 = vadd.f32 %v9178_v0, %v18523_v31 }
 0x58b   : > { %v12895_v30 = vpop.f32.mrf.mxu1  ;;  %v12947_v60 = vpop.f32.mrf.mxu0 }
 0x58c   : > { %v9276_v38 = vadd.f32 %v12895_v30, %v18527_v26 }
 0x58d   : > { %v9188_v44 = vpop.f32.mrf.mxu1  ;;  %v9575_v12 = vpop.f32.mrf.mxu0 }
 0x58e   : > { %v18640_v61 = vadd.f32 %v12947_v60, %v9276_v38  ;;  %v9275_v50 = vadd.f32 %v9188_v44, %v18531_v32 }
 0x58f   : > { %v12898_v22 = vpop.f32.mrf.mxu1  ;;  %v12950_v16 = vpop.f32.mrf.mxu0 }
 0x590   : > { %v18643_v29 = vadd.f32 %v9575_v12, %v9275_v50  ;;  %v9278_v43 = vadd.f32 %v12898_v22, %v18535_v11 }
 0x591   : > { %v9198_v5 = vpop.f32.mrf.mxu1  ;;  %v9585_v53 = vpop.f32.mrf.mxu0 }
 0x592   : > { %v18646_v31 = vadd.f32 %v12950_v16, %v9278_v43  ;;  %v9277_v36 = vadd.f32 %v9198_v5, %v18539_v46 }
 0x593   : > { %v12901_v45 = vpop.f32.mrf.mxu1  ;;  %v12953_v26 = vpop.f32.mrf.mxu0 }
 0x594   : > { %v18649_v23 = vadd.f32 %v9585_v53, %v9277_v36  ;;  %v9280_v34 = vadd.f32 %v12901_v45, %v18543_v57 }
 0x595   : > { %v9208_v25 = vpop.f32.mrf.mxu1  ;;  %v9595_v32 = vpop.f32.mrf.mxu0 }
 0x596   : > { %v18652_v42 = vadd.f32 %v12953_v26, %v9280_v34  ;;  %v9279_v48 = vadd.f32 %v9208_v25, %v18547_v20 }
 0x597   : > { %v12904_v59 = vpop.f32.mrf.mxu1  ;;  %v12956_v11 = vpop.f32.mrf.mxu0 }
 0x598   : > { %v18655_v51 = vadd.f32 %v9595_v32, %v9279_v48  ;;  %v9282_v15 = vadd.f32 %v12904_v59, %v18551_v10 }
 0x599   : > { %v9218_v3 = vpop.f32.mrf.mxu1  ;;  %v9605_v46 = vpop.f32.mrf.mxu0 }
 0x59a   : > { %v18658_v6 = vadd.f32 %v12956_v11, %v9282_v15  ;;  %v9281_v56 = vadd.f32 %v9218_v3, %v18555_v9 }
 0x59b   : > { %v12907_v58 = vpop.f32.mrf.mxu1  ;;  %v12959_v57 = vpop.f32.mrf.mxu0 }
 0x59c   : > { %v18661_v21 = vadd.f32 %v9605_v46, %v9281_v56  ;;  %v9284_v0 = vadd.f32 %v12907_v58, %v18560_v37 }
 0x59d   : > { %v9228_v30 = vpop.f32.mrf.mxu1  ;;  %v9615_v20 = vpop.f32.mrf.mxu0 }
 0x59e   : > { %v18664_v60 = vadd.f32 %v12959_v57, %v9284_v0  ;;  %v9283_v38 = vadd.f32 %v9228_v30, %v18565_v47 }
 0x59f   : > { %v12910_v44 = vpop.f32.mrf.mxu1  ;;  %v12962_v10 = vpop.f32.mrf.mxu0 }
 0x5a0   : > { %v18667_v12 = vadd.f32 %v9615_v20, %v9283_v38  ;;  %v9286_v50 = vadd.f32 %v12910_v44, %v18569_v13 }
 0x5a1   : > { %v9238_v22 = vpop.f32.mrf.mxu1  ;;  %v9625_v9 = vpop.f32.mrf.mxu0 }
 0x5a2   : > { %v18670_v16 = vadd.f32 %v12962_v10, %v9286_v50  ;;  %v9285_v43 = vadd.f32 %v9238_v22, %v18573_v52 }
 0x5a3   : > { %v12913_v5 = vpop.f32.mrf.mxu1  ;;  %v12965_v37 = vpop.f32.mrf.mxu0 }
 0x5a4   : > { %v18673_v53 = vadd.f32 %v9625_v9, %v9285_v43  ;;  %v9288_v36 = vadd.f32 %v12913_v5, %v18576_v40 }
 0x5a5   : > { %v9248_v45 = vpop.f32.mrf.mxu1  ;;  %v9635_v47 = vpop.f32.mrf.mxu0 }
 0x5a6   : > { %v18676_v26 = vadd.f32 %v12965_v37, %v9288_v36  ;;  %v9287_v34 = vadd.f32 %v9248_v45, %v18579_v1 }
 0x5a7   : > { %v12972_v25 = vpop.f32.mrf.mxu1  ;;  %v18679_v13 = vpop.f32.mrf.mxu0 }
 0x5a8   : > { %v18681_v32 = vadd.f32 %v9635_v47, %v9287_v34  ;;  %v18684_v48 = vadd.f32 %v12972_v25, %v18584_v14 }
 0x5a9   : > { %v18686_v52 = vpop.f32.mrf.mxu1  ;;  %v18688_v59 = vpop.f32.mrf.mxu0 }
 0x5ab   : > { %v12975_v11 = vpop.f32.mrf.mxu1  ;;  %v18693_v3 = vpop.f32.mrf.mxu0 }
 0x5ac   : > { %v18691_v40 = vadd.f32 %v12975_v11, %v18590_v63 }
 0x5ad   : > { %v9883_v15 = vpop.f32.mrf.mxu1  ;;  %v18701_v58 = vpop.f32.mrf.mxu0 }
 0x5ae   : > { %v18696_v1 = vadd.f32 %v9883_v15, %v18593_v28 }
 0x5af   : > { %v12978_v46 = vpop.f32.mrf.mxu1  ;;  %v18709_v20 = vpop.f32.mrf.mxu0 }
 0x5b0   : > { %v18699_v56 = vadd.f32 %v12978_v46, %v18596_v62 }
 0x5b1   : > { %v9893_v14 = vpop.f32.mrf.mxu1  ;;  %v18717_v10 = vpop.f32.mrf.mxu0 }
 0x5b2   : > { %v18704_v57 = vadd.f32 %v9893_v14, %v18599_v33 }
 0x5b3   : > { %v12981_v0 = vpop.f32.mrf.mxu1  ;;  %v18725_v9 = vpop.f32.mrf.mxu0 }
 0x5b4   : > { %v18707_v63 = vadd.f32 %v12981_v0, %v18602_v4 }
 0x5b5   : > { %v9903_v30 = vpop.f32.mrf.mxu1  ;;  %v18733_v37 = vpop.f32.mrf.mxu0 }
 0x5b6   : > { %v18712_v28 = vadd.f32 %v9903_v30, %v18605_v27 }
 0x5b7   : > { %v12984_v38 = vpop.f32.mrf.mxu1  ;;  %v18741_v47 = vpop.f32.mrf.mxu0 }
 0x5b8   : > { %v18715_v62 = vadd.f32 %v12984_v38, %v18608_v18 }
 0x5b9   : > { %v9913_v44 = vpop.f32.mrf.mxu1  ;;  %v18751_v11 = vpop.f32.mrf.mxu0 }
 0x5ba   : > { %v18720_v33 = vadd.f32 %v9913_v44, %v18611_v17 }
 0x5bb   : > { %v12987_v50 = vpop.f32.mrf.mxu1  ;;  %v18756_v46 = vpop.f32.mrf.mxu0 }
 0x5bc   : > { %v18723_v4 = vadd.f32 %v12987_v50, %v18614_v19 }
 0x5bd   : > { %v9923_v22 = vpop.f32.mrf.mxu1  ;;  %v18764_v30 = vpop.f32.mrf.mxu0 }
 0x5be   : > { %v18728_v27 = vadd.f32 %v9923_v22, %v18617_v39 }
 0x5bf   : > { %v12990_v43 = vpop.f32.mrf.mxu1  ;;  %v18772_v22 = vpop.f32.mrf.mxu0 }
 0x5c0   : > { %v18731_v18 = vadd.f32 %v12990_v43, %v18620_v7 }
 0x5c1   : > { %v9933_v5 = vpop.f32.mrf.mxu1 }
 0x5c2   : > { %v18736_v17 = vadd.f32 %v9933_v5, %v18623_v49 }
 0x5c3   : > { %v12993_v36 = vpop.f32.mrf.mxu1 }
 0x5c4   : > { %v18739_v19 = vadd.f32 %v12993_v36, %v18626_v35  ;;  %v18780_v36 = vpop.f32.mrf.mxu0 }
 0x5c5   : > { %v9943_v45 = vpop.f32.mrf.mxu1 }
 0x5c6   : > { %v18744_v39 = vadd.f32 %v9943_v45, %v18629_v8 }
 0x5c7   : > { %v12996_v34 = vpop.f32.mrf.mxu1 }
 0x5c8   : > { %v18747_v7 = vadd.f32 %v12996_v34, %v18634_v54 }
 0x5c9   : > { %v18749_v25 = vpop.f32.mrf.mxu1 }
 0x5cb   : > { %v12999_v49 = vpop.f32.mrf.mxu1 }
 0x5cc   : > { %v18754_v15 = vadd.f32 %v12999_v49, %v18640_v61  ;;  %v18788_v49 = vpop.f32.mrf.mxu0 }
 0x5cd   : > { %v9963_v35 = vpop.f32.mrf.mxu1 }
 0x5ce   : > { %v18759_v14 = vadd.f32 %v9963_v35, %v18643_v29 }
 0x5cf   : > { %v13002_v8 = vpop.f32.mrf.mxu1 }
 0x5d0   : > { %v18762_v0 = vadd.f32 %v13002_v8, %v18646_v31 }
 0x5d1   : > { %v9973_v54 = vpop.f32.mrf.mxu1 }
 0x5d2   : > { %v18767_v38 = vadd.f32 %v9973_v54, %v18649_v23  ;;  %v9644_v54 = vadd.f32 %v18582_v2, %v18587_v41 }
 0x5d3   : > { %v13005_v44 = vpop.f32.mrf.mxu1 }
 0x5d4   : > { %v18770_v61 = vadd.f32 %v13005_v44, %v18652_v42 }
 0x5d5   : > { %v9983_v50 = vpop.f32.mrf.mxu1 }
 0x5d6   : > { %v18775_v29 = vadd.f32 %v9983_v50, %v18655_v51  ;;  %v10032_v50 = vadd.f32 %v18686_v52, %v9644_v54 }
 0x5d7   : > { %v13008_v43 = vpop.f32.mrf.mxu1 }
 0x5d8   : > { %v18778_v31 = vadd.f32 %v13008_v43, %v18658_v6  ;;  %v10419_v2 = vadd.f32 %v18688_v59, %v10032_v50 }
 0x5d9   : > { %v9993_v5 = vpop.f32.mrf.mxu1 }
 0x5da   : > { %v18783_v23 = vadd.f32 %v9993_v5, %v18661_v21  ;;  %v18798_v21 = vpop.f32.mrf.mxu0 }
 0x5db   : > { %v13011_v45 = vpop.f32.mrf.mxu1 }
 0x5dc   : > { %v18786_v42 = vadd.f32 %v13011_v45, %v18664_v60  ;;  %v18807_v5 = vpop.f32.mrf.mxu0 }
 0x5dd   : > { %v10003_v34 = vpop.f32.mrf.mxu1 }
 0x5de   : > { %v18791_v51 = vadd.f32 %v10003_v34, %v18667_v12  ;;  %v10340_v34 = vpop.f32.mrf.mxu0 }
 0x5df   : > { %v13014_v35 = vpop.f32.mrf.mxu1 }
 0x5e0   : > { %v18794_v6 = vadd.f32 %v13014_v35, %v18670_v16  ;;  %v18823_v59 = vpop.f32.mrf.mxu0 }
 0x5e1   : > { %v10013_v8 = vpop.f32.mrf.mxu1 }
 0x5e2   : > { %v18801_v44 = vadd.f32 %v10013_v8, %v18673_v53  ;;  %v10420_v53 = vadd.f32 %v18679_v13, %v18684_v48 }
 0x5e3   : > { %v13017_v60 = vpop.f32.mrf.mxu1 }
 0x5e4   : > { %v18805_v43 = vadd.f32 %v13017_v60, %v18676_v26  ;;  %v18818_v26 = vld [vmem:[%s18937_s4] ss:$0 sm:$0xff]  ;;  %v10421_v60 = vadd.f32 %v18701_v58, %v18696_v1  ;;  %v10423_v1 = vadd.f32 %v18717_v10, %v18704_v57  ;;  %v10425_v57 = vadd.f32 %v18733_v37, %v18712_v28 }
 0x5e5   : > { %v10023_v12 = vpop.f32.mrf.mxu1 }
 0x5e6   : > { %v18810_v16 = vadd.f32 %v10023_v12, %v18681_v32 }
 0x5e7   : > { %v13076_v45 = vpop.f32.mrf.mxu1 }
 0x5e8   : > { %19363 = vst [vmem:[#allocation15_spill] sm:$0xff] %v18810_v16  ;;  %v10807_v8 = vadd.f32 %v13076_v45, %v10420_v53 }
 0x5e9   : > { %v10647_v41 = vpop.f32.mrf.mxu1 }
 0x5ea   : > { %v10806_v35 = vadd.f32 %v10647_v41, %v10419_v2  ;;  %v10846_v13 = vadd.f32 %v18818_v26, %v10807_v8  ;;  %v10422_v2 = vadd.f32 %v18693_v3, %v18691_v40  ;;  %v10350_v41 = vpop.f32.mrf.mxu0  ;;  %v10424_v40 = vadd.f32 %v18709_v20, %v18699_v56 }
 0x5eb   : > { %v13079_v52 = vpop.f32.mrf.mxu1  ;;  %v9660_v20 = vadd.f32 %v18632_v24, %v18637_v55 }
 0x5ec   : > { %v10845_v54 = vadd.f32 %v18818_v26, %v10806_v35  ;;  %v10809_v53 = vadd.f32 %v13079_v52, %v10422_v2  ;;  %v18831_v58 = vpop.f32.mrf.mxu0 }
 0x5ed   : > { %v10657_v32 = vpop.f32.mrf.mxu1  ;;  %v10048_v28 = vadd.f32 %v18749_v25, %v9660_v20  ;;  %v10436_v25 = vadd.f32 %v18807_v5, %v18747_v7 }
 0x5ee   : > { %10877 = vxpose.xlu0.b32.start [1/16] (narrow) %v10845_v54, 8  ;;  %v10808_v48 = vadd.f32 %v10657_v32, %v10421_v60  ;;  %v10848_v8 = vadd.f32 %v18818_v26, %v10809_v53  ;;  %v18836_v3 = vpop.f32.mrf.mxu0 }
 0x5ef   : > { %v13082_v50 = vpop.f32.mrf.mxu1  ;;  %v10435_v55 = vadd.f32 %v10340_v34, %v10048_v28  ;;  %v10437_v28 = vadd.f32 %v10350_v41, %v18759_v14 }
 0x5f0   : > { %v10847_v35 = vadd.f32 %v18818_v26, %v10808_v48  ;;  %v18841_v10 = vpop.f32.mrf.mxu0 }
 0x5f1   : > { %v10667_v12 = vpop.f32.mrf.mxu1 }
 0x5f2   : > { %10878 = vxpose.xlu0.b32.cont [2/16] (narrow) %v10846_v13, 8  ;;  %v10810_v32 = vadd.f32 %v10667_v12, %v10423_v1  ;;  %v10811_v13 = vadd.f32 %v13082_v50, %v10424_v40  ;;  %v10426_v50 = vadd.f32 %v18725_v9, %v18707_v63  ;;  %v18850_v1 = vpop.f32.mrf.mxu0 }
 0x5f3   : > { %v13085_v45 = vpop.f32.mrf.mxu1 }
 0x5f4   : > { %v10849_v48 = vadd.f32 %v18818_v26, %v10810_v32  ;;  %v10850_v12 = vadd.f32 %v18818_v26, %v10811_v13  ;;  %v10813_v37 = vadd.f32 %v13085_v45, %v10426_v50  ;;  %v13060_v13 = vpop.f32.mrf.mxu0 }
 0x5f5   : > { %v10677_v16 = vpop.f32.mrf.mxu1 }
 0x5f6   : > { %10879 = vxpose.xlu0.b32.cont [3/16] (narrow) %v10847_v35, 8  ;;  %v10812_v35 = vadd.f32 %v10677_v16, %v10425_v57  ;;  %v10427_v16 = vadd.f32 %v18751_v11, %v18720_v33  ;;  %v10852_v63 = vadd.f32 %v18818_v26, %v10813_v37  ;;  %v10428_v57 = vadd.f32 %v18741_v47, %v18715_v62  ;;  %v10380_v45 = vpop.f32.mrf.mxu0 }
 0x5f7   : > { %v13088_v54 = vpop.f32.mrf.mxu1 }
 0x5f8   : > { %v10851_v32 = vadd.f32 %v18818_v26, %v10812_v35  ;;  %v10815_v20 = vadd.f32 %v13088_v54, %v10428_v57  ;;  %v13063_v62 = vpop.f32.mrf.mxu0 }
 0x5f9   : > { %v10687_v60 = vpop.f32.mrf.mxu1 }
 0x5fa   : > { %10880 = vxpose.xlu0.b32.cont [4/16] (narrow) %v10848_v8, 8  ;;  %v10814_v9 = vadd.f32 %v10687_v60, %v10427_v16  ;;  %v10429_v60 = vadd.f32 %v18764_v30, %v18728_v27  ;;  %v10854_v7 = vadd.f32 %v18818_v26, %v10815_v20  ;;  %v10430_v16 = vadd.f32 %v18756_v46, %v18723_v4  ;;  %v10390_v27 = vpop.f32.mrf.mxu0 }
 0x5fb   : > { %v13091_v52 = vpop.f32.mrf.mxu1  ;;  %v10439_v4 = vadd.f32 %v18836_v3, %v18767_v38  ;;  %v10440_v38 = vadd.f32 %v18831_v58, %v18762_v0 }
 0x5fc   : > { %v10853_v33 = vadd.f32 %v18818_v26, %v10814_v9  ;;  %v10817_v30 = vadd.f32 %v13091_v52, %v10430_v16  ;;  %v13066_v46 = vpop.f32.mrf.mxu0  ;;  %v19364_v16 = vld [vmem:[#allocation15_spill] sm:$0xff] }
 0x5fd   : > { %v10697_v2 = vpop.f32.mrf.mxu1 }
 0x5fe   : > { %10881 = vxpose.xlu0.b32.cont [5/16] (narrow) %v10849_v48, 8  ;;  %v10816_v5 = vadd.f32 %v10697_v2, %v10429_v60  ;;  %v10856_v57 = vadd.f32 %v18818_v26, %v10817_v30  ;;  %v10400_v3 = vpop.f32.mrf.mxu0 }
 0x5ff   : > { %v18843_v53 = vpop.f32.mrf.mxu1 }
 0x600   : > { %v10855_v41 = vadd.f32 %v18818_v26, %v10816_v5 }
 0x601   : > { %v10707_v56 = vpop.f32.mrf.mxu1 }
 0x602   : > { %10882 = vxpose.xlu0.b32.cont [6/16] (narrow) %v10850_v12, 8 }
 0x603   : > { %v18852_v8 = vpop.f32.mrf.mxu1 }
 0x605   : > { %v18856_v40 = vpop.f32.mrf.mxu1 }
 0x606   : > { %10883 = vxpose.xlu0.b32.cont [7/16] (narrow) %v10851_v32, 8 }
 0x607   : > { %v13100_v24 = vpop.f32.mrf.mxu1 }
 0x608   : > { %v10823_v11 = vadd.f32 %v13100_v24, %v10436_v25  ;;  %v10438_v24 = vadd.f32 %v18823_v59, %v18754_v15  ;;  %v10444_v15 = vadd.f32 %v13060_v13, %v18778_v31  ;;  %v10443_v59 = vadd.f32 %v10380_v45, %v18783_v23 }
 0x609   : > { %v10727_v48 = vpop.f32.mrf.mxu1  ;;  %v10445_v13 = vadd.f32 %v10390_v27, %v18791_v51  ;;  %v10448_v51 = vadd.f32 %v13066_v46, %v18794_v6  ;;  %v10434_v6 = vadd.f32 %v18788_v49, %v18739_v19 }
 0x60a   : > { %v10822_v12 = vadd.f32 %v10727_v48, %v10435_v55  ;;  %10884 = vxpose.xlu0.b32.cont [8/16] (narrow) %v10852_v63, 8  ;;  %v10862_v54 = vadd.f32 %v18818_v26, %v10823_v11  ;;  %v10431_v63 = vadd.f32 %v18780_v36, %v18736_v17  ;;  %v10432_v17 = vadd.f32 %v18772_v22, %v18731_v18  ;;  %v13069_v18 = vpop.f32.mrf.mxu0 }
 0x60b   : > { %v13103_v35 = vpop.f32.mrf.mxu1  ;;  %v10446_v36 = vadd.f32 %v13063_v62, %v18786_v42  ;;  %v10433_v11 = vadd.f32 %v18798_v21, %v18744_v39  ;;  %v10821_v27 = vadd.f32 %v18852_v8, %v10434_v6 }
 0x60c   : > { %v10861_v34 = vadd.f32 %v18818_v26, %v10822_v12  ;;  %v10825_v55 = vadd.f32 %v13103_v35, %v10438_v24  ;;  %v10818_v52 = vadd.f32 %v10707_v56, %v10431_v63  ;;  %v10819_v45 = vadd.f32 %v18843_v53, %v10432_v17  ;;  %v10410_v5 = vpop.f32.mrf.mxu0 }
 0x60d   : > { %v10737_v50 = vpop.f32.mrf.mxu1  ;;  %v10449_v24 = vadd.f32 %v10410_v5, %v19364_v16  ;;  %v10860_v63 = vadd.f32 %v18818_v26, %v10821_v27 }
 0x60e   : > { %10909 = vxpose.xlu1.b32.start [1/16] (narrow) %v10861_v34, 8  ;;  %10885 = vxpose.xlu0.b32.cont [9/16] (narrow) %v10853_v33, 8  ;;  %v10824_v37 = vadd.f32 %v10737_v50, %v10437_v28  ;;  %v10864_v25 = vadd.f32 %v18818_v26, %v10825_v55  ;;  %v10857_v20 = vadd.f32 %v18818_v26, %v10818_v52 }
 0x60f   : > { %v13106_v47 = vpop.f32.mrf.mxu1  ;;  %v10441_v34 = vadd.f32 %v18850_v1, %v18775_v29  ;;  %v10447_v28 = vadd.f32 %v10400_v3, %v18801_v44  ;;  %v10858_v62 = vadd.f32 %v18818_v26, %v10819_v45  ;;  %v10450_v44 = vadd.f32 %v13069_v18, %v18805_v43 }
 0x610   : > { %v10863_v2 = vadd.f32 %v18818_v26, %v10824_v37  ;;  %v10827_v22 = vadd.f32 %v13106_v47, %v10440_v38  ;;  %v10820_v47 = vadd.f32 %v18856_v40, %v10433_v11 }
 0x611   : > { %v10747_v32 = vpop.f32.mrf.mxu1 }
 0x612   : > { %10910 = vxpose.xlu1.b32.cont [2/16] (narrow) %v10862_v54, 8  ;;  %10886 = vxpose.xlu0.b32.cont [10/16] (narrow) %v10854_v7, 8  ;;  %v10826_v12 = vadd.f32 %v10747_v32, %v10439_v4  ;;  %v10866_v39 = vadd.f32 %v18818_v26, %v10827_v22  ;;  %v10442_v54 = vadd.f32 %v18841_v10, %v18770_v61 }
 0x613   : > { %v18876_v14 = vpop.f32.mrf.mxu1  ;;  %v10859_v30 = vadd.f32 %v18818_v26, %v10820_v47 }
 0x614   : > { %v10865_v0 = vadd.f32 %v18818_v26, %v10826_v12  ;;  %v10829_v19 = vadd.f32 %v18876_v14, %v10442_v54 }
 0x615   : > { %v10757_v9 = vpop.f32.mrf.mxu1 }
 0x616   : > { %10911 = vxpose.xlu1.b32.cont [3/16] (narrow) %v10863_v2, 8  ;;  %10887 = vxpose.xlu0.b32.cont [11/16] (narrow) %v10855_v41, 8  ;;  %v10828_v21 = vadd.f32 %v10757_v9, %v10441_v34  ;;  %v10868_v8 = vadd.f32 %v18818_v26, %v10829_v19 }
 0x617   : > { %v13112_v48 = vpop.f32.mrf.mxu1 }
 0x618   : > { %v10831_v35 = vadd.f32 %v13112_v48, %v10444_v15  ;;  %v10867_v49 = vadd.f32 %v18818_v26, %v10828_v21 }
 0x619   : > { %v10767_v31 = vpop.f32.mrf.mxu1 }
 0x61a   : > { %v10870_v23 = vadd.f32 %v18818_v26, %v10831_v35  ;;  %v10830_v56 = vadd.f32 %v10767_v31, %v10443_v59  ;;  %10912 = vxpose.xlu1.b32.cont [4/16] (narrow) %v10864_v25, 8  ;;  %10888 = vxpose.xlu0.b32.cont [12/16] (narrow) %v10856_v57, 8 }
 0x61b   : > { %v13115_v33 = vpop.f32.mrf.mxu1 }
 0x61c   : > { %v10869_v58 = vadd.f32 %v18818_v26, %v10830_v56  ;;  %v10833_v42 = vadd.f32 %v13115_v33, %v10446_v36 }
 0x61d   : > { %v10777_v50 = vpop.f32.mrf.mxu1 }
 0x61e   : > { %v10872_v53 = vadd.f32 %v18818_v26, %v10833_v42  ;;  %v10832_v60 = vadd.f32 %v10777_v50, %v10445_v13  ;;  %10913 = vxpose.xlu1.b32.cont [5/16] (narrow) %v10865_v0, 8  ;;  %10889 = vxpose.xlu0.b32.cont [13/16] (narrow) %v10857_v20, 8 }
 0x61f   : > { %v13118_v7 = vpop.f32.mrf.mxu1 }
 0x620   : > { %v10871_v29 = vadd.f32 %v18818_v26, %v10832_v60  ;;  %v10835_v1 = vadd.f32 %v13118_v7, %v10448_v51 }
 0x621   : > { %v10787_v37 = vpop.f32.mrf.mxu1 }
 0x622   : > { %v10874_v32 = vadd.f32 %v18818_v26, %v10835_v1  ;;  %v10834_v40 = vadd.f32 %v10787_v37, %v10447_v28  ;;  %10914 = vxpose.xlu1.b32.cont [6/16] (narrow) %v10866_v39, 8  ;;  %10890 = vxpose.xlu0.b32.cont [14/16] (narrow) %v10858_v62, 8 }
 0x623   : > { %v13121_v41 = vpop.f32.mrf.mxu1 }
 0x624   : > { %v10873_v61 = vadd.f32 %v18818_v26, %v10834_v40  ;;  %v10837_v10 = vadd.f32 %v13121_v41, %v10450_v44 }
 0x625   : > { %v10797_v43 = vpop.f32.mrf.mxu1 }
 0x626   : > { %v10876_v55 = vadd.f32 %v18818_v26, %v10837_v10  ;;  %v10836_v2 = vadd.f32 %v10797_v43, %v10449_v24  ;;  %10915 = vxpose.xlu1.b32.cont [7/16] (narrow) %v10867_v49, 8  ;;  %10891 = vxpose.xlu0.b32.cont [15/16] (narrow) %v10859_v30, 8 }
 0x628   : > { %v10875_v9 = vadd.f32 %v18818_v26, %v10836_v2 }
 0x62a   : > { %10916 = vxpose.xlu1.b32.cont [8/16] (narrow) %v10868_v8, 8  ;;  %10892 = vxpose.xlu0.b32.end [16/16] (narrow) %v10860_v63, 8 }
 0x62e   : > { %10917 = vxpose.xlu1.b32.cont [9/16] (narrow) %v10869_v58, 8 }
 0x632   : > { %10918 = vxpose.xlu1.b32.cont [10/16] (narrow) %v10870_v23, 8 }
 0x636   : > { %10919 = vxpose.xlu1.b32.cont [11/16] (narrow) %v10871_v29, 8 }
 0x63a   : > { %10920 = vxpose.xlu1.b32.cont [12/16] (narrow) %v10872_v53, 8 }
 0x63e   : > { %10921 = vxpose.xlu1.b32.cont [13/16] (narrow) %v10873_v61, 8 }
 0x642   : > { %10922 = vxpose.xlu1.b32.cont [14/16] (narrow) %v10874_v32, 8 }
 0x646   : > { %10923 = vxpose.xlu1.b32.cont [15/16] (narrow) %v10875_v9, 8 }
 0x64a   : > { %10924 = vxpose.xlu1.b32.end [16/16] (narrow) %v10876_v55, 8 }
 0x66a   : > { %v10893_v14 = vpop.trf.xlu0 }
 0x68a   : > { %v10925_v4 = vpop.trf.xlu1 }
 0x68b   : > { %v10943_v15 = vcombine.low %v10893_v14, %v10925_v4 }
 0x68d   : > { %10945 = vst [vmem:[%s224_s24] sm:$0xff] %v10943_v15 }
 0x68e PF: > { %s15_s18 = sadd.s32 1, %s13143_s18  }
 0x68f   : > { %p12_p4 = scmp.ge.s32.totalorder %s15_s18, 4  }
 0x691   :  { %14 = sbr.rel (!%p12_p4) target bundleno = 1 (0x1), region = 78 }

</bundles_post_ra>
